<compile_context>
chip_gen: v7x
topology: tpu7x:2x2x1
jax: 0.10.0
libtpu: 0.0.40
codegen_flags: <defaults>
</compile_context>

<pallas_src>
import jax
import jax.numpy as jnp
from jax import lax
from jax.experimental import pallas as pl
from jax.experimental.pallas import tpu as pltpu  # noqa: F401  (kept for TPU-specific params if needed)

# ---------------- small config consistent with the module -------------------
VOCAB = 32
E_DIM = 16                 # GloVe embedding dim
FILTERS = 8                # cnn_filters
KERNEL_SIZES = (3, 4, 5)   # cnn_kernel_sizes
U_DIM = 24                 # u_dim : CNN feature size == GRU input size
G_DIM = 16                 # g_dim : bi-GRU output size
H = G_DIM // 2             # per-direction hidden size
NUM_LAYERS = 2
NUM_UTT = 8                # utterances per dialogue (GRU time steps)
BATCH = 2
NUM_WORDS = 12

N_ROWS = NUM_UTT * BATCH                 # 16 flattened utterances (row = t*BATCH + b)
TW_PAD = 16                              # per-utterance padded word slots (>= NUM_WORDS + maxK - 1, mult of 8, pow2)
NFLAT = N_ROWS * TW_PAD                  # 256 flattened word positions
TAIL_PAD = 8                             # extra zero rows so shifted slices stay in bounds


# ============================ fused Pallas kernel ============================
def _seqcontext_kernel(emb_ref, umask_ref, lmask_ref,
                       cw0_ref, cb0_ref, cw1_ref, cb1_ref, cw2_ref, cb2_ref,
                       wfc_ref, bfc_ref,
                       *gru_and_out):
    gru_refs = gru_and_out[:-1]          # 16 refs: (wih,whh,bih,bhh) x (L0f,L0b,L1f,L1b)
    out_ref = gru_and_out[-1]            # (BATCH, NUM_UTT, G_DIM)

    # ---------------- CNN feature extractor ----------------
    # emb_ref: (NFLAT + TAIL_PAD, E).  Row n*TW_PAD + t = word t of utterance n (t >= NUM_WORDS -> 0).
    # Window position index within each utterance block (TW_PAD is a power of 2).
    pos = jnp.bitwise_and(lax.broadcasted_iota(jnp.int32, (NFLAT, 1), 0), TW_PAD - 1)

    feat = jnp.zeros((N_ROWS, U_DIM), jnp.float32) + bfc_ref[...]       # start from fc bias
    conv_refs = ((cw0_ref, cb0_ref), (cw1_ref, cb1_ref), (cw2_ref, cb2_ref))
    for i, ksize in enumerate(KERNEL_SIZES):
        w = conv_refs[i][0][...]                                        # (K, E, F)
        b = conv_refs[i][1][...]                                        # (1, F)
        L = NUM_WORDS - ksize + 1
        # conv1d == sum of K shifted (NFLAT, E) @ (E, F) matmuls (lane-/sublane-dense lhs).
        acc = jnp.zeros((NFLAT, FILTERS), jnp.float32)
        for k in range(ksize):
            acc = acc + jnp.dot(emb_ref[k:k + NFLAT, :], w[k],
                                preferred_element_type=jnp.float32)
        acc = jnp.maximum(acc + b, 0.0)                                 # ReLU(conv)
        # zero invalid window starts (padding / cross-boundary reads); safe since ReLU >= 0.
        acc = acc * jnp.where(pos < L, 1.0, 0.0)
        # max_pool1d over time, per utterance block (tile-aligned static slices).
        pooled = jnp.concatenate(
            [jnp.max(acc[n * TW_PAD:(n + 1) * TW_PAD, :], axis=0, keepdims=True)
             for n in range(N_ROWS)], axis=0)                           # (N_ROWS, F)
        # fused fc: concat over kernel sizes == sum of partial matmuls.
        feat = feat + jnp.dot(pooled, wfc_ref[i * FILTERS:(i + 1) * FILTERS, :],
                              preferred_element_type=jnp.float32)
    # ReLU(fc(dropout(.))); dropout == identity in eval.  Then utterance mask (umask).
    feat = jnp.maximum(feat, 0.0) * umask_ref[...]                      # (N_ROWS, U_DIM), rows = (t, b)

    # ---------------- 2-layer bidirectional GRU ----------------
    lmask = lmask_ref[...]                                              # (N_ROWS, H), rows = (t, b)

    def run_direction(x_flat, wih_ref, whh_ref, bih_ref, bhh_ref, reverse):
        wih = wih_ref[...]      # (3, Din, H)  gate order r, z, n (PyTorch)
        whh = whh_ref[...]      # (3, H, H)
        bih = bih_ref[...]      # (3, 1, H)
        bhh = bhh_ref[...]      # (3, 1, H)
        # Hoisted input projections: one matmul per gate, OFF the serial recurrence chain.
        gx = [jnp.dot(x_flat, wih[g], preferred_element_type=jnp.float32) + bih[g]
              for g in range(3)]                                        # each (N_ROWS, H)
        h = jnp.zeros((BATCH, H), jnp.float32)
        outs = [None] * NUM_UTT
        order = range(NUM_UTT - 1, -1, -1) if reverse else range(NUM_UTT)
        for t in order:                                                 # fully unrolled (T=8)
            sl = slice(t * BATCH, (t + 1) * BATCH)
            # recurrent projections: per-gate tiny matmuls, results consumed immediately.
            gh_r = jnp.dot(h, whh[0], preferred_element_type=jnp.float32) + bhh[0]
            gh_z = jnp.dot(h, whh[1], preferred_element_type=jnp.float32) + bhh[1]
            gh_n = jnp.dot(h, whh[2], preferred_element_type=jnp.float32) + bhh[2]
            r = jax.nn.sigmoid(gx[0][sl] + gh_r)
            z = jax.nn.sigmoid(gx[1][sl] + gh_z)
            n = jnp.tanh(gx[2][sl] + r * gh_n)
            h_new = (1.0 - z) * n + z * h
            m_t = lmask[sl]                                             # (BATCH, H)
            h = m_t * h_new + (1.0 - m_t) * h                           # hold state past seq length
            outs[t] = m_t * h_new                                       # pad_packed zeros past length
        return outs

    # layer 0
    outs_f = run_direction(feat, *gru_refs[0:4], reverse=False)
    outs_b = run_direction(feat, *gru_refs[4:8], reverse=True)
    x1 = jnp.concatenate([jnp.concatenate(outs_f, axis=0),
                          jnp.concatenate(outs_b, axis=0)], axis=1)     # (N_ROWS, 2H)
    # TODO(synk): inter-layer GRU dropout is training-only; eval == identity.
    # layer 1
    outs_f = run_direction(x1, *gru_refs[8:12], reverse=False)
    outs_b = run_direction(x1, *gru_refs[12:16], reverse=True)

    rows = [jnp.concatenate([outs_f[t], outs_b[t]], axis=-1) for t in range(NUM_UTT)]  # (B, 2H) each
    out_ref[...] = jnp.stack(rows, axis=1)                              # one dense (B, T, 2H) store


# ============================ forward (glue) =================================
def seq_context_forward(text_len, textft, umask, params):
    num_utt, batch, num_words = textft.shape
    n_rows = num_utt * batch
    tokens = textft.reshape(-1, num_words)                              # row = t*batch + b (torch .view)
    emb = jnp.take(params["embedding"], tokens, axis=0).astype(jnp.float32)      # (N, Tw, E) gather (glue)

    # flattened, zero-padded token stream for the conv matmuls
    emb_pad = jnp.zeros((n_rows, TW_PAD, E_DIM), jnp.float32).at[:, :num_words, :].set(emb)
    emb_flat = jnp.pad(emb_pad.reshape(n_rows * TW_PAD, E_DIM), ((0, TAIL_PAD), (0, 0)))

    umask_flat = jnp.transpose(umask, (1, 0)).reshape(n_rows, 1).astype(jnp.float32)
    # pack_padded_sequence / pad_packed_sequence emulation via length mask
    lmask = (jnp.arange(num_utt)[:, None] < text_len[None, :]).astype(jnp.float32)        # (T, B)
    lmask_flat = jnp.broadcast_to(lmask[:, :, None], (num_utt, batch, H)).reshape(n_rows, H)

    args = [emb_flat, umask_flat, lmask_flat]
    for w, b in zip(params["conv_w"], params["conv_b"]):
        args += [w, b]
    args += [params["fc_w"], params["fc_b"]]
    for layer in params["gru"]:
        for d in ("fwd", "bwd"):
            args += list(layer[d])

    return pl.pallas_call(
        _seqcontext_kernel,
        out_shape=jax.ShapeDtypeStruct((batch, num_utt, G_DIM), jnp.float32),
    )(*args)                                                            # (B, T, G_DIM)


# ============================ parameters =====================================
def init_params(key):
    # Deterministic synthetic init (shapes per module __init__); no .pt / pickle loading.
    ks = jax.random.split(key, 16)
    ki = iter(ks)

    def u(k, shape, scale):
        return jax.random.uniform(k, shape, jnp.float32, -scale, scale)

    params = {"embedding": jax.random.normal(next(ki), (VOCAB, E_DIM), jnp.float32) * 0.1}
    conv_w, conv_b = [], []
    for K in KERNEL_SIZES:
        s = 1.0 / (E_DIM * K) ** 0.5
        conv_w.append(u(next(ki), (K, E_DIM, FILTERS), s))   # torch Conv1d weight (F,E,K), stored (K,E,F)
        conv_b.append(u(next(ki), (1, FILTERS), s))
    params["conv_w"], params["conv_b"] = conv_w, conv_b
    s = 1.0 / (len(KERNEL_SIZES) * FILTERS) ** 0.5
    params["fc_w"] = u(next(ki), (len(KERNEL_SIZES) * FILTERS, U_DIM), s)
    params["fc_b"] = u(next(ki), (1, U_DIM), s)

    gru, din = [], U_DIM
    for _ in range(NUM_LAYERS):
        layer = {}
        for d in ("fwd", "bwd"):
            kk = jax.random.split(next(ki), 4)
            s = 1.0 / H ** 0.5
            layer[d] = (u(kk[0], (3, din, H), s),   # weight_ih^T split per gate (r, z, n)
                        u(kk[1], (3, H, H), s),     # weight_hh^T split per gate
                        u(kk[2], (3, 1, H), s),     # bias_ih per gate
                        u(kk[3], (3, 1, H), s))     # bias_hh per gate
        gru.append(layer)
        din = 2 * H
    params["gru"] = gru
    return params


# ============================ pure-JAX reference =============================
def ref_forward(text_len, textft, umask, params):
    num_utt, batch, num_words = textft.shape
    tokens = textft.reshape(-1, num_words)
    emb = params["embedding"][tokens]
    pooled = []
    for w, b in zip(params["conv_w"], params["conv_b"]):
        K = w.shape[0]
        L = num_words - K + 1
        cols = [jnp.einsum("nke,kef->nf", emb[:, t:t + K, :], w) + b for t in range(L)]
        conv = jnp.maximum(jnp.stack(cols, axis=1), 0.0)
        pooled.append(jnp.max(conv, axis=1))
    feat = jnp.maximum(jnp.concatenate(pooled, axis=1) @ params["fc_w"] + params["fc_b"], 0.0)
    feat = feat * jnp.transpose(umask, (1, 0)).reshape(-1, 1)
    x = feat.reshape(num_utt, batch, -1).transpose(1, 0, 2)
    mask = (jnp.arange(num_utt)[None, :] < text_len[:, None]).astype(jnp.float32)

    def ref_dir(x_btd, p, reverse):
        wih, whh, bih, bhh = p
        B, T, _ = x_btd.shape
        h = jnp.zeros((B, H), jnp.float32)
        outs = [None] * T
        for t in (range(T - 1, -1, -1) if reverse else range(T)):
            xt, mt = x_btd[:, t, :], mask[:, t][:, None]
            r = jax.nn.sigmoid(xt @ wih[0] + bih[0] + h @ whh[0] + bhh[0])
            z = jax.nn.sigmoid(xt @ wih[1] + bih[1] + h @ whh[1] + bhh[1])
            n = jnp.tanh(xt @ wih[2] + bih[2] + r * (h @ whh[2] + bhh[2]))
            hn = (1 - z) * n + z * h
            h = mt * hn + (1 - mt) * h
            outs[t] = mt * hn
        return jnp.stack(outs, axis=1)

    for layer in params["gru"]:
        x = jnp.concatenate([ref_dir(x, layer["fwd"], False),
                             ref_dir(x, layer["bwd"], True)], axis=-1)
    return x


# ================================ main =======================================
if __name__ == "__main__":
    key = jax.random.PRNGKey(0)
    kp, kt = jax.random.split(key)
    params = init_params(kp)

    textft = jax.random.randint(kt, (NUM_UTT, BATCH, NUM_WORDS), 0, VOCAB, dtype=jnp.int32)
    text_len = jnp.array([NUM_UTT, 5], dtype=jnp.int32)         # max == NUM_UTT (pad_packed output len)
    umask = (jnp.arange(NUM_UTT)[None, :] < text_len[:, None]).astype(jnp.float32)  # (B, NUM_UTT)

    out = seq_context_forward(text_len, textft, umask, params)
    out = jax.block_until_ready(out)

    ref = ref_forward(text_len, textft, umask, params)
    assert out.shape == (BATCH, NUM_UTT, G_DIM), out.shape
    assert bool(jnp.all(jnp.isfinite(out)))
    assert bool(jnp.allclose(out, ref, atol=1e-3, rtol=1e-3)), float(jnp.max(jnp.abs(out - ref)))
    print("KERNEL_OK")
</pallas_src>

<mosaic_0001>
module attributes {stable_mosaic.version = 11 : i64} {
  func.func @_seqcontext_kernel(%arg0: memref<264x16xf32, #tpu.memory_space<vmem>>, %arg1: memref<16x1xf32, #tpu.memory_space<vmem>>, %arg2: memref<16x8xf32, #tpu.memory_space<vmem>>, %arg3: memref<3x16x8xf32, #tpu.memory_space<vmem>>, %arg4: memref<1x8xf32, #tpu.memory_space<vmem>>, %arg5: memref<4x16x8xf32, #tpu.memory_space<vmem>>, %arg6: memref<1x8xf32, #tpu.memory_space<vmem>>, %arg7: memref<5x16x8xf32, #tpu.memory_space<vmem>>, %arg8: memref<1x8xf32, #tpu.memory_space<vmem>>, %arg9: memref<24x24xf32, #tpu.memory_space<vmem>>, %arg10: memref<1x24xf32, #tpu.memory_space<vmem>>, %arg11: memref<3x24x8xf32, #tpu.memory_space<vmem>>, %arg12: memref<3x8x8xf32, #tpu.memory_space<vmem>>, %arg13: memref<3x1x8xf32, #tpu.memory_space<vmem>>, %arg14: memref<3x1x8xf32, #tpu.memory_space<vmem>>, %arg15: memref<3x24x8xf32, #tpu.memory_space<vmem>>, %arg16: memref<3x8x8xf32, #tpu.memory_space<vmem>>, %arg17: memref<3x1x8xf32, #tpu.memory_space<vmem>>, %arg18: memref<3x1x8xf32, #tpu.memory_space<vmem>>, %arg19: memref<3x16x8xf32, #tpu.memory_space<vmem>>, %arg20: memref<3x8x8xf32, #tpu.memory_space<vmem>>, %arg21: memref<3x1x8xf32, #tpu.memory_space<vmem>>, %arg22: memref<3x1x8xf32, #tpu.memory_space<vmem>>, %arg23: memref<3x16x8xf32, #tpu.memory_space<vmem>>, %arg24: memref<3x8x8xf32, #tpu.memory_space<vmem>>, %arg25: memref<3x1x8xf32, #tpu.memory_space<vmem>>, %arg26: memref<3x1x8xf32, #tpu.memory_space<vmem>>, %arg27: memref<2x8x16xf32, #tpu.memory_space<vmem>>) attributes {dimension_semantics = [], scalar_prefetch = 0 : i64, scratch_operands = 0 : i64, tpu.core_type = #tpu.core_type<tc>} {
    %0 = tpu.iota {dimensions = array<i32: 0>} : vector<256x1xi32>
    %c15_i32 = arith.constant 15 : i32
    %1 = vector.broadcast %c15_i32 : i32 to vector<256x1xi32>
    %2 = arith.andi %0, %1 : vector<256x1xi32>
    %cst = arith.constant 0.000000e+00 : f32
    %3 = vector.broadcast %cst : f32 to vector<16x24xf32>
    %c0 = arith.constant 0 : index
    %c0_0 = arith.constant 0 : index
    %4 = vector.load %arg10[%c0, %c0_0] : memref<1x24xf32, #tpu.memory_space<vmem>>, vector<1x24xf32>
    %5 = vector.broadcast %4 : vector<1x24xf32> to vector<16x24xf32>
    %6 = arith.addf %3, %5 : vector<16x24xf32>
    %c0_1 = arith.constant 0 : index
    %c0_2 = arith.constant 0 : index
    %c0_3 = arith.constant 0 : index
    %7 = vector.load %arg3[%c0_1, %c0_2, %c0_3] : memref<3x16x8xf32, #tpu.memory_space<vmem>>, vector<3x16x8xf32>
    %c0_4 = arith.constant 0 : index
    %c0_5 = arith.constant 0 : index
    %8 = vector.load %arg4[%c0_4, %c0_5] : memref<1x8xf32, #tpu.memory_space<vmem>>, vector<1x8xf32>
    %cst_6 = arith.constant 0.000000e+00 : f32
    %9 = vector.broadcast %cst_6 : f32 to vector<256x8xf32>
    %c0_7 = arith.constant 0 : index
    %c0_8 = arith.constant 0 : index
    %10 = vector.load %arg0[%c0_7, %c0_8] : memref<264x16xf32, #tpu.memory_space<vmem>>, vector<256x16xf32>
    %11 = vector.extract_strided_slice %7 {offsets = [0, 0, 0], sizes = [1, 16, 8], strides = [1, 1, 1]} : vector<3x16x8xf32> to vector<1x16x8xf32>
    %12 = vector.shape_cast %11 : vector<1x16x8xf32> to vector<16x8xf32>
    %cst_9 = arith.constant dense<0.000000e+00> : vector<256x8xf32>
    %13 = tpu.matmul %10, %12, %cst_9 {dimension_numbers = #tpu.dot_dimension_numbers<[1], [0], [0], [1], [0, 0, 1, 1], [], []>} : vector<256x16xf32>, vector<16x8xf32>, vector<256x8xf32> -> vector<256x8xf32>
    %14 = arith.addf %9, %13 : vector<256x8xf32>
    %c1 = arith.constant 1 : index
    %c0_10 = arith.constant 0 : index
    %15 = vector.load %arg0[%c1, %c0_10] : memref<264x16xf32, #tpu.memory_space<vmem>>, vector<256x16xf32>
    %16 = vector.extract_strided_slice %7 {offsets = [1, 0, 0], sizes = [1, 16, 8], strides = [1, 1, 1]} : vector<3x16x8xf32> to vector<1x16x8xf32>
    %17 = vector.shape_cast %16 : vector<1x16x8xf32> to vector<16x8xf32>
    %cst_11 = arith.constant dense<0.000000e+00> : vector<256x8xf32>
    %18 = tpu.matmul %15, %17, %cst_11 {dimension_numbers = #tpu.dot_dimension_numbers<[1], [0], [0], [1], [0, 0, 1, 1], [], []>} : vector<256x16xf32>, vector<16x8xf32>, vector<256x8xf32> -> vector<256x8xf32>
    %19 = arith.addf %14, %18 : vector<256x8xf32>
    %c2 = arith.constant 2 : index
    %c0_12 = arith.constant 0 : index
    %20 = vector.load %arg0[%c2, %c0_12] : memref<264x16xf32, #tpu.memory_space<vmem>>, vector<256x16xf32>
    %21 = vector.extract_strided_slice %7 {offsets = [2, 0, 0], sizes = [1, 16, 8], strides = [1, 1, 1]} : vector<3x16x8xf32> to vector<1x16x8xf32>
    %22 = vector.shape_cast %21 : vector<1x16x8xf32> to vector<16x8xf32>
    %cst_13 = arith.constant dense<0.000000e+00> : vector<256x8xf32>
    %23 = tpu.matmul %20, %22, %cst_13 {dimension_numbers = #tpu.dot_dimension_numbers<[1], [0], [0], [1], [0, 0, 1, 1], [], []>} : vector<256x16xf32>, vector<16x8xf32>, vector<256x8xf32> -> vector<256x8xf32>
    %24 = arith.addf %19, %23 : vector<256x8xf32>
    %25 = vector.broadcast %8 : vector<1x8xf32> to vector<256x8xf32>
    %26 = arith.addf %24, %25 : vector<256x8xf32>
    %cst_14 = arith.constant 0.000000e+00 : f32
    %27 = vector.broadcast %cst_14 : f32 to vector<256x8xf32>
    %28 = arith.maximumf %26, %27 : vector<256x8xf32>
    %c10_i32 = arith.constant 10 : i32
    %29 = vector.broadcast %c10_i32 : i32 to vector<256x1xi32>
    %30 = arith.cmpi slt, %2, %29 : vector<256x1xi32>
    %cst_15 = arith.constant 1.000000e+00 : f32
    %cst_16 = arith.constant 0.000000e+00 : f32
    %31 = vector.broadcast %cst_15 : f32 to vector<256x1xf32>
    %32 = vector.broadcast %cst_16 : f32 to vector<256x1xf32>
    %33 = arith.select %30, %31, %32 : vector<256x1xi1>, vector<256x1xf32>
    %34 = vector.broadcast %33 : vector<256x1xf32> to vector<256x8xf32>
    %35 = arith.mulf %28, %34 : vector<256x8xf32>
    %36 = vector.extract_strided_slice %35 {offsets = [0, 0], sizes = [16, 8], strides = [1, 1]} : vector<256x8xf32> to vector<16x8xf32>
    %cst_17 = arith.constant dense<0xFF800000> : vector<8xf32>
    %37 = vector.multi_reduction <maximumf>, %36, %cst_17 [0] : vector<16x8xf32> to vector<8xf32>
    %38 = vector.shape_cast %37 : vector<8xf32> to vector<1x8xf32>
    %39 = vector.extract_strided_slice %35 {offsets = [16, 0], sizes = [16, 8], strides = [1, 1]} : vector<256x8xf32> to vector<16x8xf32>
    %cst_18 = arith.constant dense<0xFF800000> : vector<8xf32>
    %40 = vector.multi_reduction <maximumf>, %39, %cst_18 [0] : vector<16x8xf32> to vector<8xf32>
    %41 = vector.shape_cast %40 : vector<8xf32> to vector<1x8xf32>
    %42 = vector.extract_strided_slice %35 {offsets = [32, 0], sizes = [16, 8], strides = [1, 1]} : vector<256x8xf32> to vector<16x8xf32>
    %cst_19 = arith.constant dense<0xFF800000> : vector<8xf32>
    %43 = vector.multi_reduction <maximumf>, %42, %cst_19 [0] : vector<16x8xf32> to vector<8xf32>
    %44 = vector.shape_cast %43 : vector<8xf32> to vector<1x8xf32>
    %45 = vector.extract_strided_slice %35 {offsets = [48, 0], sizes = [16, 8], strides = [1, 1]} : vector<256x8xf32> to vector<16x8xf32>
    %cst_20 = arith.constant dense<0xFF800000> : vector<8xf32>
    %46 = vector.multi_reduction <maximumf>, %45, %cst_20 [0] : vector<16x8xf32> to vector<8xf32>
    %47 = vector.shape_cast %46 : vector<8xf32> to vector<1x8xf32>
    %48 = vector.extract_strided_slice %35 {offsets = [64, 0], sizes = [16, 8], strides = [1, 1]} : vector<256x8xf32> to vector<16x8xf32>
    %cst_21 = arith.constant dense<0xFF800000> : vector<8xf32>
    %49 = vector.multi_reduction <maximumf>, %48, %cst_21 [0] : vector<16x8xf32> to vector<8xf32>
    %50 = vector.shape_cast %49 : vector<8xf32> to vector<1x8xf32>
    %51 = vector.extract_strided_slice %35 {offsets = [80, 0], sizes = [16, 8], strides = [1, 1]} : vector<256x8xf32> to vector<16x8xf32>
    %cst_22 = arith.constant dense<0xFF800000> : vector<8xf32>
    %52 = vector.multi_reduction <maximumf>, %51, %cst_22 [0] : vector<16x8xf32> to vector<8xf32>
    %53 = vector.shape_cast %52 : vector<8xf32> to vector<1x8xf32>
    %54 = vector.extract_strided_slice %35 {offsets = [96, 0], sizes = [16, 8], strides = [1, 1]} : vector<256x8xf32> to vector<16x8xf32>
    %cst_23 = arith.constant dense<0xFF800000> : vector<8xf32>
    %55 = vector.multi_reduction <maximumf>, %54, %cst_23 [0] : vector<16x8xf32> to vector<8xf32>
    %56 = vector.shape_cast %55 : vector<8xf32> to vector<1x8xf32>
    %57 = vector.extract_strided_slice %35 {offsets = [112, 0], sizes = [16, 8], strides = [1, 1]} : vector<256x8xf32> to vector<16x8xf32>
    %cst_24 = arith.constant dense<0xFF800000> : vector<8xf32>
    %58 = vector.multi_reduction <maximumf>, %57, %cst_24 [0] : vector<16x8xf32> to vector<8xf32>
    %59 = vector.shape_cast %58 : vector<8xf32> to vector<1x8xf32>
    %60 = vector.extract_strided_slice %35 {offsets = [128, 0], sizes = [16, 8], strides = [1, 1]} : vector<256x8xf32> to vector<16x8xf32>
    %cst_25 = arith.constant dense<0xFF800000> : vector<8xf32>
    %61 = vector.multi_reduction <maximumf>, %60, %cst_25 [0] : vector<16x8xf32> to vector<8xf32>
    %62 = vector.shape_cast %61 : vector<8xf32> to vector<1x8xf32>
    %63 = vector.extract_strided_slice %35 {offsets = [144, 0], sizes = [16, 8], strides = [1, 1]} : vector<256x8xf32> to vector<16x8xf32>
    %cst_26 = arith.constant dense<0xFF800000> : vector<8xf32>
    %64 = vector.multi_reduction <maximumf>, %63, %cst_26 [0] : vector<16x8xf32> to vector<8xf32>
    %65 = vector.shape_cast %64 : vector<8xf32> to vector<1x8xf32>
    %66 = vector.extract_strided_slice %35 {offsets = [160, 0], sizes = [16, 8], strides = [1, 1]} : vector<256x8xf32> to vector<16x8xf32>
    %cst_27 = arith.constant dense<0xFF800000> : vector<8xf32>
    %67 = vector.multi_reduction <maximumf>, %66, %cst_27 [0] : vector<16x8xf32> to vector<8xf32>
    %68 = vector.shape_cast %67 : vector<8xf32> to vector<1x8xf32>
    %69 = vector.extract_strided_slice %35 {offsets = [176, 0], sizes = [16, 8], strides = [1, 1]} : vector<256x8xf32> to vector<16x8xf32>
    %cst_28 = arith.constant dense<0xFF800000> : vector<8xf32>
    %70 = vector.multi_reduction <maximumf>, %69, %cst_28 [0] : vector<16x8xf32> to vector<8xf32>
    %71 = vector.shape_cast %70 : vector<8xf32> to vector<1x8xf32>
    %72 = vector.extract_strided_slice %35 {offsets = [192, 0], sizes = [16, 8], strides = [1, 1]} : vector<256x8xf32> to vector<16x8xf32>
    %cst_29 = arith.constant dense<0xFF800000> : vector<8xf32>
    %73 = vector.multi_reduction <maximumf>, %72, %cst_29 [0] : vector<16x8xf32> to vector<8xf32>
    %74 = vector.shape_cast %73 : vector<8xf32> to vector<1x8xf32>
    %75 = vector.extract_strided_slice %35 {offsets = [208, 0], sizes = [16, 8], strides = [1, 1]} : vector<256x8xf32> to vector<16x8xf32>
    %cst_30 = arith.constant dense<0xFF800000> : vector<8xf32>
    %76 = vector.multi_reduction <maximumf>, %75, %cst_30 [0] : vector<16x8xf32> to vector<8xf32>
    %77 = vector.shape_cast %76 : vector<8xf32> to vector<1x8xf32>
    %78 = vector.extract_strided_slice %35 {offsets = [224, 0], sizes = [16, 8], strides = [1, 1]} : vector<256x8xf32> to vector<16x8xf32>
    %cst_31 = arith.constant dense<0xFF800000> : vector<8xf32>
    %79 = vector.multi_reduction <maximumf>, %78, %cst_31 [0] : vector<16x8xf32> to vector<8xf32>
    %80 = vector.shape_cast %79 : vector<8xf32> to vector<1x8xf32>
    %81 = vector.extract_strided_slice %35 {offsets = [240, 0], sizes = [16, 8], strides = [1, 1]} : vector<256x8xf32> to vector<16x8xf32>
    %cst_32 = arith.constant dense<0xFF800000> : vector<8xf32>
    %82 = vector.multi_reduction <maximumf>, %81, %cst_32 [0] : vector<16x8xf32> to vector<8xf32>
    %83 = vector.shape_cast %82 : vector<8xf32> to vector<1x8xf32>
    %84 = tpu.concatenate %38, %41, %44, %47, %50, %53, %56, %59, %62, %65, %68, %71, %74, %77, %80, %83 in 0 : vector<1x8xf32>, vector<1x8xf32>, vector<1x8xf32>, vector<1x8xf32>, vector<1x8xf32>, vector<1x8xf32>, vector<1x8xf32>, vector<1x8xf32>, vector<1x8xf32>, vector<1x8xf32>, vector<1x8xf32>, vector<1x8xf32>, vector<1x8xf32>, vector<1x8xf32>, vector<1x8xf32>, vector<1x8xf32> -> vector<16x8xf32>
    %c0_33 = arith.constant 0 : index
    %c0_34 = arith.constant 0 : index
    %85 = vector.load %arg9[%c0_33, %c0_34] : memref<24x24xf32, #tpu.memory_space<vmem>>, vector<8x24xf32>
    %cst_35 = arith.constant dense<0.000000e+00> : vector<16x24xf32>
    %86 = tpu.matmul %84, %85, %cst_35 {dimension_numbers = #tpu.dot_dimension_numbers<[1], [0], [0], [1], [0, 0, 1, 1], [], []>} : vector<16x8xf32>, vector<8x24xf32>, vector<16x24xf32> -> vector<16x24xf32>
    %87 = arith.addf %6, %86 : vector<16x24xf32>
    %c0_36 = arith.constant 0 : index
    %c0_37 = arith.constant 0 : index
    %c0_38 = arith.constant 0 : index
    %88 = vector.load %arg5[%c0_36, %c0_37, %c0_38] : memref<4x16x8xf32, #tpu.memory_space<vmem>>, vector<4x16x8xf32>
    %c0_39 = arith.constant 0 : index
    %c0_40 = arith.constant 0 : index
    %89 = vector.load %arg6[%c0_39, %c0_40] : memref<1x8xf32, #tpu.memory_space<vmem>>, vector<1x8xf32>
    %cst_41 = arith.constant 0.000000e+00 : f32
    %90 = vector.broadcast %cst_41 : f32 to vector<256x8xf32>
    %c0_42 = arith.constant 0 : index
    %c0_43 = arith.constant 0 : index
    %91 = vector.load %arg0[%c0_42, %c0_43] : memref<264x16xf32, #tpu.memory_space<vmem>>, vector<256x16xf32>
    %92 = vector.extract_strided_slice %88 {offsets = [0, 0, 0], sizes = [1, 16, 8], strides = [1, 1, 1]} : vector<4x16x8xf32> to vector<1x16x8xf32>
    %93 = vector.shape_cast %92 : vector<1x16x8xf32> to vector<16x8xf32>
    %cst_44 = arith.constant dense<0.000000e+00> : vector<256x8xf32>
    %94 = tpu.matmul %91, %93, %cst_44 {dimension_numbers = #tpu.dot_dimension_numbers<[1], [0], [0], [1], [0, 0, 1, 1], [], []>} : vector<256x16xf32>, vector<16x8xf32>, vector<256x8xf32> -> vector<256x8xf32>
    %95 = arith.addf %90, %94 : vector<256x8xf32>
    %c1_45 = arith.constant 1 : index
    %c0_46 = arith.constant 0 : index
    %96 = vector.load %arg0[%c1_45, %c0_46] : memref<264x16xf32, #tpu.memory_space<vmem>>, vector<256x16xf32>
    %97 = vector.extract_strided_slice %88 {offsets = [1, 0, 0], sizes = [1, 16, 8], strides = [1, 1, 1]} : vector<4x16x8xf32> to vector<1x16x8xf32>
    %98 = vector.shape_cast %97 : vector<1x16x8xf32> to vector<16x8xf32>
    %cst_47 = arith.constant dense<0.000000e+00> : vector<256x8xf32>
    %99 = tpu.matmul %96, %98, %cst_47 {dimension_numbers = #tpu.dot_dimension_numbers<[1], [0], [0], [1], [0, 0, 1, 1], [], []>} : vector<256x16xf32>, vector<16x8xf32>, vector<256x8xf32> -> vector<256x8xf32>
    %100 = arith.addf %95, %99 : vector<256x8xf32>
    %c2_48 = arith.constant 2 : index
    %c0_49 = arith.constant 0 : index
    %101 = vector.load %arg0[%c2_48, %c0_49] : memref<264x16xf32, #tpu.memory_space<vmem>>, vector<256x16xf32>
    %102 = vector.extract_strided_slice %88 {offsets = [2, 0, 0], sizes = [1, 16, 8], strides = [1, 1, 1]} : vector<4x16x8xf32> to vector<1x16x8xf32>
    %103 = vector.shape_cast %102 : vector<1x16x8xf32> to vector<16x8xf32>
    %cst_50 = arith.constant dense<0.000000e+00> : vector<256x8xf32>
    %104 = tpu.matmul %101, %103, %cst_50 {dimension_numbers = #tpu.dot_dimension_numbers<[1], [0], [0], [1], [0, 0, 1, 1], [], []>} : vector<256x16xf32>, vector<16x8xf32>, vector<256x8xf32> -> vector<256x8xf32>
    %105 = arith.addf %100, %104 : vector<256x8xf32>
    %c3 = arith.constant 3 : index
    %c0_51 = arith.constant 0 : index
    %106 = vector.load %arg0[%c3, %c0_51] : memref<264x16xf32, #tpu.memory_space<vmem>>, vector<256x16xf32>
    %107 = vector.extract_strided_slice %88 {offsets = [3, 0, 0], sizes = [1, 16, 8], strides = [1, 1, 1]} : vector<4x16x8xf32> to vector<1x16x8xf32>
    %108 = vector.shape_cast %107 : vector<1x16x8xf32> to vector<16x8xf32>
    %cst_52 = arith.constant dense<0.000000e+00> : vector<256x8xf32>
    %109 = tpu.matmul %106, %108, %cst_52 {dimension_numbers = #tpu.dot_dimension_numbers<[1], [0], [0], [1], [0, 0, 1, 1], [], []>} : vector<256x16xf32>, vector<16x8xf32>, vector<256x8xf32> -> vector<256x8xf32>
    %110 = arith.addf %105, %109 : vector<256x8xf32>
    %111 = vector.broadcast %89 : vector<1x8xf32> to vector<256x8xf32>
    %112 = arith.addf %110, %111 : vector<256x8xf32>
    %cst_53 = arith.constant 0.000000e+00 : f32
    %113 = vector.broadcast %cst_53 : f32 to vector<256x8xf32>
    %114 = arith.maximumf %112, %113 : vector<256x8xf32>
    %c9_i32 = arith.constant 9 : i32
    %115 = vector.broadcast %c9_i32 : i32 to vector<256x1xi32>
    %116 = arith.cmpi slt, %2, %115 : vector<256x1xi32>
    %cst_54 = arith.constant 1.000000e+00 : f32
    %cst_55 = arith.constant 0.000000e+00 : f32
    %117 = vector.broadcast %cst_54 : f32 to vector<256x1xf32>
    %118 = vector.broadcast %cst_55 : f32 to vector<256x1xf32>
    %119 = arith.select %116, %117, %118 : vector<256x1xi1>, vector<256x1xf32>
    %120 = vector.broadcast %119 : vector<256x1xf32> to vector<256x8xf32>
    %121 = arith.mulf %114, %120 : vector<256x8xf32>
    %122 = vector.extract_strided_slice %121 {offsets = [0, 0], sizes = [16, 8], strides = [1, 1]} : vector<256x8xf32> to vector<16x8xf32>
    %cst_56 = arith.constant dense<0xFF800000> : vector<8xf32>
    %123 = vector.multi_reduction <maximumf>, %122, %cst_56 [0] : vector<16x8xf32> to vector<8xf32>
    %124 = vector.shape_cast %123 : vector<8xf32> to vector<1x8xf32>
    %125 = vector.extract_strided_slice %121 {offsets = [16, 0], sizes = [16, 8], strides = [1, 1]} : vector<256x8xf32> to vector<16x8xf32>
    %cst_57 = arith.constant dense<0xFF800000> : vector<8xf32>
    %126 = vector.multi_reduction <maximumf>, %125, %cst_57 [0] : vector<16x8xf32> to vector<8xf32>
    %127 = vector.shape_cast %126 : vector<8xf32> to vector<1x8xf32>
    %128 = vector.extract_strided_slice %121 {offsets = [32, 0], sizes = [16, 8], strides = [1, 1]} : vector<256x8xf32> to vector<16x8xf32>
    %cst_58 = arith.constant dense<0xFF800000> : vector<8xf32>
    %129 = vector.multi_reduction <maximumf>, %128, %cst_58 [0] : vector<16x8xf32> to vector<8xf32>
    %130 = vector.shape_cast %129 : vector<8xf32> to vector<1x8xf32>
    %131 = vector.extract_strided_slice %121 {offsets = [48, 0], sizes = [16, 8], strides = [1, 1]} : vector<256x8xf32> to vector<16x8xf32>
    %cst_59 = arith.constant dense<0xFF800000> : vector<8xf32>
    %132 = vector.multi_reduction <maximumf>, %131, %cst_59 [0] : vector<16x8xf32> to vector<8xf32>
    %133 = vector.shape_cast %132 : vector<8xf32> to vector<1x8xf32>
    %134 = vector.extract_strided_slice %121 {offsets = [64, 0], sizes = [16, 8], strides = [1, 1]} : vector<256x8xf32> to vector<16x8xf32>
    %cst_60 = arith.constant dense<0xFF800000> : vector<8xf32>
    %135 = vector.multi_reduction <maximumf>, %134, %cst_60 [0] : vector<16x8xf32> to vector<8xf32>
    %136 = vector.shape_cast %135 : vector<8xf32> to vector<1x8xf32>
    %137 = vector.extract_strided_slice %121 {offsets = [80, 0], sizes = [16, 8], strides = [1, 1]} : vector<256x8xf32> to vector<16x8xf32>
    %cst_61 = arith.constant dense<0xFF800000> : vector<8xf32>
    %138 = vector.multi_reduction <maximumf>, %137, %cst_61 [0] : vector<16x8xf32> to vector<8xf32>
    %139 = vector.shape_cast %138 : vector<8xf32> to vector<1x8xf32>
    %140 = vector.extract_strided_slice %121 {offsets = [96, 0], sizes = [16, 8], strides = [1, 1]} : vector<256x8xf32> to vector<16x8xf32>
    %cst_62 = arith.constant dense<0xFF800000> : vector<8xf32>
    %141 = vector.multi_reduction <maximumf>, %140, %cst_62 [0] : vector<16x8xf32> to vector<8xf32>
    %142 = vector.shape_cast %141 : vector<8xf32> to vector<1x8xf32>
    %143 = vector.extract_strided_slice %121 {offsets = [112, 0], sizes = [16, 8], strides = [1, 1]} : vector<256x8xf32> to vector<16x8xf32>
    %cst_63 = arith.constant dense<0xFF800000> : vector<8xf32>
    %144 = vector.multi_reduction <maximumf>, %143, %cst_63 [0] : vector<16x8xf32> to vector<8xf32>
    %145 = vector.shape_cast %144 : vector<8xf32> to vector<1x8xf32>
    %146 = vector.extract_strided_slice %121 {offsets = [128, 0], sizes = [16, 8], strides = [1, 1]} : vector<256x8xf32> to vector<16x8xf32>
    %cst_64 = arith.constant dense<0xFF800000> : vector<8xf32>
    %147 = vector.multi_reduction <maximumf>, %146, %cst_64 [0] : vector<16x8xf32> to vector<8xf32>
    %148 = vector.shape_cast %147 : vector<8xf32> to vector<1x8xf32>
    %149 = vector.extract_strided_slice %121 {offsets = [144, 0], sizes = [16, 8], strides = [1, 1]} : vector<256x8xf32> to vector<16x8xf32>
    %cst_65 = arith.constant dense<0xFF800000> : vector<8xf32>
    %150 = vector.multi_reduction <maximumf>, %149, %cst_65 [0] : vector<16x8xf32> to vector<8xf32>
    %151 = vector.shape_cast %150 : vector<8xf32> to vector<1x8xf32>
    %152 = vector.extract_strided_slice %121 {offsets = [160, 0], sizes = [16, 8], strides = [1, 1]} : vector<256x8xf32> to vector<16x8xf32>
    %cst_66 = arith.constant dense<0xFF800000> : vector<8xf32>
    %153 = vector.multi_reduction <maximumf>, %152, %cst_66 [0] : vector<16x8xf32> to vector<8xf32>
    %154 = vector.shape_cast %153 : vector<8xf32> to vector<1x8xf32>
    %155 = vector.extract_strided_slice %121 {offsets = [176, 0], sizes = [16, 8], strides = [1, 1]} : vector<256x8xf32> to vector<16x8xf32>
    %cst_67 = arith.constant dense<0xFF800000> : vector<8xf32>
    %156 = vector.multi_reduction <maximumf>, %155, %cst_67 [0] : vector<16x8xf32> to vector<8xf32>
    %157 = vector.shape_cast %156 : vector<8xf32> to vector<1x8xf32>
    %158 = vector.extract_strided_slice %121 {offsets = [192, 0], sizes = [16, 8], strides = [1, 1]} : vector<256x8xf32> to vector<16x8xf32>
    %cst_68 = arith.constant dense<0xFF800000> : vector<8xf32>
    %159 = vector.multi_reduction <maximumf>, %158, %cst_68 [0] : vector<16x8xf32> to vector<8xf32>
    %160 = vector.shape_cast %159 : vector<8xf32> to vector<1x8xf32>
    %161 = vector.extract_strided_slice %121 {offsets = [208, 0], sizes = [16, 8], strides = [1, 1]} : vector<256x8xf32> to vector<16x8xf32>
    %cst_69 = arith.constant dense<0xFF800000> : vector<8xf32>
    %162 = vector.multi_reduction <maximumf>, %161, %cst_69 [0] : vector<16x8xf32> to vector<8xf32>
    %163 = vector.shape_cast %162 : vector<8xf32> to vector<1x8xf32>
    %164 = vector.extract_strided_slice %121 {offsets = [224, 0], sizes = [16, 8], strides = [1, 1]} : vector<256x8xf32> to vector<16x8xf32>
    %cst_70 = arith.constant dense<0xFF800000> : vector<8xf32>
    %165 = vector.multi_reduction <maximumf>, %164, %cst_70 [0] : vector<16x8xf32> to vector<8xf32>
    %166 = vector.shape_cast %165 : vector<8xf32> to vector<1x8xf32>
    %167 = vector.extract_strided_slice %121 {offsets = [240, 0], sizes = [16, 8], strides = [1, 1]} : vector<256x8xf32> to vector<16x8xf32>
    %cst_71 = arith.constant dense<0xFF800000> : vector<8xf32>
    %168 = vector.multi_reduction <maximumf>, %167, %cst_71 [0] : vector<16x8xf32> to vector<8xf32>
    %169 = vector.shape_cast %168 : vector<8xf32> to vector<1x8xf32>
    %170 = tpu.concatenate %124, %127, %130, %133, %136, %139, %142, %145, %148, %151, %154, %157, %160, %163, %166, %169 in 0 : vector<1x8xf32>, vector<1x8xf32>, vector<1x8xf32>, vector<1x8xf32>, vector<1x8xf32>, vector<1x8xf32>, vector<1x8xf32>, vector<1x8xf32>, vector<1x8xf32>, vector<1x8xf32>, vector<1x8xf32>, vector<1x8xf32>, vector<1x8xf32>, vector<1x8xf32>, vector<1x8xf32>, vector<1x8xf32> -> vector<16x8xf32>
    %c8 = arith.constant 8 : index
    %c0_72 = arith.constant 0 : index
    %171 = vector.load %arg9[%c8, %c0_72] : memref<24x24xf32, #tpu.memory_space<vmem>>, vector<8x24xf32>
    %cst_73 = arith.constant dense<0.000000e+00> : vector<16x24xf32>
    %172 = tpu.matmul %170, %171, %cst_73 {dimension_numbers = #tpu.dot_dimension_numbers<[1], [0], [0], [1], [0, 0, 1, 1], [], []>} : vector<16x8xf32>, vector<8x24xf32>, vector<16x24xf32> -> vector<16x24xf32>
    %173 = arith.addf %87, %172 : vector<16x24xf32>
    %c0_74 = arith.constant 0 : index
    %c0_75 = arith.constant 0 : index
    %c0_76 = arith.constant 0 : index
    %174 = vector.load %arg7[%c0_74, %c0_75, %c0_76] : memref<5x16x8xf32, #tpu.memory_space<vmem>>, vector<5x16x8xf32>
    %c0_77 = arith.constant 0 : index
    %c0_78 = arith.constant 0 : index
    %175 = vector.load %arg8[%c0_77, %c0_78] : memref<1x8xf32, #tpu.memory_space<vmem>>, vector<1x8xf32>
    %cst_79 = arith.constant 0.000000e+00 : f32
    %176 = vector.broadcast %cst_79 : f32 to vector<256x8xf32>
    %c0_80 = arith.constant 0 : index
    %c0_81 = arith.constant 0 : index
    %177 = vector.load %arg0[%c0_80, %c0_81] : memref<264x16xf32, #tpu.memory_space<vmem>>, vector<256x16xf32>
    %178 = vector.extract_strided_slice %174 {offsets = [0, 0, 0], sizes = [1, 16, 8], strides = [1, 1, 1]} : vector<5x16x8xf32> to vector<1x16x8xf32>
    %179 = vector.shape_cast %178 : vector<1x16x8xf32> to vector<16x8xf32>
    %cst_82 = arith.constant dense<0.000000e+00> : vector<256x8xf32>
    %180 = tpu.matmul %177, %179, %cst_82 {dimension_numbers = #tpu.dot_dimension_numbers<[1], [0], [0], [1], [0, 0, 1, 1], [], []>} : vector<256x16xf32>, vector<16x8xf32>, vector<256x8xf32> -> vector<256x8xf32>
    %181 = arith.addf %176, %180 : vector<256x8xf32>
    %c1_83 = arith.constant 1 : index
    %c0_84 = arith.constant 0 : index
    %182 = vector.load %arg0[%c1_83, %c0_84] : memref<264x16xf32, #tpu.memory_space<vmem>>, vector<256x16xf32>
    %183 = vector.extract_strided_slice %174 {offsets = [1, 0, 0], sizes = [1, 16, 8], strides = [1, 1, 1]} : vector<5x16x8xf32> to vector<1x16x8xf32>
    %184 = vector.shape_cast %183 : vector<1x16x8xf32> to vector<16x8xf32>
    %cst_85 = arith.constant dense<0.000000e+00> : vector<256x8xf32>
    %185 = tpu.matmul %182, %184, %cst_85 {dimension_numbers = #tpu.dot_dimension_numbers<[1], [0], [0], [1], [0, 0, 1, 1], [], []>} : vector<256x16xf32>, vector<16x8xf32>, vector<256x8xf32> -> vector<256x8xf32>
    %186 = arith.addf %181, %185 : vector<256x8xf32>
    %c2_86 = arith.constant 2 : index
    %c0_87 = arith.constant 0 : index
    %187 = vector.load %arg0[%c2_86, %c0_87] : memref<264x16xf32, #tpu.memory_space<vmem>>, vector<256x16xf32>
    %188 = vector.extract_strided_slice %174 {offsets = [2, 0, 0], sizes = [1, 16, 8], strides = [1, 1, 1]} : vector<5x16x8xf32> to vector<1x16x8xf32>
    %189 = vector.shape_cast %188 : vector<1x16x8xf32> to vector<16x8xf32>
    %cst_88 = arith.constant dense<0.000000e+00> : vector<256x8xf32>
    %190 = tpu.matmul %187, %189, %cst_88 {dimension_numbers = #tpu.dot_dimension_numbers<[1], [0], [0], [1], [0, 0, 1, 1], [], []>} : vector<256x16xf32>, vector<16x8xf32>, vector<256x8xf32> -> vector<256x8xf32>
    %191 = arith.addf %186, %190 : vector<256x8xf32>
    %c3_89 = arith.constant 3 : index
    %c0_90 = arith.constant 0 : index
    %192 = vector.load %arg0[%c3_89, %c0_90] : memref<264x16xf32, #tpu.memory_space<vmem>>, vector<256x16xf32>
    %193 = vector.extract_strided_slice %174 {offsets = [3, 0, 0], sizes = [1, 16, 8], strides = [1, 1, 1]} : vector<5x16x8xf32> to vector<1x16x8xf32>
    %194 = vector.shape_cast %193 : vector<1x16x8xf32> to vector<16x8xf32>
    %cst_91 = arith.constant dense<0.000000e+00> : vector<256x8xf32>
    %195 = tpu.matmul %192, %194, %cst_91 {dimension_numbers = #tpu.dot_dimension_numbers<[1], [0], [0], [1], [0, 0, 1, 1], [], []>} : vector<256x16xf32>, vector<16x8xf32>, vector<256x8xf32> -> vector<256x8xf32>
    %196 = arith.addf %191, %195 : vector<256x8xf32>
    %c4 = arith.constant 4 : index
    %c0_92 = arith.constant 0 : index
    %197 = vector.load %arg0[%c4, %c0_92] : memref<264x16xf32, #tpu.memory_space<vmem>>, vector<256x16xf32>
    %198 = vector.extract_strided_slice %174 {offsets = [4, 0, 0], sizes = [1, 16, 8], strides = [1, 1, 1]} : vector<5x16x8xf32> to vector<1x16x8xf32>
    %199 = vector.shape_cast %198 : vector<1x16x8xf32> to vector<16x8xf32>
    %cst_93 = arith.constant dense<0.000000e+00> : vector<256x8xf32>
    %200 = tpu.matmul %197, %199, %cst_93 {dimension_numbers = #tpu.dot_dimension_numbers<[1], [0], [0], [1], [0, 0, 1, 1], [], []>} : vector<256x16xf32>, vector<16x8xf32>, vector<256x8xf32> -> vector<256x8xf32>
    %201 = arith.addf %196, %200 : vector<256x8xf32>
    %202 = vector.broadcast %175 : vector<1x8xf32> to vector<256x8xf32>
    %203 = arith.addf %201, %202 : vector<256x8xf32>
    %cst_94 = arith.constant 0.000000e+00 : f32
    %204 = vector.broadcast %cst_94 : f32 to vector<256x8xf32>
    %205 = arith.maximumf %203, %204 : vector<256x8xf32>
    %c8_i32 = arith.constant 8 : i32
    %206 = vector.broadcast %c8_i32 : i32 to vector<256x1xi32>
    %207 = arith.cmpi slt, %2, %206 : vector<256x1xi32>
    %cst_95 = arith.constant 1.000000e+00 : f32
    %cst_96 = arith.constant 0.000000e+00 : f32
    %208 = vector.broadcast %cst_95 : f32 to vector<256x1xf32>
    %209 = vector.broadcast %cst_96 : f32 to vector<256x1xf32>
    %210 = arith.select %207, %208, %209 : vector<256x1xi1>, vector<256x1xf32>
    %211 = vector.broadcast %210 : vector<256x1xf32> to vector<256x8xf32>
    %212 = arith.mulf %205, %211 : vector<256x8xf32>
    %213 = vector.extract_strided_slice %212 {offsets = [0, 0], sizes = [16, 8], strides = [1, 1]} : vector<256x8xf32> to vector<16x8xf32>
    %cst_97 = arith.constant dense<0xFF800000> : vector<8xf32>
    %214 = vector.multi_reduction <maximumf>, %213, %cst_97 [0] : vector<16x8xf32> to vector<8xf32>
    %215 = vector.shape_cast %214 : vector<8xf32> to vector<1x8xf32>
    %216 = vector.extract_strided_slice %212 {offsets = [16, 0], sizes = [16, 8], strides = [1, 1]} : vector<256x8xf32> to vector<16x8xf32>
    %cst_98 = arith.constant dense<0xFF800000> : vector<8xf32>
    %217 = vector.multi_reduction <maximumf>, %216, %cst_98 [0] : vector<16x8xf32> to vector<8xf32>
    %218 = vector.shape_cast %217 : vector<8xf32> to vector<1x8xf32>
    %219 = vector.extract_strided_slice %212 {offsets = [32, 0], sizes = [16, 8], strides = [1, 1]} : vector<256x8xf32> to vector<16x8xf32>
    %cst_99 = arith.constant dense<0xFF800000> : vector<8xf32>
    %220 = vector.multi_reduction <maximumf>, %219, %cst_99 [0] : vector<16x8xf32> to vector<8xf32>
    %221 = vector.shape_cast %220 : vector<8xf32> to vector<1x8xf32>
    %222 = vector.extract_strided_slice %212 {offsets = [48, 0], sizes = [16, 8], strides = [1, 1]} : vector<256x8xf32> to vector<16x8xf32>
    %cst_100 = arith.constant dense<0xFF800000> : vector<8xf32>
    %223 = vector.multi_reduction <maximumf>, %222, %cst_100 [0] : vector<16x8xf32> to vector<8xf32>
    %224 = vector.shape_cast %223 : vector<8xf32> to vector<1x8xf32>
    %225 = vector.extract_strided_slice %212 {offsets = [64, 0], sizes = [16, 8], strides = [1, 1]} : vector<256x8xf32> to vector<16x8xf32>
    %cst_101 = arith.constant dense<0xFF800000> : vector<8xf32>
    %226 = vector.multi_reduction <maximumf>, %225, %cst_101 [0] : vector<16x8xf32> to vector<8xf32>
    %227 = vector.shape_cast %226 : vector<8xf32> to vector<1x8xf32>
    %228 = vector.extract_strided_slice %212 {offsets = [80, 0], sizes = [16, 8], strides = [1, 1]} : vector<256x8xf32> to vector<16x8xf32>
    %cst_102 = arith.constant dense<0xFF800000> : vector<8xf32>
    %229 = vector.multi_reduction <maximumf>, %228, %cst_102 [0] : vector<16x8xf32> to vector<8xf32>
    %230 = vector.shape_cast %229 : vector<8xf32> to vector<1x8xf32>
    %231 = vector.extract_strided_slice %212 {offsets = [96, 0], sizes = [16, 8], strides = [1, 1]} : vector<256x8xf32> to vector<16x8xf32>
    %cst_103 = arith.constant dense<0xFF800000> : vector<8xf32>
    %232 = vector.multi_reduction <maximumf>, %231, %cst_103 [0] : vector<16x8xf32> to vector<8xf32>
    %233 = vector.shape_cast %232 : vector<8xf32> to vector<1x8xf32>
    %234 = vector.extract_strided_slice %212 {offsets = [112, 0], sizes = [16, 8], strides = [1, 1]} : vector<256x8xf32> to vector<16x8xf32>
    %cst_104 = arith.constant dense<0xFF800000> : vector<8xf32>
    %235 = vector.multi_reduction <maximumf>, %234, %cst_104 [0] : vector<16x8xf32> to vector<8xf32>
    %236 = vector.shape_cast %235 : vector<8xf32> to vector<1x8xf32>
    %237 = vector.extract_strided_slice %212 {offsets = [128, 0], sizes = [16, 8], strides = [1, 1]} : vector<256x8xf32> to vector<16x8xf32>
    %cst_105 = arith.constant dense<0xFF800000> : vector<8xf32>
    %238 = vector.multi_reduction <maximumf>, %237, %cst_105 [0] : vector<16x8xf32> to vector<8xf32>
    %239 = vector.shape_cast %238 : vector<8xf32> to vector<1x8xf32>
    %240 = vector.extract_strided_slice %212 {offsets = [144, 0], sizes = [16, 8], strides = [1, 1]} : vector<256x8xf32> to vector<16x8xf32>
    %cst_106 = arith.constant dense<0xFF800000> : vector<8xf32>
    %241 = vector.multi_reduction <maximumf>, %240, %cst_106 [0] : vector<16x8xf32> to vector<8xf32>
    %242 = vector.shape_cast %241 : vector<8xf32> to vector<1x8xf32>
    %243 = vector.extract_strided_slice %212 {offsets = [160, 0], sizes = [16, 8], strides = [1, 1]} : vector<256x8xf32> to vector<16x8xf32>
    %cst_107 = arith.constant dense<0xFF800000> : vector<8xf32>
    %244 = vector.multi_reduction <maximumf>, %243, %cst_107 [0] : vector<16x8xf32> to vector<8xf32>
    %245 = vector.shape_cast %244 : vector<8xf32> to vector<1x8xf32>
    %246 = vector.extract_strided_slice %212 {offsets = [176, 0], sizes = [16, 8], strides = [1, 1]} : vector<256x8xf32> to vector<16x8xf32>
    %cst_108 = arith.constant dense<0xFF800000> : vector<8xf32>
    %247 = vector.multi_reduction <maximumf>, %246, %cst_108 [0] : vector<16x8xf32> to vector<8xf32>
    %248 = vector.shape_cast %247 : vector<8xf32> to vector<1x8xf32>
    %249 = vector.extract_strided_slice %212 {offsets = [192, 0], sizes = [16, 8], strides = [1, 1]} : vector<256x8xf32> to vector<16x8xf32>
    %cst_109 = arith.constant dense<0xFF800000> : vector<8xf32>
    %250 = vector.multi_reduction <maximumf>, %249, %cst_109 [0] : vector<16x8xf32> to vector<8xf32>
    %251 = vector.shape_cast %250 : vector<8xf32> to vector<1x8xf32>
    %252 = vector.extract_strided_slice %212 {offsets = [208, 0], sizes = [16, 8], strides = [1, 1]} : vector<256x8xf32> to vector<16x8xf32>
    %cst_110 = arith.constant dense<0xFF800000> : vector<8xf32>
    %253 = vector.multi_reduction <maximumf>, %252, %cst_110 [0] : vector<16x8xf32> to vector<8xf32>
    %254 = vector.shape_cast %253 : vector<8xf32> to vector<1x8xf32>
    %255 = vector.extract_strided_slice %212 {offsets = [224, 0], sizes = [16, 8], strides = [1, 1]} : vector<256x8xf32> to vector<16x8xf32>
    %cst_111 = arith.constant dense<0xFF800000> : vector<8xf32>
    %256 = vector.multi_reduction <maximumf>, %255, %cst_111 [0] : vector<16x8xf32> to vector<8xf32>
    %257 = vector.shape_cast %256 : vector<8xf32> to vector<1x8xf32>
    %258 = vector.extract_strided_slice %212 {offsets = [240, 0], sizes = [16, 8], strides = [1, 1]} : vector<256x8xf32> to vector<16x8xf32>
    %cst_112 = arith.constant dense<0xFF800000> : vector<8xf32>
    %259 = vector.multi_reduction <maximumf>, %258, %cst_112 [0] : vector<16x8xf32> to vector<8xf32>
    %260 = vector.shape_cast %259 : vector<8xf32> to vector<1x8xf32>
    %261 = tpu.concatenate %215, %218, %221, %224, %227, %230, %233, %236, %239, %242, %245, %248, %251, %254, %257, %260 in 0 : vector<1x8xf32>, vector<1x8xf32>, vector<1x8xf32>, vector<1x8xf32>, vector<1x8xf32>, vector<1x8xf32>, vector<1x8xf32>, vector<1x8xf32>, vector<1x8xf32>, vector<1x8xf32>, vector<1x8xf32>, vector<1x8xf32>, vector<1x8xf32>, vector<1x8xf32>, vector<1x8xf32>, vector<1x8xf32> -> vector<16x8xf32>
    %c16 = arith.constant 16 : index
    %c0_113 = arith.constant 0 : index
    %262 = vector.load %arg9[%c16, %c0_113] : memref<24x24xf32, #tpu.memory_space<vmem>>, vector<8x24xf32>
    %cst_114 = arith.constant dense<0.000000e+00> : vector<16x24xf32>
    %263 = tpu.matmul %261, %262, %cst_114 {dimension_numbers = #tpu.dot_dimension_numbers<[1], [0], [0], [1], [0, 0, 1, 1], [], []>} : vector<16x8xf32>, vector<8x24xf32>, vector<16x24xf32> -> vector<16x24xf32>
    %264 = arith.addf %173, %263 : vector<16x24xf32>
    %cst_115 = arith.constant 0.000000e+00 : f32
    %265 = vector.broadcast %cst_115 : f32 to vector<16x24xf32>
    %266 = arith.maximumf %264, %265 : vector<16x24xf32>
    %c0_116 = arith.constant 0 : index
    %c0_117 = arith.constant 0 : index
    %267 = vector.load %arg1[%c0_116, %c0_117] : memref<16x1xf32, #tpu.memory_space<vmem>>, vector<16x1xf32>
    %268 = vector.broadcast %267 : vector<16x1xf32> to vector<16x24xf32>
    %269 = arith.mulf %266, %268 : vector<16x24xf32>
    %c0_118 = arith.constant 0 : index
    %c0_119 = arith.constant 0 : index
    %270 = vector.load %arg2[%c0_118, %c0_119] : memref<16x8xf32, #tpu.memory_space<vmem>>, vector<16x8xf32>
    %c0_120 = arith.constant 0 : index
    %c0_121 = arith.constant 0 : index
    %c0_122 = arith.constant 0 : index
    %271 = vector.load %arg11[%c0_120, %c0_121, %c0_122] : memref<3x24x8xf32, #tpu.memory_space<vmem>>, vector<3x24x8xf32>
    %c0_123 = arith.constant 0 : index
    %c0_124 = arith.constant 0 : index
    %c0_125 = arith.constant 0 : index
    %272 = vector.load %arg12[%c0_123, %c0_124, %c0_125] : memref<3x8x8xf32, #tpu.memory_space<vmem>>, vector<3x8x8xf32>
    %c0_126 = arith.constant 0 : index
    %c0_127 = arith.constant 0 : index
    %c0_128 = arith.constant 0 : index
    %273 = vector.load %arg13[%c0_126, %c0_127, %c0_128] : memref<3x1x8xf32, #tpu.memory_space<vmem>>, vector<3x1x8xf32>
    %c0_129 = arith.constant 0 : index
    %c0_130 = arith.constant 0 : index
    %c0_131 = arith.constant 0 : index
    %274 = vector.load %arg14[%c0_129, %c0_130, %c0_131] : memref<3x1x8xf32, #tpu.memory_space<vmem>>, vector<3x1x8xf32>
    %275 = vector.extract_strided_slice %271 {offsets = [0, 0, 0], sizes = [1, 24, 8], strides = [1, 1, 1]} : vector<3x24x8xf32> to vector<1x24x8xf32>
    %276 = vector.shape_cast %275 : vector<1x24x8xf32> to vector<24x8xf32>
    %cst_132 = arith.constant dense<0.000000e+00> : vector<16x8xf32>
    %277 = tpu.matmul %269, %276, %cst_132 {dimension_numbers = #tpu.dot_dimension_numbers<[1], [0], [0], [1], [0, 0, 1, 1], [], []>} : vector<16x24xf32>, vector<24x8xf32>, vector<16x8xf32> -> vector<16x8xf32>
    %278 = vector.extract_strided_slice %273 {offsets = [0, 0, 0], sizes = [1, 1, 8], strides = [1, 1, 1]} : vector<3x1x8xf32> to vector<1x1x8xf32>
    %279 = vector.shape_cast %278 : vector<1x1x8xf32> to vector<1x8xf32>
    %280 = vector.broadcast %279 : vector<1x8xf32> to vector<16x8xf32>
    %281 = arith.addf %277, %280 : vector<16x8xf32>
    %282 = vector.extract_strided_slice %271 {offsets = [1, 0, 0], sizes = [1, 24, 8], strides = [1, 1, 1]} : vector<3x24x8xf32> to vector<1x24x8xf32>
    %283 = vector.shape_cast %282 : vector<1x24x8xf32> to vector<24x8xf32>
    %cst_133 = arith.constant dense<0.000000e+00> : vector<16x8xf32>
    %284 = tpu.matmul %269, %283, %cst_133 {dimension_numbers = #tpu.dot_dimension_numbers<[1], [0], [0], [1], [0, 0, 1, 1], [], []>} : vector<16x24xf32>, vector<24x8xf32>, vector<16x8xf32> -> vector<16x8xf32>
    %285 = vector.extract_strided_slice %273 {offsets = [1, 0, 0], sizes = [1, 1, 8], strides = [1, 1, 1]} : vector<3x1x8xf32> to vector<1x1x8xf32>
    %286 = vector.shape_cast %285 : vector<1x1x8xf32> to vector<1x8xf32>
    %287 = vector.broadcast %286 : vector<1x8xf32> to vector<16x8xf32>
    %288 = arith.addf %284, %287 : vector<16x8xf32>
    %289 = vector.extract_strided_slice %271 {offsets = [2, 0, 0], sizes = [1, 24, 8], strides = [1, 1, 1]} : vector<3x24x8xf32> to vector<1x24x8xf32>
    %290 = vector.shape_cast %289 : vector<1x24x8xf32> to vector<24x8xf32>
    %cst_134 = arith.constant dense<0.000000e+00> : vector<16x8xf32>
    %291 = tpu.matmul %269, %290, %cst_134 {dimension_numbers = #tpu.dot_dimension_numbers<[1], [0], [0], [1], [0, 0, 1, 1], [], []>} : vector<16x24xf32>, vector<24x8xf32>, vector<16x8xf32> -> vector<16x8xf32>
    %292 = vector.extract_strided_slice %273 {offsets = [2, 0, 0], sizes = [1, 1, 8], strides = [1, 1, 1]} : vector<3x1x8xf32> to vector<1x1x8xf32>
    %293 = vector.shape_cast %292 : vector<1x1x8xf32> to vector<1x8xf32>
    %294 = vector.broadcast %293 : vector<1x8xf32> to vector<16x8xf32>
    %295 = arith.addf %291, %294 : vector<16x8xf32>
    %cst_135 = arith.constant 0.000000e+00 : f32
    %296 = vector.broadcast %cst_135 : f32 to vector<2x8xf32>
    %297 = vector.extract_strided_slice %272 {offsets = [0, 0, 0], sizes = [1, 8, 8], strides = [1, 1, 1]} : vector<3x8x8xf32> to vector<1x8x8xf32>
    %298 = vector.shape_cast %297 : vector<1x8x8xf32> to vector<8x8xf32>
    %cst_136 = arith.constant dense<0.000000e+00> : vector<2x8xf32>
    %299 = tpu.matmul %296, %298, %cst_136 {dimension_numbers = #tpu.dot_dimension_numbers<[1], [0], [0], [1], [0, 0, 1, 1], [], []>} : vector<2x8xf32>, vector<8x8xf32>, vector<2x8xf32> -> vector<2x8xf32>
    %300 = vector.extract_strided_slice %274 {offsets = [0, 0, 0], sizes = [1, 1, 8], strides = [1, 1, 1]} : vector<3x1x8xf32> to vector<1x1x8xf32>
    %301 = vector.shape_cast %300 : vector<1x1x8xf32> to vector<1x8xf32>
    %302 = vector.broadcast %301 : vector<1x8xf32> to vector<2x8xf32>
    %303 = arith.addf %299, %302 : vector<2x8xf32>
    %304 = vector.extract_strided_slice %272 {offsets = [1, 0, 0], sizes = [1, 8, 8], strides = [1, 1, 1]} : vector<3x8x8xf32> to vector<1x8x8xf32>
    %305 = vector.shape_cast %304 : vector<1x8x8xf32> to vector<8x8xf32>
    %cst_137 = arith.constant dense<0.000000e+00> : vector<2x8xf32>
    %306 = tpu.matmul %296, %305, %cst_137 {dimension_numbers = #tpu.dot_dimension_numbers<[1], [0], [0], [1], [0, 0, 1, 1], [], []>} : vector<2x8xf32>, vector<8x8xf32>, vector<2x8xf32> -> vector<2x8xf32>
    %307 = vector.extract_strided_slice %274 {offsets = [1, 0, 0], sizes = [1, 1, 8], strides = [1, 1, 1]} : vector<3x1x8xf32> to vector<1x1x8xf32>
    %308 = vector.shape_cast %307 : vector<1x1x8xf32> to vector<1x8xf32>
    %309 = vector.broadcast %308 : vector<1x8xf32> to vector<2x8xf32>
    %310 = arith.addf %306, %309 : vector<2x8xf32>
    %311 = vector.extract_strided_slice %272 {offsets = [2, 0, 0], sizes = [1, 8, 8], strides = [1, 1, 1]} : vector<3x8x8xf32> to vector<1x8x8xf32>
    %312 = vector.shape_cast %311 : vector<1x8x8xf32> to vector<8x8xf32>
    %cst_138 = arith.constant dense<0.000000e+00> : vector<2x8xf32>
    %313 = tpu.matmul %296, %312, %cst_138 {dimension_numbers = #tpu.dot_dimension_numbers<[1], [0], [0], [1], [0, 0, 1, 1], [], []>} : vector<2x8xf32>, vector<8x8xf32>, vector<2x8xf32> -> vector<2x8xf32>
    %314 = vector.extract_strided_slice %274 {offsets = [2, 0, 0], sizes = [1, 1, 8], strides = [1, 1, 1]} : vector<3x1x8xf32> to vector<1x1x8xf32>
    %315 = vector.shape_cast %314 : vector<1x1x8xf32> to vector<1x8xf32>
    %316 = vector.broadcast %315 : vector<1x8xf32> to vector<2x8xf32>
    %317 = arith.addf %313, %316 : vector<2x8xf32>
    %318 = vector.extract_strided_slice %281 {offsets = [0, 0], sizes = [2, 8], strides = [1, 1]} : vector<16x8xf32> to vector<2x8xf32>
    %319 = arith.addf %318, %303 : vector<2x8xf32>
    %320 = arith.negf %319 : vector<2x8xf32>
    %321 = math.exp %320 : vector<2x8xf32>
    %cst_139 = arith.constant 1.000000e+00 : f32
    %322 = vector.broadcast %cst_139 : f32 to vector<2x8xf32>
    %323 = arith.addf %322, %321 : vector<2x8xf32>
    %324 = arith.divf %322, %323 : vector<2x8xf32>
    %325 = vector.extract_strided_slice %288 {offsets = [0, 0], sizes = [2, 8], strides = [1, 1]} : vector<16x8xf32> to vector<2x8xf32>
    %326 = arith.addf %325, %310 : vector<2x8xf32>
    %327 = arith.negf %326 : vector<2x8xf32>
    %328 = math.exp %327 : vector<2x8xf32>
    %cst_140 = arith.constant 1.000000e+00 : f32
    %329 = vector.broadcast %cst_140 : f32 to vector<2x8xf32>
    %330 = arith.addf %329, %328 : vector<2x8xf32>
    %331 = arith.divf %329, %330 : vector<2x8xf32>
    %332 = vector.extract_strided_slice %295 {offsets = [0, 0], sizes = [2, 8], strides = [1, 1]} : vector<16x8xf32> to vector<2x8xf32>
    %333 = arith.mulf %324, %317 : vector<2x8xf32>
    %334 = arith.addf %332, %333 : vector<2x8xf32>
    %335 = math.tanh %334 : vector<2x8xf32>
    %cst_141 = arith.constant 1.000000e+00 : f32
    %336 = vector.broadcast %cst_141 : f32 to vector<2x8xf32>
    %337 = arith.subf %336, %331 : vector<2x8xf32>
    %338 = arith.mulf %337, %335 : vector<2x8xf32>
    %339 = arith.mulf %331, %296 : vector<2x8xf32>
    %340 = arith.addf %338, %339 : vector<2x8xf32>
    %341 = vector.extract_strided_slice %270 {offsets = [0, 0], sizes = [2, 8], strides = [1, 1]} : vector<16x8xf32> to vector<2x8xf32>
    %342 = arith.mulf %341, %340 : vector<2x8xf32>
    %cst_142 = arith.constant 1.000000e+00 : f32
    %343 = vector.broadcast %cst_142 : f32 to vector<2x8xf32>
    %344 = arith.subf %343, %341 : vector<2x8xf32>
    %345 = arith.mulf %344, %296 : vector<2x8xf32>
    %346 = arith.addf %342, %345 : vector<2x8xf32>
    %347 = arith.mulf %341, %340 : vector<2x8xf32>
    %348 = vector.extract_strided_slice %272 {offsets = [0, 0, 0], sizes = [1, 8, 8], strides = [1, 1, 1]} : vector<3x8x8xf32> to vector<1x8x8xf32>
    %349 = vector.shape_cast %348 : vector<1x8x8xf32> to vector<8x8xf32>
    %cst_143 = arith.constant dense<0.000000e+00> : vector<2x8xf32>
    %350 = tpu.matmul %346, %349, %cst_143 {dimension_numbers = #tpu.dot_dimension_numbers<[1], [0], [0], [1], [0, 0, 1, 1], [], []>} : vector<2x8xf32>, vector<8x8xf32>, vector<2x8xf32> -> vector<2x8xf32>
    %351 = vector.extract_strided_slice %274 {offsets = [0, 0, 0], sizes = [1, 1, 8], strides = [1, 1, 1]} : vector<3x1x8xf32> to vector<1x1x8xf32>
    %352 = vector.shape_cast %351 : vector<1x1x8xf32> to vector<1x8xf32>
    %353 = vector.broadcast %352 : vector<1x8xf32> to vector<2x8xf32>
    %354 = arith.addf %350, %353 : vector<2x8xf32>
    %355 = vector.extract_strided_slice %272 {offsets = [1, 0, 0], sizes = [1, 8, 8], strides = [1, 1, 1]} : vector<3x8x8xf32> to vector<1x8x8xf32>
    %356 = vector.shape_cast %355 : vector<1x8x8xf32> to vector<8x8xf32>
    %cst_144 = arith.constant dense<0.000000e+00> : vector<2x8xf32>
    %357 = tpu.matmul %346, %356, %cst_144 {dimension_numbers = #tpu.dot_dimension_numbers<[1], [0], [0], [1], [0, 0, 1, 1], [], []>} : vector<2x8xf32>, vector<8x8xf32>, vector<2x8xf32> -> vector<2x8xf32>
    %358 = vector.extract_strided_slice %274 {offsets = [1, 0, 0], sizes = [1, 1, 8], strides = [1, 1, 1]} : vector<3x1x8xf32> to vector<1x1x8xf32>
    %359 = vector.shape_cast %358 : vector<1x1x8xf32> to vector<1x8xf32>
    %360 = vector.broadcast %359 : vector<1x8xf32> to vector<2x8xf32>
    %361 = arith.addf %357, %360 : vector<2x8xf32>
    %362 = vector.extract_strided_slice %272 {offsets = [2, 0, 0], sizes = [1, 8, 8], strides = [1, 1, 1]} : vector<3x8x8xf32> to vector<1x8x8xf32>
    %363 = vector.shape_cast %362 : vector<1x8x8xf32> to vector<8x8xf32>
    %cst_145 = arith.constant dense<0.000000e+00> : vector<2x8xf32>
    %364 = tpu.matmul %346, %363, %cst_145 {dimension_numbers = #tpu.dot_dimension_numbers<[1], [0], [0], [1], [0, 0, 1, 1], [], []>} : vector<2x8xf32>, vector<8x8xf32>, vector<2x8xf32> -> vector<2x8xf32>
    %365 = vector.extract_strided_slice %274 {offsets = [2, 0, 0], sizes = [1, 1, 8], strides = [1, 1, 1]} : vector<3x1x8xf32> to vector<1x1x8xf32>
    %366 = vector.shape_cast %365 : vector<1x1x8xf32> to vector<1x8xf32>
    %367 = vector.broadcast %366 : vector<1x8xf32> to vector<2x8xf32>
    %368 = arith.addf %364, %367 : vector<2x8xf32>
    %369 = vector.extract_strided_slice %281 {offsets = [2, 0], sizes = [2, 8], strides = [1, 1]} : vector<16x8xf32> to vector<2x8xf32>
    %370 = arith.addf %369, %354 : vector<2x8xf32>
    %371 = arith.negf %370 : vector<2x8xf32>
    %372 = math.exp %371 : vector<2x8xf32>
    %cst_146 = arith.constant 1.000000e+00 : f32
    %373 = vector.broadcast %cst_146 : f32 to vector<2x8xf32>
    %374 = arith.addf %373, %372 : vector<2x8xf32>
    %375 = arith.divf %373, %374 : vector<2x8xf32>
    %376 = vector.extract_strided_slice %288 {offsets = [2, 0], sizes = [2, 8], strides = [1, 1]} : vector<16x8xf32> to vector<2x8xf32>
    %377 = arith.addf %376, %361 : vector<2x8xf32>
    %378 = arith.negf %377 : vector<2x8xf32>
    %379 = math.exp %378 : vector<2x8xf32>
    %cst_147 = arith.constant 1.000000e+00 : f32
    %380 = vector.broadcast %cst_147 : f32 to vector<2x8xf32>
    %381 = arith.addf %380, %379 : vector<2x8xf32>
    %382 = arith.divf %380, %381 : vector<2x8xf32>
    %383 = vector.extract_strided_slice %295 {offsets = [2, 0], sizes = [2, 8], strides = [1, 1]} : vector<16x8xf32> to vector<2x8xf32>
    %384 = arith.mulf %375, %368 : vector<2x8xf32>
    %385 = arith.addf %383, %384 : vector<2x8xf32>
    %386 = math.tanh %385 : vector<2x8xf32>
    %cst_148 = arith.constant 1.000000e+00 : f32
    %387 = vector.broadcast %cst_148 : f32 to vector<2x8xf32>
    %388 = arith.subf %387, %382 : vector<2x8xf32>
    %389 = arith.mulf %388, %386 : vector<2x8xf32>
    %390 = arith.mulf %382, %346 : vector<2x8xf32>
    %391 = arith.addf %389, %390 : vector<2x8xf32>
    %392 = vector.extract_strided_slice %270 {offsets = [2, 0], sizes = [2, 8], strides = [1, 1]} : vector<16x8xf32> to vector<2x8xf32>
    %393 = arith.mulf %392, %391 : vector<2x8xf32>
    %cst_149 = arith.constant 1.000000e+00 : f32
    %394 = vector.broadcast %cst_149 : f32 to vector<2x8xf32>
    %395 = arith.subf %394, %392 : vector<2x8xf32>
    %396 = arith.mulf %395, %346 : vector<2x8xf32>
    %397 = arith.addf %393, %396 : vector<2x8xf32>
    %398 = arith.mulf %392, %391 : vector<2x8xf32>
    %399 = vector.extract_strided_slice %272 {offsets = [0, 0, 0], sizes = [1, 8, 8], strides = [1, 1, 1]} : vector<3x8x8xf32> to vector<1x8x8xf32>
    %400 = vector.shape_cast %399 : vector<1x8x8xf32> to vector<8x8xf32>
    %cst_150 = arith.constant dense<0.000000e+00> : vector<2x8xf32>
    %401 = tpu.matmul %397, %400, %cst_150 {dimension_numbers = #tpu.dot_dimension_numbers<[1], [0], [0], [1], [0, 0, 1, 1], [], []>} : vector<2x8xf32>, vector<8x8xf32>, vector<2x8xf32> -> vector<2x8xf32>
    %402 = vector.extract_strided_slice %274 {offsets = [0, 0, 0], sizes = [1, 1, 8], strides = [1, 1, 1]} : vector<3x1x8xf32> to vector<1x1x8xf32>
    %403 = vector.shape_cast %402 : vector<1x1x8xf32> to vector<1x8xf32>
    %404 = vector.broadcast %403 : vector<1x8xf32> to vector<2x8xf32>
    %405 = arith.addf %401, %404 : vector<2x8xf32>
    %406 = vector.extract_strided_slice %272 {offsets = [1, 0, 0], sizes = [1, 8, 8], strides = [1, 1, 1]} : vector<3x8x8xf32> to vector<1x8x8xf32>
    %407 = vector.shape_cast %406 : vector<1x8x8xf32> to vector<8x8xf32>
    %cst_151 = arith.constant dense<0.000000e+00> : vector<2x8xf32>
    %408 = tpu.matmul %397, %407, %cst_151 {dimension_numbers = #tpu.dot_dimension_numbers<[1], [0], [0], [1], [0, 0, 1, 1], [], []>} : vector<2x8xf32>, vector<8x8xf32>, vector<2x8xf32> -> vector<2x8xf32>
    %409 = vector.extract_strided_slice %274 {offsets = [1, 0, 0], sizes = [1, 1, 8], strides = [1, 1, 1]} : vector<3x1x8xf32> to vector<1x1x8xf32>
    %410 = vector.shape_cast %409 : vector<1x1x8xf32> to vector<1x8xf32>
    %411 = vector.broadcast %410 : vector<1x8xf32> to vector<2x8xf32>
    %412 = arith.addf %408, %411 : vector<2x8xf32>
    %413 = vector.extract_strided_slice %272 {offsets = [2, 0, 0], sizes = [1, 8, 8], strides = [1, 1, 1]} : vector<3x8x8xf32> to vector<1x8x8xf32>
    %414 = vector.shape_cast %413 : vector<1x8x8xf32> to vector<8x8xf32>
    %cst_152 = arith.constant dense<0.000000e+00> : vector<2x8xf32>
    %415 = tpu.matmul %397, %414, %cst_152 {dimension_numbers = #tpu.dot_dimension_numbers<[1], [0], [0], [1], [0, 0, 1, 1], [], []>} : vector<2x8xf32>, vector<8x8xf32>, vector<2x8xf32> -> vector<2x8xf32>
    %416 = vector.extract_strided_slice %274 {offsets = [2, 0, 0], sizes = [1, 1, 8], strides = [1, 1, 1]} : vector<3x1x8xf32> to vector<1x1x8xf32>
    %417 = vector.shape_cast %416 : vector<1x1x8xf32> to vector<1x8xf32>
    %418 = vector.broadcast %417 : vector<1x8xf32> to vector<2x8xf32>
    %419 = arith.addf %415, %418 : vector<2x8xf32>
    %420 = vector.extract_strided_slice %281 {offsets = [4, 0], sizes = [2, 8], strides = [1, 1]} : vector<16x8xf32> to vector<2x8xf32>
    %421 = arith.addf %420, %405 : vector<2x8xf32>
    %422 = arith.negf %421 : vector<2x8xf32>
    %423 = math.exp %422 : vector<2x8xf32>
    %cst_153 = arith.constant 1.000000e+00 : f32
    %424 = vector.broadcast %cst_153 : f32 to vector<2x8xf32>
    %425 = arith.addf %424, %423 : vector<2x8xf32>
    %426 = arith.divf %424, %425 : vector<2x8xf32>
    %427 = vector.extract_strided_slice %288 {offsets = [4, 0], sizes = [2, 8], strides = [1, 1]} : vector<16x8xf32> to vector<2x8xf32>
    %428 = arith.addf %427, %412 : vector<2x8xf32>
    %429 = arith.negf %428 : vector<2x8xf32>
    %430 = math.exp %429 : vector<2x8xf32>
    %cst_154 = arith.constant 1.000000e+00 : f32
    %431 = vector.broadcast %cst_154 : f32 to vector<2x8xf32>
    %432 = arith.addf %431, %430 : vector<2x8xf32>
    %433 = arith.divf %431, %432 : vector<2x8xf32>
    %434 = vector.extract_strided_slice %295 {offsets = [4, 0], sizes = [2, 8], strides = [1, 1]} : vector<16x8xf32> to vector<2x8xf32>
    %435 = arith.mulf %426, %419 : vector<2x8xf32>
    %436 = arith.addf %434, %435 : vector<2x8xf32>
    %437 = math.tanh %436 : vector<2x8xf32>
    %cst_155 = arith.constant 1.000000e+00 : f32
    %438 = vector.broadcast %cst_155 : f32 to vector<2x8xf32>
    %439 = arith.subf %438, %433 : vector<2x8xf32>
    %440 = arith.mulf %439, %437 : vector<2x8xf32>
    %441 = arith.mulf %433, %397 : vector<2x8xf32>
    %442 = arith.addf %440, %441 : vector<2x8xf32>
    %443 = vector.extract_strided_slice %270 {offsets = [4, 0], sizes = [2, 8], strides = [1, 1]} : vector<16x8xf32> to vector<2x8xf32>
    %444 = arith.mulf %443, %442 : vector<2x8xf32>
    %cst_156 = arith.constant 1.000000e+00 : f32
    %445 = vector.broadcast %cst_156 : f32 to vector<2x8xf32>
    %446 = arith.subf %445, %443 : vector<2x8xf32>
    %447 = arith.mulf %446, %397 : vector<2x8xf32>
    %448 = arith.addf %444, %447 : vector<2x8xf32>
    %449 = arith.mulf %443, %442 : vector<2x8xf32>
    %450 = vector.extract_strided_slice %272 {offsets = [0, 0, 0], sizes = [1, 8, 8], strides = [1, 1, 1]} : vector<3x8x8xf32> to vector<1x8x8xf32>
    %451 = vector.shape_cast %450 : vector<1x8x8xf32> to vector<8x8xf32>
    %cst_157 = arith.constant dense<0.000000e+00> : vector<2x8xf32>
    %452 = tpu.matmul %448, %451, %cst_157 {dimension_numbers = #tpu.dot_dimension_numbers<[1], [0], [0], [1], [0, 0, 1, 1], [], []>} : vector<2x8xf32>, vector<8x8xf32>, vector<2x8xf32> -> vector<2x8xf32>
    %453 = vector.extract_strided_slice %274 {offsets = [0, 0, 0], sizes = [1, 1, 8], strides = [1, 1, 1]} : vector<3x1x8xf32> to vector<1x1x8xf32>
    %454 = vector.shape_cast %453 : vector<1x1x8xf32> to vector<1x8xf32>
    %455 = vector.broadcast %454 : vector<1x8xf32> to vector<2x8xf32>
    %456 = arith.addf %452, %455 : vector<2x8xf32>
    %457 = vector.extract_strided_slice %272 {offsets = [1, 0, 0], sizes = [1, 8, 8], strides = [1, 1, 1]} : vector<3x8x8xf32> to vector<1x8x8xf32>
    %458 = vector.shape_cast %457 : vector<1x8x8xf32> to vector<8x8xf32>
    %cst_158 = arith.constant dense<0.000000e+00> : vector<2x8xf32>
    %459 = tpu.matmul %448, %458, %cst_158 {dimension_numbers = #tpu.dot_dimension_numbers<[1], [0], [0], [1], [0, 0, 1, 1], [], []>} : vector<2x8xf32>, vector<8x8xf32>, vector<2x8xf32> -> vector<2x8xf32>
    %460 = vector.extract_strided_slice %274 {offsets = [1, 0, 0], sizes = [1, 1, 8], strides = [1, 1, 1]} : vector<3x1x8xf32> to vector<1x1x8xf32>
    %461 = vector.shape_cast %460 : vector<1x1x8xf32> to vector<1x8xf32>
    %462 = vector.broadcast %461 : vector<1x8xf32> to vector<2x8xf32>
    %463 = arith.addf %459, %462 : vector<2x8xf32>
    %464 = vector.extract_strided_slice %272 {offsets = [2, 0, 0], sizes = [1, 8, 8], strides = [1, 1, 1]} : vector<3x8x8xf32> to vector<1x8x8xf32>
    %465 = vector.shape_cast %464 : vector<1x8x8xf32> to vector<8x8xf32>
    %cst_159 = arith.constant dense<0.000000e+00> : vector<2x8xf32>
    %466 = tpu.matmul %448, %465, %cst_159 {dimension_numbers = #tpu.dot_dimension_numbers<[1], [0], [0], [1], [0, 0, 1, 1], [], []>} : vector<2x8xf32>, vector<8x8xf32>, vector<2x8xf32> -> vector<2x8xf32>
    %467 = vector.extract_strided_slice %274 {offsets = [2, 0, 0], sizes = [1, 1, 8], strides = [1, 1, 1]} : vector<3x1x8xf32> to vector<1x1x8xf32>
    %468 = vector.shape_cast %467 : vector<1x1x8xf32> to vector<1x8xf32>
    %469 = vector.broadcast %468 : vector<1x8xf32> to vector<2x8xf32>
    %470 = arith.addf %466, %469 : vector<2x8xf32>
    %471 = vector.extract_strided_slice %281 {offsets = [6, 0], sizes = [2, 8], strides = [1, 1]} : vector<16x8xf32> to vector<2x8xf32>
    %472 = arith.addf %471, %456 : vector<2x8xf32>
    %473 = arith.negf %472 : vector<2x8xf32>
    %474 = math.exp %473 : vector<2x8xf32>
    %cst_160 = arith.constant 1.000000e+00 : f32
    %475 = vector.broadcast %cst_160 : f32 to vector<2x8xf32>
    %476 = arith.addf %475, %474 : vector<2x8xf32>
    %477 = arith.divf %475, %476 : vector<2x8xf32>
    %478 = vector.extract_strided_slice %288 {offsets = [6, 0], sizes = [2, 8], strides = [1, 1]} : vector<16x8xf32> to vector<2x8xf32>
    %479 = arith.addf %478, %463 : vector<2x8xf32>
    %480 = arith.negf %479 : vector<2x8xf32>
    %481 = math.exp %480 : vector<2x8xf32>
    %cst_161 = arith.constant 1.000000e+00 : f32
    %482 = vector.broadcast %cst_161 : f32 to vector<2x8xf32>
    %483 = arith.addf %482, %481 : vector<2x8xf32>
    %484 = arith.divf %482, %483 : vector<2x8xf32>
    %485 = vector.extract_strided_slice %295 {offsets = [6, 0], sizes = [2, 8], strides = [1, 1]} : vector<16x8xf32> to vector<2x8xf32>
    %486 = arith.mulf %477, %470 : vector<2x8xf32>
    %487 = arith.addf %485, %486 : vector<2x8xf32>
    %488 = math.tanh %487 : vector<2x8xf32>
    %cst_162 = arith.constant 1.000000e+00 : f32
    %489 = vector.broadcast %cst_162 : f32 to vector<2x8xf32>
    %490 = arith.subf %489, %484 : vector<2x8xf32>
    %491 = arith.mulf %490, %488 : vector<2x8xf32>
    %492 = arith.mulf %484, %448 : vector<2x8xf32>
    %493 = arith.addf %491, %492 : vector<2x8xf32>
    %494 = vector.extract_strided_slice %270 {offsets = [6, 0], sizes = [2, 8], strides = [1, 1]} : vector<16x8xf32> to vector<2x8xf32>
    %495 = arith.mulf %494, %493 : vector<2x8xf32>
    %cst_163 = arith.constant 1.000000e+00 : f32
    %496 = vector.broadcast %cst_163 : f32 to vector<2x8xf32>
    %497 = arith.subf %496, %494 : vector<2x8xf32>
    %498 = arith.mulf %497, %448 : vector<2x8xf32>
    %499 = arith.addf %495, %498 : vector<2x8xf32>
    %500 = arith.mulf %494, %493 : vector<2x8xf32>
    %501 = vector.extract_strided_slice %272 {offsets = [0, 0, 0], sizes = [1, 8, 8], strides = [1, 1, 1]} : vector<3x8x8xf32> to vector<1x8x8xf32>
    %502 = vector.shape_cast %501 : vector<1x8x8xf32> to vector<8x8xf32>
    %cst_164 = arith.constant dense<0.000000e+00> : vector<2x8xf32>
    %503 = tpu.matmul %499, %502, %cst_164 {dimension_numbers = #tpu.dot_dimension_numbers<[1], [0], [0], [1], [0, 0, 1, 1], [], []>} : vector<2x8xf32>, vector<8x8xf32>, vector<2x8xf32> -> vector<2x8xf32>
    %504 = vector.extract_strided_slice %274 {offsets = [0, 0, 0], sizes = [1, 1, 8], strides = [1, 1, 1]} : vector<3x1x8xf32> to vector<1x1x8xf32>
    %505 = vector.shape_cast %504 : vector<1x1x8xf32> to vector<1x8xf32>
    %506 = vector.broadcast %505 : vector<1x8xf32> to vector<2x8xf32>
    %507 = arith.addf %503, %506 : vector<2x8xf32>
    %508 = vector.extract_strided_slice %272 {offsets = [1, 0, 0], sizes = [1, 8, 8], strides = [1, 1, 1]} : vector<3x8x8xf32> to vector<1x8x8xf32>
    %509 = vector.shape_cast %508 : vector<1x8x8xf32> to vector<8x8xf32>
    %cst_165 = arith.constant dense<0.000000e+00> : vector<2x8xf32>
    %510 = tpu.matmul %499, %509, %cst_165 {dimension_numbers = #tpu.dot_dimension_numbers<[1], [0], [0], [1], [0, 0, 1, 1], [], []>} : vector<2x8xf32>, vector<8x8xf32>, vector<2x8xf32> -> vector<2x8xf32>
    %511 = vector.extract_strided_slice %274 {offsets = [1, 0, 0], sizes = [1, 1, 8], strides = [1, 1, 1]} : vector<3x1x8xf32> to vector<1x1x8xf32>
    %512 = vector.shape_cast %511 : vector<1x1x8xf32> to vector<1x8xf32>
    %513 = vector.broadcast %512 : vector<1x8xf32> to vector<2x8xf32>
    %514 = arith.addf %510, %513 : vector<2x8xf32>
    %515 = vector.extract_strided_slice %272 {offsets = [2, 0, 0], sizes = [1, 8, 8], strides = [1, 1, 1]} : vector<3x8x8xf32> to vector<1x8x8xf32>
    %516 = vector.shape_cast %515 : vector<1x8x8xf32> to vector<8x8xf32>
    %cst_166 = arith.constant dense<0.000000e+00> : vector<2x8xf32>
    %517 = tpu.matmul %499, %516, %cst_166 {dimension_numbers = #tpu.dot_dimension_numbers<[1], [0], [0], [1], [0, 0, 1, 1], [], []>} : vector<2x8xf32>, vector<8x8xf32>, vector<2x8xf32> -> vector<2x8xf32>
    %518 = vector.extract_strided_slice %274 {offsets = [2, 0, 0], sizes = [1, 1, 8], strides = [1, 1, 1]} : vector<3x1x8xf32> to vector<1x1x8xf32>
    %519 = vector.shape_cast %518 : vector<1x1x8xf32> to vector<1x8xf32>
    %520 = vector.broadcast %519 : vector<1x8xf32> to vector<2x8xf32>
    %521 = arith.addf %517, %520 : vector<2x8xf32>
    %522 = vector.extract_strided_slice %281 {offsets = [8, 0], sizes = [2, 8], strides = [1, 1]} : vector<16x8xf32> to vector<2x8xf32>
    %523 = arith.addf %522, %507 : vector<2x8xf32>
    %524 = arith.negf %523 : vector<2x8xf32>
    %525 = math.exp %524 : vector<2x8xf32>
    %cst_167 = arith.constant 1.000000e+00 : f32
    %526 = vector.broadcast %cst_167 : f32 to vector<2x8xf32>
    %527 = arith.addf %526, %525 : vector<2x8xf32>
    %528 = arith.divf %526, %527 : vector<2x8xf32>
    %529 = vector.extract_strided_slice %288 {offsets = [8, 0], sizes = [2, 8], strides = [1, 1]} : vector<16x8xf32> to vector<2x8xf32>
    %530 = arith.addf %529, %514 : vector<2x8xf32>
    %531 = arith.negf %530 : vector<2x8xf32>
    %532 = math.exp %531 : vector<2x8xf32>
    %cst_168 = arith.constant 1.000000e+00 : f32
    %533 = vector.broadcast %cst_168 : f32 to vector<2x8xf32>
    %534 = arith.addf %533, %532 : vector<2x8xf32>
    %535 = arith.divf %533, %534 : vector<2x8xf32>
    %536 = vector.extract_strided_slice %295 {offsets = [8, 0], sizes = [2, 8], strides = [1, 1]} : vector<16x8xf32> to vector<2x8xf32>
    %537 = arith.mulf %528, %521 : vector<2x8xf32>
    %538 = arith.addf %536, %537 : vector<2x8xf32>
    %539 = math.tanh %538 : vector<2x8xf32>
    %cst_169 = arith.constant 1.000000e+00 : f32
    %540 = vector.broadcast %cst_169 : f32 to vector<2x8xf32>
    %541 = arith.subf %540, %535 : vector<2x8xf32>
    %542 = arith.mulf %541, %539 : vector<2x8xf32>
    %543 = arith.mulf %535, %499 : vector<2x8xf32>
    %544 = arith.addf %542, %543 : vector<2x8xf32>
    %545 = vector.extract_strided_slice %270 {offsets = [8, 0], sizes = [2, 8], strides = [1, 1]} : vector<16x8xf32> to vector<2x8xf32>
    %546 = arith.mulf %545, %544 : vector<2x8xf32>
    %cst_170 = arith.constant 1.000000e+00 : f32
    %547 = vector.broadcast %cst_170 : f32 to vector<2x8xf32>
    %548 = arith.subf %547, %545 : vector<2x8xf32>
    %549 = arith.mulf %548, %499 : vector<2x8xf32>
    %550 = arith.addf %546, %549 : vector<2x8xf32>
    %551 = arith.mulf %545, %544 : vector<2x8xf32>
    %552 = vector.extract_strided_slice %272 {offsets = [0, 0, 0], sizes = [1, 8, 8], strides = [1, 1, 1]} : vector<3x8x8xf32> to vector<1x8x8xf32>
    %553 = vector.shape_cast %552 : vector<1x8x8xf32> to vector<8x8xf32>
    %cst_171 = arith.constant dense<0.000000e+00> : vector<2x8xf32>
    %554 = tpu.matmul %550, %553, %cst_171 {dimension_numbers = #tpu.dot_dimension_numbers<[1], [0], [0], [1], [0, 0, 1, 1], [], []>} : vector<2x8xf32>, vector<8x8xf32>, vector<2x8xf32> -> vector<2x8xf32>
    %555 = vector.extract_strided_slice %274 {offsets = [0, 0, 0], sizes = [1, 1, 8], strides = [1, 1, 1]} : vector<3x1x8xf32> to vector<1x1x8xf32>
    %556 = vector.shape_cast %555 : vector<1x1x8xf32> to vector<1x8xf32>
    %557 = vector.broadcast %556 : vector<1x8xf32> to vector<2x8xf32>
    %558 = arith.addf %554, %557 : vector<2x8xf32>
    %559 = vector.extract_strided_slice %272 {offsets = [1, 0, 0], sizes = [1, 8, 8], strides = [1, 1, 1]} : vector<3x8x8xf32> to vector<1x8x8xf32>
    %560 = vector.shape_cast %559 : vector<1x8x8xf32> to vector<8x8xf32>
    %cst_172 = arith.constant dense<0.000000e+00> : vector<2x8xf32>
    %561 = tpu.matmul %550, %560, %cst_172 {dimension_numbers = #tpu.dot_dimension_numbers<[1], [0], [0], [1], [0, 0, 1, 1], [], []>} : vector<2x8xf32>, vector<8x8xf32>, vector<2x8xf32> -> vector<2x8xf32>
    %562 = vector.extract_strided_slice %274 {offsets = [1, 0, 0], sizes = [1, 1, 8], strides = [1, 1, 1]} : vector<3x1x8xf32> to vector<1x1x8xf32>
    %563 = vector.shape_cast %562 : vector<1x1x8xf32> to vector<1x8xf32>
    %564 = vector.broadcast %563 : vector<1x8xf32> to vector<2x8xf32>
    %565 = arith.addf %561, %564 : vector<2x8xf32>
    %566 = vector.extract_strided_slice %272 {offsets = [2, 0, 0], sizes = [1, 8, 8], strides = [1, 1, 1]} : vector<3x8x8xf32> to vector<1x8x8xf32>
    %567 = vector.shape_cast %566 : vector<1x8x8xf32> to vector<8x8xf32>
    %cst_173 = arith.constant dense<0.000000e+00> : vector<2x8xf32>
    %568 = tpu.matmul %550, %567, %cst_173 {dimension_numbers = #tpu.dot_dimension_numbers<[1], [0], [0], [1], [0, 0, 1, 1], [], []>} : vector<2x8xf32>, vector<8x8xf32>, vector<2x8xf32> -> vector<2x8xf32>
    %569 = vector.extract_strided_slice %274 {offsets = [2, 0, 0], sizes = [1, 1, 8], strides = [1, 1, 1]} : vector<3x1x8xf32> to vector<1x1x8xf32>
    %570 = vector.shape_cast %569 : vector<1x1x8xf32> to vector<1x8xf32>
    %571 = vector.broadcast %570 : vector<1x8xf32> to vector<2x8xf32>
    %572 = arith.addf %568, %571 : vector<2x8xf32>
    %573 = vector.extract_strided_slice %281 {offsets = [10, 0], sizes = [2, 8], strides = [1, 1]} : vector<16x8xf32> to vector<2x8xf32>
    %574 = arith.addf %573, %558 : vector<2x8xf32>
    %575 = arith.negf %574 : vector<2x8xf32>
    %576 = math.exp %575 : vector<2x8xf32>
    %cst_174 = arith.constant 1.000000e+00 : f32
    %577 = vector.broadcast %cst_174 : f32 to vector<2x8xf32>
    %578 = arith.addf %577, %576 : vector<2x8xf32>
    %579 = arith.divf %577, %578 : vector<2x8xf32>
    %580 = vector.extract_strided_slice %288 {offsets = [10, 0], sizes = [2, 8], strides = [1, 1]} : vector<16x8xf32> to vector<2x8xf32>
    %581 = arith.addf %580, %565 : vector<2x8xf32>
    %582 = arith.negf %581 : vector<2x8xf32>
    %583 = math.exp %582 : vector<2x8xf32>
    %cst_175 = arith.constant 1.000000e+00 : f32
    %584 = vector.broadcast %cst_175 : f32 to vector<2x8xf32>
    %585 = arith.addf %584, %583 : vector<2x8xf32>
    %586 = arith.divf %584, %585 : vector<2x8xf32>
    %587 = vector.extract_strided_slice %295 {offsets = [10, 0], sizes = [2, 8], strides = [1, 1]} : vector<16x8xf32> to vector<2x8xf32>
    %588 = arith.mulf %579, %572 : vector<2x8xf32>
    %589 = arith.addf %587, %588 : vector<2x8xf32>
    %590 = math.tanh %589 : vector<2x8xf32>
    %cst_176 = arith.constant 1.000000e+00 : f32
    %591 = vector.broadcast %cst_176 : f32 to vector<2x8xf32>
    %592 = arith.subf %591, %586 : vector<2x8xf32>
    %593 = arith.mulf %592, %590 : vector<2x8xf32>
    %594 = arith.mulf %586, %550 : vector<2x8xf32>
    %595 = arith.addf %593, %594 : vector<2x8xf32>
    %596 = vector.extract_strided_slice %270 {offsets = [10, 0], sizes = [2, 8], strides = [1, 1]} : vector<16x8xf32> to vector<2x8xf32>
    %597 = arith.mulf %596, %595 : vector<2x8xf32>
    %cst_177 = arith.constant 1.000000e+00 : f32
    %598 = vector.broadcast %cst_177 : f32 to vector<2x8xf32>
    %599 = arith.subf %598, %596 : vector<2x8xf32>
    %600 = arith.mulf %599, %550 : vector<2x8xf32>
    %601 = arith.addf %597, %600 : vector<2x8xf32>
    %602 = arith.mulf %596, %595 : vector<2x8xf32>
    %603 = vector.extract_strided_slice %272 {offsets = [0, 0, 0], sizes = [1, 8, 8], strides = [1, 1, 1]} : vector<3x8x8xf32> to vector<1x8x8xf32>
    %604 = vector.shape_cast %603 : vector<1x8x8xf32> to vector<8x8xf32>
    %cst_178 = arith.constant dense<0.000000e+00> : vector<2x8xf32>
    %605 = tpu.matmul %601, %604, %cst_178 {dimension_numbers = #tpu.dot_dimension_numbers<[1], [0], [0], [1], [0, 0, 1, 1], [], []>} : vector<2x8xf32>, vector<8x8xf32>, vector<2x8xf32> -> vector<2x8xf32>
    %606 = vector.extract_strided_slice %274 {offsets = [0, 0, 0], sizes = [1, 1, 8], strides = [1, 1, 1]} : vector<3x1x8xf32> to vector<1x1x8xf32>
    %607 = vector.shape_cast %606 : vector<1x1x8xf32> to vector<1x8xf32>
    %608 = vector.broadcast %607 : vector<1x8xf32> to vector<2x8xf32>
    %609 = arith.addf %605, %608 : vector<2x8xf32>
    %610 = vector.extract_strided_slice %272 {offsets = [1, 0, 0], sizes = [1, 8, 8], strides = [1, 1, 1]} : vector<3x8x8xf32> to vector<1x8x8xf32>
    %611 = vector.shape_cast %610 : vector<1x8x8xf32> to vector<8x8xf32>
    %cst_179 = arith.constant dense<0.000000e+00> : vector<2x8xf32>
    %612 = tpu.matmul %601, %611, %cst_179 {dimension_numbers = #tpu.dot_dimension_numbers<[1], [0], [0], [1], [0, 0, 1, 1], [], []>} : vector<2x8xf32>, vector<8x8xf32>, vector<2x8xf32> -> vector<2x8xf32>
    %613 = vector.extract_strided_slice %274 {offsets = [1, 0, 0], sizes = [1, 1, 8], strides = [1, 1, 1]} : vector<3x1x8xf32> to vector<1x1x8xf32>
    %614 = vector.shape_cast %613 : vector<1x1x8xf32> to vector<1x8xf32>
    %615 = vector.broadcast %614 : vector<1x8xf32> to vector<2x8xf32>
    %616 = arith.addf %612, %615 : vector<2x8xf32>
    %617 = vector.extract_strided_slice %272 {offsets = [2, 0, 0], sizes = [1, 8, 8], strides = [1, 1, 1]} : vector<3x8x8xf32> to vector<1x8x8xf32>
    %618 = vector.shape_cast %617 : vector<1x8x8xf32> to vector<8x8xf32>
    %cst_180 = arith.constant dense<0.000000e+00> : vector<2x8xf32>
    %619 = tpu.matmul %601, %618, %cst_180 {dimension_numbers = #tpu.dot_dimension_numbers<[1], [0], [0], [1], [0, 0, 1, 1], [], []>} : vector<2x8xf32>, vector<8x8xf32>, vector<2x8xf32> -> vector<2x8xf32>
    %620 = vector.extract_strided_slice %274 {offsets = [2, 0, 0], sizes = [1, 1, 8], strides = [1, 1, 1]} : vector<3x1x8xf32> to vector<1x1x8xf32>
    %621 = vector.shape_cast %620 : vector<1x1x8xf32> to vector<1x8xf32>
    %622 = vector.broadcast %621 : vector<1x8xf32> to vector<2x8xf32>
    %623 = arith.addf %619, %622 : vector<2x8xf32>
    %624 = vector.extract_strided_slice %281 {offsets = [12, 0], sizes = [2, 8], strides = [1, 1]} : vector<16x8xf32> to vector<2x8xf32>
    %625 = arith.addf %624, %609 : vector<2x8xf32>
    %626 = arith.negf %625 : vector<2x8xf32>
    %627 = math.exp %626 : vector<2x8xf32>
    %cst_181 = arith.constant 1.000000e+00 : f32
    %628 = vector.broadcast %cst_181 : f32 to vector<2x8xf32>
    %629 = arith.addf %628, %627 : vector<2x8xf32>
    %630 = arith.divf %628, %629 : vector<2x8xf32>
    %631 = vector.extract_strided_slice %288 {offsets = [12, 0], sizes = [2, 8], strides = [1, 1]} : vector<16x8xf32> to vector<2x8xf32>
    %632 = arith.addf %631, %616 : vector<2x8xf32>
    %633 = arith.negf %632 : vector<2x8xf32>
    %634 = math.exp %633 : vector<2x8xf32>
    %cst_182 = arith.constant 1.000000e+00 : f32
    %635 = vector.broadcast %cst_182 : f32 to vector<2x8xf32>
    %636 = arith.addf %635, %634 : vector<2x8xf32>
    %637 = arith.divf %635, %636 : vector<2x8xf32>
    %638 = vector.extract_strided_slice %295 {offsets = [12, 0], sizes = [2, 8], strides = [1, 1]} : vector<16x8xf32> to vector<2x8xf32>
    %639 = arith.mulf %630, %623 : vector<2x8xf32>
    %640 = arith.addf %638, %639 : vector<2x8xf32>
    %641 = math.tanh %640 : vector<2x8xf32>
    %cst_183 = arith.constant 1.000000e+00 : f32
    %642 = vector.broadcast %cst_183 : f32 to vector<2x8xf32>
    %643 = arith.subf %642, %637 : vector<2x8xf32>
    %644 = arith.mulf %643, %641 : vector<2x8xf32>
    %645 = arith.mulf %637, %601 : vector<2x8xf32>
    %646 = arith.addf %644, %645 : vector<2x8xf32>
    %647 = vector.extract_strided_slice %270 {offsets = [12, 0], sizes = [2, 8], strides = [1, 1]} : vector<16x8xf32> to vector<2x8xf32>
    %648 = arith.mulf %647, %646 : vector<2x8xf32>
    %cst_184 = arith.constant 1.000000e+00 : f32
    %649 = vector.broadcast %cst_184 : f32 to vector<2x8xf32>
    %650 = arith.subf %649, %647 : vector<2x8xf32>
    %651 = arith.mulf %650, %601 : vector<2x8xf32>
    %652 = arith.addf %648, %651 : vector<2x8xf32>
    %653 = arith.mulf %647, %646 : vector<2x8xf32>
    %654 = vector.extract_strided_slice %272 {offsets = [0, 0, 0], sizes = [1, 8, 8], strides = [1, 1, 1]} : vector<3x8x8xf32> to vector<1x8x8xf32>
    %655 = vector.shape_cast %654 : vector<1x8x8xf32> to vector<8x8xf32>
    %cst_185 = arith.constant dense<0.000000e+00> : vector<2x8xf32>
    %656 = tpu.matmul %652, %655, %cst_185 {dimension_numbers = #tpu.dot_dimension_numbers<[1], [0], [0], [1], [0, 0, 1, 1], [], []>} : vector<2x8xf32>, vector<8x8xf32>, vector<2x8xf32> -> vector<2x8xf32>
    %657 = vector.extract_strided_slice %274 {offsets = [0, 0, 0], sizes = [1, 1, 8], strides = [1, 1, 1]} : vector<3x1x8xf32> to vector<1x1x8xf32>
    %658 = vector.shape_cast %657 : vector<1x1x8xf32> to vector<1x8xf32>
    %659 = vector.broadcast %658 : vector<1x8xf32> to vector<2x8xf32>
    %660 = arith.addf %656, %659 : vector<2x8xf32>
    %661 = vector.extract_strided_slice %272 {offsets = [1, 0, 0], sizes = [1, 8, 8], strides = [1, 1, 1]} : vector<3x8x8xf32> to vector<1x8x8xf32>
    %662 = vector.shape_cast %661 : vector<1x8x8xf32> to vector<8x8xf32>
    %cst_186 = arith.constant dense<0.000000e+00> : vector<2x8xf32>
    %663 = tpu.matmul %652, %662, %cst_186 {dimension_numbers = #tpu.dot_dimension_numbers<[1], [0], [0], [1], [0, 0, 1, 1], [], []>} : vector<2x8xf32>, vector<8x8xf32>, vector<2x8xf32> -> vector<2x8xf32>
    %664 = vector.extract_strided_slice %274 {offsets = [1, 0, 0], sizes = [1, 1, 8], strides = [1, 1, 1]} : vector<3x1x8xf32> to vector<1x1x8xf32>
    %665 = vector.shape_cast %664 : vector<1x1x8xf32> to vector<1x8xf32>
    %666 = vector.broadcast %665 : vector<1x8xf32> to vector<2x8xf32>
    %667 = arith.addf %663, %666 : vector<2x8xf32>
    %668 = vector.extract_strided_slice %272 {offsets = [2, 0, 0], sizes = [1, 8, 8], strides = [1, 1, 1]} : vector<3x8x8xf32> to vector<1x8x8xf32>
    %669 = vector.shape_cast %668 : vector<1x8x8xf32> to vector<8x8xf32>
    %cst_187 = arith.constant dense<0.000000e+00> : vector<2x8xf32>
    %670 = tpu.matmul %652, %669, %cst_187 {dimension_numbers = #tpu.dot_dimension_numbers<[1], [0], [0], [1], [0, 0, 1, 1], [], []>} : vector<2x8xf32>, vector<8x8xf32>, vector<2x8xf32> -> vector<2x8xf32>
    %671 = vector.extract_strided_slice %274 {offsets = [2, 0, 0], sizes = [1, 1, 8], strides = [1, 1, 1]} : vector<3x1x8xf32> to vector<1x1x8xf32>
    %672 = vector.shape_cast %671 : vector<1x1x8xf32> to vector<1x8xf32>
    %673 = vector.broadcast %672 : vector<1x8xf32> to vector<2x8xf32>
    %674 = arith.addf %670, %673 : vector<2x8xf32>
    %675 = vector.extract_strided_slice %281 {offsets = [14, 0], sizes = [2, 8], strides = [1, 1]} : vector<16x8xf32> to vector<2x8xf32>
    %676 = arith.addf %675, %660 : vector<2x8xf32>
    %677 = arith.negf %676 : vector<2x8xf32>
    %678 = math.exp %677 : vector<2x8xf32>
    %cst_188 = arith.constant 1.000000e+00 : f32
    %679 = vector.broadcast %cst_188 : f32 to vector<2x8xf32>
    %680 = arith.addf %679, %678 : vector<2x8xf32>
    %681 = arith.divf %679, %680 : vector<2x8xf32>
    %682 = vector.extract_strided_slice %288 {offsets = [14, 0], sizes = [2, 8], strides = [1, 1]} : vector<16x8xf32> to vector<2x8xf32>
    %683 = arith.addf %682, %667 : vector<2x8xf32>
    %684 = arith.negf %683 : vector<2x8xf32>
    %685 = math.exp %684 : vector<2x8xf32>
    %cst_189 = arith.constant 1.000000e+00 : f32
    %686 = vector.broadcast %cst_189 : f32 to vector<2x8xf32>
    %687 = arith.addf %686, %685 : vector<2x8xf32>
    %688 = arith.divf %686, %687 : vector<2x8xf32>
    %689 = vector.extract_strided_slice %295 {offsets = [14, 0], sizes = [2, 8], strides = [1, 1]} : vector<16x8xf32> to vector<2x8xf32>
    %690 = arith.mulf %681, %674 : vector<2x8xf32>
    %691 = arith.addf %689, %690 : vector<2x8xf32>
    %692 = math.tanh %691 : vector<2x8xf32>
    %cst_190 = arith.constant 1.000000e+00 : f32
    %693 = vector.broadcast %cst_190 : f32 to vector<2x8xf32>
    %694 = arith.subf %693, %688 : vector<2x8xf32>
    %695 = arith.mulf %694, %692 : vector<2x8xf32>
    %696 = arith.mulf %688, %652 : vector<2x8xf32>
    %697 = arith.addf %695, %696 : vector<2x8xf32>
    %698 = vector.extract_strided_slice %270 {offsets = [14, 0], sizes = [2, 8], strides = [1, 1]} : vector<16x8xf32> to vector<2x8xf32>
    %699 = arith.mulf %698, %697 : vector<2x8xf32>
    %c0_191 = arith.constant 0 : index
    %c0_192 = arith.constant 0 : index
    %c0_193 = arith.constant 0 : index
    %700 = vector.load %arg15[%c0_191, %c0_192, %c0_193] : memref<3x24x8xf32, #tpu.memory_space<vmem>>, vector<3x24x8xf32>
    %c0_194 = arith.constant 0 : index
    %c0_195 = arith.constant 0 : index
    %c0_196 = arith.constant 0 : index
    %701 = vector.load %arg16[%c0_194, %c0_195, %c0_196] : memref<3x8x8xf32, #tpu.memory_space<vmem>>, vector<3x8x8xf32>
    %c0_197 = arith.constant 0 : index
    %c0_198 = arith.constant 0 : index
    %c0_199 = arith.constant 0 : index
    %702 = vector.load %arg17[%c0_197, %c0_198, %c0_199] : memref<3x1x8xf32, #tpu.memory_space<vmem>>, vector<3x1x8xf32>
    %c0_200 = arith.constant 0 : index
    %c0_201 = arith.constant 0 : index
    %c0_202 = arith.constant 0 : index
    %703 = vector.load %arg18[%c0_200, %c0_201, %c0_202] : memref<3x1x8xf32, #tpu.memory_space<vmem>>, vector<3x1x8xf32>
    %704 = vector.extract_strided_slice %700 {offsets = [0, 0, 0], sizes = [1, 24, 8], strides = [1, 1, 1]} : vector<3x24x8xf32> to vector<1x24x8xf32>
    %705 = vector.shape_cast %704 : vector<1x24x8xf32> to vector<24x8xf32>
    %cst_203 = arith.constant dense<0.000000e+00> : vector<16x8xf32>
    %706 = tpu.matmul %269, %705, %cst_203 {dimension_numbers = #tpu.dot_dimension_numbers<[1], [0], [0], [1], [0, 0, 1, 1], [], []>} : vector<16x24xf32>, vector<24x8xf32>, vector<16x8xf32> -> vector<16x8xf32>
    %707 = vector.extract_strided_slice %702 {offsets = [0, 0, 0], sizes = [1, 1, 8], strides = [1, 1, 1]} : vector<3x1x8xf32> to vector<1x1x8xf32>
    %708 = vector.shape_cast %707 : vector<1x1x8xf32> to vector<1x8xf32>
    %709 = vector.broadcast %708 : vector<1x8xf32> to vector<16x8xf32>
    %710 = arith.addf %706, %709 : vector<16x8xf32>
    %711 = vector.extract_strided_slice %700 {offsets = [1, 0, 0], sizes = [1, 24, 8], strides = [1, 1, 1]} : vector<3x24x8xf32> to vector<1x24x8xf32>
    %712 = vector.shape_cast %711 : vector<1x24x8xf32> to vector<24x8xf32>
    %cst_204 = arith.constant dense<0.000000e+00> : vector<16x8xf32>
    %713 = tpu.matmul %269, %712, %cst_204 {dimension_numbers = #tpu.dot_dimension_numbers<[1], [0], [0], [1], [0, 0, 1, 1], [], []>} : vector<16x24xf32>, vector<24x8xf32>, vector<16x8xf32> -> vector<16x8xf32>
    %714 = vector.extract_strided_slice %702 {offsets = [1, 0, 0], sizes = [1, 1, 8], strides = [1, 1, 1]} : vector<3x1x8xf32> to vector<1x1x8xf32>
    %715 = vector.shape_cast %714 : vector<1x1x8xf32> to vector<1x8xf32>
    %716 = vector.broadcast %715 : vector<1x8xf32> to vector<16x8xf32>
    %717 = arith.addf %713, %716 : vector<16x8xf32>
    %718 = vector.extract_strided_slice %700 {offsets = [2, 0, 0], sizes = [1, 24, 8], strides = [1, 1, 1]} : vector<3x24x8xf32> to vector<1x24x8xf32>
    %719 = vector.shape_cast %718 : vector<1x24x8xf32> to vector<24x8xf32>
    %cst_205 = arith.constant dense<0.000000e+00> : vector<16x8xf32>
    %720 = tpu.matmul %269, %719, %cst_205 {dimension_numbers = #tpu.dot_dimension_numbers<[1], [0], [0], [1], [0, 0, 1, 1], [], []>} : vector<16x24xf32>, vector<24x8xf32>, vector<16x8xf32> -> vector<16x8xf32>
    %721 = vector.extract_strided_slice %702 {offsets = [2, 0, 0], sizes = [1, 1, 8], strides = [1, 1, 1]} : vector<3x1x8xf32> to vector<1x1x8xf32>
    %722 = vector.shape_cast %721 : vector<1x1x8xf32> to vector<1x8xf32>
    %723 = vector.broadcast %722 : vector<1x8xf32> to vector<16x8xf32>
    %724 = arith.addf %720, %723 : vector<16x8xf32>
    %cst_206 = arith.constant 0.000000e+00 : f32
    %725 = vector.broadcast %cst_206 : f32 to vector<2x8xf32>
    %726 = vector.extract_strided_slice %701 {offsets = [0, 0, 0], sizes = [1, 8, 8], strides = [1, 1, 1]} : vector<3x8x8xf32> to vector<1x8x8xf32>
    %727 = vector.shape_cast %726 : vector<1x8x8xf32> to vector<8x8xf32>
    %cst_207 = arith.constant dense<0.000000e+00> : vector<2x8xf32>
    %728 = tpu.matmul %725, %727, %cst_207 {dimension_numbers = #tpu.dot_dimension_numbers<[1], [0], [0], [1], [0, 0, 1, 1], [], []>} : vector<2x8xf32>, vector<8x8xf32>, vector<2x8xf32> -> vector<2x8xf32>
    %729 = vector.extract_strided_slice %703 {offsets = [0, 0, 0], sizes = [1, 1, 8], strides = [1, 1, 1]} : vector<3x1x8xf32> to vector<1x1x8xf32>
    %730 = vector.shape_cast %729 : vector<1x1x8xf32> to vector<1x8xf32>
    %731 = vector.broadcast %730 : vector<1x8xf32> to vector<2x8xf32>
    %732 = arith.addf %728, %731 : vector<2x8xf32>
    %733 = vector.extract_strided_slice %701 {offsets = [1, 0, 0], sizes = [1, 8, 8], strides = [1, 1, 1]} : vector<3x8x8xf32> to vector<1x8x8xf32>
    %734 = vector.shape_cast %733 : vector<1x8x8xf32> to vector<8x8xf32>
    %cst_208 = arith.constant dense<0.000000e+00> : vector<2x8xf32>
    %735 = tpu.matmul %725, %734, %cst_208 {dimension_numbers = #tpu.dot_dimension_numbers<[1], [0], [0], [1], [0, 0, 1, 1], [], []>} : vector<2x8xf32>, vector<8x8xf32>, vector<2x8xf32> -> vector<2x8xf32>
    %736 = vector.extract_strided_slice %703 {offsets = [1, 0, 0], sizes = [1, 1, 8], strides = [1, 1, 1]} : vector<3x1x8xf32> to vector<1x1x8xf32>
    %737 = vector.shape_cast %736 : vector<1x1x8xf32> to vector<1x8xf32>
    %738 = vector.broadcast %737 : vector<1x8xf32> to vector<2x8xf32>
    %739 = arith.addf %735, %738 : vector<2x8xf32>
    %740 = vector.extract_strided_slice %701 {offsets = [2, 0, 0], sizes = [1, 8, 8], strides = [1, 1, 1]} : vector<3x8x8xf32> to vector<1x8x8xf32>
    %741 = vector.shape_cast %740 : vector<1x8x8xf32> to vector<8x8xf32>
    %cst_209 = arith.constant dense<0.000000e+00> : vector<2x8xf32>
    %742 = tpu.matmul %725, %741, %cst_209 {dimension_numbers = #tpu.dot_dimension_numbers<[1], [0], [0], [1], [0, 0, 1, 1], [], []>} : vector<2x8xf32>, vector<8x8xf32>, vector<2x8xf32> -> vector<2x8xf32>
    %743 = vector.extract_strided_slice %703 {offsets = [2, 0, 0], sizes = [1, 1, 8], strides = [1, 1, 1]} : vector<3x1x8xf32> to vector<1x1x8xf32>
    %744 = vector.shape_cast %743 : vector<1x1x8xf32> to vector<1x8xf32>
    %745 = vector.broadcast %744 : vector<1x8xf32> to vector<2x8xf32>
    %746 = arith.addf %742, %745 : vector<2x8xf32>
    %747 = vector.extract_strided_slice %710 {offsets = [14, 0], sizes = [2, 8], strides = [1, 1]} : vector<16x8xf32> to vector<2x8xf32>
    %748 = arith.addf %747, %732 : vector<2x8xf32>
    %749 = arith.negf %748 : vector<2x8xf32>
    %750 = math.exp %749 : vector<2x8xf32>
    %cst_210 = arith.constant 1.000000e+00 : f32
    %751 = vector.broadcast %cst_210 : f32 to vector<2x8xf32>
    %752 = arith.addf %751, %750 : vector<2x8xf32>
    %753 = arith.divf %751, %752 : vector<2x8xf32>
    %754 = vector.extract_strided_slice %717 {offsets = [14, 0], sizes = [2, 8], strides = [1, 1]} : vector<16x8xf32> to vector<2x8xf32>
    %755 = arith.addf %754, %739 : vector<2x8xf32>
    %756 = arith.negf %755 : vector<2x8xf32>
    %757 = math.exp %756 : vector<2x8xf32>
    %cst_211 = arith.constant 1.000000e+00 : f32
    %758 = vector.broadcast %cst_211 : f32 to vector<2x8xf32>
    %759 = arith.addf %758, %757 : vector<2x8xf32>
    %760 = arith.divf %758, %759 : vector<2x8xf32>
    %761 = vector.extract_strided_slice %724 {offsets = [14, 0], sizes = [2, 8], strides = [1, 1]} : vector<16x8xf32> to vector<2x8xf32>
    %762 = arith.mulf %753, %746 : vector<2x8xf32>
    %763 = arith.addf %761, %762 : vector<2x8xf32>
    %764 = math.tanh %763 : vector<2x8xf32>
    %cst_212 = arith.constant 1.000000e+00 : f32
    %765 = vector.broadcast %cst_212 : f32 to vector<2x8xf32>
    %766 = arith.subf %765, %760 : vector<2x8xf32>
    %767 = arith.mulf %766, %764 : vector<2x8xf32>
    %768 = arith.mulf %760, %725 : vector<2x8xf32>
    %769 = arith.addf %767, %768 : vector<2x8xf32>
    %770 = vector.extract_strided_slice %270 {offsets = [14, 0], sizes = [2, 8], strides = [1, 1]} : vector<16x8xf32> to vector<2x8xf32>
    %771 = arith.mulf %770, %769 : vector<2x8xf32>
    %cst_213 = arith.constant 1.000000e+00 : f32
    %772 = vector.broadcast %cst_213 : f32 to vector<2x8xf32>
    %773 = arith.subf %772, %770 : vector<2x8xf32>
    %774 = arith.mulf %773, %725 : vector<2x8xf32>
    %775 = arith.addf %771, %774 : vector<2x8xf32>
    %776 = arith.mulf %770, %769 : vector<2x8xf32>
    %777 = vector.extract_strided_slice %701 {offsets = [0, 0, 0], sizes = [1, 8, 8], strides = [1, 1, 1]} : vector<3x8x8xf32> to vector<1x8x8xf32>
    %778 = vector.shape_cast %777 : vector<1x8x8xf32> to vector<8x8xf32>
    %cst_214 = arith.constant dense<0.000000e+00> : vector<2x8xf32>
    %779 = tpu.matmul %775, %778, %cst_214 {dimension_numbers = #tpu.dot_dimension_numbers<[1], [0], [0], [1], [0, 0, 1, 1], [], []>} : vector<2x8xf32>, vector<8x8xf32>, vector<2x8xf32> -> vector<2x8xf32>
    %780 = vector.extract_strided_slice %703 {offsets = [0, 0, 0], sizes = [1, 1, 8], strides = [1, 1, 1]} : vector<3x1x8xf32> to vector<1x1x8xf32>
    %781 = vector.shape_cast %780 : vector<1x1x8xf32> to vector<1x8xf32>
    %782 = vector.broadcast %781 : vector<1x8xf32> to vector<2x8xf32>
    %783 = arith.addf %779, %782 : vector<2x8xf32>
    %784 = vector.extract_strided_slice %701 {offsets = [1, 0, 0], sizes = [1, 8, 8], strides = [1, 1, 1]} : vector<3x8x8xf32> to vector<1x8x8xf32>
    %785 = vector.shape_cast %784 : vector<1x8x8xf32> to vector<8x8xf32>
    %cst_215 = arith.constant dense<0.000000e+00> : vector<2x8xf32>
    %786 = tpu.matmul %775, %785, %cst_215 {dimension_numbers = #tpu.dot_dimension_numbers<[1], [0], [0], [1], [0, 0, 1, 1], [], []>} : vector<2x8xf32>, vector<8x8xf32>, vector<2x8xf32> -> vector<2x8xf32>
    %787 = vector.extract_strided_slice %703 {offsets = [1, 0, 0], sizes = [1, 1, 8], strides = [1, 1, 1]} : vector<3x1x8xf32> to vector<1x1x8xf32>
    %788 = vector.shape_cast %787 : vector<1x1x8xf32> to vector<1x8xf32>
    %789 = vector.broadcast %788 : vector<1x8xf32> to vector<2x8xf32>
    %790 = arith.addf %786, %789 : vector<2x8xf32>
    %791 = vector.extract_strided_slice %701 {offsets = [2, 0, 0], sizes = [1, 8, 8], strides = [1, 1, 1]} : vector<3x8x8xf32> to vector<1x8x8xf32>
    %792 = vector.shape_cast %791 : vector<1x8x8xf32> to vector<8x8xf32>
    %cst_216 = arith.constant dense<0.000000e+00> : vector<2x8xf32>
    %793 = tpu.matmul %775, %792, %cst_216 {dimension_numbers = #tpu.dot_dimension_numbers<[1], [0], [0], [1], [0, 0, 1, 1], [], []>} : vector<2x8xf32>, vector<8x8xf32>, vector<2x8xf32> -> vector<2x8xf32>
    %794 = vector.extract_strided_slice %703 {offsets = [2, 0, 0], sizes = [1, 1, 8], strides = [1, 1, 1]} : vector<3x1x8xf32> to vector<1x1x8xf32>
    %795 = vector.shape_cast %794 : vector<1x1x8xf32> to vector<1x8xf32>
    %796 = vector.broadcast %795 : vector<1x8xf32> to vector<2x8xf32>
    %797 = arith.addf %793, %796 : vector<2x8xf32>
    %798 = vector.extract_strided_slice %710 {offsets = [12, 0], sizes = [2, 8], strides = [1, 1]} : vector<16x8xf32> to vector<2x8xf32>
    %799 = arith.addf %798, %783 : vector<2x8xf32>
    %800 = arith.negf %799 : vector<2x8xf32>
    %801 = math.exp %800 : vector<2x8xf32>
    %cst_217 = arith.constant 1.000000e+00 : f32
    %802 = vector.broadcast %cst_217 : f32 to vector<2x8xf32>
    %803 = arith.addf %802, %801 : vector<2x8xf32>
    %804 = arith.divf %802, %803 : vector<2x8xf32>
    %805 = vector.extract_strided_slice %717 {offsets = [12, 0], sizes = [2, 8], strides = [1, 1]} : vector<16x8xf32> to vector<2x8xf32>
    %806 = arith.addf %805, %790 : vector<2x8xf32>
    %807 = arith.negf %806 : vector<2x8xf32>
    %808 = math.exp %807 : vector<2x8xf32>
    %cst_218 = arith.constant 1.000000e+00 : f32
    %809 = vector.broadcast %cst_218 : f32 to vector<2x8xf32>
    %810 = arith.addf %809, %808 : vector<2x8xf32>
    %811 = arith.divf %809, %810 : vector<2x8xf32>
    %812 = vector.extract_strided_slice %724 {offsets = [12, 0], sizes = [2, 8], strides = [1, 1]} : vector<16x8xf32> to vector<2x8xf32>
    %813 = arith.mulf %804, %797 : vector<2x8xf32>
    %814 = arith.addf %812, %813 : vector<2x8xf32>
    %815 = math.tanh %814 : vector<2x8xf32>
    %cst_219 = arith.constant 1.000000e+00 : f32
    %816 = vector.broadcast %cst_219 : f32 to vector<2x8xf32>
    %817 = arith.subf %816, %811 : vector<2x8xf32>
    %818 = arith.mulf %817, %815 : vector<2x8xf32>
    %819 = arith.mulf %811, %775 : vector<2x8xf32>
    %820 = arith.addf %818, %819 : vector<2x8xf32>
    %821 = vector.extract_strided_slice %270 {offsets = [12, 0], sizes = [2, 8], strides = [1, 1]} : vector<16x8xf32> to vector<2x8xf32>
    %822 = arith.mulf %821, %820 : vector<2x8xf32>
    %cst_220 = arith.constant 1.000000e+00 : f32
    %823 = vector.broadcast %cst_220 : f32 to vector<2x8xf32>
    %824 = arith.subf %823, %821 : vector<2x8xf32>
    %825 = arith.mulf %824, %775 : vector<2x8xf32>
    %826 = arith.addf %822, %825 : vector<2x8xf32>
    %827 = arith.mulf %821, %820 : vector<2x8xf32>
    %828 = vector.extract_strided_slice %701 {offsets = [0, 0, 0], sizes = [1, 8, 8], strides = [1, 1, 1]} : vector<3x8x8xf32> to vector<1x8x8xf32>
    %829 = vector.shape_cast %828 : vector<1x8x8xf32> to vector<8x8xf32>
    %cst_221 = arith.constant dense<0.000000e+00> : vector<2x8xf32>
    %830 = tpu.matmul %826, %829, %cst_221 {dimension_numbers = #tpu.dot_dimension_numbers<[1], [0], [0], [1], [0, 0, 1, 1], [], []>} : vector<2x8xf32>, vector<8x8xf32>, vector<2x8xf32> -> vector<2x8xf32>
    %831 = vector.extract_strided_slice %703 {offsets = [0, 0, 0], sizes = [1, 1, 8], strides = [1, 1, 1]} : vector<3x1x8xf32> to vector<1x1x8xf32>
    %832 = vector.shape_cast %831 : vector<1x1x8xf32> to vector<1x8xf32>
    %833 = vector.broadcast %832 : vector<1x8xf32> to vector<2x8xf32>
    %834 = arith.addf %830, %833 : vector<2x8xf32>
    %835 = vector.extract_strided_slice %701 {offsets = [1, 0, 0], sizes = [1, 8, 8], strides = [1, 1, 1]} : vector<3x8x8xf32> to vector<1x8x8xf32>
    %836 = vector.shape_cast %835 : vector<1x8x8xf32> to vector<8x8xf32>
    %cst_222 = arith.constant dense<0.000000e+00> : vector<2x8xf32>
    %837 = tpu.matmul %826, %836, %cst_222 {dimension_numbers = #tpu.dot_dimension_numbers<[1], [0], [0], [1], [0, 0, 1, 1], [], []>} : vector<2x8xf32>, vector<8x8xf32>, vector<2x8xf32> -> vector<2x8xf32>
    %838 = vector.extract_strided_slice %703 {offsets = [1, 0, 0], sizes = [1, 1, 8], strides = [1, 1, 1]} : vector<3x1x8xf32> to vector<1x1x8xf32>
    %839 = vector.shape_cast %838 : vector<1x1x8xf32> to vector<1x8xf32>
    %840 = vector.broadcast %839 : vector<1x8xf32> to vector<2x8xf32>
    %841 = arith.addf %837, %840 : vector<2x8xf32>
    %842 = vector.extract_strided_slice %701 {offsets = [2, 0, 0], sizes = [1, 8, 8], strides = [1, 1, 1]} : vector<3x8x8xf32> to vector<1x8x8xf32>
    %843 = vector.shape_cast %842 : vector<1x8x8xf32> to vector<8x8xf32>
    %cst_223 = arith.constant dense<0.000000e+00> : vector<2x8xf32>
    %844 = tpu.matmul %826, %843, %cst_223 {dimension_numbers = #tpu.dot_dimension_numbers<[1], [0], [0], [1], [0, 0, 1, 1], [], []>} : vector<2x8xf32>, vector<8x8xf32>, vector<2x8xf32> -> vector<2x8xf32>
    %845 = vector.extract_strided_slice %703 {offsets = [2, 0, 0], sizes = [1, 1, 8], strides = [1, 1, 1]} : vector<3x1x8xf32> to vector<1x1x8xf32>
    %846 = vector.shape_cast %845 : vector<1x1x8xf32> to vector<1x8xf32>
    %847 = vector.broadcast %846 : vector<1x8xf32> to vector<2x8xf32>
    %848 = arith.addf %844, %847 : vector<2x8xf32>
    %849 = vector.extract_strided_slice %710 {offsets = [10, 0], sizes = [2, 8], strides = [1, 1]} : vector<16x8xf32> to vector<2x8xf32>
    %850 = arith.addf %849, %834 : vector<2x8xf32>
    %851 = arith.negf %850 : vector<2x8xf32>
    %852 = math.exp %851 : vector<2x8xf32>
    %cst_224 = arith.constant 1.000000e+00 : f32
    %853 = vector.broadcast %cst_224 : f32 to vector<2x8xf32>
    %854 = arith.addf %853, %852 : vector<2x8xf32>
    %855 = arith.divf %853, %854 : vector<2x8xf32>
    %856 = vector.extract_strided_slice %717 {offsets = [10, 0], sizes = [2, 8], strides = [1, 1]} : vector<16x8xf32> to vector<2x8xf32>
    %857 = arith.addf %856, %841 : vector<2x8xf32>
    %858 = arith.negf %857 : vector<2x8xf32>
    %859 = math.exp %858 : vector<2x8xf32>
    %cst_225 = arith.constant 1.000000e+00 : f32
    %860 = vector.broadcast %cst_225 : f32 to vector<2x8xf32>
    %861 = arith.addf %860, %859 : vector<2x8xf32>
    %862 = arith.divf %860, %861 : vector<2x8xf32>
    %863 = vector.extract_strided_slice %724 {offsets = [10, 0], sizes = [2, 8], strides = [1, 1]} : vector<16x8xf32> to vector<2x8xf32>
    %864 = arith.mulf %855, %848 : vector<2x8xf32>
    %865 = arith.addf %863, %864 : vector<2x8xf32>
    %866 = math.tanh %865 : vector<2x8xf32>
    %cst_226 = arith.constant 1.000000e+00 : f32
    %867 = vector.broadcast %cst_226 : f32 to vector<2x8xf32>
    %868 = arith.subf %867, %862 : vector<2x8xf32>
    %869 = arith.mulf %868, %866 : vector<2x8xf32>
    %870 = arith.mulf %862, %826 : vector<2x8xf32>
    %871 = arith.addf %869, %870 : vector<2x8xf32>
    %872 = vector.extract_strided_slice %270 {offsets = [10, 0], sizes = [2, 8], strides = [1, 1]} : vector<16x8xf32> to vector<2x8xf32>
    %873 = arith.mulf %872, %871 : vector<2x8xf32>
    %cst_227 = arith.constant 1.000000e+00 : f32
    %874 = vector.broadcast %cst_227 : f32 to vector<2x8xf32>
    %875 = arith.subf %874, %872 : vector<2x8xf32>
    %876 = arith.mulf %875, %826 : vector<2x8xf32>
    %877 = arith.addf %873, %876 : vector<2x8xf32>
    %878 = arith.mulf %872, %871 : vector<2x8xf32>
    %879 = vector.extract_strided_slice %701 {offsets = [0, 0, 0], sizes = [1, 8, 8], strides = [1, 1, 1]} : vector<3x8x8xf32> to vector<1x8x8xf32>
    %880 = vector.shape_cast %879 : vector<1x8x8xf32> to vector<8x8xf32>
    %cst_228 = arith.constant dense<0.000000e+00> : vector<2x8xf32>
    %881 = tpu.matmul %877, %880, %cst_228 {dimension_numbers = #tpu.dot_dimension_numbers<[1], [0], [0], [1], [0, 0, 1, 1], [], []>} : vector<2x8xf32>, vector<8x8xf32>, vector<2x8xf32> -> vector<2x8xf32>
    %882 = vector.extract_strided_slice %703 {offsets = [0, 0, 0], sizes = [1, 1, 8], strides = [1, 1, 1]} : vector<3x1x8xf32> to vector<1x1x8xf32>
    %883 = vector.shape_cast %882 : vector<1x1x8xf32> to vector<1x8xf32>
    %884 = vector.broadcast %883 : vector<1x8xf32> to vector<2x8xf32>
    %885 = arith.addf %881, %884 : vector<2x8xf32>
    %886 = vector.extract_strided_slice %701 {offsets = [1, 0, 0], sizes = [1, 8, 8], strides = [1, 1, 1]} : vector<3x8x8xf32> to vector<1x8x8xf32>
    %887 = vector.shape_cast %886 : vector<1x8x8xf32> to vector<8x8xf32>
    %cst_229 = arith.constant dense<0.000000e+00> : vector<2x8xf32>
    %888 = tpu.matmul %877, %887, %cst_229 {dimension_numbers = #tpu.dot_dimension_numbers<[1], [0], [0], [1], [0, 0, 1, 1], [], []>} : vector<2x8xf32>, vector<8x8xf32>, vector<2x8xf32> -> vector<2x8xf32>
    %889 = vector.extract_strided_slice %703 {offsets = [1, 0, 0], sizes = [1, 1, 8], strides = [1, 1, 1]} : vector<3x1x8xf32> to vector<1x1x8xf32>
    %890 = vector.shape_cast %889 : vector<1x1x8xf32> to vector<1x8xf32>
    %891 = vector.broadcast %890 : vector<1x8xf32> to vector<2x8xf32>
    %892 = arith.addf %888, %891 : vector<2x8xf32>
    %893 = vector.extract_strided_slice %701 {offsets = [2, 0, 0], sizes = [1, 8, 8], strides = [1, 1, 1]} : vector<3x8x8xf32> to vector<1x8x8xf32>
    %894 = vector.shape_cast %893 : vector<1x8x8xf32> to vector<8x8xf32>
    %cst_230 = arith.constant dense<0.000000e+00> : vector<2x8xf32>
    %895 = tpu.matmul %877, %894, %cst_230 {dimension_numbers = #tpu.dot_dimension_numbers<[1], [0], [0], [1], [0, 0, 1, 1], [], []>} : vector<2x8xf32>, vector<8x8xf32>, vector<2x8xf32> -> vector<2x8xf32>
    %896 = vector.extract_strided_slice %703 {offsets = [2, 0, 0], sizes = [1, 1, 8], strides = [1, 1, 1]} : vector<3x1x8xf32> to vector<1x1x8xf32>
    %897 = vector.shape_cast %896 : vector<1x1x8xf32> to vector<1x8xf32>
    %898 = vector.broadcast %897 : vector<1x8xf32> to vector<2x8xf32>
    %899 = arith.addf %895, %898 : vector<2x8xf32>
    %900 = vector.extract_strided_slice %710 {offsets = [8, 0], sizes = [2, 8], strides = [1, 1]} : vector<16x8xf32> to vector<2x8xf32>
    %901 = arith.addf %900, %885 : vector<2x8xf32>
    %902 = arith.negf %901 : vector<2x8xf32>
    %903 = math.exp %902 : vector<2x8xf32>
    %cst_231 = arith.constant 1.000000e+00 : f32
    %904 = vector.broadcast %cst_231 : f32 to vector<2x8xf32>
    %905 = arith.addf %904, %903 : vector<2x8xf32>
    %906 = arith.divf %904, %905 : vector<2x8xf32>
    %907 = vector.extract_strided_slice %717 {offsets = [8, 0], sizes = [2, 8], strides = [1, 1]} : vector<16x8xf32> to vector<2x8xf32>
    %908 = arith.addf %907, %892 : vector<2x8xf32>
    %909 = arith.negf %908 : vector<2x8xf32>
    %910 = math.exp %909 : vector<2x8xf32>
    %cst_232 = arith.constant 1.000000e+00 : f32
    %911 = vector.broadcast %cst_232 : f32 to vector<2x8xf32>
    %912 = arith.addf %911, %910 : vector<2x8xf32>
    %913 = arith.divf %911, %912 : vector<2x8xf32>
    %914 = vector.extract_strided_slice %724 {offsets = [8, 0], sizes = [2, 8], strides = [1, 1]} : vector<16x8xf32> to vector<2x8xf32>
    %915 = arith.mulf %906, %899 : vector<2x8xf32>
    %916 = arith.addf %914, %915 : vector<2x8xf32>
    %917 = math.tanh %916 : vector<2x8xf32>
    %cst_233 = arith.constant 1.000000e+00 : f32
    %918 = vector.broadcast %cst_233 : f32 to vector<2x8xf32>
    %919 = arith.subf %918, %913 : vector<2x8xf32>
    %920 = arith.mulf %919, %917 : vector<2x8xf32>
    %921 = arith.mulf %913, %877 : vector<2x8xf32>
    %922 = arith.addf %920, %921 : vector<2x8xf32>
    %923 = vector.extract_strided_slice %270 {offsets = [8, 0], sizes = [2, 8], strides = [1, 1]} : vector<16x8xf32> to vector<2x8xf32>
    %924 = arith.mulf %923, %922 : vector<2x8xf32>
    %cst_234 = arith.constant 1.000000e+00 : f32
    %925 = vector.broadcast %cst_234 : f32 to vector<2x8xf32>
    %926 = arith.subf %925, %923 : vector<2x8xf32>
    %927 = arith.mulf %926, %877 : vector<2x8xf32>
    %928 = arith.addf %924, %927 : vector<2x8xf32>
    %929 = arith.mulf %923, %922 : vector<2x8xf32>
    %930 = vector.extract_strided_slice %701 {offsets = [0, 0, 0], sizes = [1, 8, 8], strides = [1, 1, 1]} : vector<3x8x8xf32> to vector<1x8x8xf32>
    %931 = vector.shape_cast %930 : vector<1x8x8xf32> to vector<8x8xf32>
    %cst_235 = arith.constant dense<0.000000e+00> : vector<2x8xf32>
    %932 = tpu.matmul %928, %931, %cst_235 {dimension_numbers = #tpu.dot_dimension_numbers<[1], [0], [0], [1], [0, 0, 1, 1], [], []>} : vector<2x8xf32>, vector<8x8xf32>, vector<2x8xf32> -> vector<2x8xf32>
    %933 = vector.extract_strided_slice %703 {offsets = [0, 0, 0], sizes = [1, 1, 8], strides = [1, 1, 1]} : vector<3x1x8xf32> to vector<1x1x8xf32>
    %934 = vector.shape_cast %933 : vector<1x1x8xf32> to vector<1x8xf32>
    %935 = vector.broadcast %934 : vector<1x8xf32> to vector<2x8xf32>
    %936 = arith.addf %932, %935 : vector<2x8xf32>
    %937 = vector.extract_strided_slice %701 {offsets = [1, 0, 0], sizes = [1, 8, 8], strides = [1, 1, 1]} : vector<3x8x8xf32> to vector<1x8x8xf32>
    %938 = vector.shape_cast %937 : vector<1x8x8xf32> to vector<8x8xf32>
    %cst_236 = arith.constant dense<0.000000e+00> : vector<2x8xf32>
    %939 = tpu.matmul %928, %938, %cst_236 {dimension_numbers = #tpu.dot_dimension_numbers<[1], [0], [0], [1], [0, 0, 1, 1], [], []>} : vector<2x8xf32>, vector<8x8xf32>, vector<2x8xf32> -> vector<2x8xf32>
    %940 = vector.extract_strided_slice %703 {offsets = [1, 0, 0], sizes = [1, 1, 8], strides = [1, 1, 1]} : vector<3x1x8xf32> to vector<1x1x8xf32>
    %941 = vector.shape_cast %940 : vector<1x1x8xf32> to vector<1x8xf32>
    %942 = vector.broadcast %941 : vector<1x8xf32> to vector<2x8xf32>
    %943 = arith.addf %939, %942 : vector<2x8xf32>
    %944 = vector.extract_strided_slice %701 {offsets = [2, 0, 0], sizes = [1, 8, 8], strides = [1, 1, 1]} : vector<3x8x8xf32> to vector<1x8x8xf32>
    %945 = vector.shape_cast %944 : vector<1x8x8xf32> to vector<8x8xf32>
    %cst_237 = arith.constant dense<0.000000e+00> : vector<2x8xf32>
    %946 = tpu.matmul %928, %945, %cst_237 {dimension_numbers = #tpu.dot_dimension_numbers<[1], [0], [0], [1], [0, 0, 1, 1], [], []>} : vector<2x8xf32>, vector<8x8xf32>, vector<2x8xf32> -> vector<2x8xf32>
    %947 = vector.extract_strided_slice %703 {offsets = [2, 0, 0], sizes = [1, 1, 8], strides = [1, 1, 1]} : vector<3x1x8xf32> to vector<1x1x8xf32>
    %948 = vector.shape_cast %947 : vector<1x1x8xf32> to vector<1x8xf32>
    %949 = vector.broadcast %948 : vector<1x8xf32> to vector<2x8xf32>
    %950 = arith.addf %946, %949 : vector<2x8xf32>
    %951 = vector.extract_strided_slice %710 {offsets = [6, 0], sizes = [2, 8], strides = [1, 1]} : vector<16x8xf32> to vector<2x8xf32>
    %952 = arith.addf %951, %936 : vector<2x8xf32>
    %953 = arith.negf %952 : vector<2x8xf32>
    %954 = math.exp %953 : vector<2x8xf32>
    %cst_238 = arith.constant 1.000000e+00 : f32
    %955 = vector.broadcast %cst_238 : f32 to vector<2x8xf32>
    %956 = arith.addf %955, %954 : vector<2x8xf32>
    %957 = arith.divf %955, %956 : vector<2x8xf32>
    %958 = vector.extract_strided_slice %717 {offsets = [6, 0], sizes = [2, 8], strides = [1, 1]} : vector<16x8xf32> to vector<2x8xf32>
    %959 = arith.addf %958, %943 : vector<2x8xf32>
    %960 = arith.negf %959 : vector<2x8xf32>
    %961 = math.exp %960 : vector<2x8xf32>
    %cst_239 = arith.constant 1.000000e+00 : f32
    %962 = vector.broadcast %cst_239 : f32 to vector<2x8xf32>
    %963 = arith.addf %962, %961 : vector<2x8xf32>
    %964 = arith.divf %962, %963 : vector<2x8xf32>
    %965 = vector.extract_strided_slice %724 {offsets = [6, 0], sizes = [2, 8], strides = [1, 1]} : vector<16x8xf32> to vector<2x8xf32>
    %966 = arith.mulf %957, %950 : vector<2x8xf32>
    %967 = arith.addf %965, %966 : vector<2x8xf32>
    %968 = math.tanh %967 : vector<2x8xf32>
    %cst_240 = arith.constant 1.000000e+00 : f32
    %969 = vector.broadcast %cst_240 : f32 to vector<2x8xf32>
    %970 = arith.subf %969, %964 : vector<2x8xf32>
    %971 = arith.mulf %970, %968 : vector<2x8xf32>
    %972 = arith.mulf %964, %928 : vector<2x8xf32>
    %973 = arith.addf %971, %972 : vector<2x8xf32>
    %974 = vector.extract_strided_slice %270 {offsets = [6, 0], sizes = [2, 8], strides = [1, 1]} : vector<16x8xf32> to vector<2x8xf32>
    %975 = arith.mulf %974, %973 : vector<2x8xf32>
    %cst_241 = arith.constant 1.000000e+00 : f32
    %976 = vector.broadcast %cst_241 : f32 to vector<2x8xf32>
    %977 = arith.subf %976, %974 : vector<2x8xf32>
    %978 = arith.mulf %977, %928 : vector<2x8xf32>
    %979 = arith.addf %975, %978 : vector<2x8xf32>
    %980 = arith.mulf %974, %973 : vector<2x8xf32>
    %981 = vector.extract_strided_slice %701 {offsets = [0, 0, 0], sizes = [1, 8, 8], strides = [1, 1, 1]} : vector<3x8x8xf32> to vector<1x8x8xf32>
    %982 = vector.shape_cast %981 : vector<1x8x8xf32> to vector<8x8xf32>
    %cst_242 = arith.constant dense<0.000000e+00> : vector<2x8xf32>
    %983 = tpu.matmul %979, %982, %cst_242 {dimension_numbers = #tpu.dot_dimension_numbers<[1], [0], [0], [1], [0, 0, 1, 1], [], []>} : vector<2x8xf32>, vector<8x8xf32>, vector<2x8xf32> -> vector<2x8xf32>
    %984 = vector.extract_strided_slice %703 {offsets = [0, 0, 0], sizes = [1, 1, 8], strides = [1, 1, 1]} : vector<3x1x8xf32> to vector<1x1x8xf32>
    %985 = vector.shape_cast %984 : vector<1x1x8xf32> to vector<1x8xf32>
    %986 = vector.broadcast %985 : vector<1x8xf32> to vector<2x8xf32>
    %987 = arith.addf %983, %986 : vector<2x8xf32>
    %988 = vector.extract_strided_slice %701 {offsets = [1, 0, 0], sizes = [1, 8, 8], strides = [1, 1, 1]} : vector<3x8x8xf32> to vector<1x8x8xf32>
    %989 = vector.shape_cast %988 : vector<1x8x8xf32> to vector<8x8xf32>
    %cst_243 = arith.constant dense<0.000000e+00> : vector<2x8xf32>
    %990 = tpu.matmul %979, %989, %cst_243 {dimension_numbers = #tpu.dot_dimension_numbers<[1], [0], [0], [1], [0, 0, 1, 1], [], []>} : vector<2x8xf32>, vector<8x8xf32>, vector<2x8xf32> -> vector<2x8xf32>
    %991 = vector.extract_strided_slice %703 {offsets = [1, 0, 0], sizes = [1, 1, 8], strides = [1, 1, 1]} : vector<3x1x8xf32> to vector<1x1x8xf32>
    %992 = vector.shape_cast %991 : vector<1x1x8xf32> to vector<1x8xf32>
    %993 = vector.broadcast %992 : vector<1x8xf32> to vector<2x8xf32>
    %994 = arith.addf %990, %993 : vector<2x8xf32>
    %995 = vector.extract_strided_slice %701 {offsets = [2, 0, 0], sizes = [1, 8, 8], strides = [1, 1, 1]} : vector<3x8x8xf32> to vector<1x8x8xf32>
    %996 = vector.shape_cast %995 : vector<1x8x8xf32> to vector<8x8xf32>
    %cst_244 = arith.constant dense<0.000000e+00> : vector<2x8xf32>
    %997 = tpu.matmul %979, %996, %cst_244 {dimension_numbers = #tpu.dot_dimension_numbers<[1], [0], [0], [1], [0, 0, 1, 1], [], []>} : vector<2x8xf32>, vector<8x8xf32>, vector<2x8xf32> -> vector<2x8xf32>
    %998 = vector.extract_strided_slice %703 {offsets = [2, 0, 0], sizes = [1, 1, 8], strides = [1, 1, 1]} : vector<3x1x8xf32> to vector<1x1x8xf32>
    %999 = vector.shape_cast %998 : vector<1x1x8xf32> to vector<1x8xf32>
    %1000 = vector.broadcast %999 : vector<1x8xf32> to vector<2x8xf32>
    %1001 = arith.addf %997, %1000 : vector<2x8xf32>
    %1002 = vector.extract_strided_slice %710 {offsets = [4, 0], sizes = [2, 8], strides = [1, 1]} : vector<16x8xf32> to vector<2x8xf32>
    %1003 = arith.addf %1002, %987 : vector<2x8xf32>
    %1004 = arith.negf %1003 : vector<2x8xf32>
    %1005 = math.exp %1004 : vector<2x8xf32>
    %cst_245 = arith.constant 1.000000e+00 : f32
    %1006 = vector.broadcast %cst_245 : f32 to vector<2x8xf32>
    %1007 = arith.addf %1006, %1005 : vector<2x8xf32>
    %1008 = arith.divf %1006, %1007 : vector<2x8xf32>
    %1009 = vector.extract_strided_slice %717 {offsets = [4, 0], sizes = [2, 8], strides = [1, 1]} : vector<16x8xf32> to vector<2x8xf32>
    %1010 = arith.addf %1009, %994 : vector<2x8xf32>
    %1011 = arith.negf %1010 : vector<2x8xf32>
    %1012 = math.exp %1011 : vector<2x8xf32>
    %cst_246 = arith.constant 1.000000e+00 : f32
    %1013 = vector.broadcast %cst_246 : f32 to vector<2x8xf32>
    %1014 = arith.addf %1013, %1012 : vector<2x8xf32>
    %1015 = arith.divf %1013, %1014 : vector<2x8xf32>
    %1016 = vector.extract_strided_slice %724 {offsets = [4, 0], sizes = [2, 8], strides = [1, 1]} : vector<16x8xf32> to vector<2x8xf32>
    %1017 = arith.mulf %1008, %1001 : vector<2x8xf32>
    %1018 = arith.addf %1016, %1017 : vector<2x8xf32>
    %1019 = math.tanh %1018 : vector<2x8xf32>
    %cst_247 = arith.constant 1.000000e+00 : f32
    %1020 = vector.broadcast %cst_247 : f32 to vector<2x8xf32>
    %1021 = arith.subf %1020, %1015 : vector<2x8xf32>
    %1022 = arith.mulf %1021, %1019 : vector<2x8xf32>
    %1023 = arith.mulf %1015, %979 : vector<2x8xf32>
    %1024 = arith.addf %1022, %1023 : vector<2x8xf32>
    %1025 = vector.extract_strided_slice %270 {offsets = [4, 0], sizes = [2, 8], strides = [1, 1]} : vector<16x8xf32> to vector<2x8xf32>
    %1026 = arith.mulf %1025, %1024 : vector<2x8xf32>
    %cst_248 = arith.constant 1.000000e+00 : f32
    %1027 = vector.broadcast %cst_248 : f32 to vector<2x8xf32>
    %1028 = arith.subf %1027, %1025 : vector<2x8xf32>
    %1029 = arith.mulf %1028, %979 : vector<2x8xf32>
    %1030 = arith.addf %1026, %1029 : vector<2x8xf32>
    %1031 = arith.mulf %1025, %1024 : vector<2x8xf32>
    %1032 = vector.extract_strided_slice %701 {offsets = [0, 0, 0], sizes = [1, 8, 8], strides = [1, 1, 1]} : vector<3x8x8xf32> to vector<1x8x8xf32>
    %1033 = vector.shape_cast %1032 : vector<1x8x8xf32> to vector<8x8xf32>
    %cst_249 = arith.constant dense<0.000000e+00> : vector<2x8xf32>
    %1034 = tpu.matmul %1030, %1033, %cst_249 {dimension_numbers = #tpu.dot_dimension_numbers<[1], [0], [0], [1], [0, 0, 1, 1], [], []>} : vector<2x8xf32>, vector<8x8xf32>, vector<2x8xf32> -> vector<2x8xf32>
    %1035 = vector.extract_strided_slice %703 {offsets = [0, 0, 0], sizes = [1, 1, 8], strides = [1, 1, 1]} : vector<3x1x8xf32> to vector<1x1x8xf32>
    %1036 = vector.shape_cast %1035 : vector<1x1x8xf32> to vector<1x8xf32>
    %1037 = vector.broadcast %1036 : vector<1x8xf32> to vector<2x8xf32>
    %1038 = arith.addf %1034, %1037 : vector<2x8xf32>
    %1039 = vector.extract_strided_slice %701 {offsets = [1, 0, 0], sizes = [1, 8, 8], strides = [1, 1, 1]} : vector<3x8x8xf32> to vector<1x8x8xf32>
    %1040 = vector.shape_cast %1039 : vector<1x8x8xf32> to vector<8x8xf32>
    %cst_250 = arith.constant dense<0.000000e+00> : vector<2x8xf32>
    %1041 = tpu.matmul %1030, %1040, %cst_250 {dimension_numbers = #tpu.dot_dimension_numbers<[1], [0], [0], [1], [0, 0, 1, 1], [], []>} : vector<2x8xf32>, vector<8x8xf32>, vector<2x8xf32> -> vector<2x8xf32>
    %1042 = vector.extract_strided_slice %703 {offsets = [1, 0, 0], sizes = [1, 1, 8], strides = [1, 1, 1]} : vector<3x1x8xf32> to vector<1x1x8xf32>
    %1043 = vector.shape_cast %1042 : vector<1x1x8xf32> to vector<1x8xf32>
    %1044 = vector.broadcast %1043 : vector<1x8xf32> to vector<2x8xf32>
    %1045 = arith.addf %1041, %1044 : vector<2x8xf32>
    %1046 = vector.extract_strided_slice %701 {offsets = [2, 0, 0], sizes = [1, 8, 8], strides = [1, 1, 1]} : vector<3x8x8xf32> to vector<1x8x8xf32>
    %1047 = vector.shape_cast %1046 : vector<1x8x8xf32> to vector<8x8xf32>
    %cst_251 = arith.constant dense<0.000000e+00> : vector<2x8xf32>
    %1048 = tpu.matmul %1030, %1047, %cst_251 {dimension_numbers = #tpu.dot_dimension_numbers<[1], [0], [0], [1], [0, 0, 1, 1], [], []>} : vector<2x8xf32>, vector<8x8xf32>, vector<2x8xf32> -> vector<2x8xf32>
    %1049 = vector.extract_strided_slice %703 {offsets = [2, 0, 0], sizes = [1, 1, 8], strides = [1, 1, 1]} : vector<3x1x8xf32> to vector<1x1x8xf32>
    %1050 = vector.shape_cast %1049 : vector<1x1x8xf32> to vector<1x8xf32>
    %1051 = vector.broadcast %1050 : vector<1x8xf32> to vector<2x8xf32>
    %1052 = arith.addf %1048, %1051 : vector<2x8xf32>
    %1053 = vector.extract_strided_slice %710 {offsets = [2, 0], sizes = [2, 8], strides = [1, 1]} : vector<16x8xf32> to vector<2x8xf32>
    %1054 = arith.addf %1053, %1038 : vector<2x8xf32>
    %1055 = arith.negf %1054 : vector<2x8xf32>
    %1056 = math.exp %1055 : vector<2x8xf32>
    %cst_252 = arith.constant 1.000000e+00 : f32
    %1057 = vector.broadcast %cst_252 : f32 to vector<2x8xf32>
    %1058 = arith.addf %1057, %1056 : vector<2x8xf32>
    %1059 = arith.divf %1057, %1058 : vector<2x8xf32>
    %1060 = vector.extract_strided_slice %717 {offsets = [2, 0], sizes = [2, 8], strides = [1, 1]} : vector<16x8xf32> to vector<2x8xf32>
    %1061 = arith.addf %1060, %1045 : vector<2x8xf32>
    %1062 = arith.negf %1061 : vector<2x8xf32>
    %1063 = math.exp %1062 : vector<2x8xf32>
    %cst_253 = arith.constant 1.000000e+00 : f32
    %1064 = vector.broadcast %cst_253 : f32 to vector<2x8xf32>
    %1065 = arith.addf %1064, %1063 : vector<2x8xf32>
    %1066 = arith.divf %1064, %1065 : vector<2x8xf32>
    %1067 = vector.extract_strided_slice %724 {offsets = [2, 0], sizes = [2, 8], strides = [1, 1]} : vector<16x8xf32> to vector<2x8xf32>
    %1068 = arith.mulf %1059, %1052 : vector<2x8xf32>
    %1069 = arith.addf %1067, %1068 : vector<2x8xf32>
    %1070 = math.tanh %1069 : vector<2x8xf32>
    %cst_254 = arith.constant 1.000000e+00 : f32
    %1071 = vector.broadcast %cst_254 : f32 to vector<2x8xf32>
    %1072 = arith.subf %1071, %1066 : vector<2x8xf32>
    %1073 = arith.mulf %1072, %1070 : vector<2x8xf32>
    %1074 = arith.mulf %1066, %1030 : vector<2x8xf32>
    %1075 = arith.addf %1073, %1074 : vector<2x8xf32>
    %1076 = vector.extract_strided_slice %270 {offsets = [2, 0], sizes = [2, 8], strides = [1, 1]} : vector<16x8xf32> to vector<2x8xf32>
    %1077 = arith.mulf %1076, %1075 : vector<2x8xf32>
    %cst_255 = arith.constant 1.000000e+00 : f32
    %1078 = vector.broadcast %cst_255 : f32 to vector<2x8xf32>
    %1079 = arith.subf %1078, %1076 : vector<2x8xf32>
    %1080 = arith.mulf %1079, %1030 : vector<2x8xf32>
    %1081 = arith.addf %1077, %1080 : vector<2x8xf32>
    %1082 = arith.mulf %1076, %1075 : vector<2x8xf32>
    %1083 = vector.extract_strided_slice %701 {offsets = [0, 0, 0], sizes = [1, 8, 8], strides = [1, 1, 1]} : vector<3x8x8xf32> to vector<1x8x8xf32>
    %1084 = vector.shape_cast %1083 : vector<1x8x8xf32> to vector<8x8xf32>
    %cst_256 = arith.constant dense<0.000000e+00> : vector<2x8xf32>
    %1085 = tpu.matmul %1081, %1084, %cst_256 {dimension_numbers = #tpu.dot_dimension_numbers<[1], [0], [0], [1], [0, 0, 1, 1], [], []>} : vector<2x8xf32>, vector<8x8xf32>, vector<2x8xf32> -> vector<2x8xf32>
    %1086 = vector.extract_strided_slice %703 {offsets = [0, 0, 0], sizes = [1, 1, 8], strides = [1, 1, 1]} : vector<3x1x8xf32> to vector<1x1x8xf32>
    %1087 = vector.shape_cast %1086 : vector<1x1x8xf32> to vector<1x8xf32>
    %1088 = vector.broadcast %1087 : vector<1x8xf32> to vector<2x8xf32>
    %1089 = arith.addf %1085, %1088 : vector<2x8xf32>
    %1090 = vector.extract_strided_slice %701 {offsets = [1, 0, 0], sizes = [1, 8, 8], strides = [1, 1, 1]} : vector<3x8x8xf32> to vector<1x8x8xf32>
    %1091 = vector.shape_cast %1090 : vector<1x8x8xf32> to vector<8x8xf32>
    %cst_257 = arith.constant dense<0.000000e+00> : vector<2x8xf32>
    %1092 = tpu.matmul %1081, %1091, %cst_257 {dimension_numbers = #tpu.dot_dimension_numbers<[1], [0], [0], [1], [0, 0, 1, 1], [], []>} : vector<2x8xf32>, vector<8x8xf32>, vector<2x8xf32> -> vector<2x8xf32>
    %1093 = vector.extract_strided_slice %703 {offsets = [1, 0, 0], sizes = [1, 1, 8], strides = [1, 1, 1]} : vector<3x1x8xf32> to vector<1x1x8xf32>
    %1094 = vector.shape_cast %1093 : vector<1x1x8xf32> to vector<1x8xf32>
    %1095 = vector.broadcast %1094 : vector<1x8xf32> to vector<2x8xf32>
    %1096 = arith.addf %1092, %1095 : vector<2x8xf32>
    %1097 = vector.extract_strided_slice %701 {offsets = [2, 0, 0], sizes = [1, 8, 8], strides = [1, 1, 1]} : vector<3x8x8xf32> to vector<1x8x8xf32>
    %1098 = vector.shape_cast %1097 : vector<1x8x8xf32> to vector<8x8xf32>
    %cst_258 = arith.constant dense<0.000000e+00> : vector<2x8xf32>
    %1099 = tpu.matmul %1081, %1098, %cst_258 {dimension_numbers = #tpu.dot_dimension_numbers<[1], [0], [0], [1], [0, 0, 1, 1], [], []>} : vector<2x8xf32>, vector<8x8xf32>, vector<2x8xf32> -> vector<2x8xf32>
    %1100 = vector.extract_strided_slice %703 {offsets = [2, 0, 0], sizes = [1, 1, 8], strides = [1, 1, 1]} : vector<3x1x8xf32> to vector<1x1x8xf32>
    %1101 = vector.shape_cast %1100 : vector<1x1x8xf32> to vector<1x8xf32>
    %1102 = vector.broadcast %1101 : vector<1x8xf32> to vector<2x8xf32>
    %1103 = arith.addf %1099, %1102 : vector<2x8xf32>
    %1104 = vector.extract_strided_slice %710 {offsets = [0, 0], sizes = [2, 8], strides = [1, 1]} : vector<16x8xf32> to vector<2x8xf32>
    %1105 = arith.addf %1104, %1089 : vector<2x8xf32>
    %1106 = arith.negf %1105 : vector<2x8xf32>
    %1107 = math.exp %1106 : vector<2x8xf32>
    %cst_259 = arith.constant 1.000000e+00 : f32
    %1108 = vector.broadcast %cst_259 : f32 to vector<2x8xf32>
    %1109 = arith.addf %1108, %1107 : vector<2x8xf32>
    %1110 = arith.divf %1108, %1109 : vector<2x8xf32>
    %1111 = vector.extract_strided_slice %717 {offsets = [0, 0], sizes = [2, 8], strides = [1, 1]} : vector<16x8xf32> to vector<2x8xf32>
    %1112 = arith.addf %1111, %1096 : vector<2x8xf32>
    %1113 = arith.negf %1112 : vector<2x8xf32>
    %1114 = math.exp %1113 : vector<2x8xf32>
    %cst_260 = arith.constant 1.000000e+00 : f32
    %1115 = vector.broadcast %cst_260 : f32 to vector<2x8xf32>
    %1116 = arith.addf %1115, %1114 : vector<2x8xf32>
    %1117 = arith.divf %1115, %1116 : vector<2x8xf32>
    %1118 = vector.extract_strided_slice %724 {offsets = [0, 0], sizes = [2, 8], strides = [1, 1]} : vector<16x8xf32> to vector<2x8xf32>
    %1119 = arith.mulf %1110, %1103 : vector<2x8xf32>
    %1120 = arith.addf %1118, %1119 : vector<2x8xf32>
    %1121 = math.tanh %1120 : vector<2x8xf32>
    %cst_261 = arith.constant 1.000000e+00 : f32
    %1122 = vector.broadcast %cst_261 : f32 to vector<2x8xf32>
    %1123 = arith.subf %1122, %1117 : vector<2x8xf32>
    %1124 = arith.mulf %1123, %1121 : vector<2x8xf32>
    %1125 = arith.mulf %1117, %1081 : vector<2x8xf32>
    %1126 = arith.addf %1124, %1125 : vector<2x8xf32>
    %1127 = vector.extract_strided_slice %270 {offsets = [0, 0], sizes = [2, 8], strides = [1, 1]} : vector<16x8xf32> to vector<2x8xf32>
    %1128 = arith.mulf %1127, %1126 : vector<2x8xf32>
    %1129 = tpu.concatenate %347, %398, %449, %500, %551, %602, %653, %699 in 0 : vector<2x8xf32>, vector<2x8xf32>, vector<2x8xf32>, vector<2x8xf32>, vector<2x8xf32>, vector<2x8xf32>, vector<2x8xf32>, vector<2x8xf32> -> vector<16x8xf32>
    %1130 = tpu.concatenate %1128, %1082, %1031, %980, %929, %878, %827, %776 in 0 : vector<2x8xf32>, vector<2x8xf32>, vector<2x8xf32>, vector<2x8xf32>, vector<2x8xf32>, vector<2x8xf32>, vector<2x8xf32>, vector<2x8xf32> -> vector<16x8xf32>
    %1131 = tpu.concatenate %1129, %1130 in 1 : vector<16x8xf32>, vector<16x8xf32> -> vector<16x16xf32>
    %c0_262 = arith.constant 0 : index
    %c0_263 = arith.constant 0 : index
    %c0_264 = arith.constant 0 : index
    %1132 = vector.load %arg19[%c0_262, %c0_263, %c0_264] : memref<3x16x8xf32, #tpu.memory_space<vmem>>, vector<3x16x8xf32>
    %c0_265 = arith.constant 0 : index
    %c0_266 = arith.constant 0 : index
    %c0_267 = arith.constant 0 : index
    %1133 = vector.load %arg20[%c0_265, %c0_266, %c0_267] : memref<3x8x8xf32, #tpu.memory_space<vmem>>, vector<3x8x8xf32>
    %c0_268 = arith.constant 0 : index
    %c0_269 = arith.constant 0 : index
    %c0_270 = arith.constant 0 : index
    %1134 = vector.load %arg21[%c0_268, %c0_269, %c0_270] : memref<3x1x8xf32, #tpu.memory_space<vmem>>, vector<3x1x8xf32>
    %c0_271 = arith.constant 0 : index
    %c0_272 = arith.constant 0 : index
    %c0_273 = arith.constant 0 : index
    %1135 = vector.load %arg22[%c0_271, %c0_272, %c0_273] : memref<3x1x8xf32, #tpu.memory_space<vmem>>, vector<3x1x8xf32>
    %1136 = vector.extract_strided_slice %1132 {offsets = [0, 0, 0], sizes = [1, 16, 8], strides = [1, 1, 1]} : vector<3x16x8xf32> to vector<1x16x8xf32>
    %1137 = vector.shape_cast %1136 : vector<1x16x8xf32> to vector<16x8xf32>
    %cst_274 = arith.constant dense<0.000000e+00> : vector<16x8xf32>
    %1138 = tpu.matmul %1131, %1137, %cst_274 {dimension_numbers = #tpu.dot_dimension_numbers<[1], [0], [0], [1], [0, 0, 1, 1], [], []>} : vector<16x16xf32>, vector<16x8xf32>, vector<16x8xf32> -> vector<16x8xf32>
    %1139 = vector.extract_strided_slice %1134 {offsets = [0, 0, 0], sizes = [1, 1, 8], strides = [1, 1, 1]} : vector<3x1x8xf32> to vector<1x1x8xf32>
    %1140 = vector.shape_cast %1139 : vector<1x1x8xf32> to vector<1x8xf32>
    %1141 = vector.broadcast %1140 : vector<1x8xf32> to vector<16x8xf32>
    %1142 = arith.addf %1138, %1141 : vector<16x8xf32>
    %1143 = vector.extract_strided_slice %1132 {offsets = [1, 0, 0], sizes = [1, 16, 8], strides = [1, 1, 1]} : vector<3x16x8xf32> to vector<1x16x8xf32>
    %1144 = vector.shape_cast %1143 : vector<1x16x8xf32> to vector<16x8xf32>
    %cst_275 = arith.constant dense<0.000000e+00> : vector<16x8xf32>
    %1145 = tpu.matmul %1131, %1144, %cst_275 {dimension_numbers = #tpu.dot_dimension_numbers<[1], [0], [0], [1], [0, 0, 1, 1], [], []>} : vector<16x16xf32>, vector<16x8xf32>, vector<16x8xf32> -> vector<16x8xf32>
    %1146 = vector.extract_strided_slice %1134 {offsets = [1, 0, 0], sizes = [1, 1, 8], strides = [1, 1, 1]} : vector<3x1x8xf32> to vector<1x1x8xf32>
    %1147 = vector.shape_cast %1146 : vector<1x1x8xf32> to vector<1x8xf32>
    %1148 = vector.broadcast %1147 : vector<1x8xf32> to vector<16x8xf32>
    %1149 = arith.addf %1145, %1148 : vector<16x8xf32>
    %1150 = vector.extract_strided_slice %1132 {offsets = [2, 0, 0], sizes = [1, 16, 8], strides = [1, 1, 1]} : vector<3x16x8xf32> to vector<1x16x8xf32>
    %1151 = vector.shape_cast %1150 : vector<1x16x8xf32> to vector<16x8xf32>
    %cst_276 = arith.constant dense<0.000000e+00> : vector<16x8xf32>
    %1152 = tpu.matmul %1131, %1151, %cst_276 {dimension_numbers = #tpu.dot_dimension_numbers<[1], [0], [0], [1], [0, 0, 1, 1], [], []>} : vector<16x16xf32>, vector<16x8xf32>, vector<16x8xf32> -> vector<16x8xf32>
    %1153 = vector.extract_strided_slice %1134 {offsets = [2, 0, 0], sizes = [1, 1, 8], strides = [1, 1, 1]} : vector<3x1x8xf32> to vector<1x1x8xf32>
    %1154 = vector.shape_cast %1153 : vector<1x1x8xf32> to vector<1x8xf32>
    %1155 = vector.broadcast %1154 : vector<1x8xf32> to vector<16x8xf32>
    %1156 = arith.addf %1152, %1155 : vector<16x8xf32>
    %cst_277 = arith.constant 0.000000e+00 : f32
    %1157 = vector.broadcast %cst_277 : f32 to vector<2x8xf32>
    %1158 = vector.extract_strided_slice %1133 {offsets = [0, 0, 0], sizes = [1, 8, 8], strides = [1, 1, 1]} : vector<3x8x8xf32> to vector<1x8x8xf32>
    %1159 = vector.shape_cast %1158 : vector<1x8x8xf32> to vector<8x8xf32>
    %cst_278 = arith.constant dense<0.000000e+00> : vector<2x8xf32>
    %1160 = tpu.matmul %1157, %1159, %cst_278 {dimension_numbers = #tpu.dot_dimension_numbers<[1], [0], [0], [1], [0, 0, 1, 1], [], []>} : vector<2x8xf32>, vector<8x8xf32>, vector<2x8xf32> -> vector<2x8xf32>
    %1161 = vector.extract_strided_slice %1135 {offsets = [0, 0, 0], sizes = [1, 1, 8], strides = [1, 1, 1]} : vector<3x1x8xf32> to vector<1x1x8xf32>
    %1162 = vector.shape_cast %1161 : vector<1x1x8xf32> to vector<1x8xf32>
    %1163 = vector.broadcast %1162 : vector<1x8xf32> to vector<2x8xf32>
    %1164 = arith.addf %1160, %1163 : vector<2x8xf32>
    %1165 = vector.extract_strided_slice %1133 {offsets = [1, 0, 0], sizes = [1, 8, 8], strides = [1, 1, 1]} : vector<3x8x8xf32> to vector<1x8x8xf32>
    %1166 = vector.shape_cast %1165 : vector<1x8x8xf32> to vector<8x8xf32>
    %cst_279 = arith.constant dense<0.000000e+00> : vector<2x8xf32>
    %1167 = tpu.matmul %1157, %1166, %cst_279 {dimension_numbers = #tpu.dot_dimension_numbers<[1], [0], [0], [1], [0, 0, 1, 1], [], []>} : vector<2x8xf32>, vector<8x8xf32>, vector<2x8xf32> -> vector<2x8xf32>
    %1168 = vector.extract_strided_slice %1135 {offsets = [1, 0, 0], sizes = [1, 1, 8], strides = [1, 1, 1]} : vector<3x1x8xf32> to vector<1x1x8xf32>
    %1169 = vector.shape_cast %1168 : vector<1x1x8xf32> to vector<1x8xf32>
    %1170 = vector.broadcast %1169 : vector<1x8xf32> to vector<2x8xf32>
    %1171 = arith.addf %1167, %1170 : vector<2x8xf32>
    %1172 = vector.extract_strided_slice %1133 {offsets = [2, 0, 0], sizes = [1, 8, 8], strides = [1, 1, 1]} : vector<3x8x8xf32> to vector<1x8x8xf32>
    %1173 = vector.shape_cast %1172 : vector<1x8x8xf32> to vector<8x8xf32>
    %cst_280 = arith.constant dense<0.000000e+00> : vector<2x8xf32>
    %1174 = tpu.matmul %1157, %1173, %cst_280 {dimension_numbers = #tpu.dot_dimension_numbers<[1], [0], [0], [1], [0, 0, 1, 1], [], []>} : vector<2x8xf32>, vector<8x8xf32>, vector<2x8xf32> -> vector<2x8xf32>
    %1175 = vector.extract_strided_slice %1135 {offsets = [2, 0, 0], sizes = [1, 1, 8], strides = [1, 1, 1]} : vector<3x1x8xf32> to vector<1x1x8xf32>
    %1176 = vector.shape_cast %1175 : vector<1x1x8xf32> to vector<1x8xf32>
    %1177 = vector.broadcast %1176 : vector<1x8xf32> to vector<2x8xf32>
    %1178 = arith.addf %1174, %1177 : vector<2x8xf32>
    %1179 = vector.extract_strided_slice %1142 {offsets = [0, 0], sizes = [2, 8], strides = [1, 1]} : vector<16x8xf32> to vector<2x8xf32>
    %1180 = arith.addf %1179, %1164 : vector<2x8xf32>
    %1181 = arith.negf %1180 : vector<2x8xf32>
    %1182 = math.exp %1181 : vector<2x8xf32>
    %cst_281 = arith.constant 1.000000e+00 : f32
    %1183 = vector.broadcast %cst_281 : f32 to vector<2x8xf32>
    %1184 = arith.addf %1183, %1182 : vector<2x8xf32>
    %1185 = arith.divf %1183, %1184 : vector<2x8xf32>
    %1186 = vector.extract_strided_slice %1149 {offsets = [0, 0], sizes = [2, 8], strides = [1, 1]} : vector<16x8xf32> to vector<2x8xf32>
    %1187 = arith.addf %1186, %1171 : vector<2x8xf32>
    %1188 = arith.negf %1187 : vector<2x8xf32>
    %1189 = math.exp %1188 : vector<2x8xf32>
    %cst_282 = arith.constant 1.000000e+00 : f32
    %1190 = vector.broadcast %cst_282 : f32 to vector<2x8xf32>
    %1191 = arith.addf %1190, %1189 : vector<2x8xf32>
    %1192 = arith.divf %1190, %1191 : vector<2x8xf32>
    %1193 = vector.extract_strided_slice %1156 {offsets = [0, 0], sizes = [2, 8], strides = [1, 1]} : vector<16x8xf32> to vector<2x8xf32>
    %1194 = arith.mulf %1185, %1178 : vector<2x8xf32>
    %1195 = arith.addf %1193, %1194 : vector<2x8xf32>
    %1196 = math.tanh %1195 : vector<2x8xf32>
    %cst_283 = arith.constant 1.000000e+00 : f32
    %1197 = vector.broadcast %cst_283 : f32 to vector<2x8xf32>
    %1198 = arith.subf %1197, %1192 : vector<2x8xf32>
    %1199 = arith.mulf %1198, %1196 : vector<2x8xf32>
    %1200 = arith.mulf %1192, %1157 : vector<2x8xf32>
    %1201 = arith.addf %1199, %1200 : vector<2x8xf32>
    %1202 = vector.extract_strided_slice %270 {offsets = [0, 0], sizes = [2, 8], strides = [1, 1]} : vector<16x8xf32> to vector<2x8xf32>
    %1203 = arith.mulf %1202, %1201 : vector<2x8xf32>
    %cst_284 = arith.constant 1.000000e+00 : f32
    %1204 = vector.broadcast %cst_284 : f32 to vector<2x8xf32>
    %1205 = arith.subf %1204, %1202 : vector<2x8xf32>
    %1206 = arith.mulf %1205, %1157 : vector<2x8xf32>
    %1207 = arith.addf %1203, %1206 : vector<2x8xf32>
    %1208 = arith.mulf %1202, %1201 : vector<2x8xf32>
    %1209 = vector.extract_strided_slice %1133 {offsets = [0, 0, 0], sizes = [1, 8, 8], strides = [1, 1, 1]} : vector<3x8x8xf32> to vector<1x8x8xf32>
    %1210 = vector.shape_cast %1209 : vector<1x8x8xf32> to vector<8x8xf32>
    %cst_285 = arith.constant dense<0.000000e+00> : vector<2x8xf32>
    %1211 = tpu.matmul %1207, %1210, %cst_285 {dimension_numbers = #tpu.dot_dimension_numbers<[1], [0], [0], [1], [0, 0, 1, 1], [], []>} : vector<2x8xf32>, vector<8x8xf32>, vector<2x8xf32> -> vector<2x8xf32>
    %1212 = vector.extract_strided_slice %1135 {offsets = [0, 0, 0], sizes = [1, 1, 8], strides = [1, 1, 1]} : vector<3x1x8xf32> to vector<1x1x8xf32>
    %1213 = vector.shape_cast %1212 : vector<1x1x8xf32> to vector<1x8xf32>
    %1214 = vector.broadcast %1213 : vector<1x8xf32> to vector<2x8xf32>
    %1215 = arith.addf %1211, %1214 : vector<2x8xf32>
    %1216 = vector.extract_strided_slice %1133 {offsets = [1, 0, 0], sizes = [1, 8, 8], strides = [1, 1, 1]} : vector<3x8x8xf32> to vector<1x8x8xf32>
    %1217 = vector.shape_cast %1216 : vector<1x8x8xf32> to vector<8x8xf32>
    %cst_286 = arith.constant dense<0.000000e+00> : vector<2x8xf32>
    %1218 = tpu.matmul %1207, %1217, %cst_286 {dimension_numbers = #tpu.dot_dimension_numbers<[1], [0], [0], [1], [0, 0, 1, 1], [], []>} : vector<2x8xf32>, vector<8x8xf32>, vector<2x8xf32> -> vector<2x8xf32>
    %1219 = vector.extract_strided_slice %1135 {offsets = [1, 0, 0], sizes = [1, 1, 8], strides = [1, 1, 1]} : vector<3x1x8xf32> to vector<1x1x8xf32>
    %1220 = vector.shape_cast %1219 : vector<1x1x8xf32> to vector<1x8xf32>
    %1221 = vector.broadcast %1220 : vector<1x8xf32> to vector<2x8xf32>
    %1222 = arith.addf %1218, %1221 : vector<2x8xf32>
    %1223 = vector.extract_strided_slice %1133 {offsets = [2, 0, 0], sizes = [1, 8, 8], strides = [1, 1, 1]} : vector<3x8x8xf32> to vector<1x8x8xf32>
    %1224 = vector.shape_cast %1223 : vector<1x8x8xf32> to vector<8x8xf32>
    %cst_287 = arith.constant dense<0.000000e+00> : vector<2x8xf32>
    %1225 = tpu.matmul %1207, %1224, %cst_287 {dimension_numbers = #tpu.dot_dimension_numbers<[1], [0], [0], [1], [0, 0, 1, 1], [], []>} : vector<2x8xf32>, vector<8x8xf32>, vector<2x8xf32> -> vector<2x8xf32>
    %1226 = vector.extract_strided_slice %1135 {offsets = [2, 0, 0], sizes = [1, 1, 8], strides = [1, 1, 1]} : vector<3x1x8xf32> to vector<1x1x8xf32>
    %1227 = vector.shape_cast %1226 : vector<1x1x8xf32> to vector<1x8xf32>
    %1228 = vector.broadcast %1227 : vector<1x8xf32> to vector<2x8xf32>
    %1229 = arith.addf %1225, %1228 : vector<2x8xf32>
    %1230 = vector.extract_strided_slice %1142 {offsets = [2, 0], sizes = [2, 8], strides = [1, 1]} : vector<16x8xf32> to vector<2x8xf32>
    %1231 = arith.addf %1230, %1215 : vector<2x8xf32>
    %1232 = arith.negf %1231 : vector<2x8xf32>
    %1233 = math.exp %1232 : vector<2x8xf32>
    %cst_288 = arith.constant 1.000000e+00 : f32
    %1234 = vector.broadcast %cst_288 : f32 to vector<2x8xf32>
    %1235 = arith.addf %1234, %1233 : vector<2x8xf32>
    %1236 = arith.divf %1234, %1235 : vector<2x8xf32>
    %1237 = vector.extract_strided_slice %1149 {offsets = [2, 0], sizes = [2, 8], strides = [1, 1]} : vector<16x8xf32> to vector<2x8xf32>
    %1238 = arith.addf %1237, %1222 : vector<2x8xf32>
    %1239 = arith.negf %1238 : vector<2x8xf32>
    %1240 = math.exp %1239 : vector<2x8xf32>
    %cst_289 = arith.constant 1.000000e+00 : f32
    %1241 = vector.broadcast %cst_289 : f32 to vector<2x8xf32>
    %1242 = arith.addf %1241, %1240 : vector<2x8xf32>
    %1243 = arith.divf %1241, %1242 : vector<2x8xf32>
    %1244 = vector.extract_strided_slice %1156 {offsets = [2, 0], sizes = [2, 8], strides = [1, 1]} : vector<16x8xf32> to vector<2x8xf32>
    %1245 = arith.mulf %1236, %1229 : vector<2x8xf32>
    %1246 = arith.addf %1244, %1245 : vector<2x8xf32>
    %1247 = math.tanh %1246 : vector<2x8xf32>
    %cst_290 = arith.constant 1.000000e+00 : f32
    %1248 = vector.broadcast %cst_290 : f32 to vector<2x8xf32>
    %1249 = arith.subf %1248, %1243 : vector<2x8xf32>
    %1250 = arith.mulf %1249, %1247 : vector<2x8xf32>
    %1251 = arith.mulf %1243, %1207 : vector<2x8xf32>
    %1252 = arith.addf %1250, %1251 : vector<2x8xf32>
    %1253 = vector.extract_strided_slice %270 {offsets = [2, 0], sizes = [2, 8], strides = [1, 1]} : vector<16x8xf32> to vector<2x8xf32>
    %1254 = arith.mulf %1253, %1252 : vector<2x8xf32>
    %cst_291 = arith.constant 1.000000e+00 : f32
    %1255 = vector.broadcast %cst_291 : f32 to vector<2x8xf32>
    %1256 = arith.subf %1255, %1253 : vector<2x8xf32>
    %1257 = arith.mulf %1256, %1207 : vector<2x8xf32>
    %1258 = arith.addf %1254, %1257 : vector<2x8xf32>
    %1259 = arith.mulf %1253, %1252 : vector<2x8xf32>
    %1260 = vector.extract_strided_slice %1133 {offsets = [0, 0, 0], sizes = [1, 8, 8], strides = [1, 1, 1]} : vector<3x8x8xf32> to vector<1x8x8xf32>
    %1261 = vector.shape_cast %1260 : vector<1x8x8xf32> to vector<8x8xf32>
    %cst_292 = arith.constant dense<0.000000e+00> : vector<2x8xf32>
    %1262 = tpu.matmul %1258, %1261, %cst_292 {dimension_numbers = #tpu.dot_dimension_numbers<[1], [0], [0], [1], [0, 0, 1, 1], [], []>} : vector<2x8xf32>, vector<8x8xf32>, vector<2x8xf32> -> vector<2x8xf32>
    %1263 = vector.extract_strided_slice %1135 {offsets = [0, 0, 0], sizes = [1, 1, 8], strides = [1, 1, 1]} : vector<3x1x8xf32> to vector<1x1x8xf32>
    %1264 = vector.shape_cast %1263 : vector<1x1x8xf32> to vector<1x8xf32>
    %1265 = vector.broadcast %1264 : vector<1x8xf32> to vector<2x8xf32>
    %1266 = arith.addf %1262, %1265 : vector<2x8xf32>
    %1267 = vector.extract_strided_slice %1133 {offsets = [1, 0, 0], sizes = [1, 8, 8], strides = [1, 1, 1]} : vector<3x8x8xf32> to vector<1x8x8xf32>
    %1268 = vector.shape_cast %1267 : vector<1x8x8xf32> to vector<8x8xf32>
    %cst_293 = arith.constant dense<0.000000e+00> : vector<2x8xf32>
    %1269 = tpu.matmul %1258, %1268, %cst_293 {dimension_numbers = #tpu.dot_dimension_numbers<[1], [0], [0], [1], [0, 0, 1, 1], [], []>} : vector<2x8xf32>, vector<8x8xf32>, vector<2x8xf32> -> vector<2x8xf32>
    %1270 = vector.extract_strided_slice %1135 {offsets = [1, 0, 0], sizes = [1, 1, 8], strides = [1, 1, 1]} : vector<3x1x8xf32> to vector<1x1x8xf32>
    %1271 = vector.shape_cast %1270 : vector<1x1x8xf32> to vector<1x8xf32>
    %1272 = vector.broadcast %1271 : vector<1x8xf32> to vector<2x8xf32>
    %1273 = arith.addf %1269, %1272 : vector<2x8xf32>
    %1274 = vector.extract_strided_slice %1133 {offsets = [2, 0, 0], sizes = [1, 8, 8], strides = [1, 1, 1]} : vector<3x8x8xf32> to vector<1x8x8xf32>
    %1275 = vector.shape_cast %1274 : vector<1x8x8xf32> to vector<8x8xf32>
    %cst_294 = arith.constant dense<0.000000e+00> : vector<2x8xf32>
    %1276 = tpu.matmul %1258, %1275, %cst_294 {dimension_numbers = #tpu.dot_dimension_numbers<[1], [0], [0], [1], [0, 0, 1, 1], [], []>} : vector<2x8xf32>, vector<8x8xf32>, vector<2x8xf32> -> vector<2x8xf32>
    %1277 = vector.extract_strided_slice %1135 {offsets = [2, 0, 0], sizes = [1, 1, 8], strides = [1, 1, 1]} : vector<3x1x8xf32> to vector<1x1x8xf32>
    %1278 = vector.shape_cast %1277 : vector<1x1x8xf32> to vector<1x8xf32>
    %1279 = vector.broadcast %1278 : vector<1x8xf32> to vector<2x8xf32>
    %1280 = arith.addf %1276, %1279 : vector<2x8xf32>
    %1281 = vector.extract_strided_slice %1142 {offsets = [4, 0], sizes = [2, 8], strides = [1, 1]} : vector<16x8xf32> to vector<2x8xf32>
    %1282 = arith.addf %1281, %1266 : vector<2x8xf32>
    %1283 = arith.negf %1282 : vector<2x8xf32>
    %1284 = math.exp %1283 : vector<2x8xf32>
    %cst_295 = arith.constant 1.000000e+00 : f32
    %1285 = vector.broadcast %cst_295 : f32 to vector<2x8xf32>
    %1286 = arith.addf %1285, %1284 : vector<2x8xf32>
    %1287 = arith.divf %1285, %1286 : vector<2x8xf32>
    %1288 = vector.extract_strided_slice %1149 {offsets = [4, 0], sizes = [2, 8], strides = [1, 1]} : vector<16x8xf32> to vector<2x8xf32>
    %1289 = arith.addf %1288, %1273 : vector<2x8xf32>
    %1290 = arith.negf %1289 : vector<2x8xf32>
    %1291 = math.exp %1290 : vector<2x8xf32>
    %cst_296 = arith.constant 1.000000e+00 : f32
    %1292 = vector.broadcast %cst_296 : f32 to vector<2x8xf32>
    %1293 = arith.addf %1292, %1291 : vector<2x8xf32>
    %1294 = arith.divf %1292, %1293 : vector<2x8xf32>
    %1295 = vector.extract_strided_slice %1156 {offsets = [4, 0], sizes = [2, 8], strides = [1, 1]} : vector<16x8xf32> to vector<2x8xf32>
    %1296 = arith.mulf %1287, %1280 : vector<2x8xf32>
    %1297 = arith.addf %1295, %1296 : vector<2x8xf32>
    %1298 = math.tanh %1297 : vector<2x8xf32>
    %cst_297 = arith.constant 1.000000e+00 : f32
    %1299 = vector.broadcast %cst_297 : f32 to vector<2x8xf32>
    %1300 = arith.subf %1299, %1294 : vector<2x8xf32>
    %1301 = arith.mulf %1300, %1298 : vector<2x8xf32>
    %1302 = arith.mulf %1294, %1258 : vector<2x8xf32>
    %1303 = arith.addf %1301, %1302 : vector<2x8xf32>
    %1304 = vector.extract_strided_slice %270 {offsets = [4, 0], sizes = [2, 8], strides = [1, 1]} : vector<16x8xf32> to vector<2x8xf32>
    %1305 = arith.mulf %1304, %1303 : vector<2x8xf32>
    %cst_298 = arith.constant 1.000000e+00 : f32
    %1306 = vector.broadcast %cst_298 : f32 to vector<2x8xf32>
    %1307 = arith.subf %1306, %1304 : vector<2x8xf32>
    %1308 = arith.mulf %1307, %1258 : vector<2x8xf32>
    %1309 = arith.addf %1305, %1308 : vector<2x8xf32>
    %1310 = arith.mulf %1304, %1303 : vector<2x8xf32>
    %1311 = vector.extract_strided_slice %1133 {offsets = [0, 0, 0], sizes = [1, 8, 8], strides = [1, 1, 1]} : vector<3x8x8xf32> to vector<1x8x8xf32>
    %1312 = vector.shape_cast %1311 : vector<1x8x8xf32> to vector<8x8xf32>
    %cst_299 = arith.constant dense<0.000000e+00> : vector<2x8xf32>
    %1313 = tpu.matmul %1309, %1312, %cst_299 {dimension_numbers = #tpu.dot_dimension_numbers<[1], [0], [0], [1], [0, 0, 1, 1], [], []>} : vector<2x8xf32>, vector<8x8xf32>, vector<2x8xf32> -> vector<2x8xf32>
    %1314 = vector.extract_strided_slice %1135 {offsets = [0, 0, 0], sizes = [1, 1, 8], strides = [1, 1, 1]} : vector<3x1x8xf32> to vector<1x1x8xf32>
    %1315 = vector.shape_cast %1314 : vector<1x1x8xf32> to vector<1x8xf32>
    %1316 = vector.broadcast %1315 : vector<1x8xf32> to vector<2x8xf32>
    %1317 = arith.addf %1313, %1316 : vector<2x8xf32>
    %1318 = vector.extract_strided_slice %1133 {offsets = [1, 0, 0], sizes = [1, 8, 8], strides = [1, 1, 1]} : vector<3x8x8xf32> to vector<1x8x8xf32>
    %1319 = vector.shape_cast %1318 : vector<1x8x8xf32> to vector<8x8xf32>
    %cst_300 = arith.constant dense<0.000000e+00> : vector<2x8xf32>
    %1320 = tpu.matmul %1309, %1319, %cst_300 {dimension_numbers = #tpu.dot_dimension_numbers<[1], [0], [0], [1], [0, 0, 1, 1], [], []>} : vector<2x8xf32>, vector<8x8xf32>, vector<2x8xf32> -> vector<2x8xf32>
    %1321 = vector.extract_strided_slice %1135 {offsets = [1, 0, 0], sizes = [1, 1, 8], strides = [1, 1, 1]} : vector<3x1x8xf32> to vector<1x1x8xf32>
    %1322 = vector.shape_cast %1321 : vector<1x1x8xf32> to vector<1x8xf32>
    %1323 = vector.broadcast %1322 : vector<1x8xf32> to vector<2x8xf32>
    %1324 = arith.addf %1320, %1323 : vector<2x8xf32>
    %1325 = vector.extract_strided_slice %1133 {offsets = [2, 0, 0], sizes = [1, 8, 8], strides = [1, 1, 1]} : vector<3x8x8xf32> to vector<1x8x8xf32>
    %1326 = vector.shape_cast %1325 : vector<1x8x8xf32> to vector<8x8xf32>
    %cst_301 = arith.constant dense<0.000000e+00> : vector<2x8xf32>
    %1327 = tpu.matmul %1309, %1326, %cst_301 {dimension_numbers = #tpu.dot_dimension_numbers<[1], [0], [0], [1], [0, 0, 1, 1], [], []>} : vector<2x8xf32>, vector<8x8xf32>, vector<2x8xf32> -> vector<2x8xf32>
    %1328 = vector.extract_strided_slice %1135 {offsets = [2, 0, 0], sizes = [1, 1, 8], strides = [1, 1, 1]} : vector<3x1x8xf32> to vector<1x1x8xf32>
    %1329 = vector.shape_cast %1328 : vector<1x1x8xf32> to vector<1x8xf32>
    %1330 = vector.broadcast %1329 : vector<1x8xf32> to vector<2x8xf32>
    %1331 = arith.addf %1327, %1330 : vector<2x8xf32>
    %1332 = vector.extract_strided_slice %1142 {offsets = [6, 0], sizes = [2, 8], strides = [1, 1]} : vector<16x8xf32> to vector<2x8xf32>
    %1333 = arith.addf %1332, %1317 : vector<2x8xf32>
    %1334 = arith.negf %1333 : vector<2x8xf32>
    %1335 = math.exp %1334 : vector<2x8xf32>
    %cst_302 = arith.constant 1.000000e+00 : f32
    %1336 = vector.broadcast %cst_302 : f32 to vector<2x8xf32>
    %1337 = arith.addf %1336, %1335 : vector<2x8xf32>
    %1338 = arith.divf %1336, %1337 : vector<2x8xf32>
    %1339 = vector.extract_strided_slice %1149 {offsets = [6, 0], sizes = [2, 8], strides = [1, 1]} : vector<16x8xf32> to vector<2x8xf32>
    %1340 = arith.addf %1339, %1324 : vector<2x8xf32>
    %1341 = arith.negf %1340 : vector<2x8xf32>
    %1342 = math.exp %1341 : vector<2x8xf32>
    %cst_303 = arith.constant 1.000000e+00 : f32
    %1343 = vector.broadcast %cst_303 : f32 to vector<2x8xf32>
    %1344 = arith.addf %1343, %1342 : vector<2x8xf32>
    %1345 = arith.divf %1343, %1344 : vector<2x8xf32>
    %1346 = vector.extract_strided_slice %1156 {offsets = [6, 0], sizes = [2, 8], strides = [1, 1]} : vector<16x8xf32> to vector<2x8xf32>
    %1347 = arith.mulf %1338, %1331 : vector<2x8xf32>
    %1348 = arith.addf %1346, %1347 : vector<2x8xf32>
    %1349 = math.tanh %1348 : vector<2x8xf32>
    %cst_304 = arith.constant 1.000000e+00 : f32
    %1350 = vector.broadcast %cst_304 : f32 to vector<2x8xf32>
    %1351 = arith.subf %1350, %1345 : vector<2x8xf32>
    %1352 = arith.mulf %1351, %1349 : vector<2x8xf32>
    %1353 = arith.mulf %1345, %1309 : vector<2x8xf32>
    %1354 = arith.addf %1352, %1353 : vector<2x8xf32>
    %1355 = vector.extract_strided_slice %270 {offsets = [6, 0], sizes = [2, 8], strides = [1, 1]} : vector<16x8xf32> to vector<2x8xf32>
    %1356 = arith.mulf %1355, %1354 : vector<2x8xf32>
    %cst_305 = arith.constant 1.000000e+00 : f32
    %1357 = vector.broadcast %cst_305 : f32 to vector<2x8xf32>
    %1358 = arith.subf %1357, %1355 : vector<2x8xf32>
    %1359 = arith.mulf %1358, %1309 : vector<2x8xf32>
    %1360 = arith.addf %1356, %1359 : vector<2x8xf32>
    %1361 = arith.mulf %1355, %1354 : vector<2x8xf32>
    %1362 = vector.extract_strided_slice %1133 {offsets = [0, 0, 0], sizes = [1, 8, 8], strides = [1, 1, 1]} : vector<3x8x8xf32> to vector<1x8x8xf32>
    %1363 = vector.shape_cast %1362 : vector<1x8x8xf32> to vector<8x8xf32>
    %cst_306 = arith.constant dense<0.000000e+00> : vector<2x8xf32>
    %1364 = tpu.matmul %1360, %1363, %cst_306 {dimension_numbers = #tpu.dot_dimension_numbers<[1], [0], [0], [1], [0, 0, 1, 1], [], []>} : vector<2x8xf32>, vector<8x8xf32>, vector<2x8xf32> -> vector<2x8xf32>
    %1365 = vector.extract_strided_slice %1135 {offsets = [0, 0, 0], sizes = [1, 1, 8], strides = [1, 1, 1]} : vector<3x1x8xf32> to vector<1x1x8xf32>
    %1366 = vector.shape_cast %1365 : vector<1x1x8xf32> to vector<1x8xf32>
    %1367 = vector.broadcast %1366 : vector<1x8xf32> to vector<2x8xf32>
    %1368 = arith.addf %1364, %1367 : vector<2x8xf32>
    %1369 = vector.extract_strided_slice %1133 {offsets = [1, 0, 0], sizes = [1, 8, 8], strides = [1, 1, 1]} : vector<3x8x8xf32> to vector<1x8x8xf32>
    %1370 = vector.shape_cast %1369 : vector<1x8x8xf32> to vector<8x8xf32>
    %cst_307 = arith.constant dense<0.000000e+00> : vector<2x8xf32>
    %1371 = tpu.matmul %1360, %1370, %cst_307 {dimension_numbers = #tpu.dot_dimension_numbers<[1], [0], [0], [1], [0, 0, 1, 1], [], []>} : vector<2x8xf32>, vector<8x8xf32>, vector<2x8xf32> -> vector<2x8xf32>
    %1372 = vector.extract_strided_slice %1135 {offsets = [1, 0, 0], sizes = [1, 1, 8], strides = [1, 1, 1]} : vector<3x1x8xf32> to vector<1x1x8xf32>
    %1373 = vector.shape_cast %1372 : vector<1x1x8xf32> to vector<1x8xf32>
    %1374 = vector.broadcast %1373 : vector<1x8xf32> to vector<2x8xf32>
    %1375 = arith.addf %1371, %1374 : vector<2x8xf32>
    %1376 = vector.extract_strided_slice %1133 {offsets = [2, 0, 0], sizes = [1, 8, 8], strides = [1, 1, 1]} : vector<3x8x8xf32> to vector<1x8x8xf32>
    %1377 = vector.shape_cast %1376 : vector<1x8x8xf32> to vector<8x8xf32>
    %cst_308 = arith.constant dense<0.000000e+00> : vector<2x8xf32>
    %1378 = tpu.matmul %1360, %1377, %cst_308 {dimension_numbers = #tpu.dot_dimension_numbers<[1], [0], [0], [1], [0, 0, 1, 1], [], []>} : vector<2x8xf32>, vector<8x8xf32>, vector<2x8xf32> -> vector<2x8xf32>
    %1379 = vector.extract_strided_slice %1135 {offsets = [2, 0, 0], sizes = [1, 1, 8], strides = [1, 1, 1]} : vector<3x1x8xf32> to vector<1x1x8xf32>
    %1380 = vector.shape_cast %1379 : vector<1x1x8xf32> to vector<1x8xf32>
    %1381 = vector.broadcast %1380 : vector<1x8xf32> to vector<2x8xf32>
    %1382 = arith.addf %1378, %1381 : vector<2x8xf32>
    %1383 = vector.extract_strided_slice %1142 {offsets = [8, 0], sizes = [2, 8], strides = [1, 1]} : vector<16x8xf32> to vector<2x8xf32>
    %1384 = arith.addf %1383, %1368 : vector<2x8xf32>
    %1385 = arith.negf %1384 : vector<2x8xf32>
    %1386 = math.exp %1385 : vector<2x8xf32>
    %cst_309 = arith.constant 1.000000e+00 : f32
    %1387 = vector.broadcast %cst_309 : f32 to vector<2x8xf32>
    %1388 = arith.addf %1387, %1386 : vector<2x8xf32>
    %1389 = arith.divf %1387, %1388 : vector<2x8xf32>
    %1390 = vector.extract_strided_slice %1149 {offsets = [8, 0], sizes = [2, 8], strides = [1, 1]} : vector<16x8xf32> to vector<2x8xf32>
    %1391 = arith.addf %1390, %1375 : vector<2x8xf32>
    %1392 = arith.negf %1391 : vector<2x8xf32>
    %1393 = math.exp %1392 : vector<2x8xf32>
    %cst_310 = arith.constant 1.000000e+00 : f32
    %1394 = vector.broadcast %cst_310 : f32 to vector<2x8xf32>
    %1395 = arith.addf %1394, %1393 : vector<2x8xf32>
    %1396 = arith.divf %1394, %1395 : vector<2x8xf32>
    %1397 = vector.extract_strided_slice %1156 {offsets = [8, 0], sizes = [2, 8], strides = [1, 1]} : vector<16x8xf32> to vector<2x8xf32>
    %1398 = arith.mulf %1389, %1382 : vector<2x8xf32>
    %1399 = arith.addf %1397, %1398 : vector<2x8xf32>
    %1400 = math.tanh %1399 : vector<2x8xf32>
    %cst_311 = arith.constant 1.000000e+00 : f32
    %1401 = vector.broadcast %cst_311 : f32 to vector<2x8xf32>
    %1402 = arith.subf %1401, %1396 : vector<2x8xf32>
    %1403 = arith.mulf %1402, %1400 : vector<2x8xf32>
    %1404 = arith.mulf %1396, %1360 : vector<2x8xf32>
    %1405 = arith.addf %1403, %1404 : vector<2x8xf32>
    %1406 = vector.extract_strided_slice %270 {offsets = [8, 0], sizes = [2, 8], strides = [1, 1]} : vector<16x8xf32> to vector<2x8xf32>
    %1407 = arith.mulf %1406, %1405 : vector<2x8xf32>
    %cst_312 = arith.constant 1.000000e+00 : f32
    %1408 = vector.broadcast %cst_312 : f32 to vector<2x8xf32>
    %1409 = arith.subf %1408, %1406 : vector<2x8xf32>
    %1410 = arith.mulf %1409, %1360 : vector<2x8xf32>
    %1411 = arith.addf %1407, %1410 : vector<2x8xf32>
    %1412 = arith.mulf %1406, %1405 : vector<2x8xf32>
    %1413 = vector.extract_strided_slice %1133 {offsets = [0, 0, 0], sizes = [1, 8, 8], strides = [1, 1, 1]} : vector<3x8x8xf32> to vector<1x8x8xf32>
    %1414 = vector.shape_cast %1413 : vector<1x8x8xf32> to vector<8x8xf32>
    %cst_313 = arith.constant dense<0.000000e+00> : vector<2x8xf32>
    %1415 = tpu.matmul %1411, %1414, %cst_313 {dimension_numbers = #tpu.dot_dimension_numbers<[1], [0], [0], [1], [0, 0, 1, 1], [], []>} : vector<2x8xf32>, vector<8x8xf32>, vector<2x8xf32> -> vector<2x8xf32>
    %1416 = vector.extract_strided_slice %1135 {offsets = [0, 0, 0], sizes = [1, 1, 8], strides = [1, 1, 1]} : vector<3x1x8xf32> to vector<1x1x8xf32>
    %1417 = vector.shape_cast %1416 : vector<1x1x8xf32> to vector<1x8xf32>
    %1418 = vector.broadcast %1417 : vector<1x8xf32> to vector<2x8xf32>
    %1419 = arith.addf %1415, %1418 : vector<2x8xf32>
    %1420 = vector.extract_strided_slice %1133 {offsets = [1, 0, 0], sizes = [1, 8, 8], strides = [1, 1, 1]} : vector<3x8x8xf32> to vector<1x8x8xf32>
    %1421 = vector.shape_cast %1420 : vector<1x8x8xf32> to vector<8x8xf32>
    %cst_314 = arith.constant dense<0.000000e+00> : vector<2x8xf32>
    %1422 = tpu.matmul %1411, %1421, %cst_314 {dimension_numbers = #tpu.dot_dimension_numbers<[1], [0], [0], [1], [0, 0, 1, 1], [], []>} : vector<2x8xf32>, vector<8x8xf32>, vector<2x8xf32> -> vector<2x8xf32>
    %1423 = vector.extract_strided_slice %1135 {offsets = [1, 0, 0], sizes = [1, 1, 8], strides = [1, 1, 1]} : vector<3x1x8xf32> to vector<1x1x8xf32>
    %1424 = vector.shape_cast %1423 : vector<1x1x8xf32> to vector<1x8xf32>
    %1425 = vector.broadcast %1424 : vector<1x8xf32> to vector<2x8xf32>
    %1426 = arith.addf %1422, %1425 : vector<2x8xf32>
    %1427 = vector.extract_strided_slice %1133 {offsets = [2, 0, 0], sizes = [1, 8, 8], strides = [1, 1, 1]} : vector<3x8x8xf32> to vector<1x8x8xf32>
    %1428 = vector.shape_cast %1427 : vector<1x8x8xf32> to vector<8x8xf32>
    %cst_315 = arith.constant dense<0.000000e+00> : vector<2x8xf32>
    %1429 = tpu.matmul %1411, %1428, %cst_315 {dimension_numbers = #tpu.dot_dimension_numbers<[1], [0], [0], [1], [0, 0, 1, 1], [], []>} : vector<2x8xf32>, vector<8x8xf32>, vector<2x8xf32> -> vector<2x8xf32>
    %1430 = vector.extract_strided_slice %1135 {offsets = [2, 0, 0], sizes = [1, 1, 8], strides = [1, 1, 1]} : vector<3x1x8xf32> to vector<1x1x8xf32>
    %1431 = vector.shape_cast %1430 : vector<1x1x8xf32> to vector<1x8xf32>
    %1432 = vector.broadcast %1431 : vector<1x8xf32> to vector<2x8xf32>
    %1433 = arith.addf %1429, %1432 : vector<2x8xf32>
    %1434 = vector.extract_strided_slice %1142 {offsets = [10, 0], sizes = [2, 8], strides = [1, 1]} : vector<16x8xf32> to vector<2x8xf32>
    %1435 = arith.addf %1434, %1419 : vector<2x8xf32>
    %1436 = arith.negf %1435 : vector<2x8xf32>
    %1437 = math.exp %1436 : vector<2x8xf32>
    %cst_316 = arith.constant 1.000000e+00 : f32
    %1438 = vector.broadcast %cst_316 : f32 to vector<2x8xf32>
    %1439 = arith.addf %1438, %1437 : vector<2x8xf32>
    %1440 = arith.divf %1438, %1439 : vector<2x8xf32>
    %1441 = vector.extract_strided_slice %1149 {offsets = [10, 0], sizes = [2, 8], strides = [1, 1]} : vector<16x8xf32> to vector<2x8xf32>
    %1442 = arith.addf %1441, %1426 : vector<2x8xf32>
    %1443 = arith.negf %1442 : vector<2x8xf32>
    %1444 = math.exp %1443 : vector<2x8xf32>
    %cst_317 = arith.constant 1.000000e+00 : f32
    %1445 = vector.broadcast %cst_317 : f32 to vector<2x8xf32>
    %1446 = arith.addf %1445, %1444 : vector<2x8xf32>
    %1447 = arith.divf %1445, %1446 : vector<2x8xf32>
    %1448 = vector.extract_strided_slice %1156 {offsets = [10, 0], sizes = [2, 8], strides = [1, 1]} : vector<16x8xf32> to vector<2x8xf32>
    %1449 = arith.mulf %1440, %1433 : vector<2x8xf32>
    %1450 = arith.addf %1448, %1449 : vector<2x8xf32>
    %1451 = math.tanh %1450 : vector<2x8xf32>
    %cst_318 = arith.constant 1.000000e+00 : f32
    %1452 = vector.broadcast %cst_318 : f32 to vector<2x8xf32>
    %1453 = arith.subf %1452, %1447 : vector<2x8xf32>
    %1454 = arith.mulf %1453, %1451 : vector<2x8xf32>
    %1455 = arith.mulf %1447, %1411 : vector<2x8xf32>
    %1456 = arith.addf %1454, %1455 : vector<2x8xf32>
    %1457 = vector.extract_strided_slice %270 {offsets = [10, 0], sizes = [2, 8], strides = [1, 1]} : vector<16x8xf32> to vector<2x8xf32>
    %1458 = arith.mulf %1457, %1456 : vector<2x8xf32>
    %cst_319 = arith.constant 1.000000e+00 : f32
    %1459 = vector.broadcast %cst_319 : f32 to vector<2x8xf32>
    %1460 = arith.subf %1459, %1457 : vector<2x8xf32>
    %1461 = arith.mulf %1460, %1411 : vector<2x8xf32>
    %1462 = arith.addf %1458, %1461 : vector<2x8xf32>
    %1463 = arith.mulf %1457, %1456 : vector<2x8xf32>
    %1464 = vector.extract_strided_slice %1133 {offsets = [0, 0, 0], sizes = [1, 8, 8], strides = [1, 1, 1]} : vector<3x8x8xf32> to vector<1x8x8xf32>
    %1465 = vector.shape_cast %1464 : vector<1x8x8xf32> to vector<8x8xf32>
    %cst_320 = arith.constant dense<0.000000e+00> : vector<2x8xf32>
    %1466 = tpu.matmul %1462, %1465, %cst_320 {dimension_numbers = #tpu.dot_dimension_numbers<[1], [0], [0], [1], [0, 0, 1, 1], [], []>} : vector<2x8xf32>, vector<8x8xf32>, vector<2x8xf32> -> vector<2x8xf32>
    %1467 = vector.extract_strided_slice %1135 {offsets = [0, 0, 0], sizes = [1, 1, 8], strides = [1, 1, 1]} : vector<3x1x8xf32> to vector<1x1x8xf32>
    %1468 = vector.shape_cast %1467 : vector<1x1x8xf32> to vector<1x8xf32>
    %1469 = vector.broadcast %1468 : vector<1x8xf32> to vector<2x8xf32>
    %1470 = arith.addf %1466, %1469 : vector<2x8xf32>
    %1471 = vector.extract_strided_slice %1133 {offsets = [1, 0, 0], sizes = [1, 8, 8], strides = [1, 1, 1]} : vector<3x8x8xf32> to vector<1x8x8xf32>
    %1472 = vector.shape_cast %1471 : vector<1x8x8xf32> to vector<8x8xf32>
    %cst_321 = arith.constant dense<0.000000e+00> : vector<2x8xf32>
    %1473 = tpu.matmul %1462, %1472, %cst_321 {dimension_numbers = #tpu.dot_dimension_numbers<[1], [0], [0], [1], [0, 0, 1, 1], [], []>} : vector<2x8xf32>, vector<8x8xf32>, vector<2x8xf32> -> vector<2x8xf32>
    %1474 = vector.extract_strided_slice %1135 {offsets = [1, 0, 0], sizes = [1, 1, 8], strides = [1, 1, 1]} : vector<3x1x8xf32> to vector<1x1x8xf32>
    %1475 = vector.shape_cast %1474 : vector<1x1x8xf32> to vector<1x8xf32>
    %1476 = vector.broadcast %1475 : vector<1x8xf32> to vector<2x8xf32>
    %1477 = arith.addf %1473, %1476 : vector<2x8xf32>
    %1478 = vector.extract_strided_slice %1133 {offsets = [2, 0, 0], sizes = [1, 8, 8], strides = [1, 1, 1]} : vector<3x8x8xf32> to vector<1x8x8xf32>
    %1479 = vector.shape_cast %1478 : vector<1x8x8xf32> to vector<8x8xf32>
    %cst_322 = arith.constant dense<0.000000e+00> : vector<2x8xf32>
    %1480 = tpu.matmul %1462, %1479, %cst_322 {dimension_numbers = #tpu.dot_dimension_numbers<[1], [0], [0], [1], [0, 0, 1, 1], [], []>} : vector<2x8xf32>, vector<8x8xf32>, vector<2x8xf32> -> vector<2x8xf32>
    %1481 = vector.extract_strided_slice %1135 {offsets = [2, 0, 0], sizes = [1, 1, 8], strides = [1, 1, 1]} : vector<3x1x8xf32> to vector<1x1x8xf32>
    %1482 = vector.shape_cast %1481 : vector<1x1x8xf32> to vector<1x8xf32>
    %1483 = vector.broadcast %1482 : vector<1x8xf32> to vector<2x8xf32>
    %1484 = arith.addf %1480, %1483 : vector<2x8xf32>
    %1485 = vector.extract_strided_slice %1142 {offsets = [12, 0], sizes = [2, 8], strides = [1, 1]} : vector<16x8xf32> to vector<2x8xf32>
    %1486 = arith.addf %1485, %1470 : vector<2x8xf32>
    %1487 = arith.negf %1486 : vector<2x8xf32>
    %1488 = math.exp %1487 : vector<2x8xf32>
    %cst_323 = arith.constant 1.000000e+00 : f32
    %1489 = vector.broadcast %cst_323 : f32 to vector<2x8xf32>
    %1490 = arith.addf %1489, %1488 : vector<2x8xf32>
    %1491 = arith.divf %1489, %1490 : vector<2x8xf32>
    %1492 = vector.extract_strided_slice %1149 {offsets = [12, 0], sizes = [2, 8], strides = [1, 1]} : vector<16x8xf32> to vector<2x8xf32>
    %1493 = arith.addf %1492, %1477 : vector<2x8xf32>
    %1494 = arith.negf %1493 : vector<2x8xf32>
    %1495 = math.exp %1494 : vector<2x8xf32>
    %cst_324 = arith.constant 1.000000e+00 : f32
    %1496 = vector.broadcast %cst_324 : f32 to vector<2x8xf32>
    %1497 = arith.addf %1496, %1495 : vector<2x8xf32>
    %1498 = arith.divf %1496, %1497 : vector<2x8xf32>
    %1499 = vector.extract_strided_slice %1156 {offsets = [12, 0], sizes = [2, 8], strides = [1, 1]} : vector<16x8xf32> to vector<2x8xf32>
    %1500 = arith.mulf %1491, %1484 : vector<2x8xf32>
    %1501 = arith.addf %1499, %1500 : vector<2x8xf32>
    %1502 = math.tanh %1501 : vector<2x8xf32>
    %cst_325 = arith.constant 1.000000e+00 : f32
    %1503 = vector.broadcast %cst_325 : f32 to vector<2x8xf32>
    %1504 = arith.subf %1503, %1498 : vector<2x8xf32>
    %1505 = arith.mulf %1504, %1502 : vector<2x8xf32>
    %1506 = arith.mulf %1498, %1462 : vector<2x8xf32>
    %1507 = arith.addf %1505, %1506 : vector<2x8xf32>
    %1508 = vector.extract_strided_slice %270 {offsets = [12, 0], sizes = [2, 8], strides = [1, 1]} : vector<16x8xf32> to vector<2x8xf32>
    %1509 = arith.mulf %1508, %1507 : vector<2x8xf32>
    %cst_326 = arith.constant 1.000000e+00 : f32
    %1510 = vector.broadcast %cst_326 : f32 to vector<2x8xf32>
    %1511 = arith.subf %1510, %1508 : vector<2x8xf32>
    %1512 = arith.mulf %1511, %1462 : vector<2x8xf32>
    %1513 = arith.addf %1509, %1512 : vector<2x8xf32>
    %1514 = arith.mulf %1508, %1507 : vector<2x8xf32>
    %1515 = vector.extract_strided_slice %1133 {offsets = [0, 0, 0], sizes = [1, 8, 8], strides = [1, 1, 1]} : vector<3x8x8xf32> to vector<1x8x8xf32>
    %1516 = vector.shape_cast %1515 : vector<1x8x8xf32> to vector<8x8xf32>
    %cst_327 = arith.constant dense<0.000000e+00> : vector<2x8xf32>
    %1517 = tpu.matmul %1513, %1516, %cst_327 {dimension_numbers = #tpu.dot_dimension_numbers<[1], [0], [0], [1], [0, 0, 1, 1], [], []>} : vector<2x8xf32>, vector<8x8xf32>, vector<2x8xf32> -> vector<2x8xf32>
    %1518 = vector.extract_strided_slice %1135 {offsets = [0, 0, 0], sizes = [1, 1, 8], strides = [1, 1, 1]} : vector<3x1x8xf32> to vector<1x1x8xf32>
    %1519 = vector.shape_cast %1518 : vector<1x1x8xf32> to vector<1x8xf32>
    %1520 = vector.broadcast %1519 : vector<1x8xf32> to vector<2x8xf32>
    %1521 = arith.addf %1517, %1520 : vector<2x8xf32>
    %1522 = vector.extract_strided_slice %1133 {offsets = [1, 0, 0], sizes = [1, 8, 8], strides = [1, 1, 1]} : vector<3x8x8xf32> to vector<1x8x8xf32>
    %1523 = vector.shape_cast %1522 : vector<1x8x8xf32> to vector<8x8xf32>
    %cst_328 = arith.constant dense<0.000000e+00> : vector<2x8xf32>
    %1524 = tpu.matmul %1513, %1523, %cst_328 {dimension_numbers = #tpu.dot_dimension_numbers<[1], [0], [0], [1], [0, 0, 1, 1], [], []>} : vector<2x8xf32>, vector<8x8xf32>, vector<2x8xf32> -> vector<2x8xf32>
    %1525 = vector.extract_strided_slice %1135 {offsets = [1, 0, 0], sizes = [1, 1, 8], strides = [1, 1, 1]} : vector<3x1x8xf32> to vector<1x1x8xf32>
    %1526 = vector.shape_cast %1525 : vector<1x1x8xf32> to vector<1x8xf32>
    %1527 = vector.broadcast %1526 : vector<1x8xf32> to vector<2x8xf32>
    %1528 = arith.addf %1524, %1527 : vector<2x8xf32>
    %1529 = vector.extract_strided_slice %1133 {offsets = [2, 0, 0], sizes = [1, 8, 8], strides = [1, 1, 1]} : vector<3x8x8xf32> to vector<1x8x8xf32>
    %1530 = vector.shape_cast %1529 : vector<1x8x8xf32> to vector<8x8xf32>
    %cst_329 = arith.constant dense<0.000000e+00> : vector<2x8xf32>
    %1531 = tpu.matmul %1513, %1530, %cst_329 {dimension_numbers = #tpu.dot_dimension_numbers<[1], [0], [0], [1], [0, 0, 1, 1], [], []>} : vector<2x8xf32>, vector<8x8xf32>, vector<2x8xf32> -> vector<2x8xf32>
    %1532 = vector.extract_strided_slice %1135 {offsets = [2, 0, 0], sizes = [1, 1, 8], strides = [1, 1, 1]} : vector<3x1x8xf32> to vector<1x1x8xf32>
    %1533 = vector.shape_cast %1532 : vector<1x1x8xf32> to vector<1x8xf32>
    %1534 = vector.broadcast %1533 : vector<1x8xf32> to vector<2x8xf32>
    %1535 = arith.addf %1531, %1534 : vector<2x8xf32>
    %1536 = vector.extract_strided_slice %1142 {offsets = [14, 0], sizes = [2, 8], strides = [1, 1]} : vector<16x8xf32> to vector<2x8xf32>
    %1537 = arith.addf %1536, %1521 : vector<2x8xf32>
    %1538 = arith.negf %1537 : vector<2x8xf32>
    %1539 = math.exp %1538 : vector<2x8xf32>
    %cst_330 = arith.constant 1.000000e+00 : f32
    %1540 = vector.broadcast %cst_330 : f32 to vector<2x8xf32>
    %1541 = arith.addf %1540, %1539 : vector<2x8xf32>
    %1542 = arith.divf %1540, %1541 : vector<2x8xf32>
    %1543 = vector.extract_strided_slice %1149 {offsets = [14, 0], sizes = [2, 8], strides = [1, 1]} : vector<16x8xf32> to vector<2x8xf32>
    %1544 = arith.addf %1543, %1528 : vector<2x8xf32>
    %1545 = arith.negf %1544 : vector<2x8xf32>
    %1546 = math.exp %1545 : vector<2x8xf32>
    %cst_331 = arith.constant 1.000000e+00 : f32
    %1547 = vector.broadcast %cst_331 : f32 to vector<2x8xf32>
    %1548 = arith.addf %1547, %1546 : vector<2x8xf32>
    %1549 = arith.divf %1547, %1548 : vector<2x8xf32>
    %1550 = vector.extract_strided_slice %1156 {offsets = [14, 0], sizes = [2, 8], strides = [1, 1]} : vector<16x8xf32> to vector<2x8xf32>
    %1551 = arith.mulf %1542, %1535 : vector<2x8xf32>
    %1552 = arith.addf %1550, %1551 : vector<2x8xf32>
    %1553 = math.tanh %1552 : vector<2x8xf32>
    %cst_332 = arith.constant 1.000000e+00 : f32
    %1554 = vector.broadcast %cst_332 : f32 to vector<2x8xf32>
    %1555 = arith.subf %1554, %1549 : vector<2x8xf32>
    %1556 = arith.mulf %1555, %1553 : vector<2x8xf32>
    %1557 = arith.mulf %1549, %1513 : vector<2x8xf32>
    %1558 = arith.addf %1556, %1557 : vector<2x8xf32>
    %1559 = vector.extract_strided_slice %270 {offsets = [14, 0], sizes = [2, 8], strides = [1, 1]} : vector<16x8xf32> to vector<2x8xf32>
    %1560 = arith.mulf %1559, %1558 : vector<2x8xf32>
    %c0_333 = arith.constant 0 : index
    %c0_334 = arith.constant 0 : index
    %c0_335 = arith.constant 0 : index
    %1561 = vector.load %arg23[%c0_333, %c0_334, %c0_335] : memref<3x16x8xf32, #tpu.memory_space<vmem>>, vector<3x16x8xf32>
    %c0_336 = arith.constant 0 : index
    %c0_337 = arith.constant 0 : index
    %c0_338 = arith.constant 0 : index
    %1562 = vector.load %arg24[%c0_336, %c0_337, %c0_338] : memref<3x8x8xf32, #tpu.memory_space<vmem>>, vector<3x8x8xf32>
    %c0_339 = arith.constant 0 : index
    %c0_340 = arith.constant 0 : index
    %c0_341 = arith.constant 0 : index
    %1563 = vector.load %arg25[%c0_339, %c0_340, %c0_341] : memref<3x1x8xf32, #tpu.memory_space<vmem>>, vector<3x1x8xf32>
    %c0_342 = arith.constant 0 : index
    %c0_343 = arith.constant 0 : index
    %c0_344 = arith.constant 0 : index
    %1564 = vector.load %arg26[%c0_342, %c0_343, %c0_344] : memref<3x1x8xf32, #tpu.memory_space<vmem>>, vector<3x1x8xf32>
    %1565 = vector.extract_strided_slice %1561 {offsets = [0, 0, 0], sizes = [1, 16, 8], strides = [1, 1, 1]} : vector<3x16x8xf32> to vector<1x16x8xf32>
    %1566 = vector.shape_cast %1565 : vector<1x16x8xf32> to vector<16x8xf32>
    %cst_345 = arith.constant dense<0.000000e+00> : vector<16x8xf32>
    %1567 = tpu.matmul %1131, %1566, %cst_345 {dimension_numbers = #tpu.dot_dimension_numbers<[1], [0], [0], [1], [0, 0, 1, 1], [], []>} : vector<16x16xf32>, vector<16x8xf32>, vector<16x8xf32> -> vector<16x8xf32>
    %1568 = vector.extract_strided_slice %1563 {offsets = [0, 0, 0], sizes = [1, 1, 8], strides = [1, 1, 1]} : vector<3x1x8xf32> to vector<1x1x8xf32>
    %1569 = vector.shape_cast %1568 : vector<1x1x8xf32> to vector<1x8xf32>
    %1570 = vector.broadcast %1569 : vector<1x8xf32> to vector<16x8xf32>
    %1571 = arith.addf %1567, %1570 : vector<16x8xf32>
    %1572 = vector.extract_strided_slice %1561 {offsets = [1, 0, 0], sizes = [1, 16, 8], strides = [1, 1, 1]} : vector<3x16x8xf32> to vector<1x16x8xf32>
    %1573 = vector.shape_cast %1572 : vector<1x16x8xf32> to vector<16x8xf32>
    %cst_346 = arith.constant dense<0.000000e+00> : vector<16x8xf32>
    %1574 = tpu.matmul %1131, %1573, %cst_346 {dimension_numbers = #tpu.dot_dimension_numbers<[1], [0], [0], [1], [0, 0, 1, 1], [], []>} : vector<16x16xf32>, vector<16x8xf32>, vector<16x8xf32> -> vector<16x8xf32>
    %1575 = vector.extract_strided_slice %1563 {offsets = [1, 0, 0], sizes = [1, 1, 8], strides = [1, 1, 1]} : vector<3x1x8xf32> to vector<1x1x8xf32>
    %1576 = vector.shape_cast %1575 : vector<1x1x8xf32> to vector<1x8xf32>
    %1577 = vector.broadcast %1576 : vector<1x8xf32> to vector<16x8xf32>
    %1578 = arith.addf %1574, %1577 : vector<16x8xf32>
    %1579 = vector.extract_strided_slice %1561 {offsets = [2, 0, 0], sizes = [1, 16, 8], strides = [1, 1, 1]} : vector<3x16x8xf32> to vector<1x16x8xf32>
    %1580 = vector.shape_cast %1579 : vector<1x16x8xf32> to vector<16x8xf32>
    %cst_347 = arith.constant dense<0.000000e+00> : vector<16x8xf32>
    %1581 = tpu.matmul %1131, %1580, %cst_347 {dimension_numbers = #tpu.dot_dimension_numbers<[1], [0], [0], [1], [0, 0, 1, 1], [], []>} : vector<16x16xf32>, vector<16x8xf32>, vector<16x8xf32> -> vector<16x8xf32>
    %1582 = vector.extract_strided_slice %1563 {offsets = [2, 0, 0], sizes = [1, 1, 8], strides = [1, 1, 1]} : vector<3x1x8xf32> to vector<1x1x8xf32>
    %1583 = vector.shape_cast %1582 : vector<1x1x8xf32> to vector<1x8xf32>
    %1584 = vector.broadcast %1583 : vector<1x8xf32> to vector<16x8xf32>
    %1585 = arith.addf %1581, %1584 : vector<16x8xf32>
    %cst_348 = arith.constant 0.000000e+00 : f32
    %1586 = vector.broadcast %cst_348 : f32 to vector<2x8xf32>
    %1587 = vector.extract_strided_slice %1562 {offsets = [0, 0, 0], sizes = [1, 8, 8], strides = [1, 1, 1]} : vector<3x8x8xf32> to vector<1x8x8xf32>
    %1588 = vector.shape_cast %1587 : vector<1x8x8xf32> to vector<8x8xf32>
    %cst_349 = arith.constant dense<0.000000e+00> : vector<2x8xf32>
    %1589 = tpu.matmul %1586, %1588, %cst_349 {dimension_numbers = #tpu.dot_dimension_numbers<[1], [0], [0], [1], [0, 0, 1, 1], [], []>} : vector<2x8xf32>, vector<8x8xf32>, vector<2x8xf32> -> vector<2x8xf32>
    %1590 = vector.extract_strided_slice %1564 {offsets = [0, 0, 0], sizes = [1, 1, 8], strides = [1, 1, 1]} : vector<3x1x8xf32> to vector<1x1x8xf32>
    %1591 = vector.shape_cast %1590 : vector<1x1x8xf32> to vector<1x8xf32>
    %1592 = vector.broadcast %1591 : vector<1x8xf32> to vector<2x8xf32>
    %1593 = arith.addf %1589, %1592 : vector<2x8xf32>
    %1594 = vector.extract_strided_slice %1562 {offsets = [1, 0, 0], sizes = [1, 8, 8], strides = [1, 1, 1]} : vector<3x8x8xf32> to vector<1x8x8xf32>
    %1595 = vector.shape_cast %1594 : vector<1x8x8xf32> to vector<8x8xf32>
    %cst_350 = arith.constant dense<0.000000e+00> : vector<2x8xf32>
    %1596 = tpu.matmul %1586, %1595, %cst_350 {dimension_numbers = #tpu.dot_dimension_numbers<[1], [0], [0], [1], [0, 0, 1, 1], [], []>} : vector<2x8xf32>, vector<8x8xf32>, vector<2x8xf32> -> vector<2x8xf32>
    %1597 = vector.extract_strided_slice %1564 {offsets = [1, 0, 0], sizes = [1, 1, 8], strides = [1, 1, 1]} : vector<3x1x8xf32> to vector<1x1x8xf32>
    %1598 = vector.shape_cast %1597 : vector<1x1x8xf32> to vector<1x8xf32>
    %1599 = vector.broadcast %1598 : vector<1x8xf32> to vector<2x8xf32>
    %1600 = arith.addf %1596, %1599 : vector<2x8xf32>
    %1601 = vector.extract_strided_slice %1562 {offsets = [2, 0, 0], sizes = [1, 8, 8], strides = [1, 1, 1]} : vector<3x8x8xf32> to vector<1x8x8xf32>
    %1602 = vector.shape_cast %1601 : vector<1x8x8xf32> to vector<8x8xf32>
    %cst_351 = arith.constant dense<0.000000e+00> : vector<2x8xf32>
    %1603 = tpu.matmul %1586, %1602, %cst_351 {dimension_numbers = #tpu.dot_dimension_numbers<[1], [0], [0], [1], [0, 0, 1, 1], [], []>} : vector<2x8xf32>, vector<8x8xf32>, vector<2x8xf32> -> vector<2x8xf32>
    %1604 = vector.extract_strided_slice %1564 {offsets = [2, 0, 0], sizes = [1, 1, 8], strides = [1, 1, 1]} : vector<3x1x8xf32> to vector<1x1x8xf32>
    %1605 = vector.shape_cast %1604 : vector<1x1x8xf32> to vector<1x8xf32>
    %1606 = vector.broadcast %1605 : vector<1x8xf32> to vector<2x8xf32>
    %1607 = arith.addf %1603, %1606 : vector<2x8xf32>
    %1608 = vector.extract_strided_slice %1571 {offsets = [14, 0], sizes = [2, 8], strides = [1, 1]} : vector<16x8xf32> to vector<2x8xf32>
    %1609 = arith.addf %1608, %1593 : vector<2x8xf32>
    %1610 = arith.negf %1609 : vector<2x8xf32>
    %1611 = math.exp %1610 : vector<2x8xf32>
    %cst_352 = arith.constant 1.000000e+00 : f32
    %1612 = vector.broadcast %cst_352 : f32 to vector<2x8xf32>
    %1613 = arith.addf %1612, %1611 : vector<2x8xf32>
    %1614 = arith.divf %1612, %1613 : vector<2x8xf32>
    %1615 = vector.extract_strided_slice %1578 {offsets = [14, 0], sizes = [2, 8], strides = [1, 1]} : vector<16x8xf32> to vector<2x8xf32>
    %1616 = arith.addf %1615, %1600 : vector<2x8xf32>
    %1617 = arith.negf %1616 : vector<2x8xf32>
    %1618 = math.exp %1617 : vector<2x8xf32>
    %cst_353 = arith.constant 1.000000e+00 : f32
    %1619 = vector.broadcast %cst_353 : f32 to vector<2x8xf32>
    %1620 = arith.addf %1619, %1618 : vector<2x8xf32>
    %1621 = arith.divf %1619, %1620 : vector<2x8xf32>
    %1622 = vector.extract_strided_slice %1585 {offsets = [14, 0], sizes = [2, 8], strides = [1, 1]} : vector<16x8xf32> to vector<2x8xf32>
    %1623 = arith.mulf %1614, %1607 : vector<2x8xf32>
    %1624 = arith.addf %1622, %1623 : vector<2x8xf32>
    %1625 = math.tanh %1624 : vector<2x8xf32>
    %cst_354 = arith.constant 1.000000e+00 : f32
    %1626 = vector.broadcast %cst_354 : f32 to vector<2x8xf32>
    %1627 = arith.subf %1626, %1621 : vector<2x8xf32>
    %1628 = arith.mulf %1627, %1625 : vector<2x8xf32>
    %1629 = arith.mulf %1621, %1586 : vector<2x8xf32>
    %1630 = arith.addf %1628, %1629 : vector<2x8xf32>
    %1631 = vector.extract_strided_slice %270 {offsets = [14, 0], sizes = [2, 8], strides = [1, 1]} : vector<16x8xf32> to vector<2x8xf32>
    %1632 = arith.mulf %1631, %1630 : vector<2x8xf32>
    %cst_355 = arith.constant 1.000000e+00 : f32
    %1633 = vector.broadcast %cst_355 : f32 to vector<2x8xf32>
    %1634 = arith.subf %1633, %1631 : vector<2x8xf32>
    %1635 = arith.mulf %1634, %1586 : vector<2x8xf32>
    %1636 = arith.addf %1632, %1635 : vector<2x8xf32>
    %1637 = arith.mulf %1631, %1630 : vector<2x8xf32>
    %1638 = vector.extract_strided_slice %1562 {offsets = [0, 0, 0], sizes = [1, 8, 8], strides = [1, 1, 1]} : vector<3x8x8xf32> to vector<1x8x8xf32>
    %1639 = vector.shape_cast %1638 : vector<1x8x8xf32> to vector<8x8xf32>
    %cst_356 = arith.constant dense<0.000000e+00> : vector<2x8xf32>
    %1640 = tpu.matmul %1636, %1639, %cst_356 {dimension_numbers = #tpu.dot_dimension_numbers<[1], [0], [0], [1], [0, 0, 1, 1], [], []>} : vector<2x8xf32>, vector<8x8xf32>, vector<2x8xf32> -> vector<2x8xf32>
    %1641 = vector.extract_strided_slice %1564 {offsets = [0, 0, 0], sizes = [1, 1, 8], strides = [1, 1, 1]} : vector<3x1x8xf32> to vector<1x1x8xf32>
    %1642 = vector.shape_cast %1641 : vector<1x1x8xf32> to vector<1x8xf32>
    %1643 = vector.broadcast %1642 : vector<1x8xf32> to vector<2x8xf32>
    %1644 = arith.addf %1640, %1643 : vector<2x8xf32>
    %1645 = vector.extract_strided_slice %1562 {offsets = [1, 0, 0], sizes = [1, 8, 8], strides = [1, 1, 1]} : vector<3x8x8xf32> to vector<1x8x8xf32>
    %1646 = vector.shape_cast %1645 : vector<1x8x8xf32> to vector<8x8xf32>
    %cst_357 = arith.constant dense<0.000000e+00> : vector<2x8xf32>
    %1647 = tpu.matmul %1636, %1646, %cst_357 {dimension_numbers = #tpu.dot_dimension_numbers<[1], [0], [0], [1], [0, 0, 1, 1], [], []>} : vector<2x8xf32>, vector<8x8xf32>, vector<2x8xf32> -> vector<2x8xf32>
    %1648 = vector.extract_strided_slice %1564 {offsets = [1, 0, 0], sizes = [1, 1, 8], strides = [1, 1, 1]} : vector<3x1x8xf32> to vector<1x1x8xf32>
    %1649 = vector.shape_cast %1648 : vector<1x1x8xf32> to vector<1x8xf32>
    %1650 = vector.broadcast %1649 : vector<1x8xf32> to vector<2x8xf32>
    %1651 = arith.addf %1647, %1650 : vector<2x8xf32>
    %1652 = vector.extract_strided_slice %1562 {offsets = [2, 0, 0], sizes = [1, 8, 8], strides = [1, 1, 1]} : vector<3x8x8xf32> to vector<1x8x8xf32>
    %1653 = vector.shape_cast %1652 : vector<1x8x8xf32> to vector<8x8xf32>
    %cst_358 = arith.constant dense<0.000000e+00> : vector<2x8xf32>
    %1654 = tpu.matmul %1636, %1653, %cst_358 {dimension_numbers = #tpu.dot_dimension_numbers<[1], [0], [0], [1], [0, 0, 1, 1], [], []>} : vector<2x8xf32>, vector<8x8xf32>, vector<2x8xf32> -> vector<2x8xf32>
    %1655 = vector.extract_strided_slice %1564 {offsets = [2, 0, 0], sizes = [1, 1, 8], strides = [1, 1, 1]} : vector<3x1x8xf32> to vector<1x1x8xf32>
    %1656 = vector.shape_cast %1655 : vector<1x1x8xf32> to vector<1x8xf32>
    %1657 = vector.broadcast %1656 : vector<1x8xf32> to vector<2x8xf32>
    %1658 = arith.addf %1654, %1657 : vector<2x8xf32>
    %1659 = vector.extract_strided_slice %1571 {offsets = [12, 0], sizes = [2, 8], strides = [1, 1]} : vector<16x8xf32> to vector<2x8xf32>
    %1660 = arith.addf %1659, %1644 : vector<2x8xf32>
    %1661 = arith.negf %1660 : vector<2x8xf32>
    %1662 = math.exp %1661 : vector<2x8xf32>
    %cst_359 = arith.constant 1.000000e+00 : f32
    %1663 = vector.broadcast %cst_359 : f32 to vector<2x8xf32>
    %1664 = arith.addf %1663, %1662 : vector<2x8xf32>
    %1665 = arith.divf %1663, %1664 : vector<2x8xf32>
    %1666 = vector.extract_strided_slice %1578 {offsets = [12, 0], sizes = [2, 8], strides = [1, 1]} : vector<16x8xf32> to vector<2x8xf32>
    %1667 = arith.addf %1666, %1651 : vector<2x8xf32>
    %1668 = arith.negf %1667 : vector<2x8xf32>
    %1669 = math.exp %1668 : vector<2x8xf32>
    %cst_360 = arith.constant 1.000000e+00 : f32
    %1670 = vector.broadcast %cst_360 : f32 to vector<2x8xf32>
    %1671 = arith.addf %1670, %1669 : vector<2x8xf32>
    %1672 = arith.divf %1670, %1671 : vector<2x8xf32>
    %1673 = vector.extract_strided_slice %1585 {offsets = [12, 0], sizes = [2, 8], strides = [1, 1]} : vector<16x8xf32> to vector<2x8xf32>
    %1674 = arith.mulf %1665, %1658 : vector<2x8xf32>
    %1675 = arith.addf %1673, %1674 : vector<2x8xf32>
    %1676 = math.tanh %1675 : vector<2x8xf32>
    %cst_361 = arith.constant 1.000000e+00 : f32
    %1677 = vector.broadcast %cst_361 : f32 to vector<2x8xf32>
    %1678 = arith.subf %1677, %1672 : vector<2x8xf32>
    %1679 = arith.mulf %1678, %1676 : vector<2x8xf32>
    %1680 = arith.mulf %1672, %1636 : vector<2x8xf32>
    %1681 = arith.addf %1679, %1680 : vector<2x8xf32>
    %1682 = vector.extract_strided_slice %270 {offsets = [12, 0], sizes = [2, 8], strides = [1, 1]} : vector<16x8xf32> to vector<2x8xf32>
    %1683 = arith.mulf %1682, %1681 : vector<2x8xf32>
    %cst_362 = arith.constant 1.000000e+00 : f32
    %1684 = vector.broadcast %cst_362 : f32 to vector<2x8xf32>
    %1685 = arith.subf %1684, %1682 : vector<2x8xf32>
    %1686 = arith.mulf %1685, %1636 : vector<2x8xf32>
    %1687 = arith.addf %1683, %1686 : vector<2x8xf32>
    %1688 = arith.mulf %1682, %1681 : vector<2x8xf32>
    %1689 = vector.extract_strided_slice %1562 {offsets = [0, 0, 0], sizes = [1, 8, 8], strides = [1, 1, 1]} : vector<3x8x8xf32> to vector<1x8x8xf32>
    %1690 = vector.shape_cast %1689 : vector<1x8x8xf32> to vector<8x8xf32>
    %cst_363 = arith.constant dense<0.000000e+00> : vector<2x8xf32>
    %1691 = tpu.matmul %1687, %1690, %cst_363 {dimension_numbers = #tpu.dot_dimension_numbers<[1], [0], [0], [1], [0, 0, 1, 1], [], []>} : vector<2x8xf32>, vector<8x8xf32>, vector<2x8xf32> -> vector<2x8xf32>
    %1692 = vector.extract_strided_slice %1564 {offsets = [0, 0, 0], sizes = [1, 1, 8], strides = [1, 1, 1]} : vector<3x1x8xf32> to vector<1x1x8xf32>
    %1693 = vector.shape_cast %1692 : vector<1x1x8xf32> to vector<1x8xf32>
    %1694 = vector.broadcast %1693 : vector<1x8xf32> to vector<2x8xf32>
    %1695 = arith.addf %1691, %1694 : vector<2x8xf32>
    %1696 = vector.extract_strided_slice %1562 {offsets = [1, 0, 0], sizes = [1, 8, 8], strides = [1, 1, 1]} : vector<3x8x8xf32> to vector<1x8x8xf32>
    %1697 = vector.shape_cast %1696 : vector<1x8x8xf32> to vector<8x8xf32>
    %cst_364 = arith.constant dense<0.000000e+00> : vector<2x8xf32>
    %1698 = tpu.matmul %1687, %1697, %cst_364 {dimension_numbers = #tpu.dot_dimension_numbers<[1], [0], [0], [1], [0, 0, 1, 1], [], []>} : vector<2x8xf32>, vector<8x8xf32>, vector<2x8xf32> -> vector<2x8xf32>
    %1699 = vector.extract_strided_slice %1564 {offsets = [1, 0, 0], sizes = [1, 1, 8], strides = [1, 1, 1]} : vector<3x1x8xf32> to vector<1x1x8xf32>
    %1700 = vector.shape_cast %1699 : vector<1x1x8xf32> to vector<1x8xf32>
    %1701 = vector.broadcast %1700 : vector<1x8xf32> to vector<2x8xf32>
    %1702 = arith.addf %1698, %1701 : vector<2x8xf32>
    %1703 = vector.extract_strided_slice %1562 {offsets = [2, 0, 0], sizes = [1, 8, 8], strides = [1, 1, 1]} : vector<3x8x8xf32> to vector<1x8x8xf32>
    %1704 = vector.shape_cast %1703 : vector<1x8x8xf32> to vector<8x8xf32>
    %cst_365 = arith.constant dense<0.000000e+00> : vector<2x8xf32>
    %1705 = tpu.matmul %1687, %1704, %cst_365 {dimension_numbers = #tpu.dot_dimension_numbers<[1], [0], [0], [1], [0, 0, 1, 1], [], []>} : vector<2x8xf32>, vector<8x8xf32>, vector<2x8xf32> -> vector<2x8xf32>
    %1706 = vector.extract_strided_slice %1564 {offsets = [2, 0, 0], sizes = [1, 1, 8], strides = [1, 1, 1]} : vector<3x1x8xf32> to vector<1x1x8xf32>
    %1707 = vector.shape_cast %1706 : vector<1x1x8xf32> to vector<1x8xf32>
    %1708 = vector.broadcast %1707 : vector<1x8xf32> to vector<2x8xf32>
    %1709 = arith.addf %1705, %1708 : vector<2x8xf32>
    %1710 = vector.extract_strided_slice %1571 {offsets = [10, 0], sizes = [2, 8], strides = [1, 1]} : vector<16x8xf32> to vector<2x8xf32>
    %1711 = arith.addf %1710, %1695 : vector<2x8xf32>
    %1712 = arith.negf %1711 : vector<2x8xf32>
    %1713 = math.exp %1712 : vector<2x8xf32>
    %cst_366 = arith.constant 1.000000e+00 : f32
    %1714 = vector.broadcast %cst_366 : f32 to vector<2x8xf32>
    %1715 = arith.addf %1714, %1713 : vector<2x8xf32>
    %1716 = arith.divf %1714, %1715 : vector<2x8xf32>
    %1717 = vector.extract_strided_slice %1578 {offsets = [10, 0], sizes = [2, 8], strides = [1, 1]} : vector<16x8xf32> to vector<2x8xf32>
    %1718 = arith.addf %1717, %1702 : vector<2x8xf32>
    %1719 = arith.negf %1718 : vector<2x8xf32>
    %1720 = math.exp %1719 : vector<2x8xf32>
    %cst_367 = arith.constant 1.000000e+00 : f32
    %1721 = vector.broadcast %cst_367 : f32 to vector<2x8xf32>
    %1722 = arith.addf %1721, %1720 : vector<2x8xf32>
    %1723 = arith.divf %1721, %1722 : vector<2x8xf32>
    %1724 = vector.extract_strided_slice %1585 {offsets = [10, 0], sizes = [2, 8], strides = [1, 1]} : vector<16x8xf32> to vector<2x8xf32>
    %1725 = arith.mulf %1716, %1709 : vector<2x8xf32>
    %1726 = arith.addf %1724, %1725 : vector<2x8xf32>
    %1727 = math.tanh %1726 : vector<2x8xf32>
    %cst_368 = arith.constant 1.000000e+00 : f32
    %1728 = vector.broadcast %cst_368 : f32 to vector<2x8xf32>
    %1729 = arith.subf %1728, %1723 : vector<2x8xf32>
    %1730 = arith.mulf %1729, %1727 : vector<2x8xf32>
    %1731 = arith.mulf %1723, %1687 : vector<2x8xf32>
    %1732 = arith.addf %1730, %1731 : vector<2x8xf32>
    %1733 = vector.extract_strided_slice %270 {offsets = [10, 0], sizes = [2, 8], strides = [1, 1]} : vector<16x8xf32> to vector<2x8xf32>
    %1734 = arith.mulf %1733, %1732 : vector<2x8xf32>
    %cst_369 = arith.constant 1.000000e+00 : f32
    %1735 = vector.broadcast %cst_369 : f32 to vector<2x8xf32>
    %1736 = arith.subf %1735, %1733 : vector<2x8xf32>
    %1737 = arith.mulf %1736, %1687 : vector<2x8xf32>
    %1738 = arith.addf %1734, %1737 : vector<2x8xf32>
    %1739 = arith.mulf %1733, %1732 : vector<2x8xf32>
    %1740 = vector.extract_strided_slice %1562 {offsets = [0, 0, 0], sizes = [1, 8, 8], strides = [1, 1, 1]} : vector<3x8x8xf32> to vector<1x8x8xf32>
    %1741 = vector.shape_cast %1740 : vector<1x8x8xf32> to vector<8x8xf32>
    %cst_370 = arith.constant dense<0.000000e+00> : vector<2x8xf32>
    %1742 = tpu.matmul %1738, %1741, %cst_370 {dimension_numbers = #tpu.dot_dimension_numbers<[1], [0], [0], [1], [0, 0, 1, 1], [], []>} : vector<2x8xf32>, vector<8x8xf32>, vector<2x8xf32> -> vector<2x8xf32>
    %1743 = vector.extract_strided_slice %1564 {offsets = [0, 0, 0], sizes = [1, 1, 8], strides = [1, 1, 1]} : vector<3x1x8xf32> to vector<1x1x8xf32>
    %1744 = vector.shape_cast %1743 : vector<1x1x8xf32> to vector<1x8xf32>
    %1745 = vector.broadcast %1744 : vector<1x8xf32> to vector<2x8xf32>
    %1746 = arith.addf %1742, %1745 : vector<2x8xf32>
    %1747 = vector.extract_strided_slice %1562 {offsets = [1, 0, 0], sizes = [1, 8, 8], strides = [1, 1, 1]} : vector<3x8x8xf32> to vector<1x8x8xf32>
    %1748 = vector.shape_cast %1747 : vector<1x8x8xf32> to vector<8x8xf32>
    %cst_371 = arith.constant dense<0.000000e+00> : vector<2x8xf32>
    %1749 = tpu.matmul %1738, %1748, %cst_371 {dimension_numbers = #tpu.dot_dimension_numbers<[1], [0], [0], [1], [0, 0, 1, 1], [], []>} : vector<2x8xf32>, vector<8x8xf32>, vector<2x8xf32> -> vector<2x8xf32>
    %1750 = vector.extract_strided_slice %1564 {offsets = [1, 0, 0], sizes = [1, 1, 8], strides = [1, 1, 1]} : vector<3x1x8xf32> to vector<1x1x8xf32>
    %1751 = vector.shape_cast %1750 : vector<1x1x8xf32> to vector<1x8xf32>
    %1752 = vector.broadcast %1751 : vector<1x8xf32> to vector<2x8xf32>
    %1753 = arith.addf %1749, %1752 : vector<2x8xf32>
    %1754 = vector.extract_strided_slice %1562 {offsets = [2, 0, 0], sizes = [1, 8, 8], strides = [1, 1, 1]} : vector<3x8x8xf32> to vector<1x8x8xf32>
    %1755 = vector.shape_cast %1754 : vector<1x8x8xf32> to vector<8x8xf32>
    %cst_372 = arith.constant dense<0.000000e+00> : vector<2x8xf32>
    %1756 = tpu.matmul %1738, %1755, %cst_372 {dimension_numbers = #tpu.dot_dimension_numbers<[1], [0], [0], [1], [0, 0, 1, 1], [], []>} : vector<2x8xf32>, vector<8x8xf32>, vector<2x8xf32> -> vector<2x8xf32>
    %1757 = vector.extract_strided_slice %1564 {offsets = [2, 0, 0], sizes = [1, 1, 8], strides = [1, 1, 1]} : vector<3x1x8xf32> to vector<1x1x8xf32>
    %1758 = vector.shape_cast %1757 : vector<1x1x8xf32> to vector<1x8xf32>
    %1759 = vector.broadcast %1758 : vector<1x8xf32> to vector<2x8xf32>
    %1760 = arith.addf %1756, %1759 : vector<2x8xf32>
    %1761 = vector.extract_strided_slice %1571 {offsets = [8, 0], sizes = [2, 8], strides = [1, 1]} : vector<16x8xf32> to vector<2x8xf32>
    %1762 = arith.addf %1761, %1746 : vector<2x8xf32>
    %1763 = arith.negf %1762 : vector<2x8xf32>
    %1764 = math.exp %1763 : vector<2x8xf32>
    %cst_373 = arith.constant 1.000000e+00 : f32
    %1765 = vector.broadcast %cst_373 : f32 to vector<2x8xf32>
    %1766 = arith.addf %1765, %1764 : vector<2x8xf32>
    %1767 = arith.divf %1765, %1766 : vector<2x8xf32>
    %1768 = vector.extract_strided_slice %1578 {offsets = [8, 0], sizes = [2, 8], strides = [1, 1]} : vector<16x8xf32> to vector<2x8xf32>
    %1769 = arith.addf %1768, %1753 : vector<2x8xf32>
    %1770 = arith.negf %1769 : vector<2x8xf32>
    %1771 = math.exp %1770 : vector<2x8xf32>
    %cst_374 = arith.constant 1.000000e+00 : f32
    %1772 = vector.broadcast %cst_374 : f32 to vector<2x8xf32>
    %1773 = arith.addf %1772, %1771 : vector<2x8xf32>
    %1774 = arith.divf %1772, %1773 : vector<2x8xf32>
    %1775 = vector.extract_strided_slice %1585 {offsets = [8, 0], sizes = [2, 8], strides = [1, 1]} : vector<16x8xf32> to vector<2x8xf32>
    %1776 = arith.mulf %1767, %1760 : vector<2x8xf32>
    %1777 = arith.addf %1775, %1776 : vector<2x8xf32>
    %1778 = math.tanh %1777 : vector<2x8xf32>
    %cst_375 = arith.constant 1.000000e+00 : f32
    %1779 = vector.broadcast %cst_375 : f32 to vector<2x8xf32>
    %1780 = arith.subf %1779, %1774 : vector<2x8xf32>
    %1781 = arith.mulf %1780, %1778 : vector<2x8xf32>
    %1782 = arith.mulf %1774, %1738 : vector<2x8xf32>
    %1783 = arith.addf %1781, %1782 : vector<2x8xf32>
    %1784 = vector.extract_strided_slice %270 {offsets = [8, 0], sizes = [2, 8], strides = [1, 1]} : vector<16x8xf32> to vector<2x8xf32>
    %1785 = arith.mulf %1784, %1783 : vector<2x8xf32>
    %cst_376 = arith.constant 1.000000e+00 : f32
    %1786 = vector.broadcast %cst_376 : f32 to vector<2x8xf32>
    %1787 = arith.subf %1786, %1784 : vector<2x8xf32>
    %1788 = arith.mulf %1787, %1738 : vector<2x8xf32>
    %1789 = arith.addf %1785, %1788 : vector<2x8xf32>
    %1790 = arith.mulf %1784, %1783 : vector<2x8xf32>
    %1791 = vector.extract_strided_slice %1562 {offsets = [0, 0, 0], sizes = [1, 8, 8], strides = [1, 1, 1]} : vector<3x8x8xf32> to vector<1x8x8xf32>
    %1792 = vector.shape_cast %1791 : vector<1x8x8xf32> to vector<8x8xf32>
    %cst_377 = arith.constant dense<0.000000e+00> : vector<2x8xf32>
    %1793 = tpu.matmul %1789, %1792, %cst_377 {dimension_numbers = #tpu.dot_dimension_numbers<[1], [0], [0], [1], [0, 0, 1, 1], [], []>} : vector<2x8xf32>, vector<8x8xf32>, vector<2x8xf32> -> vector<2x8xf32>
    %1794 = vector.extract_strided_slice %1564 {offsets = [0, 0, 0], sizes = [1, 1, 8], strides = [1, 1, 1]} : vector<3x1x8xf32> to vector<1x1x8xf32>
    %1795 = vector.shape_cast %1794 : vector<1x1x8xf32> to vector<1x8xf32>
    %1796 = vector.broadcast %1795 : vector<1x8xf32> to vector<2x8xf32>
    %1797 = arith.addf %1793, %1796 : vector<2x8xf32>
    %1798 = vector.extract_strided_slice %1562 {offsets = [1, 0, 0], sizes = [1, 8, 8], strides = [1, 1, 1]} : vector<3x8x8xf32> to vector<1x8x8xf32>
    %1799 = vector.shape_cast %1798 : vector<1x8x8xf32> to vector<8x8xf32>
    %cst_378 = arith.constant dense<0.000000e+00> : vector<2x8xf32>
    %1800 = tpu.matmul %1789, %1799, %cst_378 {dimension_numbers = #tpu.dot_dimension_numbers<[1], [0], [0], [1], [0, 0, 1, 1], [], []>} : vector<2x8xf32>, vector<8x8xf32>, vector<2x8xf32> -> vector<2x8xf32>
    %1801 = vector.extract_strided_slice %1564 {offsets = [1, 0, 0], sizes = [1, 1, 8], strides = [1, 1, 1]} : vector<3x1x8xf32> to vector<1x1x8xf32>
    %1802 = vector.shape_cast %1801 : vector<1x1x8xf32> to vector<1x8xf32>
    %1803 = vector.broadcast %1802 : vector<1x8xf32> to vector<2x8xf32>
    %1804 = arith.addf %1800, %1803 : vector<2x8xf32>
    %1805 = vector.extract_strided_slice %1562 {offsets = [2, 0, 0], sizes = [1, 8, 8], strides = [1, 1, 1]} : vector<3x8x8xf32> to vector<1x8x8xf32>
    %1806 = vector.shape_cast %1805 : vector<1x8x8xf32> to vector<8x8xf32>
    %cst_379 = arith.constant dense<0.000000e+00> : vector<2x8xf32>
    %1807 = tpu.matmul %1789, %1806, %cst_379 {dimension_numbers = #tpu.dot_dimension_numbers<[1], [0], [0], [1], [0, 0, 1, 1], [], []>} : vector<2x8xf32>, vector<8x8xf32>, vector<2x8xf32> -> vector<2x8xf32>
    %1808 = vector.extract_strided_slice %1564 {offsets = [2, 0, 0], sizes = [1, 1, 8], strides = [1, 1, 1]} : vector<3x1x8xf32> to vector<1x1x8xf32>
    %1809 = vector.shape_cast %1808 : vector<1x1x8xf32> to vector<1x8xf32>
    %1810 = vector.broadcast %1809 : vector<1x8xf32> to vector<2x8xf32>
    %1811 = arith.addf %1807, %1810 : vector<2x8xf32>
    %1812 = vector.extract_strided_slice %1571 {offsets = [6, 0], sizes = [2, 8], strides = [1, 1]} : vector<16x8xf32> to vector<2x8xf32>
    %1813 = arith.addf %1812, %1797 : vector<2x8xf32>
    %1814 = arith.negf %1813 : vector<2x8xf32>
    %1815 = math.exp %1814 : vector<2x8xf32>
    %cst_380 = arith.constant 1.000000e+00 : f32
    %1816 = vector.broadcast %cst_380 : f32 to vector<2x8xf32>
    %1817 = arith.addf %1816, %1815 : vector<2x8xf32>
    %1818 = arith.divf %1816, %1817 : vector<2x8xf32>
    %1819 = vector.extract_strided_slice %1578 {offsets = [6, 0], sizes = [2, 8], strides = [1, 1]} : vector<16x8xf32> to vector<2x8xf32>
    %1820 = arith.addf %1819, %1804 : vector<2x8xf32>
    %1821 = arith.negf %1820 : vector<2x8xf32>
    %1822 = math.exp %1821 : vector<2x8xf32>
    %cst_381 = arith.constant 1.000000e+00 : f32
    %1823 = vector.broadcast %cst_381 : f32 to vector<2x8xf32>
    %1824 = arith.addf %1823, %1822 : vector<2x8xf32>
    %1825 = arith.divf %1823, %1824 : vector<2x8xf32>
    %1826 = vector.extract_strided_slice %1585 {offsets = [6, 0], sizes = [2, 8], strides = [1, 1]} : vector<16x8xf32> to vector<2x8xf32>
    %1827 = arith.mulf %1818, %1811 : vector<2x8xf32>
    %1828 = arith.addf %1826, %1827 : vector<2x8xf32>
    %1829 = math.tanh %1828 : vector<2x8xf32>
    %cst_382 = arith.constant 1.000000e+00 : f32
    %1830 = vector.broadcast %cst_382 : f32 to vector<2x8xf32>
    %1831 = arith.subf %1830, %1825 : vector<2x8xf32>
    %1832 = arith.mulf %1831, %1829 : vector<2x8xf32>
    %1833 = arith.mulf %1825, %1789 : vector<2x8xf32>
    %1834 = arith.addf %1832, %1833 : vector<2x8xf32>
    %1835 = vector.extract_strided_slice %270 {offsets = [6, 0], sizes = [2, 8], strides = [1, 1]} : vector<16x8xf32> to vector<2x8xf32>
    %1836 = arith.mulf %1835, %1834 : vector<2x8xf32>
    %cst_383 = arith.constant 1.000000e+00 : f32
    %1837 = vector.broadcast %cst_383 : f32 to vector<2x8xf32>
    %1838 = arith.subf %1837, %1835 : vector<2x8xf32>
    %1839 = arith.mulf %1838, %1789 : vector<2x8xf32>
    %1840 = arith.addf %1836, %1839 : vector<2x8xf32>
    %1841 = arith.mulf %1835, %1834 : vector<2x8xf32>
    %1842 = vector.extract_strided_slice %1562 {offsets = [0, 0, 0], sizes = [1, 8, 8], strides = [1, 1, 1]} : vector<3x8x8xf32> to vector<1x8x8xf32>
    %1843 = vector.shape_cast %1842 : vector<1x8x8xf32> to vector<8x8xf32>
    %cst_384 = arith.constant dense<0.000000e+00> : vector<2x8xf32>
    %1844 = tpu.matmul %1840, %1843, %cst_384 {dimension_numbers = #tpu.dot_dimension_numbers<[1], [0], [0], [1], [0, 0, 1, 1], [], []>} : vector<2x8xf32>, vector<8x8xf32>, vector<2x8xf32> -> vector<2x8xf32>
    %1845 = vector.extract_strided_slice %1564 {offsets = [0, 0, 0], sizes = [1, 1, 8], strides = [1, 1, 1]} : vector<3x1x8xf32> to vector<1x1x8xf32>
    %1846 = vector.shape_cast %1845 : vector<1x1x8xf32> to vector<1x8xf32>
    %1847 = vector.broadcast %1846 : vector<1x8xf32> to vector<2x8xf32>
    %1848 = arith.addf %1844, %1847 : vector<2x8xf32>
    %1849 = vector.extract_strided_slice %1562 {offsets = [1, 0, 0], sizes = [1, 8, 8], strides = [1, 1, 1]} : vector<3x8x8xf32> to vector<1x8x8xf32>
    %1850 = vector.shape_cast %1849 : vector<1x8x8xf32> to vector<8x8xf32>
    %cst_385 = arith.constant dense<0.000000e+00> : vector<2x8xf32>
    %1851 = tpu.matmul %1840, %1850, %cst_385 {dimension_numbers = #tpu.dot_dimension_numbers<[1], [0], [0], [1], [0, 0, 1, 1], [], []>} : vector<2x8xf32>, vector<8x8xf32>, vector<2x8xf32> -> vector<2x8xf32>
    %1852 = vector.extract_strided_slice %1564 {offsets = [1, 0, 0], sizes = [1, 1, 8], strides = [1, 1, 1]} : vector<3x1x8xf32> to vector<1x1x8xf32>
    %1853 = vector.shape_cast %1852 : vector<1x1x8xf32> to vector<1x8xf32>
    %1854 = vector.broadcast %1853 : vector<1x8xf32> to vector<2x8xf32>
    %1855 = arith.addf %1851, %1854 : vector<2x8xf32>
    %1856 = vector.extract_strided_slice %1562 {offsets = [2, 0, 0], sizes = [1, 8, 8], strides = [1, 1, 1]} : vector<3x8x8xf32> to vector<1x8x8xf32>
    %1857 = vector.shape_cast %1856 : vector<1x8x8xf32> to vector<8x8xf32>
    %cst_386 = arith.constant dense<0.000000e+00> : vector<2x8xf32>
    %1858 = tpu.matmul %1840, %1857, %cst_386 {dimension_numbers = #tpu.dot_dimension_numbers<[1], [0], [0], [1], [0, 0, 1, 1], [], []>} : vector<2x8xf32>, vector<8x8xf32>, vector<2x8xf32> -> vector<2x8xf32>
    %1859 = vector.extract_strided_slice %1564 {offsets = [2, 0, 0], sizes = [1, 1, 8], strides = [1, 1, 1]} : vector<3x1x8xf32> to vector<1x1x8xf32>
    %1860 = vector.shape_cast %1859 : vector<1x1x8xf32> to vector<1x8xf32>
    %1861 = vector.broadcast %1860 : vector<1x8xf32> to vector<2x8xf32>
    %1862 = arith.addf %1858, %1861 : vector<2x8xf32>
    %1863 = vector.extract_strided_slice %1571 {offsets = [4, 0], sizes = [2, 8], strides = [1, 1]} : vector<16x8xf32> to vector<2x8xf32>
    %1864 = arith.addf %1863, %1848 : vector<2x8xf32>
    %1865 = arith.negf %1864 : vector<2x8xf32>
    %1866 = math.exp %1865 : vector<2x8xf32>
    %cst_387 = arith.constant 1.000000e+00 : f32
    %1867 = vector.broadcast %cst_387 : f32 to vector<2x8xf32>
    %1868 = arith.addf %1867, %1866 : vector<2x8xf32>
    %1869 = arith.divf %1867, %1868 : vector<2x8xf32>
    %1870 = vector.extract_strided_slice %1578 {offsets = [4, 0], sizes = [2, 8], strides = [1, 1]} : vector<16x8xf32> to vector<2x8xf32>
    %1871 = arith.addf %1870, %1855 : vector<2x8xf32>
    %1872 = arith.negf %1871 : vector<2x8xf32>
    %1873 = math.exp %1872 : vector<2x8xf32>
    %cst_388 = arith.constant 1.000000e+00 : f32
    %1874 = vector.broadcast %cst_388 : f32 to vector<2x8xf32>
    %1875 = arith.addf %1874, %1873 : vector<2x8xf32>
    %1876 = arith.divf %1874, %1875 : vector<2x8xf32>
    %1877 = vector.extract_strided_slice %1585 {offsets = [4, 0], sizes = [2, 8], strides = [1, 1]} : vector<16x8xf32> to vector<2x8xf32>
    %1878 = arith.mulf %1869, %1862 : vector<2x8xf32>
    %1879 = arith.addf %1877, %1878 : vector<2x8xf32>
    %1880 = math.tanh %1879 : vector<2x8xf32>
    %cst_389 = arith.constant 1.000000e+00 : f32
    %1881 = vector.broadcast %cst_389 : f32 to vector<2x8xf32>
    %1882 = arith.subf %1881, %1876 : vector<2x8xf32>
    %1883 = arith.mulf %1882, %1880 : vector<2x8xf32>
    %1884 = arith.mulf %1876, %1840 : vector<2x8xf32>
    %1885 = arith.addf %1883, %1884 : vector<2x8xf32>
    %1886 = vector.extract_strided_slice %270 {offsets = [4, 0], sizes = [2, 8], strides = [1, 1]} : vector<16x8xf32> to vector<2x8xf32>
    %1887 = arith.mulf %1886, %1885 : vector<2x8xf32>
    %cst_390 = arith.constant 1.000000e+00 : f32
    %1888 = vector.broadcast %cst_390 : f32 to vector<2x8xf32>
    %1889 = arith.subf %1888, %1886 : vector<2x8xf32>
    %1890 = arith.mulf %1889, %1840 : vector<2x8xf32>
    %1891 = arith.addf %1887, %1890 : vector<2x8xf32>
    %1892 = arith.mulf %1886, %1885 : vector<2x8xf32>
    %1893 = vector.extract_strided_slice %1562 {offsets = [0, 0, 0], sizes = [1, 8, 8], strides = [1, 1, 1]} : vector<3x8x8xf32> to vector<1x8x8xf32>
    %1894 = vector.shape_cast %1893 : vector<1x8x8xf32> to vector<8x8xf32>
    %cst_391 = arith.constant dense<0.000000e+00> : vector<2x8xf32>
    %1895 = tpu.matmul %1891, %1894, %cst_391 {dimension_numbers = #tpu.dot_dimension_numbers<[1], [0], [0], [1], [0, 0, 1, 1], [], []>} : vector<2x8xf32>, vector<8x8xf32>, vector<2x8xf32> -> vector<2x8xf32>
    %1896 = vector.extract_strided_slice %1564 {offsets = [0, 0, 0], sizes = [1, 1, 8], strides = [1, 1, 1]} : vector<3x1x8xf32> to vector<1x1x8xf32>
    %1897 = vector.shape_cast %1896 : vector<1x1x8xf32> to vector<1x8xf32>
    %1898 = vector.broadcast %1897 : vector<1x8xf32> to vector<2x8xf32>
    %1899 = arith.addf %1895, %1898 : vector<2x8xf32>
    %1900 = vector.extract_strided_slice %1562 {offsets = [1, 0, 0], sizes = [1, 8, 8], strides = [1, 1, 1]} : vector<3x8x8xf32> to vector<1x8x8xf32>
    %1901 = vector.shape_cast %1900 : vector<1x8x8xf32> to vector<8x8xf32>
    %cst_392 = arith.constant dense<0.000000e+00> : vector<2x8xf32>
    %1902 = tpu.matmul %1891, %1901, %cst_392 {dimension_numbers = #tpu.dot_dimension_numbers<[1], [0], [0], [1], [0, 0, 1, 1], [], []>} : vector<2x8xf32>, vector<8x8xf32>, vector<2x8xf32> -> vector<2x8xf32>
    %1903 = vector.extract_strided_slice %1564 {offsets = [1, 0, 0], sizes = [1, 1, 8], strides = [1, 1, 1]} : vector<3x1x8xf32> to vector<1x1x8xf32>
    %1904 = vector.shape_cast %1903 : vector<1x1x8xf32> to vector<1x8xf32>
    %1905 = vector.broadcast %1904 : vector<1x8xf32> to vector<2x8xf32>
    %1906 = arith.addf %1902, %1905 : vector<2x8xf32>
    %1907 = vector.extract_strided_slice %1562 {offsets = [2, 0, 0], sizes = [1, 8, 8], strides = [1, 1, 1]} : vector<3x8x8xf32> to vector<1x8x8xf32>
    %1908 = vector.shape_cast %1907 : vector<1x8x8xf32> to vector<8x8xf32>
    %cst_393 = arith.constant dense<0.000000e+00> : vector<2x8xf32>
    %1909 = tpu.matmul %1891, %1908, %cst_393 {dimension_numbers = #tpu.dot_dimension_numbers<[1], [0], [0], [1], [0, 0, 1, 1], [], []>} : vector<2x8xf32>, vector<8x8xf32>, vector<2x8xf32> -> vector<2x8xf32>
    %1910 = vector.extract_strided_slice %1564 {offsets = [2, 0, 0], sizes = [1, 1, 8], strides = [1, 1, 1]} : vector<3x1x8xf32> to vector<1x1x8xf32>
    %1911 = vector.shape_cast %1910 : vector<1x1x8xf32> to vector<1x8xf32>
    %1912 = vector.broadcast %1911 : vector<1x8xf32> to vector<2x8xf32>
    %1913 = arith.addf %1909, %1912 : vector<2x8xf32>
    %1914 = vector.extract_strided_slice %1571 {offsets = [2, 0], sizes = [2, 8], strides = [1, 1]} : vector<16x8xf32> to vector<2x8xf32>
    %1915 = arith.addf %1914, %1899 : vector<2x8xf32>
    %1916 = arith.negf %1915 : vector<2x8xf32>
    %1917 = math.exp %1916 : vector<2x8xf32>
    %cst_394 = arith.constant 1.000000e+00 : f32
    %1918 = vector.broadcast %cst_394 : f32 to vector<2x8xf32>
    %1919 = arith.addf %1918, %1917 : vector<2x8xf32>
    %1920 = arith.divf %1918, %1919 : vector<2x8xf32>
    %1921 = vector.extract_strided_slice %1578 {offsets = [2, 0], sizes = [2, 8], strides = [1, 1]} : vector<16x8xf32> to vector<2x8xf32>
    %1922 = arith.addf %1921, %1906 : vector<2x8xf32>
    %1923 = arith.negf %1922 : vector<2x8xf32>
    %1924 = math.exp %1923 : vector<2x8xf32>
    %cst_395 = arith.constant 1.000000e+00 : f32
    %1925 = vector.broadcast %cst_395 : f32 to vector<2x8xf32>
    %1926 = arith.addf %1925, %1924 : vector<2x8xf32>
    %1927 = arith.divf %1925, %1926 : vector<2x8xf32>
    %1928 = vector.extract_strided_slice %1585 {offsets = [2, 0], sizes = [2, 8], strides = [1, 1]} : vector<16x8xf32> to vector<2x8xf32>
    %1929 = arith.mulf %1920, %1913 : vector<2x8xf32>
    %1930 = arith.addf %1928, %1929 : vector<2x8xf32>
    %1931 = math.tanh %1930 : vector<2x8xf32>
    %cst_396 = arith.constant 1.000000e+00 : f32
    %1932 = vector.broadcast %cst_396 : f32 to vector<2x8xf32>
    %1933 = arith.subf %1932, %1927 : vector<2x8xf32>
    %1934 = arith.mulf %1933, %1931 : vector<2x8xf32>
    %1935 = arith.mulf %1927, %1891 : vector<2x8xf32>
    %1936 = arith.addf %1934, %1935 : vector<2x8xf32>
    %1937 = vector.extract_strided_slice %270 {offsets = [2, 0], sizes = [2, 8], strides = [1, 1]} : vector<16x8xf32> to vector<2x8xf32>
    %1938 = arith.mulf %1937, %1936 : vector<2x8xf32>
    %cst_397 = arith.constant 1.000000e+00 : f32
    %1939 = vector.broadcast %cst_397 : f32 to vector<2x8xf32>
    %1940 = arith.subf %1939, %1937 : vector<2x8xf32>
    %1941 = arith.mulf %1940, %1891 : vector<2x8xf32>
    %1942 = arith.addf %1938, %1941 : vector<2x8xf32>
    %1943 = arith.mulf %1937, %1936 : vector<2x8xf32>
    %1944 = vector.extract_strided_slice %1562 {offsets = [0, 0, 0], sizes = [1, 8, 8], strides = [1, 1, 1]} : vector<3x8x8xf32> to vector<1x8x8xf32>
    %1945 = vector.shape_cast %1944 : vector<1x8x8xf32> to vector<8x8xf32>
    %cst_398 = arith.constant dense<0.000000e+00> : vector<2x8xf32>
    %1946 = tpu.matmul %1942, %1945, %cst_398 {dimension_numbers = #tpu.dot_dimension_numbers<[1], [0], [0], [1], [0, 0, 1, 1], [], []>} : vector<2x8xf32>, vector<8x8xf32>, vector<2x8xf32> -> vector<2x8xf32>
    %1947 = vector.extract_strided_slice %1564 {offsets = [0, 0, 0], sizes = [1, 1, 8], strides = [1, 1, 1]} : vector<3x1x8xf32> to vector<1x1x8xf32>
    %1948 = vector.shape_cast %1947 : vector<1x1x8xf32> to vector<1x8xf32>
    %1949 = vector.broadcast %1948 : vector<1x8xf32> to vector<2x8xf32>
    %1950 = arith.addf %1946, %1949 : vector<2x8xf32>
    %1951 = vector.extract_strided_slice %1562 {offsets = [1, 0, 0], sizes = [1, 8, 8], strides = [1, 1, 1]} : vector<3x8x8xf32> to vector<1x8x8xf32>
    %1952 = vector.shape_cast %1951 : vector<1x8x8xf32> to vector<8x8xf32>
    %cst_399 = arith.constant dense<0.000000e+00> : vector<2x8xf32>
    %1953 = tpu.matmul %1942, %1952, %cst_399 {dimension_numbers = #tpu.dot_dimension_numbers<[1], [0], [0], [1], [0, 0, 1, 1], [], []>} : vector<2x8xf32>, vector<8x8xf32>, vector<2x8xf32> -> vector<2x8xf32>
    %1954 = vector.extract_strided_slice %1564 {offsets = [1, 0, 0], sizes = [1, 1, 8], strides = [1, 1, 1]} : vector<3x1x8xf32> to vector<1x1x8xf32>
    %1955 = vector.shape_cast %1954 : vector<1x1x8xf32> to vector<1x8xf32>
    %1956 = vector.broadcast %1955 : vector<1x8xf32> to vector<2x8xf32>
    %1957 = arith.addf %1953, %1956 : vector<2x8xf32>
    %1958 = vector.extract_strided_slice %1562 {offsets = [2, 0, 0], sizes = [1, 8, 8], strides = [1, 1, 1]} : vector<3x8x8xf32> to vector<1x8x8xf32>
    %1959 = vector.shape_cast %1958 : vector<1x8x8xf32> to vector<8x8xf32>
    %cst_400 = arith.constant dense<0.000000e+00> : vector<2x8xf32>
    %1960 = tpu.matmul %1942, %1959, %cst_400 {dimension_numbers = #tpu.dot_dimension_numbers<[1], [0], [0], [1], [0, 0, 1, 1], [], []>} : vector<2x8xf32>, vector<8x8xf32>, vector<2x8xf32> -> vector<2x8xf32>
    %1961 = vector.extract_strided_slice %1564 {offsets = [2, 0, 0], sizes = [1, 1, 8], strides = [1, 1, 1]} : vector<3x1x8xf32> to vector<1x1x8xf32>
    %1962 = vector.shape_cast %1961 : vector<1x1x8xf32> to vector<1x8xf32>
    %1963 = vector.broadcast %1962 : vector<1x8xf32> to vector<2x8xf32>
    %1964 = arith.addf %1960, %1963 : vector<2x8xf32>
    %1965 = vector.extract_strided_slice %1571 {offsets = [0, 0], sizes = [2, 8], strides = [1, 1]} : vector<16x8xf32> to vector<2x8xf32>
    %1966 = arith.addf %1965, %1950 : vector<2x8xf32>
    %1967 = arith.negf %1966 : vector<2x8xf32>
    %1968 = math.exp %1967 : vector<2x8xf32>
    %cst_401 = arith.constant 1.000000e+00 : f32
    %1969 = vector.broadcast %cst_401 : f32 to vector<2x8xf32>
    %1970 = arith.addf %1969, %1968 : vector<2x8xf32>
    %1971 = arith.divf %1969, %1970 : vector<2x8xf32>
    %1972 = vector.extract_strided_slice %1578 {offsets = [0, 0], sizes = [2, 8], strides = [1, 1]} : vector<16x8xf32> to vector<2x8xf32>
    %1973 = arith.addf %1972, %1957 : vector<2x8xf32>
    %1974 = arith.negf %1973 : vector<2x8xf32>
    %1975 = math.exp %1974 : vector<2x8xf32>
    %cst_402 = arith.constant 1.000000e+00 : f32
    %1976 = vector.broadcast %cst_402 : f32 to vector<2x8xf32>
    %1977 = arith.addf %1976, %1975 : vector<2x8xf32>
    %1978 = arith.divf %1976, %1977 : vector<2x8xf32>
    %1979 = vector.extract_strided_slice %1585 {offsets = [0, 0], sizes = [2, 8], strides = [1, 1]} : vector<16x8xf32> to vector<2x8xf32>
    %1980 = arith.mulf %1971, %1964 : vector<2x8xf32>
    %1981 = arith.addf %1979, %1980 : vector<2x8xf32>
    %1982 = math.tanh %1981 : vector<2x8xf32>
    %cst_403 = arith.constant 1.000000e+00 : f32
    %1983 = vector.broadcast %cst_403 : f32 to vector<2x8xf32>
    %1984 = arith.subf %1983, %1978 : vector<2x8xf32>
    %1985 = arith.mulf %1984, %1982 : vector<2x8xf32>
    %1986 = arith.mulf %1978, %1942 : vector<2x8xf32>
    %1987 = arith.addf %1985, %1986 : vector<2x8xf32>
    %1988 = vector.extract_strided_slice %270 {offsets = [0, 0], sizes = [2, 8], strides = [1, 1]} : vector<16x8xf32> to vector<2x8xf32>
    %1989 = arith.mulf %1988, %1987 : vector<2x8xf32>
    %1990 = tpu.concatenate %1208, %1989 in 1 : vector<2x8xf32>, vector<2x8xf32> -> vector<2x16xf32>
    %1991 = tpu.concatenate %1259, %1943 in 1 : vector<2x8xf32>, vector<2x8xf32> -> vector<2x16xf32>
    %1992 = tpu.concatenate %1310, %1892 in 1 : vector<2x8xf32>, vector<2x8xf32> -> vector<2x16xf32>
    %1993 = tpu.concatenate %1361, %1841 in 1 : vector<2x8xf32>, vector<2x8xf32> -> vector<2x16xf32>
    %1994 = tpu.concatenate %1412, %1790 in 1 : vector<2x8xf32>, vector<2x8xf32> -> vector<2x16xf32>
    %1995 = tpu.concatenate %1463, %1739 in 1 : vector<2x8xf32>, vector<2x8xf32> -> vector<2x16xf32>
    %1996 = tpu.concatenate %1514, %1688 in 1 : vector<2x8xf32>, vector<2x8xf32> -> vector<2x16xf32>
    %1997 = tpu.concatenate %1560, %1637 in 1 : vector<2x8xf32>, vector<2x8xf32> -> vector<2x16xf32>
    %1998 = vector.shape_cast %1990 : vector<2x16xf32> to vector<2x1x16xf32>
    %1999 = vector.shape_cast %1991 : vector<2x16xf32> to vector<2x1x16xf32>
    %2000 = vector.shape_cast %1992 : vector<2x16xf32> to vector<2x1x16xf32>
    %2001 = vector.shape_cast %1993 : vector<2x16xf32> to vector<2x1x16xf32>
    %2002 = vector.shape_cast %1994 : vector<2x16xf32> to vector<2x1x16xf32>
    %2003 = vector.shape_cast %1995 : vector<2x16xf32> to vector<2x1x16xf32>
    %2004 = vector.shape_cast %1996 : vector<2x16xf32> to vector<2x1x16xf32>
    %2005 = vector.shape_cast %1997 : vector<2x16xf32> to vector<2x1x16xf32>
    %2006 = tpu.concatenate %1998, %1999, %2000, %2001, %2002, %2003, %2004, %2005 in 1 : vector<2x1x16xf32>, vector<2x1x16xf32>, vector<2x1x16xf32>, vector<2x1x16xf32>, vector<2x1x16xf32>, vector<2x1x16xf32>, vector<2x1x16xf32>, vector<2x1x16xf32> -> vector<2x8x16xf32>
    %c0_404 = arith.constant 0 : index
    %c0_405 = arith.constant 0 : index
    %c0_406 = arith.constant 0 : index
    %2007 = vector.load %arg27[%c0_404, %c0_405, %c0_406] : memref<2x8x16xf32, #tpu.memory_space<vmem>>, vector<2x8x16xf32>
    tpu.vector_store %arg27[%c0_404, %c0_405, %c0_406], %2006 {strides = array<i32>} : memref<2x8x16xf32, #tpu.memory_space<vmem>>, vector<2x8x16xf32>,
    return
  }
}

</mosaic_0001>

<bundles_post_ra>
// kernel: tpu_custom_call.1
= control target key start
LH: loop header
LB: loop body
LE: loop exit
PB: predicated region body
PF: predicated region fallthrough
CT: control target
= control target key end

     0   :  { %s21451_s0 = inlined_call_operand.vmem [shape: f32[264,16], index: 0, kind: input, shape index: {}]   ;;  %s21452_s1 = inlined_call_operand.vmem [shape: f32[16,1], index: 1, kind: input, shape index: {}]   ;;  %s21453_s2 = inlined_call_operand.vmem [shape: f32[16,8], index: 2, kind: input, shape index: {}]   ;;  %s21454_s3 = inlined_call_operand.vmem [shape: f32[3,16,8], index: 3, kind: input, shape index: {}]   ;;  %s21455_s4 = inlined_call_operand.vmem [shape: f32[1,8], index: 4, kind: input, shape index: {}]   ;;  %s21456_s5 = inlined_call_operand.vmem [shape: f32[4,16,8], index: 5, kind: input, shape index: {}]   ;;  %s21457_s6 = inlined_call_operand.vmem [shape: f32[1,8], index: 6, kind: input, shape index: {}]   ;;  %s21458_s7 = inlined_call_operand.vmem [shape: f32[5,16,8], index: 7, kind: input, shape index: {}]   ;;  %s21459_s8 = inlined_call_operand.vmem [shape: f32[1,8], index: 8, kind: input, shape index: {}]   ;;  %s21460_s9 = inlined_call_operand.vmem [shape: f32[24,24], index: 9, kind: input, shape index: {}]   ;;  %s21461_s10 = inlined_call_operand.vmem [shape: f32[1,24], index: 10, kind: input, shape index: {}]   ;;  %s21462_s11 = inlined_call_operand.vmem [shape: f32[3,24,8], index: 11, kind: input, shape index: {}]   ;;  %s21463_s12 = inlined_call_operand.vmem [shape: f32[3,8,8], index: 12, kind: input, shape index: {}]   ;;  %s21464_s13 = inlined_call_operand.vmem [shape: f32[3,1,8], index: 13, kind: input, shape index: {}]   ;;  %s21465_s14 = inlined_call_operand.vmem [shape: f32[3,1,8], index: 14, kind: input, shape index: {}]   ;;  %s21466_s15 = inlined_call_operand.vmem [shape: f32[3,24,8], index: 15, kind: input, shape index: {}]   ;;  %s21467_s16 = inlined_call_operand.vmem [shape: f32[3,8,8], index: 16, kind: input, shape index: {}]   ;;  %s21468_s17 = inlined_call_operand.vmem [shape: f32[3,1,8], index: 17, kind: input, shape index: {}]   ;;  %s21469_s18 = inlined_call_operand.vmem [shape: f32[3,1,8], index: 18, kind: input, shape index: {}]   ;;  %s21470_s19 = inlined_call_operand.vmem [shape: f32[3,16,8], index: 19, kind: input, shape index: {}]   ;;  %s21471_s20 = inlined_call_operand.vmem [shape: f32[3,8,8], index: 20, kind: input, shape index: {}]   ;;  %s21472_s21 = inlined_call_operand.vmem [shape: f32[3,1,8], index: 21, kind: input, shape index: {}]   ;;  %s21473_s22 = inlined_call_operand.vmem [shape: f32[3,1,8], index: 22, kind: input, shape index: {}]   ;;  %s21474_s23 = inlined_call_operand.vmem [shape: f32[3,16,8], index: 23, kind: input, shape index: {}]   ;;  %s21475_s24 = inlined_call_operand.vmem [shape: f32[3,8,8], index: 24, kind: input, shape index: {}]   ;;  %s21476_s25 = inlined_call_operand.vmem [shape: f32[3,1,8], index: 25, kind: input, shape index: {}]   ;;  %s21477_s26 = inlined_call_operand.vmem [shape: f32[3,1,8], index: 26, kind: input, shape index: {}]   ;;  %s21478_s27 = inlined_call_operand.hbm [shape: f32[2,8,16], index: 27, kind: output, shape index: {}]  }
   0x1   :  { %21534 = sst [smem:[#allocation41_spill]] %s21451_s0 }
   0x2   :  { %21535 = sst [smem:[#allocation42_spill]] %s21452_s1 }
   0x3   :  { %21536 = sst [smem:[#allocation43_spill]] %s21453_s2 }
   0x4   :  { %21537 = sst [smem:[#allocation44_spill]] %s21454_s3 }
   0x5   :  { %21538 = sst [smem:[#allocation45_spill]] %s21455_s4 }
   0x6   :  { %21539 = sst [smem:[#allocation46_spill]] %s21456_s5 }
   0x7   :  { %21540 = sst [smem:[#allocation47_spill]] %s21457_s6 }
   0x8   :  { %21541 = sst [smem:[#allocation48_spill]] %s21458_s7 }
   0x9   :  { %21542 = sst [smem:[#allocation49_spill]] %s21459_s8 }
   0xa   :  { %21543 = sst [smem:[#allocation50_spill]] %s21460_s9 }
   0xb   :  { %21544 = sst [smem:[#allocation51_spill]] %s21461_s10 }
   0xc   :  { %21545 = sst [smem:[#allocation52_spill]] %s21462_s11 }
   0xd   :  { %s21546_s8 = sld [smem:[#allocation44_spill]]  ;;  %s21547_s0 = sld [smem:[#allocation41_spill]]  ;;  %vm231_vm0 = vcmask 130048  }
  0x13   :  { %v162_v0 = vld [vmem:[%s21546_s8 + $0x10] sm:$0xff]  ;;  %v163_v1 = vld [vmem:[%s21546_s8 + $0x18] sm:$0xff]  ;;  %v17776_v2 = vld [vmem:[%s21547_s0 + $0x1] sm:$0xff] }
  0x14   :  { %v16778_v3 = vpack.c.bf16 %v163_v1, %v162_v0  ;;  %15567 = vmatprep.mubr.msk.f32.mxu0 %vm231_vm0, %v17776_v2  ;;  %v160_v4 = vld [vmem:[%s21546_s8] sm:$0xff]  ;;  %v161_v5 = vld [vmem:[%s21546_s8 + $0x8] sm:$0xff]  ;;  %v17794_v8 = vld [vmem:[%s21547_s0 + $0x11] sm:$0xff] }
  0x15   :  { %v16782_v6 = vpack.c.bf16 %v161_v5, %v160_v4  ;;  %v17789_v7 = vld [vmem:[%s21547_s0 + $0x9] sm:$0xff]  ;;  %v17803_v9 = vld [vmem:[%s21547_s0 + $0x19] sm:$0xff]  ;;  %v17808_v10 = vld [vmem:[%s21547_s0 + $0x21] sm:$0xff] }
  0x16   :  { %16779 = vmatprep.subr.bf16.mxu0 %v16778_v3  ;;  %v17817_v11 = vld [vmem:[%s21547_s0 + $0x29] sm:$0xff]  ;;  %v164_v12 = vld [vmem:[%s21546_s8 + $0x20] sm:$0xff]  ;;  %v17825_v13 = vld [vmem:[%s21547_s0 + $0x31] sm:$0xff] }
  0x17   :  { %16781 = vmatpush3.bf16.msra.mxu0 %v16778_v3  ;;  %v165_v14 = vld [vmem:[%s21546_s8 + $0x28] sm:$0xff]  ;;  %v17839_v16 = vld [vmem:[%s21547_s0 + $0x39] sm:$0xff]  ;;  %v17859_v19 = vld [vmem:[%s21547_s0 + $0x51] sm:$0xff] }
  0x18   :  { %16783 = vmatprep.subr.bf16.mxu0 %v16782_v6  ;;  %v17830_v15 = vpack.c.bf16 %v165_v14, %v164_v12  ;;  %v17845_v17 = vld [vmem:[%s21547_s0 + $0x41] sm:$0xff]  ;;  %v17854_v18 = vld [vmem:[%s21547_s0 + $0x49] sm:$0xff]  ;;  %v17868_v20 = vld [vmem:[%s21547_s0 + $0x59] sm:$0xff] }
  0x19   :  { %v17873_v21 = vld [vmem:[%s21547_s0 + $0x61] sm:$0xff] }
  0x1a   :  { %15568 = vmatmul.mubr.msk.f32.vlgmr.msra.gmra.mrb[0].mxu0 %vm231_vm0, %v17789_v7 }
  0x1b   :  { %16785 = vmatpush3.bf16.msra.mxu0 %v16782_v6  ;;  %15570 = vmatprep.mubr.msk.f32.mxu0 %vm231_vm0, %v17794_v8 }
  0x1c   :  { %16787 = vmatprep.subr.bf16.mxu0 %v17830_v15 }
  0x1e   :  { %15571 = vmatmul.mubr.msk.f32.gmra.mrb[2].mxu0 %vm231_vm0, %v17803_v9 }
  0x1f   :  { %15573 = vmatprep.mubr.msk.f32.mxu0 %vm231_vm0, %v17808_v10 }
  0x22   :  { %15574 = vmatmul.mubr.msk.f32.gmra.mrb[4].mxu0 %vm231_vm0, %v17817_v11 }
  0x23   :  { %15576 = vmatprep.mubr.msk.f32.mxu0 %vm231_vm0, %v17825_v13 }
  0x26   :  { %15577 = vmatmul.mubr.msk.f32.gmra.mrb[6].mxu0 %vm231_vm0, %v17839_v16 }
  0x27   :  { %15579 = vmatprep.mubr.msk.f32.mxu0 %vm231_vm0, %v17845_v17 }
  0x2a   :  { %15580 = vmatmul.mubr.msk.f32.gmra.mrb[8].mxu0 %vm231_vm0, %v17854_v18 }
  0x2b   :  { %15582 = vmatprep.mubr.msk.f32.mxu0 %vm231_vm0, %v17859_v19 }
  0x2e   :  { %15583 = vmatmul.mubr.msk.f32.gmra.mrb[10].mxu0 %vm231_vm0, %v17868_v20 }
  0x2f   :  { %32 = vsyncpa [#allocation3], 0  ;;  %15585 = vmatprep.mubr.msk.f32.mxu0 %vm231_vm0, %v17873_v21  ;;  %v17882_v22 = vld [vmem:[%s21547_s0 + $0x69] sm:$0xff]  ;;  %v17887_v23 = vld [vmem:[%s21547_s0 + $0x71] sm:$0xff]  ;;  %s21548_s2 = sld [smem:[#allocation48_spill]]  ;;  %s21585_s11 = sld [smem:[#allocation50_spill]] }
  0x30   :  { %v17896_v24 = vld [vmem:[%s21547_s0 + $0x79] sm:$0xff]  ;;  %v17901_v25 = vld [vmem:[%s21547_s0 + $0x81] sm:$0xff]  ;;  %v17910_v26 = vld [vmem:[%s21547_s0 + $0x89] sm:$0xff]  ;;  %s21586_s4 = sld [smem:[#allocation46_spill]]  ;;  %s21603_s1 = sld [smem:[#allocation45_spill]]  ;;  %vm1425_vm4 = vcmask 64512  }
  0x31   :  { %v17915_v27 = vld [vmem:[%s21547_s0 + $0x91] sm:$0xff]  ;;  %v17924_v28 = vld [vmem:[%s21547_s0 + $0x99] sm:$0xff]  ;;  %v17929_v29 = vld [vmem:[%s21547_s0 + $0xa1] sm:$0xff]  ;;  %vm1570_vm14 = vcmask 1040384   ;;  %s21645_s9 = sld [smem:[#allocation42_spill]]  ;;  %s21674_s8 = sld [smem:[#allocation43_spill]] }
  0x32   :  { %15586 = vmatmul.mubr.msk.f32.gmra.mrb[12].mxu0 %vm231_vm0, %v17882_v22  ;;  %v17938_v30 = vld [vmem:[%s21547_s0 + $0xa9] sm:$0xff]  ;;  %v17943_v31 = vld [vmem:[%s21547_s0 + $0xb1] sm:$0xff]  ;;  %v17952_v32 = vld [vmem:[%s21547_s0 + $0xb9] sm:$0xff]  ;;  %s17623_s6 = smov 8  }
  0x33   :  { %15588 = vmatprep.mubr.msk.f32.mxu0 %vm231_vm0, %v17887_v23  ;;  %v17957_v33 = vld [vmem:[%s21547_s0 + $0xc1] sm:$0xff]  ;;  %v17966_v34 = vld [vmem:[%s21547_s0 + $0xc9] sm:$0xff]  ;;  %v17971_v35 = vld [vmem:[%s21547_s0 + $0xd1] sm:$0xff] }
  0x34   :  { %v17980_v36 = vld [vmem:[%s21547_s0 + $0xd9] sm:$0xff]  ;;  %v17985_v37 = vld [vmem:[%s21547_s0 + $0xe1] sm:$0xff]  ;;  %v17994_v38 = vld [vmem:[%s21547_s0 + $0xe9] sm:$0xff] }
  0x35   :  { %v17999_v39 = vld [vmem:[%s21547_s0 + $0xf1] sm:$0xff]  ;;  %v18008_v40 = vld [vmem:[%s21547_s0 + $0xf9] sm:$0xff]  ;;  %v18028_v44 = vld [vmem:[%s21547_s0 + $0x8] sm:$0xff] }
  0x36   :  { %15589 = vmatmul.mubr.msk.f32.gmra.mrb[14].mxu0 %vm231_vm0, %v17896_v24  ;;  %v18013_v41 = vld [vmem:[%s21547_s0] sm:$0xff]  ;;  %v3186_v42 = vld [vmem:[%s21548_s2 + $0x10] sm:$0xff]  ;;  %v3187_v43 = vld [vmem:[%s21548_s2 + $0x18] sm:$0xff] }
  0x37   :  { %15591 = vmatprep.mubr.msk.f32.mxu0 %vm231_vm0, %v17901_v25  ;;  %v18033_v45 = vld [vmem:[%s21547_s0 + $0x10] sm:$0xff]  ;;  %v18035_v46 = vpack.c.bf16 %v3187_v43, %v3186_v42  ;;  %v18045_v47 = vld [vmem:[%s21547_s0 + $0x18] sm:$0xff]  ;;  %v18050_v48 = vld [vmem:[%s21547_s0 + $0x20] sm:$0xff] }
  0x38   :  { %v18060_v49 = vld [vmem:[%s21547_s0 + $0x28] sm:$0xff]  ;;  %v18065_v50 = vld [vmem:[%s21547_s0 + $0x30] sm:$0xff]  ;;  %v18074_v51 = vld [vmem:[%s21547_s0 + $0x38] sm:$0xff] }
  0x39   :  { %v18079_v52 = vld [vmem:[%s21547_s0 + $0x40] sm:$0xff]  ;;  %v18088_v53 = vld [vmem:[%s21547_s0 + $0x48] sm:$0xff]  ;;  %v18093_v54 = vld [vmem:[%s21547_s0 + $0x50] sm:$0xff] }
  0x3a   :  { %15592 = vmatmul.mubr.msk.f32.gmra.mrb[16].mxu0 %vm231_vm0, %v17910_v26  ;;  %v18102_v55 = vld [vmem:[%s21547_s0 + $0x58] sm:$0xff]  ;;  %v18107_v56 = vld [vmem:[%s21547_s0 + $0x60] sm:$0xff]  ;;  %v18116_v57 = vld [vmem:[%s21547_s0 + $0x68] sm:$0xff] }
  0x3b   :  { %15594 = vmatprep.mubr.msk.f32.mxu0 %vm231_vm0, %v17915_v27  ;;  %v18121_v58 = vld [vmem:[%s21547_s0 + $0x70] sm:$0xff]  ;;  %v18130_v59 = vld [vmem:[%s21547_s0 + $0x78] sm:$0xff]  ;;  %v18135_v60 = vld [vmem:[%s21547_s0 + $0x80] sm:$0xff] }
  0x3c   :  { %v18144_v61 = vld [vmem:[%s21547_s0 + $0x88] sm:$0xff]  ;;  %v18149_v62 = vld [vmem:[%s21547_s0 + $0x90] sm:$0xff]  ;;  %v18158_v63 = vld [vmem:[%s21547_s0 + $0x98] sm:$0xff] }
  0x3d   :  { %v18163_v0 = vld [vmem:[%s21547_s0 + $0xa0] sm:$0xff]  ;;  %v18172_v1 = vld [vmem:[%s21547_s0 + $0xa8] sm:$0xff]  ;;  %v18177_v3 = vld [vmem:[%s21547_s0 + $0xb0] sm:$0xff] }
  0x3e   :  { %15595 = vmatmul.mubr.msk.f32.gmra.mrb[18].mxu0 %vm231_vm0, %v17924_v28  ;;  %v18186_v4 = vld [vmem:[%s21547_s0 + $0xb8] sm:$0xff]  ;;  %v18191_v5 = vld [vmem:[%s21547_s0 + $0xc0] sm:$0xff]  ;;  %v18200_v6 = vld [vmem:[%s21547_s0 + $0xc8] sm:$0xff] }
  0x3f   :  { %15597 = vmatprep.mubr.msk.f32.mxu0 %vm231_vm0, %v17929_v29  ;;  %21549 = vst [vmem:[#allocation5_spill] sm:$0xff] %v18191_v5  ;;  %21550 = vst [vmem:[#allocation6_spill] sm:$0xff] %v18200_v6  ;;  %v18205_v12 = vld [vmem:[%s21547_s0 + $0xd0] sm:$0xff]  ;;  %v18214_v14 = vld [vmem:[%s21547_s0 + $0xd8] sm:$0xff] }
  0x40   :  { %21551 = vst [vmem:[#allocation7_spill] sm:$0xff] %v18205_v12  ;;  %21552 = vst [vmem:[#allocation8_spill] sm:$0xff] %v18214_v14  ;;  %v18228_v42 = vld [vmem:[%s21547_s0 + $0xe8] sm:$0xff]  ;;  %v18233_v43 = vld [vmem:[%s21547_s0 + $0xf0] sm:$0xff] }
  0x41   :  { %21554 = vst [vmem:[#allocation10_spill] sm:$0xff] %v18228_v42  ;;  %21555 = vst [vmem:[#allocation11_spill] sm:$0xff] %v18233_v43 }
  0x42   :  { %15598 = vmatmul.mubr.msk.f32.gmra.mrb[20].mxu0 %vm231_vm0, %v17938_v30 }
  0x43   :  { %15600 = vmatprep.mubr.msk.f32.mxu0 %vm231_vm0, %v17943_v31 }
  0x46   :  { %15601 = vmatmul.mubr.msk.f32.gmra.mrb[22].mxu0 %vm231_vm0, %v17952_v32 }
  0x47   :  { %15603 = vmatprep.mubr.msk.f32.mxu0 %vm231_vm0, %v17957_v33 }
  0x4a   :  { %15604 = vmatmul.mubr.msk.f32.gmra.mrb[24].mxu0 %vm231_vm0, %v17966_v34 }
  0x4b   :  { %15606 = vmatprep.mubr.msk.f32.mxu0 %vm231_vm0, %v17971_v35 }
  0x4e   :  { %15607 = vmatmul.mubr.msk.f32.gmra.mrb[26].mxu0 %vm231_vm0, %v17980_v36 }
  0x4f   :  { %15609 = vmatprep.mubr.msk.f32.mxu0 %vm231_vm0, %v17985_v37 }
  0x52   :  { %15610 = vmatmul.mubr.msk.f32.gmra.mrb[28].mxu0 %vm231_vm0, %v17994_v38 }
  0x53   :  { %15612 = vmatprep.mubr.msk.f32.mxu0 %vm231_vm0, %v17999_v39 }
  0x56   :  { %15613 = vmatmul.mubr.msk.f32.gmra.mrb[30].mxu0 %vm231_vm0, %v18008_v40 }
  0x57   :  { %15619 = vmatprep.mubr.msk.f32.mxu0 %vm231_vm0, %v18013_v41 }
  0x5a   :  { %15620 = vmatmul.mubr.msk.f32.vlgmr.msra.gmra.mrb[0].mxu0 %vm231_vm0, %v18028_v44 }
  0x5b   :  { %16789 = vmatpush3.bf16.msra.mxu0 %v17830_v15  ;;  %15622 = vmatprep.mubr.msk.f32.mxu0 %vm231_vm0, %v18033_v45  ;;  %v18219_v15 = vld [vmem:[%s21547_s0 + $0xe0] sm:$0xff] }
  0x5c   :  { %16807 = vmatprep.subr.bf16.mxu0 %v18035_v46  ;;  %21553 = vst [vmem:[#allocation9_spill] sm:$0xff] %v18219_v15 }
  0x5e   :  { %15623 = vmatmul.mubr.msk.f32.gmra.mrb[2].mxu0 %vm231_vm0, %v18045_v47 }
  0x5f   :  { %15625 = vmatprep.mubr.msk.f32.mxu0 %vm231_vm0, %v18050_v48 }
  0x62   :  { %15626 = vmatmul.mubr.msk.f32.gmra.mrb[4].mxu0 %vm231_vm0, %v18060_v49 }
  0x63   :  { %15628 = vmatprep.mubr.msk.f32.mxu0 %vm231_vm0, %v18065_v50 }
  0x66   :  { %15629 = vmatmul.mubr.msk.f32.gmra.mrb[6].mxu0 %vm231_vm0, %v18074_v51 }
  0x67   :  { %15631 = vmatprep.mubr.msk.f32.mxu0 %vm231_vm0, %v18079_v52 }
  0x6a   :  { %15632 = vmatmul.mubr.msk.f32.gmra.mrb[8].mxu0 %vm231_vm0, %v18088_v53 }
  0x6b   :  { %15634 = vmatprep.mubr.msk.f32.mxu0 %vm231_vm0, %v18093_v54 }
  0x6e   :  { %15635 = vmatmul.mubr.msk.f32.gmra.mrb[10].mxu0 %vm231_vm0, %v18102_v55 }
  0x6f   :  { %15637 = vmatprep.mubr.msk.f32.mxu0 %vm231_vm0, %v18107_v56 }
  0x72   :  { %15638 = vmatmul.mubr.msk.f32.gmra.mrb[12].mxu0 %vm231_vm0, %v18116_v57 }
  0x73   :  { %15640 = vmatprep.mubr.msk.f32.mxu0 %vm231_vm0, %v18121_v58 }
  0x76   :  { %15641 = vmatmul.mubr.msk.f32.gmra.mrb[14].mxu0 %vm231_vm0, %v18130_v59 }
  0x77   :  { %15643 = vmatprep.mubr.msk.f32.mxu0 %vm231_vm0, %v18135_v60 }
  0x7a   :  { %15644 = vmatmul.mubr.msk.f32.gmra.mrb[16].mxu0 %vm231_vm0, %v18144_v61 }
  0x7b   :  { %15646 = vmatprep.mubr.msk.f32.mxu0 %vm231_vm0, %v18149_v62 }
  0x7e   :  { %15647 = vmatmul.mubr.msk.f32.gmra.mrb[18].mxu0 %vm231_vm0, %v18158_v63 }
  0x7f   :  { %15649 = vmatprep.mubr.msk.f32.mxu0 %vm231_vm0, %v18163_v0 }
  0x82   :  { %15650 = vmatmul.mubr.msk.f32.gmra.mrb[20].mxu0 %vm231_vm0, %v18172_v1 }
  0x83   :  { %15652 = vmatprep.mubr.msk.f32.mxu0 %vm231_vm0, %v18177_v3 }
  0x86   :  { %15653 = vmatmul.mubr.msk.f32.gmra.mrb[22].mxu0 %vm231_vm0, %v18186_v4 }
  0x87   :  { %15655 = vmatprep.mubr.msk.f32.mxu0 %vm231_vm0, %v18191_v5 }
  0x8a   :  { %15656 = vmatmul.mubr.msk.f32.gmra.mrb[24].mxu0 %vm231_vm0, %v18200_v6  ;;  %v18267_v6 = vld [vmem:[%s21547_s0 + $0x12] sm:$0xff] }
  0x8b   :  { %15658 = vmatprep.mubr.msk.f32.mxu0 %vm231_vm0, %v18205_v12  ;;  %v3184_v12 = vld [vmem:[%s21548_s2] sm:$0xff] }
  0x8e   :  { %15659 = vmatmul.mubr.msk.f32.gmra.mrb[26].mxu0 %vm231_vm0, %v18214_v14  ;;  %v18247_v14 = vld [vmem:[%s21547_s0 + $0x2] sm:$0xff] }
  0x8f   :  { %15661 = vmatprep.mubr.msk.f32.mxu0 %vm231_vm0, %v18219_v15  ;;  %v18242_v15 = vld [vmem:[%s21547_s0 + $0xf8] sm:$0xff]  ;;  %21557 = vst [vmem:[#allocation13_spill] sm:$0xff] %v18247_v14 }
  0x90   :  { %21556 = vst [vmem:[#allocation12_spill] sm:$0xff] %v18242_v15 }
  0x92   :  { %15662 = vmatmul.mubr.msk.f32.gmra.mrb[28].mxu0 %vm231_vm0, %v18228_v42  ;;  %v3185_v42 = vld [vmem:[%s21548_s2 + $0x8] sm:$0xff] }
  0x93   :  { %15664 = vmatprep.mubr.msk.f32.mxu0 %vm231_vm0, %v18233_v43  ;;  %v18262_v43 = vld [vmem:[%s21547_s0 + $0xa] sm:$0xff]  ;;  %v18269_v5 = vpack.c.bf16 %v3185_v42, %v3184_v12  ;;  %v18308_v42 = vld [vmem:[%s21547_s0 + $0x3a] sm:$0xff] }
  0x94   :  { %v18294_v12 = vld [vmem:[%s21547_s0 + $0x2a] sm:$0xff]  ;;  %21562 = vst [vmem:[#allocation18_spill] sm:$0xff] %v18308_v42 }
  0x95   :  { %21560 = vst [vmem:[#allocation16_spill] sm:$0xff] %v18294_v12 }
  0x96   :  { %15665 = vmatmul.mubr.msk.f32.gmra.mrb[30].mxu0 %vm231_vm0, %v18242_v15  ;;  %v18284_v15 = vld [vmem:[%s21547_s0 + $0x22] sm:$0xff] }
  0x97   :  { %15671 = vmatprep.mubr.msk.f32.mxu0 %vm231_vm0, %v18247_v14  ;;  %v18278_v14 = vld [vmem:[%s21547_s0 + $0x1a] sm:$0xff]  ;;  %21559 = vst [vmem:[#allocation15_spill] sm:$0xff] %v18284_v15 }
  0x98   :  { %21558 = vst [vmem:[#allocation14_spill] sm:$0xff] %v18278_v14 }
  0x9a   :  { %15672 = vmatmul.mubr.msk.f32.vlgmr.msra.gmra.mrb[0].mxu0 %vm231_vm0, %v18262_v43 }
  0x9b   :  { %15674 = vmatprep.mubr.msk.f32.mxu0 %vm231_vm0, %v18267_v6  ;;  %16809 = vmatpush3.bf16.msra.mxu0 %v18035_v46  ;;  %v18299_v46 = vld [vmem:[%s21547_s0 + $0x32] sm:$0xff] }
  0x9c   :  { %16811 = vmatprep.subr.bf16.mxu0 %v18269_v5  ;;  %21561 = vst [vmem:[#allocation17_spill] sm:$0xff] %v18299_v46 }
  0x9e   :  { %15675 = vmatmul.mubr.msk.f32.gmra.mrb[2].mxu0 %vm231_vm0, %v18278_v14  ;;  %v3189_v14 = vld [vmem:[%s21548_s2 + $0x28] sm:$0xff] }
  0x9f   :  { %15677 = vmatprep.mubr.msk.f32.mxu0 %vm231_vm0, %v18284_v15  ;;  %v18313_v15 = vld [vmem:[%s21547_s0 + $0x42] sm:$0xff] }
  0xa0   :  { %21563 = vst [vmem:[#allocation19_spill] sm:$0xff] %v18313_v15 }
  0xa2   :  { %15678 = vmatmul.mubr.msk.f32.gmra.mrb[4].mxu0 %vm231_vm0, %v18294_v12  ;;  %v18327_v12 = vld [vmem:[%s21547_s0 + $0x52] sm:$0xff] }
  0xa3   :  { %15680 = vmatprep.mubr.msk.f32.mxu0 %vm231_vm0, %v18299_v46  ;;  %v18322_v46 = vld [vmem:[%s21547_s0 + $0x4a] sm:$0xff]  ;;  %21565 = vst [vmem:[#allocation21_spill] sm:$0xff] %v18327_v12 }
  0xa4   :  { %21564 = vst [vmem:[#allocation20_spill] sm:$0xff] %v18322_v46 }
  0xa6   :  { %15681 = vmatmul.mubr.msk.f32.gmra.mrb[6].mxu0 %vm231_vm0, %v18308_v42  ;;  %v18341_v42 = vld [vmem:[%s21547_s0 + $0x62] sm:$0xff] }
  0xa7   :  { %15683 = vmatprep.mubr.msk.f32.mxu0 %vm231_vm0, %v18313_v15  ;;  %v18336_v15 = vld [vmem:[%s21547_s0 + $0x5a] sm:$0xff]  ;;  %21567 = vst [vmem:[#allocation23_spill] sm:$0xff] %v18341_v42 }
  0xa8   :  { %21566 = vst [vmem:[#allocation22_spill] sm:$0xff] %v18336_v15 }
  0xaa   :  { %15684 = vmatmul.mubr.msk.f32.gmra.mrb[8].mxu0 %vm231_vm0, %v18322_v46  ;;  %v18355_v46 = vld [vmem:[%s21547_s0 + $0x72] sm:$0xff] }
  0xab   :  { %15686 = vmatprep.mubr.msk.f32.mxu0 %vm231_vm0, %v18327_v12  ;;  %v18350_v12 = vld [vmem:[%s21547_s0 + $0x6a] sm:$0xff]  ;;  %21569 = vst [vmem:[#allocation25_spill] sm:$0xff] %v18355_v46 }
  0xac   :  { %21568 = vst [vmem:[#allocation24_spill] sm:$0xff] %v18350_v12 }
  0xae   :  { %15687 = vmatmul.mubr.msk.f32.gmra.mrb[10].mxu0 %vm231_vm0, %v18336_v15  ;;  %v18369_v15 = vld [vmem:[%s21547_s0 + $0x82] sm:$0xff] }
  0xaf   :  { %15689 = vmatprep.mubr.msk.f32.mxu0 %vm231_vm0, %v18341_v42  ;;  %v18364_v42 = vld [vmem:[%s21547_s0 + $0x7a] sm:$0xff]  ;;  %21571 = vst [vmem:[#allocation27_spill] sm:$0xff] %v18369_v15 }
  0xb0   :  { %21570 = vst [vmem:[#allocation26_spill] sm:$0xff] %v18364_v42 }
  0xb2   :  { %15690 = vmatmul.mubr.msk.f32.gmra.mrb[12].mxu0 %vm231_vm0, %v18350_v12  ;;  %v18383_v12 = vld [vmem:[%s21547_s0 + $0x92] sm:$0xff] }
  0xb3   :  { %15692 = vmatprep.mubr.msk.f32.mxu0 %vm231_vm0, %v18355_v46  ;;  %v18378_v46 = vld [vmem:[%s21547_s0 + $0x8a] sm:$0xff]  ;;  %21573 = vst [vmem:[#allocation29_spill] sm:$0xff] %v18383_v12 }
  0xb4   :  { %21572 = vst [vmem:[#allocation28_spill] sm:$0xff] %v18378_v46 }
  0xb6   :  { %15693 = vmatmul.mubr.msk.f32.gmra.mrb[14].mxu0 %vm231_vm0, %v18364_v42  ;;  %v18397_v42 = vld [vmem:[%s21547_s0 + $0xa2] sm:$0xff] }
  0xb7   :  { %15695 = vmatprep.mubr.msk.f32.mxu0 %vm231_vm0, %v18369_v15  ;;  %v18392_v15 = vld [vmem:[%s21547_s0 + $0x9a] sm:$0xff]  ;;  %21575 = vst [vmem:[#allocation31_spill] sm:$0xff] %v18397_v42 }
  0xb8   :  { %21574 = vst [vmem:[#allocation30_spill] sm:$0xff] %v18392_v15 }
  0xba   :  { %15696 = vmatmul.mubr.msk.f32.gmra.mrb[16].mxu0 %vm231_vm0, %v18378_v46  ;;  %v18411_v46 = vld [vmem:[%s21547_s0 + $0xb2] sm:$0xff] }
  0xbb   :  { %15698 = vmatprep.mubr.msk.f32.mxu0 %vm231_vm0, %v18383_v12  ;;  %v18406_v12 = vld [vmem:[%s21547_s0 + $0xaa] sm:$0xff]  ;;  %21577 = vst [vmem:[#allocation33_spill] sm:$0xff] %v18411_v46 }
  0xbc   :  { %21576 = vst [vmem:[#allocation32_spill] sm:$0xff] %v18406_v12 }
  0xbe   :  { %15699 = vmatmul.mubr.msk.f32.gmra.mrb[18].mxu0 %vm231_vm0, %v18392_v15  ;;  %v18425_v15 = vld [vmem:[%s21547_s0 + $0xc2] sm:$0xff] }
  0xbf   :  { %15701 = vmatprep.mubr.msk.f32.mxu0 %vm231_vm0, %v18397_v42  ;;  %v18420_v42 = vld [vmem:[%s21547_s0 + $0xba] sm:$0xff]  ;;  %21579 = vst [vmem:[#allocation35_spill] sm:$0xff] %v18425_v15 }
  0xc0   :  { %21578 = vst [vmem:[#allocation34_spill] sm:$0xff] %v18420_v42 }
  0xc2   :  { %15702 = vmatmul.mubr.msk.f32.gmra.mrb[20].mxu0 %vm231_vm0, %v18406_v12  ;;  %v18439_v12 = vld [vmem:[%s21547_s0 + $0xd2] sm:$0xff] }
  0xc3   :  { %15704 = vmatprep.mubr.msk.f32.mxu0 %vm231_vm0, %v18411_v46  ;;  %v18434_v46 = vld [vmem:[%s21547_s0 + $0xca] sm:$0xff]  ;;  %21581 = vst [vmem:[#allocation37_spill] sm:$0xff] %v18439_v12 }
  0xc4   :  { %21580 = vst [vmem:[#allocation36_spill] sm:$0xff] %v18434_v46 }
  0xc6   :  { %15705 = vmatmul.mubr.msk.f32.gmra.mrb[22].mxu0 %vm231_vm0, %v18420_v42  ;;  %v18453_v42 = vld [vmem:[%s21547_s0 + $0xe2] sm:$0xff] }
  0xc7   :  { %15707 = vmatprep.mubr.msk.f32.mxu0 %vm231_vm0, %v18425_v15  ;;  %v18448_v15 = vld [vmem:[%s21547_s0 + $0xda] sm:$0xff]  ;;  %21583 = vst [vmem:[#allocation39_spill] sm:$0xff] %v18453_v42 }
  0xc8   :  { %21582 = vst [vmem:[#allocation38_spill] sm:$0xff] %v18448_v15 }
  0xca   :  { %15708 = vmatmul.mubr.msk.f32.gmra.mrb[24].mxu0 %vm231_vm0, %v18434_v46  ;;  %v18467_v46 = vld [vmem:[%s21547_s0 + $0xf2] sm:$0xff] }
  0xcb   :  { %15710 = vmatprep.mubr.msk.f32.mxu0 %vm231_vm0, %v18439_v12  ;;  %v18462_v12 = vld [vmem:[%s21547_s0 + $0xea] sm:$0xff]  ;;  %21584 = vst [vmem:[#allocation40_spill] sm:$0xff] %v18467_v46 }
  0xce   :  { %15711 = vmatmul.mubr.msk.f32.gmra.mrb[26].mxu0 %vm231_vm0, %v18448_v15  ;;  %v3188_v15 = vld [vmem:[%s21548_s2 + $0x20] sm:$0xff] }
  0xcf   :  { %15713 = vmatprep.mubr.msk.f32.mxu0 %vm231_vm0, %v18453_v42  ;;  %v18476_v42 = vld [vmem:[%s21547_s0 + $0xfa] sm:$0xff] }
  0xd2   :  { %15714 = vmatmul.mubr.msk.f32.gmra.mrb[28].mxu0 %vm231_vm0, %v18462_v12 }
  0xd3   :  { %15716 = vmatprep.mubr.msk.f32.mxu0 %vm231_vm0, %v18467_v46  ;;  %v16814_v46 = vpack.c.bf16 %v3189_v14, %v3188_v15 }
  0xd6   :  { %15717 = vmatmul.mubr.msk.f32.gmra.mrb[30].mxu0 %vm231_vm0, %v18476_v42 }
  0xd7   :  { %15941 = vmatprep.mubr.msk.f32.mxu0 %vm231_vm0, %v17776_v2  ;;  %v3190_v2 = vld [vmem:[%s21548_s2 + $0x30] sm:$0xff] }
  0xda   :  { %15942 = vmatmul.mubr.msk.f32.vlgmr.msra.gmra.mrb[32].mxu0 %vm231_vm0, %v17789_v7  ;;  %v3191_v7 = vld [vmem:[%s21548_s2 + $0x38] sm:$0xff] }
  0xdb   :  { %15944 = vmatprep.mubr.msk.f32.mxu0 %vm231_vm0, %v17794_v8  ;;  %16813 = vmatpush3.bf16.msra.mxu0 %v18269_v5  ;;  %v16818_v8 = vpack.c.bf16 %v3191_v7, %v3190_v2  ;;  %v21610_v5 = vld [vmem:[#allocation23_spill] sm:$0xff] }
  0xdc   :  { %16815 = vmatprep.subr.bf16.mxu0 %v16814_v46 }
  0xde   :  { %15945 = vmatmul.mubr.msk.f32.gmra.mrb[34].mxu0 %vm231_vm0, %v17803_v9  ;;  %v1591_v9 = vld [vmem:[%s21585_s11] sm:$0xff] }
  0xdf   :  { %15947 = vmatprep.mubr.msk.f32.mxu0 %vm231_vm0, %v17808_v10  ;;  %15719 = vmatprep.subr.mxu1 %v1591_v9  ;;  %v1677_v10 = vld [vmem:[%s21586_s4 + $0x10] sm:$0xff] }
  0xe0   :  { %15720 = vmatpush3.msra.mxu1 %v1591_v9 }
  0xe2   :  { %15948 = vmatmul.mubr.msk.f32.gmra.mrb[36].mxu0 %vm231_vm0, %v17817_v11  ;;  %v1678_v11 = vld [vmem:[%s21586_s4 + $0x18] sm:$0xff] }
  0xe3   :  { %15950 = vmatprep.mubr.msk.f32.mxu0 %vm231_vm0, %v17825_v13  ;;  %v18608_v13 = vpack.c.bf16 %v1678_v11, %v1677_v10 }
  0xe5   :  { %16791 = vmatprep.subr.bf16.mxu1 %v18608_v13 }
  0xe6   :  { %15951 = vmatmul.mubr.msk.f32.gmra.mrb[38].mxu0 %vm231_vm0, %v17839_v16  ;;  %v21587_v16 = vld [vmem:[#allocation5_spill] sm:$0xff] }
  0xe7   :  { %15953 = vmatprep.mubr.msk.f32.mxu0 %vm231_vm0, %v17845_v17  ;;  %v21588_v17 = vld [vmem:[#allocation6_spill] sm:$0xff] }
  0xea   :  { %15954 = vmatmul.mubr.msk.f32.gmra.mrb[40].mxu0 %vm231_vm0, %v17854_v18  ;;  %v21589_v18 = vld [vmem:[#allocation7_spill] sm:$0xff] }
  0xeb   :  { %15956 = vmatprep.mubr.msk.f32.mxu0 %vm231_vm0, %v17859_v19  ;;  %v21590_v19 = vld [vmem:[#allocation8_spill] sm:$0xff] }
  0xee   :  { %15957 = vmatmul.mubr.msk.f32.gmra.mrb[42].mxu0 %vm231_vm0, %v17868_v20  ;;  %v21591_v20 = vld [vmem:[#allocation9_spill] sm:$0xff] }
  0xef   :  { %15959 = vmatprep.mubr.msk.f32.mxu0 %vm231_vm0, %v17873_v21  ;;  %v21592_v21 = vld [vmem:[#allocation10_spill] sm:$0xff] }
  0xf2   :  { %15960 = vmatmul.mubr.msk.f32.gmra.mrb[44].mxu0 %vm231_vm0, %v17882_v22  ;;  %v21593_v22 = vld [vmem:[#allocation11_spill] sm:$0xff] }
  0xf3   :  { %15962 = vmatprep.mubr.msk.f32.mxu0 %vm231_vm0, %v17887_v23  ;;  %v3192_v23 = vld [vmem:[%s21548_s2 + $0x40] sm:$0xff] }
  0xf6   :  { %15963 = vmatmul.mubr.msk.f32.gmra.mrb[46].mxu0 %vm231_vm0, %v17896_v24  ;;  %v3193_v24 = vld [vmem:[%s21548_s2 + $0x48] sm:$0xff]  ;;  %s21644_s2 = sld [smem:[#allocation49_spill]] }
  0xf7   :  { %15965 = vmatprep.mubr.msk.f32.mxu0 %vm231_vm0, %v17901_v25  ;;  %v21594_v25 = vld [vmem:[#allocation12_spill] sm:$0xff] }
  0xfa   :  { %15966 = vmatmul.mubr.msk.f32.gmra.mrb[48].mxu0 %vm231_vm0, %v17910_v26  ;;  %v21595_v26 = vld [vmem:[#allocation13_spill] sm:$0xff] }
  0xfb   :  { %15968 = vmatprep.mubr.msk.f32.mxu0 %vm231_vm0, %v17915_v27  ;;  %v18641_v27 = vpack.c.bf16 %v3193_v24, %v3192_v23  ;;  %v21616_v23 = vld [vmem:[#allocation25_spill] sm:$0xff] }
  0xfe   :  { %15969 = vmatmul.mubr.msk.f32.gmra.mrb[50].mxu0 %vm231_vm0, %v17924_v28  ;;  %v87_v28 = vlaneseq }
  0xff   :  { %15971 = vmatprep.mubr.msk.f32.mxu0 %vm231_vm0, %v17929_v29  ;;  %v21596_v29 = vld [vmem:[#allocation14_spill] sm:$0xff] }
 0x102   :  { %15972 = vmatmul.mubr.msk.f32.gmra.mrb[52].mxu0 %vm231_vm0, %v17938_v30  ;;  %v21597_v30 = vld [vmem:[#allocation15_spill] sm:$0xff] }
 0x103   :  { %15974 = vmatprep.mubr.msk.f32.mxu0 %vm231_vm0, %v17943_v31  ;;  %v18652_v31 = vshrl.u32 %v87_v28, 7 }
 0x105   :  { %v18754_v10 = vadd.s32 152, %v18652_v31 }
 0x106   :  { %15975 = vmatmul.mubr.msk.f32.gmra.mrb[54].mxu0 %vm231_vm0, %v17952_v32  ;;  %v21598_v32 = vld [vmem:[#allocation16_spill] sm:$0xff] }
 0x107   :  { %15977 = vmatprep.mubr.msk.f32.mxu0 %vm231_vm0, %v17957_v33  ;;  %v21599_v33 = vld [vmem:[#allocation17_spill] sm:$0xff] }
 0x10a   :  { %15978 = vmatmul.mubr.msk.f32.gmra.mrb[56].mxu0 %vm231_vm0, %v17966_v34  ;;  %v18659_v34 = vadd.s32 8, %v18652_v31 }
 0x10b   :  { %15980 = vmatprep.mubr.msk.f32.mxu0 %vm231_vm0, %v17971_v35  ;;  %v18662_v35 = vadd.s32 24, %v18652_v31 }
 0x10e   :  { %15981 = vmatmul.mubr.msk.f32.gmra.mrb[58].mxu0 %vm231_vm0, %v17980_v36  ;;  %v18665_v36 = vadd.s32 40, %v18652_v31 }
 0x10f   :  { %15983 = vmatprep.mubr.msk.f32.mxu0 %vm231_vm0, %v17985_v37  ;;  %v21600_v37 = vld [vmem:[#allocation18_spill] sm:$0xff] }
 0x112   :  { %15984 = vmatmul.mubr.msk.f32.gmra.mrb[60].mxu0 %vm231_vm0, %v17994_v38  ;;  %v18670_v38 = vadd.s32 56, %v18652_v31 }
 0x113   :  { %15986 = vmatprep.mubr.msk.f32.mxu0 %vm231_vm0, %v17999_v39  ;;  %v21601_v39 = vld [vmem:[#allocation19_spill] sm:$0xff] }
 0x116   :  { %15987 = vmatmul.mubr.msk.f32.gmra.mrb[62].mxu0 %vm231_vm0, %v18008_v40  ;;  %v121_v40 = vand.u32 15, %v18659_v34 }
 0x117   :  { %15993 = vmatprep.mubr.msk.f32.mxu0 %vm231_vm0, %v18013_v41  ;;  %v123_v41 = vand.u32 15, %v18662_v35 }
 0x118   :  { %vm1330_vm1 = vcmp.lt.s32.totalorder %v121_v40, 10 }
 0x119   :  { %vm18700_vm2 = vcmp.lt.s32.totalorder %v123_v41, 10 }
 0x11a   :  { %15994 = vmatmul.mubr.msk.f32.vlgmr.msra.gmra.mrb[32].mxu0 %vm231_vm0, %v18028_v44  ;;  %v18677_v44 = vadd.s32 72, %v18652_v31 }
 0x11b   :  { %15996 = vmatprep.mubr.msk.f32.mxu0 %vm231_vm0, %v18033_v45  ;;  %16817 = vmatpush3.bf16.msra.mxu0 %v16814_v46  ;;  %v125_v45 = vand.u32 15, %v18665_v36 }
 0x11c   :  { %16819 = vmatprep.subr.bf16.mxu0 %v16818_v8 }
 0x11d   :  { %vm18707_vm3 = vcmp.lt.s32.totalorder %v125_v45, 10 }
 0x11e   :  { %15997 = vmatmul.mubr.msk.f32.gmra.mrb[34].mxu0 %vm231_vm0, %v18045_v47  ;;  %v18681_v47 = vadd.s32 88, %v18652_v31 }
 0x11f   :  { %15999 = vmatprep.mubr.msk.f32.mxu0 %vm231_vm0, %v18050_v48  ;;  %v18684_v48 = vadd.s32 104, %v18652_v31 }
 0x122   :  { %16000 = vmatmul.mubr.msk.f32.gmra.mrb[36].mxu0 %vm231_vm0, %v18060_v49  ;;  %v21602_v49 = vld [vmem:[#allocation20_spill] sm:$0xff] }
 0x123   :  { %16002 = vmatprep.mubr.msk.f32.mxu0 %vm231_vm0, %v18065_v50  ;;  %v127_v50 = vand.u32 15, %v18670_v38 }
 0x125   :  { %vm1336_vm5 = vcmp.lt.s32.totalorder %v127_v50, 10 }
 0x126   :  { %16003 = vmatmul.mubr.msk.f32.gmra.mrb[38].mxu0 %vm231_vm0, %v18074_v51  ;;  %v18692_v51 = vld [vmem:[%s21603_s1] ss:$0 sm:$0xff] }
 0x127   :  { %16005 = vmatprep.mubr.msk.f32.mxu0 %vm231_vm0, %v18079_v52  ;;  %v21604_v52 = vld [vmem:[#allocation21_spill] sm:$0xff] }
 0x12a   :  { %16006 = vmatmul.mubr.msk.f32.gmra.mrb[40].mxu0 %vm231_vm0, %v18088_v53 }
 0x12b   :  { %16008 = vmatprep.mubr.msk.f32.mxu0 %vm231_vm0, %v18093_v54  ;;  %v129_v54 = vand.u32 15, %v18677_v44 }
 0x12d   :  { %vm1338_vm6 = vcmp.lt.s32.totalorder %v129_v54, 10 }
 0x12e   :  { %16009 = vmatmul.mubr.msk.f32.gmra.mrb[42].mxu0 %vm231_vm0, %v18102_v55  ;;  %v21619_v55 = vld [vmem:[#allocation26_spill] sm:$0xff] }
 0x12f   :  { %16011 = vmatprep.mubr.msk.f32.mxu0 %vm231_vm0, %v18107_v56  ;;  %v21533_v56 = vand.u32 15, %v18681_v47 }
 0x131   :  { %vm18738_vm7 = vcmp.lt.s32.totalorder %v21533_v56, 10  ;;  %v17529_v56 = vld [vmem:[%s21547_s0 + $0x8] sm:$0xff] }
 0x132   :  { %16012 = vmatmul.mubr.msk.f32.gmra.mrb[44].mxu0 %vm231_vm0, %v18116_v57  ;;  %v21532_v57 = vand.u32 15, %v18684_v48 }
 0x133   :  { %16014 = vmatprep.mubr.msk.f32.mxu0 %vm231_vm0, %v18121_v58  ;;  %v18714_v58 = vadd.s32 120, %v18652_v31 }
 0x134   :  { %vm18744_vm8 = vcmp.lt.s32.totalorder %v21532_v57, 10 }
 0x135   :  { %v21531_v46 = vand.u32 15, %v18714_v58 }
 0x136   :  { %16015 = vmatmul.mubr.msk.f32.gmra.mrb[46].mxu0 %vm231_vm0, %v18130_v59 }
 0x137   :  { %16017 = vmatprep.mubr.msk.f32.mxu0 %vm231_vm0, %v18135_v60  ;;  %v18717_v60 = vadd.s32 136, %v18652_v31  ;;  %vm18782_vm9 = vcmp.lt.s32.totalorder %v21531_v46, 10  ;;  %v4163_v46 = vld [vmem:[%s21547_s0 + $0x24] sm:$0xff] }
 0x139   :  { %v21527_v9 = vand.u32 15, %v18717_v60 }
 0x13a   :  { %16018 = vmatmul.mubr.msk.f32.gmra.mrb[48].mxu0 %vm231_vm0, %v18144_v61 }
 0x13b   :  { %16020 = vmatprep.mubr.msk.f32.mxu0 %vm231_vm0, %v18149_v62  ;;  %v17620_v62 = vmov 0.0   ;;  %vm1346_vm10 = vcmp.lt.s32.totalorder %v21527_v9, 10  ;;  %v21631_v9 = vld [vmem:[#allocation34_spill] sm:$0xff] }
 0x13c   :  { %v18772_v24 = vsel %vm18738_vm7, 1.0, %v17620_v62  ;;  %v18810_v15 = vsel %vm1346_vm10, 1.0, %v17620_v62  ;;  %vm1580_vm7 = vcmask 1045504  }
 0x13e   :  { %16021 = vmatmul.mubr.msk.f32.gmra.mrb[50].mxu0 %vm231_vm0, %v18158_v63  ;;  %v1362_v63 = vsel %vm1330_vm1, 1.0, %v17620_v62  ;;  %vm1572_vm1 = vcmask 1041408  }
 0x13f   :  { %16023 = vmatprep.mubr.msk.f32.mxu0 %vm231_vm0, %v18163_v0 }
 0x142   :  { %16024 = vmatmul.mubr.msk.f32.gmra.mrb[52].mxu0 %vm231_vm0, %v18172_v1  ;;  %v21609_v1 = vld [vmem:[#allocation22_spill] sm:$0xff] }
 0x143   :  { %16026 = vmatprep.mubr.msk.f32.mxu0 %vm231_vm0, %v18177_v3 }
 0x146   :  { %16027 = vmatmul.mubr.msk.f32.gmra.mrb[54].mxu0 %vm231_vm0, %v18186_v4  ;;  %v1364_v4 = vsel %vm18700_vm2, 1.0, %v17620_v62  ;;  %vm1574_vm2 = vcmask 1042432  }
 0x147   :  { %16029 = vmatprep.mubr.msk.f32.mxu0 %vm231_vm0, %v21587_v16 }
 0x14a   :  { %16030 = vmatmul.mubr.msk.f32.gmra.mrb[56].mxu0 %vm231_vm0, %v21588_v17 }
 0x14b   :  { %16032 = vmatprep.mubr.msk.f32.mxu0 %vm231_vm0, %v21589_v18  ;;  %v21615_v18 = vld [vmem:[#allocation24_spill] sm:$0xff] }
 0x14e   :  { %16033 = vmatmul.mubr.msk.f32.gmra.mrb[58].mxu0 %vm231_vm0, %v21590_v19  ;;  %v18760_v19 = vsel %vm1338_vm6, 1.0, %v17620_v62  ;;  %vm1578_vm6 = vcmask 1044480  }
 0x14f   :  { %16035 = vmatprep.mubr.msk.f32.mxu0 %vm231_vm0, %v21591_v20  ;;  %v18763_v20 = vadd.s32 168, %v18652_v31 }
 0x152   :  { %16036 = vmatmul.mubr.msk.f32.gmra.mrb[60].mxu0 %vm231_vm0, %v21592_v21 }
 0x153   :  { %16038 = vmatprep.mubr.msk.f32.mxu0 %vm231_vm0, %v21593_v22 }
 0x156   :  { %16039 = vmatmul.mubr.msk.f32.gmra.mrb[62].mxu0 %vm231_vm0, %v21594_v25  ;;  %v18777_v25 = vsel %vm18744_vm8, 1.0, %v17620_v62  ;;  %vm1582_vm8 = vcmask 1046528  }
 0x157   :  { %16045 = vmatprep.mubr.msk.f32.mxu0 %vm231_vm0, %v21595_v26 }
 0x15a   :  { %16046 = vmatmul.mubr.msk.f32.vlgmr.msra.gmra.mrb[32].mxu0 %vm231_vm0, %v18262_v43 }
 0x15b   :  { %16048 = vmatprep.mubr.msk.f32.mxu0 %vm231_vm0, %v18267_v6  ;;  %16821 = vmatpush3.bf16.msra.mxu0 %v16818_v8  ;;  %v1366_v6 = vsel %vm18707_vm3, 1.0, %v17620_v62  ;;  %v18750_v8 = vsel %vm1336_vm5, 1.0, %v17620_v62  ;;  %vm1576_vm3 = vcmask 1043456  }
 0x15c   :  { %16823 = vmatprep.subr.bf16.mxu0 %v18641_v27 }
 0x15e   :  { %16049 = vmatmul.mubr.msk.f32.gmra.mrb[34].mxu0 %vm231_vm0, %v21596_v29 }
 0x15f   :  { %16051 = vmatprep.mubr.msk.f32.mxu0 %vm231_vm0, %v21597_v30  ;;  %v18787_v30 = vadd.s32 184, %v18652_v31 }
 0x161   :  { %v21524_v43 = vand.u32 15, %v18787_v30 }
 0x162   :  { %16052 = vmatmul.mubr.msk.f32.gmra.mrb[36].mxu0 %vm231_vm0, %v21598_v32 }
 0x163   :  { %16054 = vmatprep.mubr.msk.f32.mxu0 %vm231_vm0, %v21599_v33  ;;  %vm18835_vm13 = vcmp.lt.s32.totalorder %v21524_v43, 10 }
 0x166   :  { %16055 = vmatmul.mubr.msk.f32.gmra.mrb[38].mxu0 %vm231_vm0, %v21600_v37 }
 0x167   :  { %16057 = vmatprep.mubr.msk.f32.mxu0 %vm231_vm0, %v21601_v39  ;;  %v21526_v39 = vand.u32 15, %v18754_v10 }
 0x169   :  { %vm1348_vm11 = vcmp.lt.s32.totalorder %v21526_v39, 10 }
 0x16a   :  { %16058 = vmatmul.mubr.msk.f32.gmra.mrb[40].mxu0 %vm231_vm0, %v21602_v49 }
 0x16b   :  { %16060 = vmatprep.mubr.msk.f32.mxu0 %vm231_vm0, %v21604_v52 }
 0x16d   :  { %v15673_v59 = vpop.f32.mrb[0].mxu0 }
 0x16e   :  { %v1266_v61 = vadd.f32 %v15673_v59, %v18692_v51  ;;  %v1068_v0 = vpop.f32.mrb[1].mxu0  ;;  %16061 = vmatmul.mubr.msk.f32.gmra.mrb[42].mxu0 %vm231_vm0, %v21609_v1  ;;  %v21525_v59 = vand.u32 15, %v18763_v20 }
 0x16f   :  { %v1265_v3 = vadd.f32 %v18692_v51, %v1068_v0  ;;  %16063 = vmatprep.mubr.msk.f32.mxu0 %vm231_vm0, %v21610_v5 }
 0x170   :  { %v1298_v14 = vmax.f32 %v1266_v61, 0.0  ;;  %v18797_v61 = vadd.s32 200, %v18652_v31  ;;  %vm18820_vm12 = vcmp.lt.s32.totalorder %v21525_v59, 10 }
 0x171   :  { %v1297_v2 = vmax.f32 %v1265_v3, 0.0  ;;  %v15676_v7 = vpop.f32.mrb[2].mxu0  ;;  %v21620_v3 = vld [vmem:[#allocation27_spill] sm:$0xff] }
 0x172   :  { %v1394_v11 = vmul.f32 %v1362_v63, %v1298_v14  ;;  %v1268_v16 = vadd.f32 %v15676_v7, %v18692_v51  ;;  %v1078_v17 = vpop.f32.mrb[3].mxu0  ;;  %16064 = vmatmul.mubr.msk.f32.gmra.mrb[44].mxu0 %vm231_vm0, %v21615_v18 }
 0x173   :  { %v1426_v21 = vsel %vm1425_vm4, %v1297_v2, -inf  ;;  %v1267_v22 = vadd.f32 %v18692_v51, %v1078_v17  ;;  %16066 = vmatprep.mubr.msk.f32.mxu0 %vm231_vm0, %v21616_v23 }
 0x174   :  { %v1427_v26 = vsel %vm1425_vm4, %v1394_v11, -inf  ;;  %v1300_v28 = vmax.f32 %v1268_v16, 0.0 }
 0x175   :  { %v1428_v32 = vmax.f32 %v1426_v21, %v1427_v26  ;;  %v1299_v33 = vmax.f32 %v1267_v22, 0.0  ;;  %v15679_v37 = vpop.f32.mrb[4].mxu0  ;;  %v21621_v22 = vld [vmem:[#allocation28_spill] sm:$0xff]  ;;  %v21523_v26 = vand.u32 15, %v18797_v61 }
 0x176   :  { %v1396_v49 = vmul.f32 %v1364_v4, %v1300_v28  ;;  %v1270_v52 = vadd.f32 %v15679_v37, %v18692_v51  ;;  %v1088_v53 = vpop.f32.mrb[5].mxu0  ;;  %16067 = vmatmul.mubr.msk.f32.gmra.mrb[46].mxu0 %vm231_vm0, %v21619_v55  ;;  %v18806_v4 = vsel %vm18782_vm9, 1.0, %v17620_v62 }
 0x177   :  { %v1429_v63 = vrot.slane %v1428_v32, 4  ;;  %v1435_v0 = vsel %vm1425_vm4, %v1299_v33, -inf  ;;  %v1269_v1 = vadd.f32 %v18692_v51, %v1088_v53  ;;  %16069 = vmatprep.mubr.msk.f32.mxu0 %vm231_vm0, %v21620_v3  ;;  %v21624_v33 = vld [vmem:[#allocation29_spill] sm:$0xff]  ;;  %v18842_v3 = vsel %vm18820_vm12, 1.0, %v17620_v62 }
 0x178   :  { %v1436_v5 = vsel %vm1425_vm4, %v1396_v49, -inf  ;;  %v1302_v14 = vmax.f32 %v1270_v52, 0.0  ;;  %v18831_v52 = vsel %vm1348_vm11, 1.0, %v17620_v62  ;;  %vm1354_vm15 = vcmp.lt.s32.totalorder %v21523_v26, 10 }
 0x179   :  { %v1430_v2 = vmax.f32 %v1428_v32, %v1429_v63  ;;  %v1437_v7 = vmax.f32 %v1435_v0, %v1436_v5  ;;  %v1301_v11 = vmax.f32 %v1269_v1, 0.0  ;;  %v15682_v16 = vpop.f32.mrb[6].mxu0  ;;  %vm2847_vm11 = vcmp.lt.s32.totalorder %v121_v40, 9 }
 0x17a   :  { %v1398_v17 = vmul.f32 %v1366_v6, %v1302_v14  ;;  %v1272_v18 = vadd.f32 %v15682_v16, %v18692_v51  ;;  %v1098_v21 = vpop.f32.mrb[7].mxu0  ;;  %16070 = vmatmul.mubr.msk.f32.gmra.mrb[48].mxu0 %vm231_vm0, %v21621_v22  ;;  %v21628_v22 = vld [vmem:[#allocation31_spill] sm:$0xff]  ;;  %vm2849_vm12 = vcmp.lt.s32.totalorder %v123_v41, 9 }
 0x17b   :  { %v1431_v28 = vrot.slane %v1430_v2, 2  ;;  %v1438_v29 = vrot.slane %v1437_v7, 4  ;;  %v1444_v32 = vsel %vm1425_vm4, %v1301_v11, -inf  ;;  %v1271_v6 = vadd.f32 %v18692_v51, %v1098_v21  ;;  %16072 = vmatprep.mubr.msk.f32.mxu0 %vm231_vm0, %v21624_v33 }
 0x17c   :  { %v1445_v37 = vsel %vm1425_vm4, %v1398_v17, -inf  ;;  %v1304_v49 = vmax.f32 %v1272_v18, 0.0  ;;  %v21627_v17 = vld [vmem:[#allocation30_spill] sm:$0xff]  ;;  %v2881_v40 = vsel %vm2849_vm12, 1.0, %v17620_v62 }
 0x17d   :  { %v1439_v55 = vmax.f32 %v1437_v7, %v1438_v29  ;;  %v1446_v63 = vmax.f32 %v1444_v32, %v1445_v37  ;;  %v1303_v0 = vmax.f32 %v1271_v6, 0.0  ;;  %v15685_v1 = vpop.f32.mrb[8].mxu0  ;;  %v1432_v5 = vmax.f32 %v1430_v2, %v1431_v28 }
 0x17e   :  { %v1400_v14 = vmul.f32 %v18750_v8, %v1304_v49  ;;  %v1274_v11 = vadd.f32 %v15685_v1, %v18692_v51  ;;  %v1108_v16 = vpop.f32.mrb[9].mxu0  ;;  %16073 = vmatmul.mubr.msk.f32.gmra.mrb[50].mxu0 %vm231_vm0, %v21627_v17  ;;  %v18856_v8 = vsel %vm18835_vm13, 1.0, %v17620_v62  ;;  %v18861_v29 = vadd.s32 216, %v18652_v31  ;;  %v21629_v17 = vld [vmem:[#allocation32_spill] sm:$0xff] }
 0x17f   :  { %v1440_v7 = vrot.slane %v1439_v55, 2  ;;  %v1447_v18 = vrot.slane %v1446_v63, 4  ;;  %v1453_v21 = vsel %vm1425_vm4, %v1303_v0, -inf  ;;  %16075 = vmatprep.mubr.msk.f32.mxu0 %vm231_vm0, %v21628_v22  ;;  %v1273_v28 = vadd.f32 %v18692_v51, %v1108_v16 }
 0x180   :  { %v1454_v2 = vsel %vm1425_vm4, %v1400_v14, -inf  ;;  %v1306_v23 = vmax.f32 %v1274_v11, 0.0  ;;  %v18864_v49 = vsel %vm1354_vm15, 1.0, %v17620_v62  ;;  %v1433_v0 = vrot.slane %v1432_v5, 1 }
 0x181   :  { %v1441_v32 = vmax.f32 %v1439_v55, %v1440_v7  ;;  %v1448_v6 = vmax.f32 %v1446_v63, %v1447_v18  ;;  %v1455_v33 = vmax.f32 %v1453_v21, %v1454_v2  ;;  %v15688_v37 = vpop.f32.mrb[10].mxu0  ;;  %v1305_v1 = vmax.f32 %v1273_v28, 0.0  ;;  %v21630_v7 = vld [vmem:[#allocation33_spill] sm:$0xff] }
 0x182   :  { %v1402_v53 = vmul.f32 %v18760_v19, %v1306_v23  ;;  %v1276_v14 = vadd.f32 %v15688_v37, %v18692_v51  ;;  %v1118_v11 = vpop.f32.mrb[11].mxu0  ;;  %16076 = vmatmul.mubr.msk.f32.gmra.mrb[52].mxu0 %vm231_vm0, %v21629_v17  ;;  %v21530_v2 = vand.u32 15, %v18861_v29  ;;  %v1434_v43 = vmax.f32 %v1432_v5, %v1433_v0 }
 0x183   :  { %v1442_v16 = vrot.slane %v1441_v32, 1  ;;  %v1449_v22 = vrot.slane %v1448_v6, 2  ;;  %v1456_v55 = vrot.slane %v1455_v33, 4  ;;  %v1275_v63 = vadd.f32 %v18692_v51, %v1118_v11  ;;  %16078 = vmatprep.mubr.msk.f32.mxu0 %vm231_vm0, %v21630_v7 }
 0x184   :  { %v1462_v18 = vsel %vm1425_vm4, %v1305_v1, -inf  ;;  %v1463_v21 = vsel %vm1425_vm4, %v1402_v53, -inf  ;;  %v1308_v19 = vmax.f32 %v1276_v14, 0.0  ;;  %vm18892_vm5 = vcmp.lt.s32.totalorder %v21530_v2, 10 }
 0x185   :  { %v1443_v23 = vmax.f32 %v1441_v32, %v1442_v16  ;;  %v1450_v28 = vmax.f32 %v1448_v6, %v1449_v22  ;;  %v1457_v37 = vmax.f32 %v1455_v33, %v1456_v55  ;;  %v1464_v26 = vmax.f32 %v1462_v18, %v1463_v21  ;;  %v15691_v17 = vpop.f32.mrb[12].mxu0  ;;  %v21632_v6 = vld [vmem:[#allocation35_spill] sm:$0xff] }
 0x186   :  { %v1404_v59 = vmul.f32 %v18772_v24, %v1308_v19  ;;  %v1307_v11 = vmax.f32 %v1275_v63, 0.0  ;;  %v1278_v39 = vadd.f32 %v15691_v17, %v18692_v51  ;;  %v1128_v7 = vpop.f32.mrb[13].mxu0  ;;  %16079 = vmatmul.mubr.msk.f32.gmra.mrb[54].mxu0 %vm231_vm0, %v21631_v9  ;;  %vm2851_vm13 = vcmp.lt.s32.totalorder %v125_v45, 9 }
 0x187   :  { %v1451_v53 = vrot.slane %v1450_v28, 1  ;;  %v1458_v1 = vrot.slane %v1457_v37, 2  ;;  %v1465_v14 = vrot.slane %v1464_v26, 4  ;;  %v1277_v32 = vadd.f32 %v18692_v51, %v1128_v7  ;;  %16081 = vmatprep.mubr.msk.f32.mxu0 %vm231_vm0, %v21632_v6  ;;  %v21633_v7 = vld [vmem:[#allocation36_spill] sm:$0xff] }
 0x188   :  { %v1471_v33 = vsel %vm1425_vm4, %v1307_v11, -inf  ;;  %v1472_v5 = vsel %vm1425_vm4, %v1404_v59, -inf  ;;  %v1310_v24 = vmax.f32 %v1278_v39, 0.0  ;;  %v1571_v0 = vsel %vm1570_vm14, %v1434_v43, %v1443_v23 }
 0x189   :  { %v1452_v16 = vmax.f32 %v1450_v28, %v1451_v53  ;;  %v1459_v22 = vmax.f32 %v1457_v37, %v1458_v1  ;;  %v1466_v55 = vmax.f32 %v1464_v26, %v1465_v14  ;;  %v1473_v63 = vmax.f32 %v1471_v33, %v1472_v5  ;;  %v15694_v9 = vpop.f32.mrb[14].mxu0  ;;  %v21636_v28 = vld [vmem:[#allocation37_spill] sm:$0xff] }
 0x18a   :  { %v1406_v18 = vmul.f32 %v18777_v25, %v1310_v24  ;;  %v1309_v21 = vmax.f32 %v1277_v32, 0.0  ;;  %v1280_v19 = vadd.f32 %v15694_v9, %v18692_v51  ;;  %v1138_v17 = vpop.f32.mrb[15].mxu0  ;;  %16082 = vmatmul.mubr.msk.f32.gmra.mrb[56].mxu0 %vm231_vm0, %v21633_v7  ;;  %v21637_v7 = vld [vmem:[#allocation38_spill] sm:$0xff]  ;;  %vm2853_vm15 = vcmp.lt.s32.totalorder %v127_v50, 9 }
 0x18b   :  { %v1460_v59 = vrot.slane %v1459_v22, 1  ;;  %v1467_v43 = vrot.slane %v1466_v55, 2  ;;  %v1474_v26 = vrot.slane %v1473_v63, 4  ;;  %v1279_v23 = vadd.f32 %v18692_v51, %v1138_v17  ;;  %16084 = vmatprep.mubr.msk.f32.mxu0 %vm231_vm0, %v21636_v28 }
 0x18c   :  { %v1480_v25 = vsel %vm1425_vm4, %v1309_v21, -inf  ;;  %v1481_v37 = vsel %vm1425_vm4, %v1406_v18, -inf  ;;  %v1312_v11 = vmax.f32 %v1280_v19, 0.0  ;;  %v1573_v53 = vsel %vm1572_vm1, %v1571_v0, %v1452_v16 }
 0x18d   :  { %v1461_v1 = vmax.f32 %v1459_v22, %v1460_v59  ;;  %v1468_v14 = vmax.f32 %v1466_v55, %v1467_v43  ;;  %v1475_v32 = vmax.f32 %v1473_v63, %v1474_v26  ;;  %v1482_v6 = vmax.f32 %v1480_v25, %v1481_v37  ;;  %v15697_v33 = vpop.f32.mrb[16].mxu0  ;;  %v21638_v55 = vld [vmem:[#allocation39_spill] sm:$0xff] }
 0x18e   :  { %v1408_v5 = vmul.f32 %v18806_v4, %v1312_v11  ;;  %v1311_v24 = vmax.f32 %v1279_v23, 0.0  ;;  %v1282_v9 = vadd.f32 %v15697_v33, %v18692_v51  ;;  %v1148_v17 = vpop.f32.mrb[17].mxu0  ;;  %16085 = vmatmul.mubr.msk.f32.gmra.mrb[58].mxu0 %vm231_vm0, %v21637_v7  ;;  %v18907_v18 = vadd.s32 232, %v18652_v31 }
 0x18f   :  { %v1469_v21 = vrot.slane %v1468_v14, 1  ;;  %v1476_v0 = vrot.slane %v1475_v32, 2  ;;  %v1483_v16 = vrot.slane %v1482_v6, 4  ;;  %v1281_v22 = vadd.f32 %v18692_v51, %v1148_v17  ;;  %16087 = vmatprep.mubr.msk.f32.mxu0 %vm231_vm0, %v21638_v55 }
 0x190   :  { %v1489_v4 = vsel %vm1425_vm4, %v1311_v24, -inf  ;;  %v1490_v63 = vsel %vm1425_vm4, %v1408_v5, -inf  ;;  %v1314_v19 = vmax.f32 %v1282_v9, 0.0  ;;  %v1575_v59 = vsel %vm1574_vm2, %v1573_v53, %v1461_v1 }
 0x191   :  { %v1470_v43 = vmax.f32 %v1468_v14, %v1469_v21  ;;  %v1477_v26 = vmax.f32 %v1475_v32, %v1476_v0  ;;  %v1484_v23 = vmax.f32 %v1482_v6, %v1483_v16  ;;  %v1491_v28 = vmax.f32 %v1489_v4, %v1490_v63  ;;  %v15700_v25 = vpop.f32.mrb[18].mxu0  ;;  %v21639_v6 = vld [vmem:[#allocation40_spill] sm:$0xff] }
 0x192   :  { %v1410_v37 = vmul.f32 %v18810_v15, %v1314_v19  ;;  %v1313_v11 = vmax.f32 %v1281_v22, 0.0  ;;  %v1284_v33 = vadd.f32 %v15700_v25, %v18692_v51  ;;  %v1158_v17 = vpop.f32.mrb[19].mxu0  ;;  %16088 = vmatmul.mubr.msk.f32.gmra.mrb[60].mxu0 %vm231_vm0, %v18462_v12  ;;  %v18922_v5 = vsel %vm18892_vm5, 1.0, %v17620_v62  ;;  %v18932_v12 = vld [vmem:[%s21547_s0 + $0x3] sm:$0xff] }
 0x193   :  { %v1478_v53 = vrot.slane %v1477_v26, 1  ;;  %v1485_v1 = vrot.slane %v1484_v23, 2  ;;  %v1492_v14 = vrot.slane %v1491_v28, 4  ;;  %v1283_v32 = vadd.f32 %v18692_v51, %v1158_v17  ;;  %16090 = vmatprep.mubr.msk.f32.mxu0 %vm231_vm0, %v21639_v6 }
 0x194   :  { %v1498_v15 = vsel %vm1425_vm4, %v1313_v11, -inf  ;;  %v1499_v24 = vsel %vm1425_vm4, %v1410_v37, -inf  ;;  %v1316_v9 = vmax.f32 %v1284_v33, 0.0  ;;  %v1577_v39 = vsel %vm1576_vm3, %v1575_v59, %v1470_v43 }
 0x195   :  { %v1486_v7 = vmax.f32 %v1484_v23, %v1485_v1  ;;  %v1493_v21 = vmax.f32 %v1491_v28, %v1492_v14  ;;  %v1500_v0 = vmax.f32 %v1498_v15, %v1499_v24  ;;  %v1315_v16 = vmax.f32 %v1283_v32, 0.0  ;;  %v15703_v22 = vpop.f32.mrb[20].mxu0 }
 0x196   :  { %v1412_v55 = vmul.f32 %v18831_v52, %v1316_v9  ;;  %v1286_v4 = vadd.f32 %v15703_v22, %v18692_v51  ;;  %v1168_v63 = vpop.f32.mrb[21].mxu0  ;;  %16091 = vmatmul.mubr.msk.f32.gmra.mrb[62].mxu0 %vm231_vm0, %v18476_v42  ;;  %v1479_v19 = vmax.f32 %v1477_v26, %v1478_v53  ;;  %v21528_v25 = vand.u32 15, %v18907_v18  ;;  %v18947_v52 = vld [vmem:[%s21547_s0 + $0xb] sm:$0xff]  ;;  %v18953_v26 = vld [vmem:[%s21547_s0 + $0x13] sm:$0xff] }
 0x197   :  { %v1494_v37 = vrot.slane %v1493_v21, 2  ;;  %v1501_v11 = vrot.slane %v1500_v0, 4  ;;  %v1507_v59 = vsel %vm1425_vm4, %v1315_v16, -inf  ;;  %v1285_v43 = vadd.f32 %v18692_v51, %v1168_v63  ;;  %16097 = vmatprep.mubr.msk.f32.mxu0 %vm231_vm0, %v18932_v12 }
 0x198   :  { %v1508_v23 = vsel %vm1425_vm4, %v1412_v55, -inf  ;;  %v1318_v42 = vmax.f32 %v1286_v4, 0.0  ;;  %v1487_v28 = vrot.slane %v1486_v7, 1  ;;  %v1579_v33 = vsel %vm1578_vm6, %v1577_v39, %v1479_v19  ;;  %v18981_v19 = vld [vmem:[%s21547_s0 + $0x23] sm:$0xff] }
 0x199   :  { %v1502_v17 = vmax.f32 %v1500_v0, %v1501_v11  ;;  %v1509_v53 = vmax.f32 %v1507_v59, %v1508_v23  ;;  %v1317_v1 = vmax.f32 %v1285_v43, 0.0  ;;  %v15706_v14 = vpop.f32.mrb[22].mxu0  ;;  %v1495_v32 = vmax.f32 %v1493_v21, %v1494_v37 }
 0x19a   :  { %v1414_v6 = vmul.f32 %v18842_v3, %v1318_v42  ;;  %v1288_v15 = vadd.f32 %v15706_v14, %v18692_v51  ;;  %v1178_v24 = vpop.f32.mrb[23].mxu0  ;;  %16098 = vmatmul.mubr.msk.f32.vlgmr.msra.gmra.mrb[32].mxu0 %vm231_vm0, %v18947_v52  ;;  %v1488_v9 = vmax.f32 %v1486_v7, %v1487_v28  ;;  %vm18962_vm9 = vcmp.lt.s32.totalorder %v21528_v25, 10  ;;  %v18973_v3 = vld [vmem:[%s21547_s0 + $0x1b] sm:$0xff] }
 0x19b   :  { %v1503_v39 = vrot.slane %v1502_v17, 2  ;;  %v1510_v0 = vrot.slane %v1509_v53, 4  ;;  %v1516_v22 = vsel %vm1425_vm4, %v1317_v1, -inf  ;;  %v1287_v21 = vadd.f32 %v18692_v51, %v1178_v24  ;;  %16100 = vmatprep.mubr.msk.f32.mxu0 %vm231_vm0, %v18953_v26  ;;  %16825 = vmatpush3.bf16.msra.mxu0 %v18641_v27 }
 0x19c   :  { %v1517_v7 = vsel %vm1425_vm4, %v1414_v6, -inf  ;;  %v1320_v55 = vmax.f32 %v1288_v15, 0.0  ;;  %v1496_v4 = vrot.slane %v1495_v32, 1  ;;  %v1581_v63 = vsel %vm1580_vm7, %v1579_v33, %v1488_v9  ;;  %16527 = vmatprep.subr.mxu0 %v17620_v62 }
 0x19d   :  { %v1504_v37 = vmax.f32 %v1502_v17, %v1503_v39  ;;  %v1511_v11 = vmax.f32 %v1509_v53, %v1510_v0  ;;  %v1518_v59 = vmax.f32 %v1516_v22, %v1517_v7  ;;  %v1319_v43 = vmax.f32 %v1287_v21, 0.0  ;;  %v15709_v23 = vpop.f32.mrb[24].mxu0  ;;  %v19005_v39 = vld [vmem:[%s21547_s0 + $0x33] sm:$0xff] }
 0x19e   :  { %v1416_v27 = vmul.f32 %v18856_v8, %v1320_v55  ;;  %v1290_v42 = vadd.f32 %v15709_v23, %v18692_v51  ;;  %v1188_v28 = vpop.f32.mrb[25].mxu0  ;;  %16101 = vmatmul.mubr.msk.f32.gmra.mrb[34].mxu0 %vm231_vm0, %v18973_v3  ;;  %v1497_v33 = vmax.f32 %v1495_v32, %v1496_v4  ;;  %v18989_v1 = vadd.s32 248, %v18652_v31  ;;  %v18997_v8 = vld [vmem:[%s21547_s0 + $0x2b] sm:$0xff] }
 0x19f   :  { %v1505_v14 = vrot.slane %v1504_v37, 1  ;;  %v1512_v6 = vrot.slane %v1511_v11, 2  ;;  %v1519_v15 = vrot.slane %v1518_v59, 4  ;;  %v1525_v17 = vsel %vm1425_vm4, %v1319_v43, -inf  ;;  %16103 = vmatprep.mubr.msk.f32.mxu0 %vm231_vm0, %v18981_v19 }
 0x1a0   :  { %v1526_v53 = vsel %vm1425_vm4, %v1416_v27, -inf  ;;  %v1322_v24 = vmax.f32 %v1290_v42, 0.0  ;;  %v1289_v32 = vadd.f32 %v18692_v51, %v1188_v28  ;;  %v1583_v9 = vsel %vm1582_vm8, %v1581_v63, %v1497_v33 }
 0x1a1   :  { %v1513_v0 = vmax.f32 %v1511_v11, %v1512_v6  ;;  %v1520_v22 = vmax.f32 %v1518_v59, %v1519_v15  ;;  %v1527_v21 = vmax.f32 %v1525_v17, %v1526_v53  ;;  %15721 = vmatprep.mubr.msk.f32.mxu1 %vm1425_vm4, %v1583_v9  ;;  %v15712_v7 = vpop.f32.mrb[26].mxu0  ;;  %v1390_v55 = vsel %vm18962_vm9, 1.0, %v17620_v62  ;;  %v19029_v17 = vld [vmem:[%s21547_s0 + $0x43] sm:$0xff] }
 0x1a2   :  { %v1418_v4 = vmul.f32 %v18864_v49, %v1322_v24  ;;  %v1321_v43 = vmax.f32 %v1289_v32, 0.0  ;;  %v1292_v63 = vadd.f32 %v15712_v7, %v18692_v51  ;;  %v1198_v23 = vpop.f32.mrb[27].mxu0  ;;  %16104 = vmatmul.mubr.msk.f32.gmra.mrb[36].mxu0 %vm231_vm0, %v18997_v8  ;;  %v21529_v11 = vand.u32 15, %v18989_v1  ;;  %v19022_v49 = vld [vmem:[%s21547_s0 + $0x3b] sm:$0xff] }
 0x1a3   :  { %v1514_v59 = vrot.slane %v1513_v0, 1  ;;  %v1521_v27 = vrot.slane %v1520_v22, 2  ;;  %v1528_v42 = vrot.slane %v1527_v21, 4  ;;  %v1291_v28 = vadd.f32 %v18692_v51, %v1198_v23  ;;  %16106 = vmatprep.mubr.msk.f32.mxu0 %vm231_vm0, %v19005_v39 }
 0x1a4   :  { %v1506_v16 = vmax.f32 %v1504_v37, %v1505_v14  ;;  %v1534_v33 = vsel %vm1425_vm4, %v1321_v43, -inf  ;;  %v1535_v6 = vsel %vm1425_vm4, %v1418_v4, -inf  ;;  %v1324_v15 = vmax.f32 %v1292_v63, 0.0 }
 0x1a5   :  { %v1515_v53 = vmax.f32 %v1513_v0, %v1514_v59  ;;  %v1522_v24 = vmax.f32 %v1520_v22, %v1521_v27  ;;  %v1529_v32 = vmax.f32 %v1527_v21, %v1528_v42  ;;  %v1536_v9 = vmax.f32 %v1534_v33, %v1535_v6  ;;  %v15715_v7 = vpop.f32.mrb[28].mxu0 }
 0x1a6   :  { %v1420_v23 = vmul.f32 %v18922_v5, %v1324_v15  ;;  %v1323_v25 = vmax.f32 %v1291_v28, 0.0  ;;  %v1294_v37 = vadd.f32 %v15715_v7, %v18692_v51  ;;  %v1208_v14 = vpop.f32.mrb[29].mxu0  ;;  %16107 = vmatmul.mubr.msk.f32.gmra.mrb[38].mxu0 %vm231_vm0, %v19022_v49  ;;  %vm19037_vm10 = vcmp.lt.s32.totalorder %v21529_v11, 10  ;;  %v19047_v5 = vld [vmem:[%s21547_s0 + $0x4b] sm:$0xff]  ;;  %v19055_v28 = vld [vmem:[%s21547_s0 + $0x53] sm:$0xff] }
 0x1a7   :  { %v1584_v0 = vsel %vm1570_vm14, %v1506_v16, %v1515_v53  ;;  %v1523_v22 = vrot.slane %v1522_v24, 1  ;;  %v1530_v21 = vrot.slane %v1529_v32, 2  ;;  %v1537_v43 = vrot.slane %v1536_v9, 4  ;;  %16109 = vmatprep.mubr.msk.f32.mxu0 %vm231_vm0, %v19029_v17 }
 0x1a8   :  { %v1543_v63 = vsel %vm1425_vm4, %v1323_v25, -inf  ;;  %v1544_v59 = vsel %vm1425_vm4, %v1420_v23, -inf  ;;  %v1326_v27 = vmax.f32 %v1294_v37, 0.0  ;;  %v1293_v42 = vadd.f32 %v18692_v51, %v1208_v14 }
 0x1a9   :  { %v1524_v16 = vmax.f32 %v1522_v24, %v1523_v22  ;;  %v1531_v33 = vmax.f32 %v1529_v32, %v1530_v21  ;;  %v1538_v6 = vmax.f32 %v1536_v9, %v1537_v43  ;;  %v1545_v15 = vmax.f32 %v1543_v63, %v1544_v59  ;;  %v15718_v53 = vpop.f32.mrb[30].mxu0 }
 0x1aa   :  { %v1422_v7 = vmul.f32 %v1390_v55, %v1326_v27  ;;  %v1325_v11 = vmax.f32 %v1293_v42, 0.0  ;;  %v1296_v2 = vadd.f32 %v15718_v53, %v18692_v51  ;;  %v1392_v25 = vsel %vm19037_vm10, 1.0, %v17620_v62  ;;  %v1218_v23 = vpop.f32.mrb[31].mxu0  ;;  %16110 = vmatmul.mubr.msk.f32.gmra.mrb[40].mxu0 %vm231_vm0, %v19047_v5  ;;  %v19069_v55 = vld [vmem:[%s21547_s0 + $0x5b] sm:$0xff] }
 0x1ab   :  { %v1585_v37 = vsel %vm1572_vm1, %v1584_v0, %v1524_v16  ;;  %v1532_v14 = vrot.slane %v1531_v33, 1  ;;  %v1539_v24 = vrot.slane %v1538_v6, 2  ;;  %v1546_v32 = vrot.slane %v1545_v15, 4  ;;  %16112 = vmatprep.mubr.msk.f32.mxu0 %vm231_vm0, %v19055_v28  ;;  %v19077_v0 = vld [vmem:[%s21547_s0 + $0x63] sm:$0xff] }
 0x1ac   :  { %v1552_v9 = vsel %vm1425_vm4, %v1325_v11, -inf  ;;  %v1553_v4 = vsel %vm1425_vm4, %v1422_v7, -inf  ;;  %v1328_v22 = vmax.f32 %v1296_v2, 0.0  ;;  %v1295_v21 = vadd.f32 %v18692_v51, %v1218_v23  ;;  %v19086_v51 = vld [vmem:[%s21547_s0 + $0x6b] sm:$0xff] }
 0x1ad   :  { %v1533_v43 = vmax.f32 %v1531_v33, %v1532_v14  ;;  %v1540_v63 = vmax.f32 %v1538_v6, %v1539_v24  ;;  %v1547_v59 = vmax.f32 %v1545_v15, %v1546_v32  ;;  %v1554_v27 = vmax.f32 %v1552_v9, %v1553_v4  ;;  %v19094_v15 = vld [vmem:[%s21547_s0 + $0x73] sm:$0xff] }
 0x1ae   :  { %v1424_v42 = vmul.f32 %v1392_v25, %v1328_v22  ;;  %v1327_v16 = vmax.f32 %v1295_v21, 0.0  ;;  %16113 = vmatmul.mubr.msk.f32.gmra.mrb[42].mxu0 %vm231_vm0, %v19069_v55  ;;  %v19109_v21 = vld [vmem:[%s21547_s0 + $0x83] sm:$0xff]  ;;  %vm2855_vm5 = vcmp.lt.s32.totalorder %v129_v54, 9  ;;  %v2885_v44 = vsel %vm2853_vm15, 1.0, %v17620_v62 }
 0x1af   :  { %v1541_v11 = vrot.slane %v1540_v63, 1  ;;  %v1548_v53 = vrot.slane %v1547_v59, 2  ;;  %v1555_v7 = vrot.slane %v1554_v27, 4  ;;  %16115 = vmatprep.mubr.msk.f32.mxu0 %vm231_vm0, %v19077_v0  ;;  %v1586_v2 = vsel %vm1574_vm2, %v1585_v37, %v1533_v43  ;;  %v19103_v37 = vld [vmem:[%s21547_s0 + $0x7b] sm:$0xff] }
 0x1b0   :  { %v1561_v33 = vsel %vm1425_vm4, %v1327_v16, -inf  ;;  %v1562_v6 = vsel %vm1425_vm4, %v1424_v42, -inf  ;;  %v19118_v16 = vld [vmem:[%s21547_s0 + $0x8b] sm:$0xff]  ;;  %v2887_v54 = vsel %vm2855_vm5, 1.0, %v17620_v62 }
 0x1b1   :  { %v1542_v25 = vmax.f32 %v1540_v63, %v1541_v11  ;;  %v1549_v23 = vmax.f32 %v1547_v59, %v1548_v53  ;;  %v1556_v14 = vmax.f32 %v1554_v27, %v1555_v7  ;;  %v1563_v24 = vmax.f32 %v1561_v33, %v1562_v6  ;;  %v19124_v53 = vld [vmem:[%s21547_s0 + $0x93] sm:$0xff]  ;;  %v19133_v33 = vld [vmem:[%s21547_s0 + $0x9b] sm:$0xff] }
 0x1b2   :  { %16116 = vmatmul.mubr.msk.f32.gmra.mrb[44].mxu0 %vm231_vm0, %v19086_v51 }
 0x1b3   :  { %v1550_v32 = vrot.slane %v1549_v23, 1  ;;  %v1557_v9 = vrot.slane %v1556_v14, 2  ;;  %v1564_v4 = vrot.slane %v1563_v24, 4  ;;  %16118 = vmatprep.mubr.msk.f32.mxu0 %vm231_vm0, %v19094_v15  ;;  %v1587_v22 = vsel %vm1576_vm3, %v1586_v2, %v1542_v25 }
 0x1b5   :  { %v1551_v43 = vmax.f32 %v1549_v23, %v1550_v32  ;;  %v1558_v63 = vmax.f32 %v1556_v14, %v1557_v9  ;;  %v1565_v59 = vmax.f32 %v1563_v24, %v1564_v4  ;;  %v1675_v23 = vld [vmem:[%s21586_s4] sm:$0xff]  ;;  %v1676_v14 = vld [vmem:[%s21586_s4 + $0x8] sm:$0xff] }
 0x1b6   :  { %16119 = vmatmul.mubr.msk.f32.gmra.mrb[46].mxu0 %vm231_vm0, %v19103_v37  ;;  %v19145_v24 = vld [vmem:[%s21547_s0 + $0xa3] sm:$0xff]  ;;  %v16794_v9 = vpack.c.bf16 %v1676_v14, %v1675_v23  ;;  %v19215_v23 = vld [vmem:[%s21547_s0 + $0xd3] sm:$0xff] }
 0x1b7   :  { %v1559_v27 = vrot.slane %v1558_v63, 1  ;;  %v1566_v42 = vrot.slane %v1565_v59, 2  ;;  %16121 = vmatprep.mubr.msk.f32.mxu0 %vm231_vm0, %v19109_v21  ;;  %v1588_v11 = vsel %vm1578_vm6, %v1587_v22, %v1551_v43  ;;  %v19155_v22 = vld [vmem:[%s21547_s0 + $0xab] sm:$0xff]  ;;  %v1679_v43 = vld [vmem:[%s21586_s4 + $0x20] sm:$0xff] }
 0x1b8   :  { %v17500_v14 = vld [vmem:[%s21547_s0 + $0x21] sm:$0xff] }
 0x1b9   :  { %v1560_v7 = vmax.f32 %v1558_v63, %v1559_v27  ;;  %v1567_v2 = vmax.f32 %v1565_v59, %v1566_v42  ;;  %v1680_v63 = vld [vmem:[%s21586_s4 + $0x28] sm:$0xff]  ;;  %v19167_v59 = vld [vmem:[%s21547_s0 + $0xb3] sm:$0xff] }
 0x1ba   :  { %16122 = vmatmul.mubr.msk.f32.gmra.mrb[48].mxu0 %vm231_vm0, %v19118_v16  ;;  %v17496_v27 = vld [vmem:[%s21547_s0 + $0x1] sm:$0xff]  ;;  %v19176_v42 = vpack.c.bf16 %v1680_v63, %v1679_v43  ;;  %v17502_v43 = vld [vmem:[%s21547_s0 + $0x31] sm:$0xff] }
 0x1bb   :  { %16124 = vmatprep.mubr.msk.f32.mxu0 %vm231_vm0, %v19124_v53  ;;  %v1568_v6 = vrot.slane %v1567_v2, 1  ;;  %v1589_v25 = vsel %vm1580_vm7, %v1588_v11, %v1560_v7  ;;  %v19183_v11 = vld [vmem:[%s21547_s0 + $0xbb] sm:$0xff]  ;;  %v19192_v7 = vld [vmem:[%s21547_s0 + $0xc3] sm:$0xff]  ;;  %v19250_v63 = vld [vmem:[%s21547_s0 + $0xeb] sm:$0xff] }
 0x1bd   :  { %v1569_v32 = vmax.f32 %v1567_v2, %v1568_v6  ;;  %v17498_v2 = vld [vmem:[%s21547_s0 + $0x11] sm:$0xff] }
 0x1be   :  { %16125 = vmatmul.mubr.msk.f32.gmra.mrb[50].mxu0 %vm231_vm0, %v19133_v33  ;;  %v19206_v6 = vld [vmem:[%s21547_s0 + $0xcb] sm:$0xff] }
 0x1bf   :  { %v1590_v4 = vsel %vm1582_vm8, %v1589_v25, %v1569_v32  ;;  %16127 = vmatprep.mubr.msk.f32.mxu0 %vm231_vm0, %v19145_v24  ;;  %v17499_v25 = vld [vmem:[%s21547_s0 + $0x19] sm:$0xff] }
 0x1c0   :  { %15722 = vmatmul.mubr.msk.f32.vlgmr.msra.gmra.mrb[0].mxu1 %vm1425_vm4, %v1590_v4  ;;  %v19228_v32 = vld [vmem:[%s21547_s0 + $0xdb] sm:$0xff]  ;;  %v19237_v4 = vld [vmem:[%s21547_s0 + $0xe3] sm:$0xff] }
 0x1c1   :  { %16793 = vmatpush3.bf16.msra.mxu1 %v18608_v13  ;;  %15728 = vmatprep.mubr.msk.f32.mxu1 %vm231_vm0, %v17496_v27  ;;  %v17497_v13 = vld [vmem:[%s21547_s0 + $0x9] sm:$0xff]  ;;  %v17503_v27 = vld [vmem:[%s21547_s0 + $0x39] sm:$0xff] }
 0x1c2   :  { %16128 = vmatmul.mubr.msk.f32.gmra.mrb[52].mxu0 %vm231_vm0, %v19155_v22  ;;  %16795 = vmatprep.subr.bf16.mxu1 %v16794_v9 }
 0x1c3   :  { %16130 = vmatprep.mubr.msk.f32.mxu0 %vm231_vm0, %v19167_v59 }
 0x1c4   :  { %15729 = vmatmul.mubr.msk.f32.vlgmr.msra.gmra.mrb[2].mxu1 %vm231_vm0, %v17497_v13  ;;  %v19259_v13 = vld [vmem:[%s21547_s0 + $0xf3] sm:$0xff] }
 0x1c5   :  { %16797 = vmatpush3.bf16.msra.mxu1 %v16794_v9  ;;  %15731 = vmatprep.mubr.msk.f32.mxu1 %vm231_vm0, %v17498_v2  ;;  %v17501_v9 = vld [vmem:[%s21547_s0 + $0x29] sm:$0xff]  ;;  %v17504_v2 = vld [vmem:[%s21547_s0 + $0x41] sm:$0xff] }
 0x1c6   :  { %16131 = vmatmul.mubr.msk.f32.gmra.mrb[54].mxu0 %vm231_vm0, %v19183_v11  ;;  %16799 = vmatprep.subr.bf16.mxu1 %v19176_v42 }
 0x1c7   :  { %16133 = vmatprep.mubr.msk.f32.mxu0 %vm231_vm0, %v19192_v7 }
 0x1c8   :  { %15732 = vmatmul.mubr.msk.f32.gmra.mrb[4].mxu1 %vm231_vm0, %v17499_v25  ;;  %v19272_v25 = vld [vmem:[%s21547_s0 + $0xfb] sm:$0xff] }
 0x1c9   :  { %15734 = vmatprep.mubr.msk.f32.mxu1 %vm231_vm0, %v17500_v14  ;;  %v17505_v14 = vld [vmem:[%s21547_s0 + $0x49] sm:$0xff] }
 0x1ca   :  { %16134 = vmatmul.mubr.msk.f32.gmra.mrb[56].mxu0 %vm231_vm0, %v19206_v6 }
 0x1cb   :  { %16136 = vmatprep.mubr.msk.f32.mxu0 %vm231_vm0, %v19215_v23 }
 0x1cc   :  { %15735 = vmatmul.mubr.msk.f32.gmra.mrb[6].mxu1 %vm231_vm0, %v17501_v9  ;;  %v4159_v9 = vld [vmem:[%s21547_s0 + $0x4] sm:$0xff] }
 0x1cd   :  { %15737 = vmatprep.mubr.msk.f32.mxu1 %vm231_vm0, %v17502_v43  ;;  %v17506_v43 = vld [vmem:[%s21547_s0 + $0x51] sm:$0xff] }
 0x1ce   :  { %16137 = vmatmul.mubr.msk.f32.gmra.mrb[58].mxu0 %vm231_vm0, %v19228_v32 }
 0x1cf   :  { %16139 = vmatprep.mubr.msk.f32.mxu0 %vm231_vm0, %v19237_v4 }
 0x1d0   :  { %15738 = vmatmul.mubr.msk.f32.gmra.mrb[8].mxu1 %vm231_vm0, %v17503_v27  ;;  %v4160_v27 = vld [vmem:[%s21547_s0 + $0xc] sm:$0xff] }
 0x1d1   :  { %15740 = vmatprep.mubr.msk.f32.mxu1 %vm231_vm0, %v17504_v2  ;;  %v17507_v2 = vld [vmem:[%s21547_s0 + $0x59] sm:$0xff] }
 0x1d2   :  { %16140 = vmatmul.mubr.msk.f32.gmra.mrb[60].mxu0 %vm231_vm0, %v19250_v63 }
 0x1d3   :  { %16142 = vmatprep.mubr.msk.f32.mxu0 %vm231_vm0, %v19259_v13 }
 0x1d4   :  { %15741 = vmatmul.mubr.msk.f32.gmra.mrb[10].mxu1 %vm231_vm0, %v17505_v14  ;;  %v4161_v14 = vld [vmem:[%s21547_s0 + $0x14] sm:$0xff] }
 0x1d5   :  { %15743 = vmatprep.mubr.msk.f32.mxu1 %vm231_vm0, %v17506_v43  ;;  %v17508_v43 = vld [vmem:[%s21547_s0 + $0x61] sm:$0xff] }
 0x1d6   :  { %16143 = vmatmul.mubr.msk.f32.gmra.mrb[62].mxu0 %vm231_vm0, %v19272_v25 }
 0x1d7   :  { %16149 = vmatprep.mubr.msk.f32.mxu0 %vm231_vm0, %v4159_v9  ;;  %v4162_v9 = vld [vmem:[%s21547_s0 + $0x1c] sm:$0xff] }
 0x1d8   :  { %15744 = vmatmul.mubr.msk.f32.gmra.mrb[12].mxu1 %vm231_vm0, %v17507_v2  ;;  %v17509_v2 = vld [vmem:[%s21547_s0 + $0x69] sm:$0xff] }
 0x1d9   :  { %15746 = vmatprep.mubr.msk.f32.mxu1 %vm231_vm0, %v17508_v43  ;;  %v17511_v43 = vld [vmem:[%s21547_s0 + $0x79] sm:$0xff] }
 0x1da   :  { %16150 = vmatmul.mubr.msk.f32.vlgmr.msra.gmra.mrb[32].mxu0 %vm231_vm0, %v4160_v27  ;;  %v17510_v27 = vld [vmem:[%s21547_s0 + $0x71] sm:$0xff] }
 0x1db   :  { %16152 = vmatprep.mubr.msk.f32.mxu0 %vm231_vm0, %v4161_v14  ;;  %v4164_v14 = vld [vmem:[%s21547_s0 + $0x2c] sm:$0xff] }
 0x1dc   :  { %15747 = vmatmul.mubr.msk.f32.gmra.mrb[14].mxu1 %vm231_vm0, %v17509_v2  ;;  %v4165_v2 = vld [vmem:[%s21547_s0 + $0x34] sm:$0xff] }
 0x1dd   :  { %15749 = vmatprep.mubr.msk.f32.mxu1 %vm231_vm0, %v17510_v27  ;;  %v17513_v27 = vld [vmem:[%s21547_s0 + $0x89] sm:$0xff] }
 0x1de   :  { %16153 = vmatmul.mubr.msk.f32.gmra.mrb[34].mxu0 %vm231_vm0, %v4162_v9  ;;  %v17512_v9 = vld [vmem:[%s21547_s0 + $0x81] sm:$0xff] }
 0x1df   :  { %16155 = vmatprep.mubr.msk.f32.mxu0 %vm231_vm0, %v4163_v46  ;;  %v4166_v46 = vld [vmem:[%s21547_s0 + $0x3c] sm:$0xff] }
 0x1e0   :  { %15750 = vmatmul.mubr.msk.f32.gmra.mrb[16].mxu1 %vm231_vm0, %v17511_v43  ;;  %v4167_v43 = vld [vmem:[%s21547_s0 + $0x44] sm:$0xff] }
 0x1e1   :  { %15752 = vmatprep.mubr.msk.f32.mxu1 %vm231_vm0, %v17512_v9  ;;  %v17515_v9 = vld [vmem:[%s21547_s0 + $0x99] sm:$0xff] }
 0x1e2   :  { %16156 = vmatmul.mubr.msk.f32.gmra.mrb[36].mxu0 %vm231_vm0, %v4164_v14  ;;  %v17514_v14 = vld [vmem:[%s21547_s0 + $0x91] sm:$0xff] }
 0x1e3   :  { %16158 = vmatprep.mubr.msk.f32.mxu0 %vm231_vm0, %v4165_v2  ;;  %v4168_v2 = vld [vmem:[%s21547_s0 + $0x4c] sm:$0xff] }
 0x1e4   :  { %15753 = vmatmul.mubr.msk.f32.gmra.mrb[18].mxu1 %vm231_vm0, %v17513_v27  ;;  %v4169_v27 = vld [vmem:[%s21547_s0 + $0x54] sm:$0xff] }
 0x1e5   :  { %15755 = vmatprep.mubr.msk.f32.mxu1 %vm231_vm0, %v17514_v14  ;;  %v17517_v14 = vld [vmem:[%s21547_s0 + $0xa9] sm:$0xff] }
 0x1e6   :  { %16159 = vmatmul.mubr.msk.f32.gmra.mrb[38].mxu0 %vm231_vm0, %v4166_v46  ;;  %v17516_v46 = vld [vmem:[%s21547_s0 + $0xa1] sm:$0xff] }
 0x1e7   :  { %16161 = vmatprep.mubr.msk.f32.mxu0 %vm231_vm0, %v4167_v43  ;;  %v4170_v43 = vld [vmem:[%s21547_s0 + $0x5c] sm:$0xff] }
 0x1e8   :  { %15756 = vmatmul.mubr.msk.f32.gmra.mrb[20].mxu1 %vm231_vm0, %v17515_v9  ;;  %v4171_v9 = vld [vmem:[%s21547_s0 + $0x64] sm:$0xff] }
 0x1e9   :  { %15758 = vmatprep.mubr.msk.f32.mxu1 %vm231_vm0, %v17516_v46  ;;  %v17519_v46 = vld [vmem:[%s21547_s0 + $0xb9] sm:$0xff] }
 0x1ea   :  { %16162 = vmatmul.mubr.msk.f32.gmra.mrb[40].mxu0 %vm231_vm0, %v4168_v2  ;;  %v17518_v2 = vld [vmem:[%s21547_s0 + $0xb1] sm:$0xff] }
 0x1eb   :  { %16164 = vmatprep.mubr.msk.f32.mxu0 %vm231_vm0, %v4169_v27  ;;  %v4172_v27 = vld [vmem:[%s21547_s0 + $0x6c] sm:$0xff] }
 0x1ec   :  { %15759 = vmatmul.mubr.msk.f32.gmra.mrb[22].mxu1 %vm231_vm0, %v17517_v14  ;;  %v4173_v14 = vld [vmem:[%s21547_s0 + $0x74] sm:$0xff] }
 0x1ed   :  { %15761 = vmatprep.mubr.msk.f32.mxu1 %vm231_vm0, %v17518_v2  ;;  %v17521_v2 = vld [vmem:[%s21547_s0 + $0xc9] sm:$0xff] }
 0x1ee   :  { %16165 = vmatmul.mubr.msk.f32.gmra.mrb[42].mxu0 %vm231_vm0, %v4170_v43  ;;  %v17520_v43 = vld [vmem:[%s21547_s0 + $0xc1] sm:$0xff] }
 0x1ef   :  { %16167 = vmatprep.mubr.msk.f32.mxu0 %vm231_vm0, %v4171_v9  ;;  %v4174_v9 = vld [vmem:[%s21547_s0 + $0x7c] sm:$0xff] }
 0x1f0   :  { %15762 = vmatmul.mubr.msk.f32.gmra.mrb[24].mxu1 %vm231_vm0, %v17519_v46  ;;  %v4175_v46 = vld [vmem:[%s21547_s0 + $0x84] sm:$0xff] }
 0x1f1   :  { %15764 = vmatprep.mubr.msk.f32.mxu1 %vm231_vm0, %v17520_v43  ;;  %v17523_v43 = vld [vmem:[%s21547_s0 + $0xd9] sm:$0xff] }
 0x1f2   :  { %16168 = vmatmul.mubr.msk.f32.gmra.mrb[44].mxu0 %vm231_vm0, %v4172_v27  ;;  %v17522_v27 = vld [vmem:[%s21547_s0 + $0xd1] sm:$0xff] }
 0x1f3   :  { %16170 = vmatprep.mubr.msk.f32.mxu0 %vm231_vm0, %v4173_v14  ;;  %v4176_v14 = vld [vmem:[%s21547_s0 + $0x8c] sm:$0xff] }
 0x1f4   :  { %15765 = vmatmul.mubr.msk.f32.gmra.mrb[26].mxu1 %vm231_vm0, %v17521_v2  ;;  %v4177_v2 = vld [vmem:[%s21547_s0 + $0x94] sm:$0xff] }
 0x1f5   :  { %15767 = vmatprep.mubr.msk.f32.mxu1 %vm231_vm0, %v17522_v27  ;;  %v17525_v27 = vld [vmem:[%s21547_s0 + $0xe9] sm:$0xff] }
 0x1f6   :  { %16171 = vmatmul.mubr.msk.f32.gmra.mrb[46].mxu0 %vm231_vm0, %v4174_v9  ;;  %v17524_v9 = vld [vmem:[%s21547_s0 + $0xe1] sm:$0xff] }
 0x1f7   :  { %16173 = vmatprep.mubr.msk.f32.mxu0 %vm231_vm0, %v4175_v46  ;;  %v4178_v46 = vld [vmem:[%s21547_s0 + $0x9c] sm:$0xff] }
 0x1f8   :  { %15768 = vmatmul.mubr.msk.f32.gmra.mrb[28].mxu1 %vm231_vm0, %v17523_v43  ;;  %v4179_v43 = vld [vmem:[%s21547_s0 + $0xa4] sm:$0xff] }
 0x1f9   :  { %15770 = vmatprep.mubr.msk.f32.mxu1 %vm231_vm0, %v17524_v9  ;;  %v1681_v9 = vld [vmem:[%s21586_s4 + $0x30] sm:$0xff] }
 0x1fa   :  { %16174 = vmatmul.mubr.msk.f32.gmra.mrb[48].mxu0 %vm231_vm0, %v4176_v14  ;;  %v17526_v14 = vld [vmem:[%s21547_s0 + $0xf1] sm:$0xff] }
 0x1fb   :  { %16176 = vmatprep.mubr.msk.f32.mxu0 %vm231_vm0, %v4177_v2  ;;  %v4180_v2 = vld [vmem:[%s21547_s0 + $0xac] sm:$0xff] }
 0x1fc   :  { %15771 = vmatmul.mubr.msk.f32.gmra.mrb[30].mxu1 %vm231_vm0, %v17525_v27  ;;  %v1682_v27 = vld [vmem:[%s21586_s4 + $0x38] sm:$0xff]  ;;  %s21673_s4 = sld [smem:[#allocation51_spill]] }
 0x1fd   :  { %15773 = vmatprep.mubr.msk.f32.mxu1 %vm231_vm0, %v17526_v14  ;;  %v17527_v14 = vld [vmem:[%s21547_s0 + $0xf9] sm:$0xff]  ;;  %v19469_v57 = vpack.c.bf16 %v1682_v27, %v1681_v9 }
 0x1fe   :  { %16177 = vmatmul.mubr.msk.f32.gmra.mrb[50].mxu0 %vm231_vm0, %v4178_v46  ;;  %v4181_v46 = vld [vmem:[%s21547_s0 + $0xb4] sm:$0xff]  ;;  %v17532_v27 = vld [vmem:[%s21547_s0 + $0x20] sm:$0xff] }
 0x1ff   :  { %16179 = vmatprep.mubr.msk.f32.mxu0 %vm231_vm0, %v4179_v43  ;;  %v17528_v43 = vld [vmem:[%s21547_s0] sm:$0xff]  ;;  %v4185_v9 = vld [vmem:[%s21547_s0 + $0xd4] sm:$0xff] }
 0x200   :  { %15774 = vmatmul.mubr.msk.f32.gmra.mrb[32].mxu1 %vm231_vm0, %v17527_v14  ;;  %v4182_v14 = vld [vmem:[%s21547_s0 + $0xbc] sm:$0xff] }
 0x201   :  { %15780 = vmatprep.mubr.msk.f32.mxu1 %vm231_vm0, %v17528_v43  ;;  %v4183_v43 = vld [vmem:[%s21547_s0 + $0xc4] sm:$0xff] }
 0x202   :  { %16180 = vmatmul.mubr.msk.f32.gmra.mrb[52].mxu0 %vm231_vm0, %v4180_v2  ;;  %v17530_v2 = vld [vmem:[%s21547_s0 + $0x10] sm:$0xff] }
 0x203   :  { %16182 = vmatprep.mubr.msk.f32.mxu0 %vm231_vm0, %v4181_v46  ;;  %v4186_v46 = vld [vmem:[%s21547_s0 + $0xdc] sm:$0xff] }
 0x204   :  { %15781 = vmatmul.mubr.msk.f32.vlgmr.msra.gmra.mrb[2].mxu1 %vm231_vm0, %v17529_v56  ;;  %v4184_v56 = vld [vmem:[%s21547_s0 + $0xcc] sm:$0xff] }
 0x205   :  { %16801 = vmatpush3.bf16.msra.mxu1 %v19176_v42  ;;  %15783 = vmatprep.mubr.msk.f32.mxu1 %vm231_vm0, %v17530_v2  ;;  %v17531_v42 = vld [vmem:[%s21547_s0 + $0x18] sm:$0xff]  ;;  %v17534_v2 = vld [vmem:[%s21547_s0 + $0x30] sm:$0xff] }
 0x206   :  { %16183 = vmatmul.mubr.msk.f32.gmra.mrb[54].mxu0 %vm231_vm0, %v4182_v14  ;;  %16803 = vmatprep.subr.bf16.mxu1 %v19469_v57  ;;  %v17533_v14 = vld [vmem:[%s21547_s0 + $0x28] sm:$0xff] }
 0x207   :  { %16185 = vmatprep.mubr.msk.f32.mxu0 %vm231_vm0, %v4183_v43  ;;  %v4187_v43 = vld [vmem:[%s21547_s0 + $0xe4] sm:$0xff] }
 0x208   :  { %15784 = vmatmul.mubr.msk.f32.gmra.mrb[4].mxu1 %vm231_vm0, %v17531_v42  ;;  %v17535_v42 = vld [vmem:[%s21547_s0 + $0x38] sm:$0xff] }
 0x209   :  { %15786 = vmatprep.mubr.msk.f32.mxu1 %vm231_vm0, %v17532_v27  ;;  %v17536_v27 = vld [vmem:[%s21547_s0 + $0x40] sm:$0xff] }
 0x20a   :  { %16186 = vmatmul.mubr.msk.f32.gmra.mrb[56].mxu0 %vm231_vm0, %v4184_v56  ;;  %v4188_v56 = vld [vmem:[%s21547_s0 + $0xec] sm:$0xff] }
 0x20b   :  { %16188 = vmatprep.mubr.msk.f32.mxu0 %vm231_vm0, %v4185_v9  ;;  %v4189_v9 = vld [vmem:[%s21547_s0 + $0xf4] sm:$0xff] }
 0x20c   :  { %15787 = vmatmul.mubr.msk.f32.gmra.mrb[6].mxu1 %vm231_vm0, %v17533_v14  ;;  %v17537_v14 = vld [vmem:[%s21547_s0 + $0x48] sm:$0xff] }
 0x20d   :  { %15789 = vmatprep.mubr.msk.f32.mxu1 %vm231_vm0, %v17534_v2  ;;  %v17539_v2 = vld [vmem:[%s21547_s0 + $0x58] sm:$0xff] }
 0x20e   :  { %16189 = vmatmul.mubr.msk.f32.gmra.mrb[58].mxu0 %vm231_vm0, %v4186_v46  ;;  %v4190_v46 = vld [vmem:[%s21547_s0 + $0xfc] sm:$0xff] }
 0x20f   :  { %16191 = vmatprep.mubr.msk.f32.mxu0 %vm231_vm0, %v4187_v43  ;;  %v17538_v43 = vld [vmem:[%s21547_s0 + $0x50] sm:$0xff] }
 0x210   :  { %15790 = vmatmul.mubr.msk.f32.gmra.mrb[8].mxu1 %vm231_vm0, %v17535_v42  ;;  %v17541_v42 = vld [vmem:[%s21547_s0 + $0x68] sm:$0xff] }
 0x211   :  { %15792 = vmatprep.mubr.msk.f32.mxu1 %vm231_vm0, %v17536_v27  ;;  %v17543_v27 = vld [vmem:[%s21547_s0 + $0x78] sm:$0xff] }
 0x212   :  { %16192 = vmatmul.mubr.msk.f32.gmra.mrb[60].mxu0 %vm231_vm0, %v4188_v56  ;;  %v17540_v56 = vld [vmem:[%s21547_s0 + $0x60] sm:$0xff] }
 0x213   :  { %16194 = vmatprep.mubr.msk.f32.mxu0 %vm231_vm0, %v4189_v9  ;;  %v17542_v9 = vld [vmem:[%s21547_s0 + $0x70] sm:$0xff] }
 0x214   :  { %15793 = vmatmul.mubr.msk.f32.gmra.mrb[10].mxu1 %vm231_vm0, %v17537_v14  ;;  %v17545_v14 = vld [vmem:[%s21547_s0 + $0x88] sm:$0xff] }
 0x215   :  { %15795 = vmatprep.mubr.msk.f32.mxu1 %vm231_vm0, %v17538_v43  ;;  %v17546_v43 = vld [vmem:[%s21547_s0 + $0x90] sm:$0xff] }
 0x216   :  { %16195 = vmatmul.mubr.msk.f32.gmra.mrb[62].mxu0 %vm231_vm0, %v4190_v46  ;;  %v17544_v46 = vld [vmem:[%s21547_s0 + $0x80] sm:$0xff] }
 0x218   :  { %15796 = vmatmul.mubr.msk.f32.gmra.mrb[12].mxu1 %vm231_vm0, %v17539_v2  ;;  %v17547_v2 = vld [vmem:[%s21547_s0 + $0x98] sm:$0xff] }
 0x219   :  { %15798 = vmatprep.mubr.msk.f32.mxu1 %vm231_vm0, %v17540_v56  ;;  %v17548_v56 = vld [vmem:[%s21547_s0 + $0xa0] sm:$0xff] }
 0x21c   :  { %15799 = vmatmul.mubr.msk.f32.gmra.mrb[14].mxu1 %vm231_vm0, %v17541_v42  ;;  %v17549_v42 = vld [vmem:[%s21547_s0 + $0xa8] sm:$0xff] }
 0x21d   :  { %15801 = vmatprep.mubr.msk.f32.mxu1 %vm231_vm0, %v17542_v9  ;;  %v17550_v9 = vld [vmem:[%s21547_s0 + $0xb0] sm:$0xff] }
 0x220   :  { %15802 = vmatmul.mubr.msk.f32.gmra.mrb[16].mxu1 %vm231_vm0, %v17543_v27  ;;  %v17551_v27 = vld [vmem:[%s21547_s0 + $0xb8] sm:$0xff] }
 0x221   :  { %15804 = vmatprep.mubr.msk.f32.mxu1 %vm231_vm0, %v17544_v46  ;;  %v17552_v46 = vld [vmem:[%s21547_s0 + $0xc0] sm:$0xff] }
 0x224   :  { %15805 = vmatmul.mubr.msk.f32.gmra.mrb[18].mxu1 %vm231_vm0, %v17545_v14  ;;  %v17553_v14 = vld [vmem:[%s21547_s0 + $0xc8] sm:$0xff] }
 0x225   :  { %15807 = vmatprep.mubr.msk.f32.mxu1 %vm231_vm0, %v17546_v43  ;;  %v17554_v43 = vld [vmem:[%s21547_s0 + $0xd0] sm:$0xff] }
 0x228   :  { %15808 = vmatmul.mubr.msk.f32.gmra.mrb[20].mxu1 %vm231_vm0, %v17547_v2  ;;  %v17555_v2 = vld [vmem:[%s21547_s0 + $0xd8] sm:$0xff] }
 0x229   :  { %15810 = vmatprep.mubr.msk.f32.mxu1 %vm231_vm0, %v17548_v56  ;;  %v17556_v56 = vld [vmem:[%s21547_s0 + $0xe0] sm:$0xff] }
 0x22c   :  { %15811 = vmatmul.mubr.msk.f32.gmra.mrb[22].mxu1 %vm231_vm0, %v17549_v42  ;;  %v17557_v42 = vld [vmem:[%s21547_s0 + $0xe8] sm:$0xff] }
 0x22d   :  { %15813 = vmatprep.mubr.msk.f32.mxu1 %vm231_vm0, %v17550_v9  ;;  %v17558_v9 = vld [vmem:[%s21547_s0 + $0xf0] sm:$0xff] }
 0x230   :  { %15814 = vmatmul.mubr.msk.f32.gmra.mrb[24].mxu1 %vm231_vm0, %v17551_v27  ;;  %v17559_v27 = vld [vmem:[%s21547_s0 + $0xf8] sm:$0xff] }
 0x231   :  { %15816 = vmatprep.mubr.msk.f32.mxu1 %vm231_vm0, %v17552_v46  ;;  %v17560_v46 = vld [vmem:[%s21547_s0 + $0x2] sm:$0xff] }
 0x234   :  { %15817 = vmatmul.mubr.msk.f32.gmra.mrb[26].mxu1 %vm231_vm0, %v17553_v14  ;;  %v17561_v14 = vld [vmem:[%s21547_s0 + $0xa] sm:$0xff] }
 0x235   :  { %15819 = vmatprep.mubr.msk.f32.mxu1 %vm231_vm0, %v17554_v43  ;;  %v17562_v43 = vld [vmem:[%s21547_s0 + $0x12] sm:$0xff] }
 0x238   :  { %15820 = vmatmul.mubr.msk.f32.gmra.mrb[28].mxu1 %vm231_vm0, %v17555_v2  ;;  %v17563_v2 = vld [vmem:[%s21547_s0 + $0x1a] sm:$0xff] }
 0x239   :  { %15822 = vmatprep.mubr.msk.f32.mxu1 %vm231_vm0, %v17556_v56  ;;  %v17564_v56 = vld [vmem:[%s21547_s0 + $0x22] sm:$0xff] }
 0x23c   :  { %15823 = vmatmul.mubr.msk.f32.gmra.mrb[30].mxu1 %vm231_vm0, %v17557_v42  ;;  %v17566_v42 = vld [vmem:[%s21547_s0 + $0x32] sm:$0xff] }
 0x23d   :  { %15825 = vmatprep.mubr.msk.f32.mxu1 %vm231_vm0, %v17558_v9  ;;  %v17567_v9 = vld [vmem:[%s21547_s0 + $0x3a] sm:$0xff] }
 0x240   :  { %15826 = vmatmul.mubr.msk.f32.gmra.mrb[32].mxu1 %vm231_vm0, %v17559_v27  ;;  %v17568_v27 = vld [vmem:[%s21547_s0 + $0x42] sm:$0xff] }
 0x241   :  { %15832 = vmatprep.mubr.msk.f32.mxu1 %vm231_vm0, %v17560_v46  ;;  %v17569_v46 = vld [vmem:[%s21547_s0 + $0x4a] sm:$0xff] }
 0x244   :  { %15833 = vmatmul.mubr.msk.f32.vlgmr.msra.gmra.mrb[2].mxu1 %vm231_vm0, %v17561_v14  ;;  %v17570_v14 = vld [vmem:[%s21547_s0 + $0x52] sm:$0xff] }
 0x245   :  { %16805 = vmatpush3.bf16.msra.mxu1 %v19469_v57  ;;  %15835 = vmatprep.mubr.msk.f32.mxu1 %vm231_vm0, %v17562_v43  ;;  %v17565_v57 = vld [vmem:[%s21547_s0 + $0x2a] sm:$0xff]  ;;  %v17571_v43 = vld [vmem:[%s21547_s0 + $0x5a] sm:$0xff] }
 0x248   :  { %15836 = vmatmul.mubr.msk.f32.gmra.mrb[4].mxu1 %vm231_vm0, %v17563_v2  ;;  %v17572_v2 = vld [vmem:[%s21547_s0 + $0x62] sm:$0xff] }
 0x249   :  { %15838 = vmatprep.mubr.msk.f32.mxu1 %vm231_vm0, %v17564_v56  ;;  %v17573_v56 = vld [vmem:[%s21547_s0 + $0x6a] sm:$0xff] }
 0x24c   :  { %15839 = vmatmul.mubr.msk.f32.gmra.mrb[6].mxu1 %vm231_vm0, %v17565_v57  ;;  %v17574_v57 = vld [vmem:[%s21547_s0 + $0x72] sm:$0xff] }
 0x24d   :  { %15841 = vmatprep.mubr.msk.f32.mxu1 %vm231_vm0, %v17566_v42  ;;  %v17575_v42 = vld [vmem:[%s21547_s0 + $0x7a] sm:$0xff] }
 0x250   :  { %15842 = vmatmul.mubr.msk.f32.gmra.mrb[8].mxu1 %vm231_vm0, %v17567_v9  ;;  %v17576_v9 = vld [vmem:[%s21547_s0 + $0x82] sm:$0xff] }
 0x251   :  { %15844 = vmatprep.mubr.msk.f32.mxu1 %vm231_vm0, %v17568_v27  ;;  %v17577_v27 = vld [vmem:[%s21547_s0 + $0x8a] sm:$0xff] }
 0x254   :  { %15845 = vmatmul.mubr.msk.f32.gmra.mrb[10].mxu1 %vm231_vm0, %v17569_v46  ;;  %v17578_v46 = vld [vmem:[%s21547_s0 + $0x92] sm:$0xff] }
 0x255   :  { %15847 = vmatprep.mubr.msk.f32.mxu1 %vm231_vm0, %v17570_v14  ;;  %v17579_v14 = vld [vmem:[%s21547_s0 + $0x9a] sm:$0xff] }
 0x258   :  { %15848 = vmatmul.mubr.msk.f32.gmra.mrb[12].mxu1 %vm231_vm0, %v17571_v43  ;;  %v17580_v43 = vld [vmem:[%s21547_s0 + $0xa2] sm:$0xff] }
 0x259   :  { %15850 = vmatprep.mubr.msk.f32.mxu1 %vm231_vm0, %v17572_v2  ;;  %v17581_v2 = vld [vmem:[%s21547_s0 + $0xaa] sm:$0xff] }
 0x25c   :  { %15851 = vmatmul.mubr.msk.f32.gmra.mrb[14].mxu1 %vm231_vm0, %v17573_v56  ;;  %v17582_v56 = vld [vmem:[%s21547_s0 + $0xb2] sm:$0xff] }
 0x25d   :  { %15853 = vmatprep.mubr.msk.f32.mxu1 %vm231_vm0, %v17574_v57  ;;  %v17583_v57 = vld [vmem:[%s21547_s0 + $0xba] sm:$0xff] }
 0x260   :  { %15854 = vmatmul.mubr.msk.f32.gmra.mrb[16].mxu1 %vm231_vm0, %v17575_v42  ;;  %v17584_v42 = vld [vmem:[%s21547_s0 + $0xc2] sm:$0xff] }
 0x261   :  { %15856 = vmatprep.mubr.msk.f32.mxu1 %vm231_vm0, %v17576_v9  ;;  %v17585_v9 = vld [vmem:[%s21547_s0 + $0xca] sm:$0xff] }
 0x264   :  { %15857 = vmatmul.mubr.msk.f32.gmra.mrb[18].mxu1 %vm231_vm0, %v17577_v27  ;;  %v17586_v27 = vld [vmem:[%s21547_s0 + $0xd2] sm:$0xff] }
 0x265   :  { %15859 = vmatprep.mubr.msk.f32.mxu1 %vm231_vm0, %v17578_v46  ;;  %v17587_v46 = vld [vmem:[%s21547_s0 + $0xda] sm:$0xff] }
 0x268   :  { %15860 = vmatmul.mubr.msk.f32.gmra.mrb[20].mxu1 %vm231_vm0, %v17579_v14  ;;  %v17588_v14 = vld [vmem:[%s21547_s0 + $0xe2] sm:$0xff] }
 0x269   :  { %15862 = vmatprep.mubr.msk.f32.mxu1 %vm231_vm0, %v17580_v43  ;;  %v17589_v43 = vld [vmem:[%s21547_s0 + $0xea] sm:$0xff] }
 0x26c   :  { %15863 = vmatmul.mubr.msk.f32.gmra.mrb[22].mxu1 %vm231_vm0, %v17581_v2  ;;  %v17590_v2 = vld [vmem:[%s21547_s0 + $0xf2] sm:$0xff] }
 0x26d   :  { %15865 = vmatprep.mubr.msk.f32.mxu1 %vm231_vm0, %v17582_v56  ;;  %v17591_v56 = vld [vmem:[%s21547_s0 + $0xfa] sm:$0xff]  ;;  %s21646_s0 = sld [smem:[#allocation47_spill]] }
 0x270   :  { %15866 = vmatmul.mubr.msk.f32.gmra.mrb[24].mxu1 %vm231_vm0, %v17583_v57 }
 0x271   :  { %15868 = vmatprep.mubr.msk.f32.mxu1 %vm231_vm0, %v17584_v42 }
 0x274   :  { %15869 = vmatmul.mubr.msk.f32.gmra.mrb[26].mxu1 %vm231_vm0, %v17585_v9 }
 0x275   :  { %15871 = vmatprep.mubr.msk.f32.mxu1 %vm231_vm0, %v17586_v27 }
 0x278   :  { %15872 = vmatmul.mubr.msk.f32.gmra.mrb[28].mxu1 %vm231_vm0, %v17587_v46 }
 0x279   :  { %15874 = vmatprep.mubr.msk.f32.mxu1 %vm231_vm0, %v17588_v14 }
 0x27c   :  { %15875 = vmatmul.mubr.msk.f32.gmra.mrb[30].mxu1 %vm231_vm0, %v17589_v43 }
 0x27d   :  { %15877 = vmatprep.mubr.msk.f32.mxu1 %vm231_vm0, %v17590_v2 }
 0x280   :  { %15878 = vmatmul.mubr.msk.f32.gmra.mrb[32].mxu1 %vm231_vm0, %v17591_v56 }
 0x281   :  { %15884 = vmatprep.mubr.msk.f32.mxu1 %vm231_vm0, %v18932_v12  ;;  %v19808_v12 = vld [vmem:[%s21644_s2] ss:$0 sm:$0xff]  ;;  %s21672_s2 = sld [smem:[#allocation52_spill]] }
 0x284   :  { %15885 = vmatmul.mubr.msk.f32.vlgmr.msra.gmra.mrb[2].mxu1 %vm231_vm0, %v18947_v52 }
 0x285   :  { %15887 = vmatprep.mubr.msk.f32.mxu1 %vm231_vm0, %v18953_v26 }
 0x288   :  { %15888 = vmatmul.mubr.msk.f32.gmra.mrb[4].mxu1 %vm231_vm0, %v18973_v3 }
 0x289   :  { %15890 = vmatprep.mubr.msk.f32.mxu1 %vm231_vm0, %v18981_v19 }
 0x28c   :  { %15891 = vmatmul.mubr.msk.f32.gmra.mrb[6].mxu1 %vm231_vm0, %v18997_v8 }
 0x28d   :  { %15893 = vmatprep.mubr.msk.f32.mxu1 %vm231_vm0, %v19005_v39 }
 0x290   :  { %15894 = vmatmul.mubr.msk.f32.gmra.mrb[8].mxu1 %vm231_vm0, %v19022_v49 }
 0x291   :  { %15896 = vmatprep.mubr.msk.f32.mxu1 %vm231_vm0, %v19029_v17 }
 0x294   :  { %15897 = vmatmul.mubr.msk.f32.gmra.mrb[10].mxu1 %vm231_vm0, %v19047_v5 }
 0x295   :  { %15899 = vmatprep.mubr.msk.f32.mxu1 %vm231_vm0, %v19055_v28 }
 0x298   :  { %15900 = vmatmul.mubr.msk.f32.gmra.mrb[12].mxu1 %vm231_vm0, %v19069_v55 }
 0x299   :  { %15902 = vmatprep.mubr.msk.f32.mxu1 %vm231_vm0, %v19077_v0 }
 0x29c   :  { %15903 = vmatmul.mubr.msk.f32.gmra.mrb[14].mxu1 %vm231_vm0, %v19086_v51 }
 0x29d   :  { %15905 = vmatprep.mubr.msk.f32.mxu1 %vm231_vm0, %v19094_v15 }
 0x2a0   :  { %15906 = vmatmul.mubr.msk.f32.gmra.mrb[16].mxu1 %vm231_vm0, %v19103_v37 }
 0x2a1   :  { %15908 = vmatprep.mubr.msk.f32.mxu1 %vm231_vm0, %v19109_v21 }
 0x2a4   :  { %15909 = vmatmul.mubr.msk.f32.gmra.mrb[18].mxu1 %vm231_vm0, %v19118_v16 }
 0x2a5   :  { %15911 = vmatprep.mubr.msk.f32.mxu1 %vm231_vm0, %v19124_v53 }
 0x2a8   :  { %15912 = vmatmul.mubr.msk.f32.gmra.mrb[20].mxu1 %vm231_vm0, %v19133_v33 }
 0x2a9   :  { %15914 = vmatprep.mubr.msk.f32.mxu1 %vm231_vm0, %v19145_v24 }
 0x2ac   :  { %15915 = vmatmul.mubr.msk.f32.gmra.mrb[22].mxu1 %vm231_vm0, %v19155_v22 }
 0x2ad   :  { %v16151_v52 = vpop.f32.mrb[32].mxu0  ;;  %15917 = vmatprep.mubr.msk.f32.mxu1 %vm231_vm0, %v19167_v59 }
 0x2ae   :  { %v4551_v26 = vadd.f32 %v16151_v52, %v19808_v12  ;;  %v4353_v3 = vpop.f32.mrb[33].mxu0 }
 0x2af   :  { %v4550_v19 = vadd.f32 %v19808_v12, %v4353_v3 }
 0x2b0   :  { %v4583_v8 = vmax.f32 %v4551_v26, 0.0  ;;  %15918 = vmatmul.mubr.msk.f32.gmra.mrb[24].mxu1 %vm231_vm0, %v19183_v11 }
 0x2b1   :  { %v4582_v39 = vmax.f32 %v4550_v19, 0.0  ;;  %v16154_v49 = vpop.f32.mrb[34].mxu0  ;;  %15920 = vmatprep.mubr.msk.f32.mxu1 %vm231_vm0, %v19192_v7 }
 0x2b2   :  { %v4679_v17 = vmul.f32 0.0, %v4583_v8  ;;  %v4553_v5 = vadd.f32 %v16154_v49, %v19808_v12  ;;  %v4363_v28 = vpop.f32.mrb[35].mxu0 }
 0x2b3   :  { %v4710_v55 = vsel %vm1425_vm4, %v4582_v39, -inf  ;;  %v4552_v0 = vadd.f32 %v19808_v12, %v4363_v28 }
 0x2b4   :  { %v4711_v51 = vsel %vm1425_vm4, %v4679_v17, -inf  ;;  %v4585_v15 = vmax.f32 %v4553_v5, 0.0  ;;  %15921 = vmatmul.mubr.msk.f32.gmra.mrb[26].mxu1 %vm231_vm0, %v19206_v6 }
 0x2b5   :  { %v4712_v37 = vmax.f32 %v4710_v55, %v4711_v51  ;;  %v4584_v21 = vmax.f32 %v4552_v0, 0.0  ;;  %v16157_v16 = vpop.f32.mrb[36].mxu0  ;;  %15923 = vmatprep.mubr.msk.f32.mxu1 %vm231_vm0, %v19215_v23 }
 0x2b6   :  { %v4681_v53 = vmul.f32 0.0, %v4585_v15  ;;  %v4555_v33 = vadd.f32 %v16157_v16, %v19808_v12  ;;  %v4373_v24 = vpop.f32.mrb[37].mxu0 }
 0x2b7   :  { %v4713_v22 = vrot.slane %v4712_v37, 4  ;;  %v4719_v59 = vsel %vm1425_vm4, %v4584_v21, -inf  ;;  %v4554_v11 = vadd.f32 %v19808_v12, %v4373_v24 }
 0x2b8   :  { %v4720_v7 = vsel %vm1425_vm4, %v4681_v53, -inf  ;;  %v4587_v57 = vmax.f32 %v4555_v33, 0.0  ;;  %15924 = vmatmul.mubr.msk.f32.gmra.mrb[28].mxu1 %vm231_vm0, %v19228_v32 }
 0x2b9   :  { %v4714_v6 = vmax.f32 %v4712_v37, %v4713_v22  ;;  %v4721_v42 = vmax.f32 %v4719_v59, %v4720_v7  ;;  %v4586_v9 = vmax.f32 %v4554_v11, 0.0  ;;  %v16160_v27 = vpop.f32.mrb[38].mxu0  ;;  %15926 = vmatprep.mubr.msk.f32.mxu1 %vm231_vm0, %v19237_v4 }
 0x2ba   :  { %v4683_v23 = vmul.f32 0.0, %v4587_v57  ;;  %v4557_v46 = vadd.f32 %v16160_v27, %v19808_v12  ;;  %v4383_v14 = vpop.f32.mrb[39].mxu0 }
 0x2bb   :  { %v4715_v43 = vrot.slane %v4714_v6, 2  ;;  %v4722_v2 = vrot.slane %v4721_v42, 4  ;;  %v4728_v56 = vsel %vm1425_vm4, %v4586_v9, -inf  ;;  %v4556_v52 = vadd.f32 %v19808_v12, %v4383_v14 }
 0x2bc   :  { %v4729_v26 = vsel %vm1425_vm4, %v4683_v23, -inf  ;;  %v4589_v32 = vmax.f32 %v4557_v46, 0.0  ;;  %15927 = vmatmul.mubr.msk.f32.gmra.mrb[30].mxu1 %vm231_vm0, %v19250_v63 }
 0x2bd   :  { %v4716_v3 = vmax.f32 %v4714_v6, %v4715_v43  ;;  %v4723_v19 = vmax.f32 %v4721_v42, %v4722_v2  ;;  %v4730_v8 = vmax.f32 %v4728_v56, %v4729_v26  ;;  %v4588_v4 = vmax.f32 %v4556_v52, 0.0  ;;  %v16163_v39 = vpop.f32.mrb[40].mxu0  ;;  %15929 = vmatprep.mubr.msk.f32.mxu1 %vm231_vm0, %v19259_v13 }
 0x2be   :  { %v4685_v49 = vmul.f32 0.0, %v4589_v32  ;;  %v4559_v17 = vadd.f32 %v16163_v39, %v19808_v12  ;;  %v4393_v5 = vpop.f32.mrb[41].mxu0 }
 0x2bf   :  { %v4724_v28 = vrot.slane %v4723_v19, 2  ;;  %v4731_v55 = vrot.slane %v4730_v8, 4  ;;  %v4737_v0 = vsel %vm1425_vm4, %v4588_v4, -inf  ;;  %v4717_v51 = vrot.slane %v4716_v3, 1 }
 0x2c0   :  { %v4738_v15 = vsel %vm1425_vm4, %v4685_v49, -inf  ;;  %v4591_v63 = vmax.f32 %v4559_v17, 0.0  ;;  %v4558_v37 = vadd.f32 %v19808_v12, %v4393_v5  ;;  %15930 = vmatmul.mubr.msk.f32.gmra.mrb[32].mxu1 %vm231_vm0, %v19272_v25 }
 0x2c1   :  { %v4725_v21 = vmax.f32 %v4723_v19, %v4724_v28  ;;  %v4732_v16 = vmax.f32 %v4730_v8, %v4731_v55  ;;  %v4739_v13 = vmax.f32 %v4737_v0, %v4738_v15  ;;  %v16166_v53 = vpop.f32.mrb[42].mxu0  ;;  %v4718_v42 = vmax.f32 %v4716_v3, %v4717_v51 }
 0x2c2   :  { %v4687_v33 = vmul.f32 0.0, %v4591_v63  ;;  %v4590_v24 = vmax.f32 %v4558_v37, 0.0  ;;  %v4561_v22 = vadd.f32 %v16166_v53, %v19808_v12  ;;  %v4403_v59 = vpop.f32.mrb[43].mxu0 }
 0x2c3   :  { %v4726_v11 = vrot.slane %v4725_v21, 1  ;;  %v4733_v7 = vrot.slane %v4732_v16, 2  ;;  %v4740_v57 = vrot.slane %v4739_v13, 4  ;;  %v4560_v6 = vadd.f32 %v19808_v12, %v4403_v59 }
 0x2c4   :  { %v4747_v9 = vsel %vm1425_vm4, %v4687_v33, -inf  ;;  %v4746_v27 = vsel %vm1425_vm4, %v4590_v24, -inf  ;;  %v4593_v25 = vmax.f32 %v4561_v22, 0.0 }
 0x2c5   :  { %v4727_v23 = vmax.f32 %v4725_v21, %v4726_v11  ;;  %v4734_v46 = vmax.f32 %v4732_v16, %v4733_v7  ;;  %v4741_v14 = vmax.f32 %v4739_v13, %v4740_v57  ;;  %v4748_v43 = vmax.f32 %v4746_v27, %v4747_v9  ;;  %v16169_v2 = vpop.f32.mrb[44].mxu0 }
 0x2c6   :  { %v4689_v56 = vmul.f32 0.0, %v4593_v25  ;;  %v4592_v52 = vmax.f32 %v4560_v6, 0.0  ;;  %v4563_v26 = vadd.f32 %v16169_v2, %v19808_v12  ;;  %v4413_v32 = vpop.f32.mrb[45].mxu0 }
 0x2c7   :  { %v4854_v19 = vsel %vm1570_vm14, %v4718_v42, %v4727_v23  ;;  %v4735_v8 = vrot.slane %v4734_v46, 1  ;;  %v4742_v4 = vrot.slane %v4741_v14, 2  ;;  %v4749_v3 = vrot.slane %v4748_v43, 4 }
 0x2c8   :  { %v4756_v39 = vsel %vm1425_vm4, %v4689_v56, -inf  ;;  %v4755_v49 = vsel %vm1425_vm4, %v4592_v52, -inf  ;;  %v4595_v17 = vmax.f32 %v4563_v26, 0.0  ;;  %v4562_v5 = vadd.f32 %v19808_v12, %v4413_v32 }
 0x2c9   :  { %v4736_v28 = vmax.f32 %v4734_v46, %v4735_v8  ;;  %v4743_v55 = vmax.f32 %v4741_v14, %v4742_v4  ;;  %v4750_v0 = vmax.f32 %v4748_v43, %v4749_v3  ;;  %v4757_v51 = vmax.f32 %v4755_v49, %v4756_v39  ;;  %v16172_v15 = vpop.f32.mrb[46].mxu0 }
 0x2ca   :  { %v4691_v63 = vmul.f32 0.0, %v4595_v17  ;;  %v4594_v37 = vmax.f32 %v4562_v5, 0.0  ;;  %v4565_v21 = vadd.f32 %v16172_v15, %v19808_v12  ;;  %v4423_v16 = vpop.f32.mrb[47].mxu0 }
 0x2cb   :  { %v4855_v13 = vsel %vm1572_vm1, %v4854_v19, %v4736_v28  ;;  %v4744_v53 = vrot.slane %v4743_v55, 1  ;;  %v4751_v33 = vrot.slane %v4750_v0, 2  ;;  %v4758_v24 = vrot.slane %v4757_v51, 4 }
 0x2cc   :  { %v4765_v22 = vsel %vm1425_vm4, %v4691_v63, -inf  ;;  %v4764_v59 = vsel %vm1425_vm4, %v4594_v37, -inf  ;;  %v4597_v11 = vmax.f32 %v4565_v21, 0.0  ;;  %v4564_v7 = vadd.f32 %v19808_v12, %v4423_v16 }
 0x2cd   :  { %v4745_v57 = vmax.f32 %v4743_v55, %v4744_v53  ;;  %v4752_v6 = vmax.f32 %v4750_v0, %v4751_v33  ;;  %v4759_v42 = vmax.f32 %v4757_v51, %v4758_v24  ;;  %v4766_v9 = vmax.f32 %v4764_v59, %v4765_v22  ;;  %v16175_v27 = vpop.f32.mrb[48].mxu0 }
 0x2ce   :  { %v4693_v25 = vmul.f32 0.0, %v4597_v11  ;;  %v4596_v23 = vmax.f32 %v4564_v7, 0.0  ;;  %v4567_v46 = vadd.f32 %v16175_v27, %v19808_v12  ;;  %v4433_v14 = vpop.f32.mrb[49].mxu0 }
 0x2cf   :  { %v4753_v43 = vrot.slane %v4752_v6, 1  ;;  %v4760_v2 = vrot.slane %v4759_v42, 2  ;;  %v4767_v56 = vrot.slane %v4766_v9, 4  ;;  %v4566_v52 = vadd.f32 %v19808_v12, %v4433_v14 }
 0x2d0   :  { %v4774_v26 = vsel %vm1425_vm4, %v4693_v25, -inf  ;;  %v4773_v32 = vsel %vm1425_vm4, %v4596_v23, -inf  ;;  %v4599_v19 = vmax.f32 %v4567_v46, 0.0  ;;  %v4856_v8 = vsel %vm1574_vm2, %v4855_v13, %v4745_v57 }
 0x2d1   :  { %v4754_v4 = vmax.f32 %v4752_v6, %v4753_v43  ;;  %v4761_v3 = vmax.f32 %v4759_v42, %v4760_v2  ;;  %v4768_v39 = vmax.f32 %v4766_v9, %v4767_v56  ;;  %v4775_v49 = vmax.f32 %v4773_v32, %v4774_v26  ;;  %v16178_v17 = vpop.f32.mrb[50].mxu0 }
 0x2d2   :  { %v4695_v5 = vmul.f32 0.0, %v4599_v19  ;;  %v4598_v28 = vmax.f32 %v4566_v52, 0.0  ;;  %v4569_v55 = vadd.f32 %v16178_v17, %v19808_v12  ;;  %v4443_v0 = vpop.f32.mrb[51].mxu0 }
 0x2d3   :  { %v4762_v51 = vrot.slane %v4761_v3, 1  ;;  %v4769_v15 = vrot.slane %v4768_v39, 2  ;;  %v4568_v63 = vadd.f32 %v19808_v12, %v4443_v0  ;;  %v4857_v13 = vsel %vm1576_vm3, %v4856_v8, %v4754_v4 }
 0x2d4   :  { %v4783_v37 = vsel %vm1425_vm4, %v4695_v5, -inf  ;;  %v4782_v21 = vsel %vm1425_vm4, %v4598_v28, -inf  ;;  %v4601_v16 = vmax.f32 %v4569_v55, 0.0  ;;  %v4776_v14 = vrot.slane %v4775_v49, 4 }
 0x2d5   :  { %v4763_v53 = vmax.f32 %v4761_v3, %v4762_v51  ;;  %v4770_v33 = vmax.f32 %v4768_v39, %v4769_v15  ;;  %v4784_v24 = vmax.f32 %v4782_v21, %v4783_v37  ;;  %v16181_v22 = vpop.f32.mrb[52].mxu0  ;;  %v4600_v11 = vmax.f32 %v4568_v63, 0.0 }
 0x2d6   :  { %v4697_v59 = vmul.f32 0.0, %v4601_v16  ;;  %v4571_v7 = vadd.f32 %v16181_v22, %v19808_v12  ;;  %v4453_v57 = vpop.f32.mrb[53].mxu0  ;;  %v4777_v37 = vmax.f32 %v4775_v49, %v4776_v14 }
 0x2d7   :  { %v4771_v6 = vrot.slane %v4770_v33, 1  ;;  %v4785_v42 = vrot.slane %v4784_v24, 4  ;;  %v4570_v9 = vadd.f32 %v19808_v12, %v4453_v57  ;;  %v4791_v25 = vsel %vm1425_vm4, %v4600_v11, -inf }
 0x2d8   :  { %v4792_v27 = vsel %vm1425_vm4, %v4697_v59, -inf  ;;  %v4603_v23 = vmax.f32 %v4571_v7, 0.0  ;;  %v4858_v46 = vsel %vm1578_vm6, %v4857_v13, %v4763_v53 }
 0x2d9   :  { %v4786_v43 = vmax.f32 %v4784_v24, %v4785_v42  ;;  %v4793_v2 = vmax.f32 %v4791_v25, %v4792_v27  ;;  %v16184_v56 = vpop.f32.mrb[54].mxu0  ;;  %v4772_v52 = vmax.f32 %v4770_v33, %v4771_v6  ;;  %v4602_v32 = vmax.f32 %v4570_v9, 0.0 }
 0x2da   :  { %v4699_v26 = vmul.f32 0.0, %v4603_v23  ;;  %v4573_v19 = vadd.f32 %v16184_v56, %v19808_v12  ;;  %v4463_v8 = vpop.f32.mrb[55].mxu0  ;;  %v4778_v27 = vrot.slane %v4777_v37, 2 }
 0x2db   :  { %v4787_v4 = vrot.slane %v4786_v43, 2  ;;  %v4794_v3 = vrot.slane %v4793_v2, 4  ;;  %v4572_v39 = vadd.f32 %v19808_v12, %v4463_v8  ;;  %v4800_v5 = vsel %vm1425_vm4, %v4602_v32, -inf }
 0x2dc   :  { %v4801_v17 = vsel %vm1425_vm4, %v4699_v26, -inf  ;;  %v4605_v28 = vmax.f32 %v4573_v19, 0.0  ;;  %v19885_v53 = vsel %vm1580_vm7, %v4858_v46, %v4772_v52 }
 0x2dd   :  { %v4788_v55 = vmax.f32 %v4786_v43, %v4787_v4  ;;  %v4795_v0 = vmax.f32 %v4793_v2, %v4794_v3  ;;  %v4802_v51 = vmax.f32 %v4800_v5, %v4801_v17  ;;  %v4604_v15 = vmax.f32 %v4572_v39, 0.0  ;;  %v16187_v63 = vpop.f32.mrb[56].mxu0 }
 0x2de   :  { %v4701_v21 = vmul.f32 0.0, %v4605_v28  ;;  %v4575_v16 = vadd.f32 %v16187_v63, %v19808_v12  ;;  %v4473_v13 = vpop.f32.mrb[57].mxu0  ;;  %v4779_v28 = vmax.f32 %v4777_v37, %v4778_v27 }
 0x2df   :  { %v4796_v33 = vrot.slane %v4795_v0, 2  ;;  %v4803_v24 = vrot.slane %v4802_v51, 4  ;;  %v4809_v22 = vsel %vm1425_vm4, %v4604_v15, -inf  ;;  %v4789_v59 = vrot.slane %v4788_v55, 1 }
 0x2e0   :  { %v4810_v11 = vsel %vm1425_vm4, %v4701_v21, -inf  ;;  %v4607_v7 = vmax.f32 %v4575_v16, 0.0  ;;  %v4574_v57 = vadd.f32 %v19808_v12, %v4473_v13 }
 0x2e1   :  { %v4797_v6 = vmax.f32 %v4795_v0, %v4796_v33  ;;  %v4804_v42 = vmax.f32 %v4802_v51, %v4803_v24  ;;  %v4811_v49 = vmax.f32 %v4809_v22, %v4810_v11  ;;  %v16190_v9 = vpop.f32.mrb[58].mxu0  ;;  %v4790_v26 = vmax.f32 %v4788_v55, %v4789_v59 }
 0x2e2   :  { %v4703_v25 = vmul.f32 0.0, %v4607_v7  ;;  %v4606_v23 = vmax.f32 %v4574_v57, 0.0  ;;  %v4577_v46 = vadd.f32 %v16190_v9, %v19808_v12  ;;  %v4483_v14 = vpop.f32.mrb[59].mxu0 }
 0x2e3   :  { %v4798_v43 = vrot.slane %v4797_v6, 1  ;;  %v4805_v2 = vrot.slane %v4804_v42, 2  ;;  %v4812_v56 = vrot.slane %v4811_v49, 4  ;;  %v4576_v52 = vadd.f32 %v19808_v12, %v4483_v14 }
 0x2e4   :  { %v4819_v32 = vsel %vm1425_vm4, %v4703_v25, -inf  ;;  %v4818_v19 = vsel %vm1425_vm4, %v4606_v23, -inf  ;;  %v4609_v8 = vmax.f32 %v4577_v46, 0.0  ;;  %v4780_v25 = vrot.slane %v4779_v28, 1 }
 0x2e5   :  { %v4799_v4 = vmax.f32 %v4797_v6, %v4798_v43  ;;  %v4806_v3 = vmax.f32 %v4804_v42, %v4805_v2  ;;  %v4813_v39 = vmax.f32 %v4811_v49, %v4812_v56  ;;  %v4820_v17 = vmax.f32 %v4818_v19, %v4819_v32  ;;  %v16193_v5 = vpop.f32.mrb[60].mxu0 }
 0x2e6   :  { %v4705_v0 = vmul.f32 0.0, %v4609_v8  ;;  %v4608_v51 = vmax.f32 %v4576_v52, 0.0  ;;  %v4579_v15 = vadd.f32 %v16193_v5, %v19808_v12  ;;  %v4493_v63 = vpop.f32.mrb[61].mxu0 }
 0x2e7   :  { %v4861_v21 = vsel %vm1570_vm14, %v4790_v26, %v4799_v4  ;;  %v4807_v16 = vrot.slane %v4806_v3, 1  ;;  %v4814_v55 = vrot.slane %v4813_v39, 2  ;;  %v4821_v13 = vrot.slane %v4820_v17, 4 }
 0x2e8   :  { %v4828_v33 = vsel %vm1425_vm4, %v4705_v0, -inf  ;;  %v4827_v24 = vsel %vm1425_vm4, %v4608_v51, -inf  ;;  %v4611_v22 = vmax.f32 %v4579_v15, 0.0  ;;  %v4578_v59 = vadd.f32 %v19808_v12, %v4493_v63 }
 0x2e9   :  { %v4808_v11 = vmax.f32 %v4806_v3, %v4807_v16  ;;  %v4815_v7 = vmax.f32 %v4813_v39, %v4814_v55  ;;  %v4822_v37 = vmax.f32 %v4820_v17, %v4821_v13  ;;  %v4829_v57 = vmax.f32 %v4827_v24, %v4828_v33  ;;  %v16196_v6 = vpop.f32.mrb[62].mxu0 }
 0x2ea   :  { %v4707_v42 = vmul.f32 0.0, %v4611_v22  ;;  %v4610_v49 = vmax.f32 %v4578_v59, 0.0  ;;  %v4581_v9 = vadd.f32 %v16196_v6, %v19808_v12  ;;  %v4503_v27 = vpop.f32.mrb[63].mxu0  ;;  %v4781_v17 = vmax.f32 %v4779_v28, %v4780_v25 }
 0x2eb   :  { %v4862_v23 = vsel %vm1572_vm1, %v4861_v21, %v4808_v11  ;;  %v4816_v46 = vrot.slane %v4815_v7, 1  ;;  %v4823_v14 = vrot.slane %v4822_v37, 2  ;;  %v4830_v43 = vrot.slane %v4829_v57, 4 }
 0x2ec   :  { %v4837_v2 = vsel %vm1425_vm4, %v4707_v42, -inf  ;;  %v4836_v56 = vsel %vm1425_vm4, %v4610_v49, -inf  ;;  %v4613_v52 = vmax.f32 %v4581_v9, 0.0  ;;  %v4580_v26 = vadd.f32 %v19808_v12, %v4503_v27 }
 0x2ed   :  { %v4817_v32 = vmax.f32 %v4815_v7, %v4816_v46  ;;  %v4824_v19 = vmax.f32 %v4822_v37, %v4823_v14  ;;  %v4831_v8 = vmax.f32 %v4829_v57, %v4830_v43  ;;  %v4838_v4 = vmax.f32 %v4836_v56, %v4837_v2  ;;  %v19923_v14 = vld [vmem:[%s21585_s11 + $0x10] sm:$0xff]  ;;  %v4954_v43 = vld [vmem:[%s21645_s9] sm:$0xff]  ;;  %v4955_v56 = vld [vmem:[%s21645_s9 + $0x8] sm:$0xff] }
 0x2ee   :  { %v4709_v3 = vmul.f32 0.0, %v4613_v52  ;;  %v4612_v39 = vmax.f32 %v4580_v26, 0.0  ;;  %v19909_v33 = vsel %vm1582_vm8, %v19885_v53, %v4781_v17  ;;  %v3100_v53 = vld [vmem:[%s21585_s11 + $0x8] sm:$0xff]  ;;  %v17621_v2 = vmov 0   ;;  %v19935_v52 = vld [vmem:[%s21646_s0] ss:$0 sm:$0xff] }
 0x2ef   :  { %v4863_v5 = vsel %vm1574_vm2, %v4862_v23, %v4817_v32  ;;  %v4825_v0 = vrot.slane %v4824_v19, 1  ;;  %v4832_v51 = vrot.slane %v4831_v8, 2  ;;  %v4839_v15 = vrot.slane %v4838_v4, 4  ;;  %15932 = vmatprep.subr.mxu1 %v3100_v53  ;;  %17175 = vset.pattern.permute.xlu0 %v17621_v2 }
 0x2f0   :  { %v4846_v63 = vsel %vm1425_vm4, %v4709_v3, -inf  ;;  %v4845_v21 = vsel %vm1425_vm4, %v4612_v39, -inf  ;;  %15933 = vmatpush3.msra.mxu1 %v3100_v53  ;;  %4958 = vperm.xlu0 %17175, %v4954_v43  }
 0x2f1   :  { %v4826_v16 = vmax.f32 %v4824_v19, %v4825_v0  ;;  %v4833_v55 = vmax.f32 %v4831_v8, %v4832_v51  ;;  %v4840_v13 = vmax.f32 %v4838_v4, %v4839_v15  ;;  %v4847_v12 = vmax.f32 %v4845_v21, %v4846_v63  ;;  %16197 = vmatprep.subr.mxu1 %v19923_v14 }
 0x2f2   :  { %v2879_v8 = vsel %vm2847_vm11, 1.0, %v17620_v62 }
 0x2f3   :  { %v4834_v24 = vrot.slane %v4833_v55, 1  ;;  %v4841_v22 = vrot.slane %v4840_v13, 2  ;;  %v4848_v28 = vrot.slane %v4847_v12, 4  ;;  %v4864_v59 = vsel %vm1576_vm3, %v4863_v5, %v4826_v16 }
 0x2f4   :  { %4963 = vperm.xlu0 %17175, %v4955_v56  }
 0x2f5   :  { %v4835_v11 = vmax.f32 %v4833_v55, %v4834_v24  ;;  %v4842_v7 = vmax.f32 %v4840_v13, %v4841_v22  ;;  %v4849_v37 = vmax.f32 %v4847_v12, %v4848_v28  ;;  %v2883_v12 = vsel %vm2851_vm13, 1.0, %v17620_v62 }
 0x2f6   :  { %v21647_v28 = vand.u32 15, %v18681_v47 }
 0x2f7   :  { %v4843_v57 = vrot.slane %v4842_v7, 1  ;;  %v4850_v6 = vrot.slane %v4849_v37, 2  ;;  %v4865_v42 = vsel %vm1578_vm6, %v4864_v59, %v4835_v11 }
 0x2f8   :  { %vm2857_vm9 = vcmp.lt.s32.totalorder %v21647_v28, 9 }
 0x2f9   :  { %v4844_v49 = vmax.f32 %v4842_v7, %v4843_v57  ;;  %v4851_v9 = vmax.f32 %v4849_v37, %v4850_v6  ;;  %v21648_v57 = vand.u32 15, %v18684_v48  ;;  %v2889_v47 = vsel %vm2857_vm9, 1.0, %v17620_v62 }
 0x2fb   :  { %v4852_v27 = vrot.slane %v4851_v9, 1  ;;  %v4866_v25 = vsel %vm1580_vm7, %v4865_v42, %v4844_v49  ;;  %vm2859_vm10 = vcmp.lt.s32.totalorder %v21648_v57, 9 }
 0x2fc   :  { %v2891_v56 = vsel %vm2859_vm10, 1.0, %v17620_v62 }
 0x2fd   :  { %v4853_v23 = vmax.f32 %v4851_v9, %v4852_v27  ;;  %v21649_v9 = vand.u32 15, %v18714_v58 }
 0x2ff   :  { %v19918_v46 = vsel %vm1582_vm8, %v4866_v25, %v4853_v23  ;;  %vm19970_vm11 = vcmp.lt.s32.totalorder %v21649_v9, 9 }
 0x357   :  { %v15886_v26 = vpop.f32.mrb[2].mxu1 }
 0x358   :  { %v2783_v32 = vadd.f32 %v15886_v26, %v19935_v52  ;;  %v2585_v19 = vpop.f32.mrb[3].mxu1  ;;  %v21652_v26 = vand.u32 15, %v18717_v60 }
 0x359   :  { %v2782_v4 = vadd.f32 %v19935_v52, %v2585_v19 }
 0x35a   :  { %v2815_v3 = vmax.f32 %v2783_v32, 0.0  ;;  %vm2863_vm12 = vcmp.lt.s32.totalorder %v21652_v26, 9 }
 0x35b   :  { %v2814_v39 = vmax.f32 %v2782_v4, 0.0  ;;  %v15889_v17 = vpop.f32.mrb[4].mxu1 }
 0x35c   :  { %v2911_v5 = vmul.f32 %v2879_v8, %v2815_v3  ;;  %v2785_v0 = vadd.f32 %v15889_v17, %v19935_v52  ;;  %v2595_v51 = vpop.f32.mrb[5].mxu1 }
 0x35d   :  { %v2942_v34 = vsel %vm1425_vm4, %v2814_v39, -inf  ;;  %v2784_v15 = vadd.f32 %v19935_v52, %v2595_v51 }
 0x35e   :  { %v2943_v63 = vsel %vm1425_vm4, %v2911_v5, -inf  ;;  %v2817_v21 = vmax.f32 %v2785_v0, 0.0  ;;  %v19984_v5 = vsel %vm19970_vm11, 1.0, %v17620_v62  ;;  %v21653_v0 = vand.u32 15, %v18754_v10 }
 0x35f   :  { %v2944_v35 = vmax.f32 %v2942_v34, %v2943_v63  ;;  %v2816_v41 = vmax.f32 %v2784_v15, 0.0  ;;  %v15892_v16 = vpop.f32.mrb[6].mxu1 }
 0x360   :  { %v2913_v55 = vmul.f32 %v2881_v40, %v2817_v21  ;;  %v2787_v13 = vadd.f32 %v15892_v16, %v19935_v52  ;;  %v2605_v24 = vpop.f32.mrb[7].mxu1  ;;  %vm2865_vm13 = vcmp.lt.s32.totalorder %v21653_v0, 9  ;;  %v19990_v40 = vsel %vm2863_vm12, 1.0, %v17620_v62 }
 0x361   :  { %v2945_v36 = vrot.slane %v2944_v35, 4  ;;  %v2951_v45 = vsel %vm1425_vm4, %v2816_v41, -inf  ;;  %v2786_v22 = vadd.f32 %v19935_v52, %v2605_v24  ;;  %v19995_v10 = vsel %vm2865_vm13, 1.0, %v17620_v62 }
 0x362   :  { %v2952_v38 = vsel %vm1425_vm4, %v2913_v55, -inf  ;;  %v2819_v50 = vmax.f32 %v2787_v13, 0.0  ;;  %vm17622_vm13 = vmmov 0  }
 0x363   :  { %v2946_v59 = vmax.f32 %v2944_v35, %v2945_v36  ;;  %v2953_v11 = vmax.f32 %v2951_v45, %v2952_v38  ;;  %v2818_v7 = vmax.f32 %v2786_v22, 0.0  ;;  %v15895_v37 = vpop.f32.mrb[8].mxu1  ;;  %v21654_v22 = vand.u32 15, %v18763_v20  ;;  %16529 = vmatprep.mubr.msk.f32.mxu0 %vm17622_vm13, %v17620_v62 }
 0x364   :  { %v2915_v6 = vmul.f32 %v2883_v12, %v2819_v50  ;;  %v2789_v42 = vadd.f32 %v15895_v37, %v19935_v52  ;;  %v2615_v49 = vpop.f32.mrb[9].mxu1 }
 0x365   :  { %v2947_v53 = vrot.slane %v2946_v59, 2  ;;  %v2954_v25 = vrot.slane %v2953_v11, 4  ;;  %v2960_v23 = vsel %vm1425_vm4, %v2818_v7, -inf  ;;  %v2788_v43 = vadd.f32 %v19935_v52, %v2615_v49 }
 0x366   :  { %v2961_v48 = vsel %vm1425_vm4, %v2915_v6, -inf  ;;  %v2821_v2 = vmax.f32 %v2789_v42, 0.0  ;;  %vm20000_vm15 = vcmp.lt.s32.totalorder %v21654_v22, 9 }
 0x367   :  { %v2948_v32 = vmax.f32 %v2946_v59, %v2947_v53  ;;  %v2955_v58 = vmax.f32 %v2953_v11, %v2954_v25  ;;  %v2962_v19 = vmax.f32 %v2960_v23, %v2961_v48  ;;  %v2820_v8 = vmax.f32 %v2788_v43, 0.0  ;;  %v15898_v4 = vpop.f32.mrb[10].mxu1 }
 0x368   :  { %v2917_v3 = vmul.f32 %v2885_v44, %v2821_v2  ;;  %v2791_v39 = vadd.f32 %v15898_v4, %v19935_v52  ;;  %v2625_v17 = vpop.f32.mrb[11].mxu1  ;;  %v20011_v23 = vsel %vm20000_vm15, 1.0, %v17620_v62  ;;  %vm4994_vm15 = vcmask 195584  }
 0x369   :  { %v2956_v51 = vrot.slane %v2955_v58, 2  ;;  %v2963_v60 = vrot.slane %v2962_v19, 4  ;;  %v2969_v34 = vsel %vm1425_vm4, %v2820_v8, -inf  ;;  %v2949_v15 = vrot.slane %v2948_v32, 1 }
 0x36a   :  { %v2970_v63 = vsel %vm1425_vm4, %v2917_v3, -inf  ;;  %v2823_v21 = vmax.f32 %v2791_v39, 0.0  ;;  %v2790_v35 = vadd.f32 %v19935_v52, %v2625_v17 }
 0x36b   :  { %v2957_v41 = vmax.f32 %v2955_v58, %v2956_v51  ;;  %v2964_v16 = vmax.f32 %v2962_v19, %v2963_v60  ;;  %v2971_v55 = vmax.f32 %v2969_v34, %v2970_v63  ;;  %v15901_v13 = vpop.f32.mrb[12].mxu1  ;;  %v2950_v11 = vmax.f32 %v2948_v32, %v2949_v15 }
 0x36c   :  { %v2919_v12 = vmul.f32 %v2887_v54, %v2823_v21  ;;  %v2822_v24 = vmax.f32 %v2790_v35, 0.0  ;;  %v2793_v36 = vadd.f32 %v15901_v13, %v19935_v52  ;;  %v2635_v45 = vpop.f32.mrb[13].mxu1  ;;  %v21657_v15 = vand.u32 15, %v18787_v30 }
 0x36d   :  { %v2958_v38 = vrot.slane %v2957_v41, 1  ;;  %v2965_v50 = vrot.slane %v2964_v16, 2  ;;  %v2972_v44 = vrot.slane %v2971_v55, 4  ;;  %v2792_v59 = vadd.f32 %v19935_v52, %v2635_v45 }
 0x36e   :  { %v2978_v7 = vsel %vm1425_vm4, %v2822_v24, -inf  ;;  %v2979_v54 = vsel %vm1425_vm4, %v2919_v12, -inf  ;;  %v2825_v37 = vmax.f32 %v2793_v36, 0.0  ;;  %vm20020_vm5 = vcmp.lt.s32.totalorder %v21657_v15, 9 }
 0x36f   :  { %v2959_v57 = vmax.f32 %v2957_v41, %v2958_v38  ;;  %v2966_v6 = vmax.f32 %v2964_v16, %v2965_v50  ;;  %v2973_v42 = vmax.f32 %v2971_v55, %v2972_v44  ;;  %v2980_v49 = vmax.f32 %v2978_v7, %v2979_v54  ;;  %v15904_v20 = vpop.f32.mrb[14].mxu1 }
 0x370   :  { %v2921_v9 = vmul.f32 %v2889_v47, %v2825_v37  ;;  %v2824_v27 = vmax.f32 %v2792_v59, 0.0  ;;  %v2795_v53 = vadd.f32 %v15904_v20, %v19935_v52  ;;  %v2645_v25 = vpop.f32.mrb[15].mxu1  ;;  %v20033_v59 = vsel %vm20020_vm5, 1.0, %v17620_v62 }
 0x371   :  { %v3086_v43 = vsel %vm1570_vm14, %v2950_v11, %v2959_v57  ;;  %v2967_v48 = vrot.slane %v2966_v6, 1  ;;  %v2974_v2 = vrot.slane %v2973_v42, 2  ;;  %v2981_v26 = vrot.slane %v2980_v49, 4 }
 0x372   :  { %v2987_v32 = vsel %vm1425_vm4, %v2824_v27, -inf  ;;  %v2988_v58 = vsel %vm1425_vm4, %v2921_v9, -inf  ;;  %v2827_v19 = vmax.f32 %v2795_v53, 0.0  ;;  %v2794_v47 = vadd.f32 %v19935_v52, %v2645_v25 }
 0x373   :  { %v2968_v8 = vmax.f32 %v2966_v6, %v2967_v48  ;;  %v2975_v4 = vmax.f32 %v2973_v42, %v2974_v2  ;;  %v2982_v3 = vmax.f32 %v2980_v49, %v2981_v26  ;;  %v2989_v39 = vmax.f32 %v2987_v32, %v2988_v58  ;;  %v15907_v17 = vpop.f32.mrb[16].mxu1 }
 0x374   :  { %v2923_v0 = vmul.f32 %v2891_v56, %v2827_v19  ;;  %v2826_v51 = vmax.f32 %v2794_v47, 0.0  ;;  %v2797_v60 = vadd.f32 %v15907_v17, %v19935_v52  ;;  %v2655_v34 = vpop.f32.mrb[17].mxu1  ;;  %v21660_v26 = vand.u32 15, %v18797_v61 }
 0x375   :  { %v3087_v21 = vsel %vm1572_vm1, %v3086_v43, %v2968_v8  ;;  %v2976_v35 = vrot.slane %v2975_v4, 1  ;;  %v2983_v41 = vrot.slane %v2982_v3, 2  ;;  %v2990_v16 = vrot.slane %v2989_v39, 4 }
 0x376   :  { %v2996_v55 = vsel %vm1425_vm4, %v2826_v51, -inf  ;;  %v2997_v13 = vsel %vm1425_vm4, %v2923_v0, -inf  ;;  %v2829_v56 = vmax.f32 %v2797_v60, 0.0  ;;  %v2796_v12 = vadd.f32 %v19935_v52, %v2655_v34 }
 0x377   :  { %v2977_v24 = vmax.f32 %v2975_v4, %v2976_v35  ;;  %v2984_v36 = vmax.f32 %v2982_v3, %v2983_v41  ;;  %v2991_v45 = vmax.f32 %v2989_v39, %v2990_v16  ;;  %v2998_v30 = vmax.f32 %v2996_v55, %v2997_v13  ;;  %v15910_v22 = vpop.f32.mrb[18].mxu1 }
 0x378   :  { %v2925_v28 = vmul.f32 %v19984_v5, %v2829_v56  ;;  %v2828_v38 = vmax.f32 %v2796_v12, 0.0  ;;  %v2799_v50 = vadd.f32 %v15910_v22, %v19935_v52  ;;  %v2665_v44 = vpop.f32.mrb[19].mxu1  ;;  %vm20043_vm9 = vcmp.lt.s32.totalorder %v21660_v26, 9 }
 0x379   :  { %v2985_v11 = vrot.slane %v2984_v36, 1  ;;  %v2992_v7 = vrot.slane %v2991_v45, 2  ;;  %v2999_v54 = vrot.slane %v2998_v30, 4  ;;  %v2798_v37 = vadd.f32 %v19935_v52, %v2665_v44 }
 0x37a   :  { %v3005_v57 = vsel %vm1425_vm4, %v2828_v38, -inf  ;;  %v3006_v6 = vsel %vm1425_vm4, %v2925_v28, -inf  ;;  %v2831_v42 = vmax.f32 %v2799_v50, 0.0  ;;  %v3088_v5 = vsel %vm1574_vm2, %v3087_v21, %v2977_v24 }
 0x37b   :  { %v2986_v49 = vmax.f32 %v2984_v36, %v2985_v11  ;;  %v2993_v20 = vmax.f32 %v2991_v45, %v2992_v7  ;;  %v3000_v9 = vmax.f32 %v2998_v30, %v2999_v54  ;;  %v3007_v27 = vmax.f32 %v3005_v57, %v3006_v6  ;;  %v15913_v53 = vpop.f32.mrb[20].mxu1 }
 0x37c   :  { %v2927_v25 = vmul.f32 %v19990_v40, %v2831_v42  ;;  %v2830_v43 = vmax.f32 %v2798_v37, 0.0  ;;  %v2801_v48 = vadd.f32 %v15913_v53, %v19935_v52  ;;  %v2675_v2 = vpop.f32.mrb[21].mxu1  ;;  %v2903_v35 = vsel %vm20043_vm9, 1.0, %v17620_v62 }
 0x37d   :  { %v2994_v58 = vrot.slane %v2993_v20, 1  ;;  %v3001_v19 = vrot.slane %v3000_v9, 2  ;;  %v3008_v47 = vrot.slane %v3007_v27, 4  ;;  %v2800_v8 = vadd.f32 %v19935_v52, %v2675_v2 }
 0x37e   :  { %v3014_v4 = vsel %vm1425_vm4, %v2830_v43, -inf  ;;  %v3015_v3 = vsel %vm1425_vm4, %v2927_v25, -inf  ;;  %v2833_v40 = vmax.f32 %v2801_v48, 0.0  ;;  %v3089_v39 = vsel %vm1576_vm3, %v3088_v5, %v2986_v49 }
 0x37f   :  { %v2995_v17 = vmax.f32 %v2993_v20, %v2994_v58  ;;  %v3002_v0 = vmax.f32 %v3000_v9, %v3001_v19  ;;  %v3009_v51 = vmax.f32 %v3007_v27, %v3008_v47  ;;  %v3016_v61 = vmax.f32 %v3014_v4, %v3015_v3  ;;  %v15916_v60 = vpop.f32.mrb[22].mxu1 }
 0x380   :  { %v2929_v34 = vmul.f32 %v19995_v10, %v2833_v40  ;;  %v2832_v15 = vmax.f32 %v2800_v8, 0.0  ;;  %v2803_v63 = vadd.f32 %v15916_v60, %v19935_v52  ;;  %v2685_v21 = vpop.f32.mrb[23].mxu1  ;;  %v21663_v7 = vand.u32 15, %v18861_v29 }
 0x381   :  { %v3003_v41 = vrot.slane %v3002_v0, 1  ;;  %v3010_v16 = vrot.slane %v3009_v51, 2  ;;  %v3017_v55 = vrot.slane %v3016_v61, 4  ;;  %v2802_v13 = vadd.f32 %v19935_v52, %v2685_v21 }
 0x382   :  { %v3023_v56 = vsel %vm1425_vm4, %v2832_v15, -inf  ;;  %v3024_v12 = vsel %vm1425_vm4, %v2929_v34, -inf  ;;  %v2835_v24 = vmax.f32 %v2803_v63, 0.0  ;;  %v3090_v10 = vsel %vm1578_vm6, %v3089_v39, %v2995_v17 }
 0x383   :  { %v3004_v36 = vmax.f32 %v3002_v0, %v3003_v41  ;;  %v3011_v45 = vmax.f32 %v3009_v51, %v3010_v16  ;;  %v3018_v30 = vmax.f32 %v3016_v61, %v3017_v55  ;;  %v3025_v22 = vmax.f32 %v3023_v56, %v3024_v12  ;;  %v15919_v28 = vpop.f32.mrb[24].mxu1 }
 0x384   :  { %v2931_v38 = vmul.f32 %v20011_v23, %v2835_v24  ;;  %v2834_v50 = vmax.f32 %v2802_v13, 0.0  ;;  %v2805_v44 = vadd.f32 %v15919_v28, %v19935_v52  ;;  %v2695_v11 = vpop.f32.mrb[25].mxu1  ;;  %vm20064_vm10 = vcmp.lt.s32.totalorder %v21663_v7, 9  ;;  %v4970_v7 = vld [vmem:[%s21672_s2] sm:$0xff] }
 0x385   :  { %v3019_v37 = vrot.slane %v3018_v30, 2  ;;  %v3026_v57 = vrot.slane %v3025_v22, 4  ;;  %v2804_v6 = vadd.f32 %v19935_v52, %v2695_v11  ;;  %v3012_v42 = vrot.slane %v3011_v45, 1 }
 0x386   :  { %v3032_v5 = vsel %vm1425_vm4, %v2834_v50, -inf  ;;  %v3033_v49 = vsel %vm1425_vm4, %v2931_v38, -inf  ;;  %v2837_v23 = vmax.f32 %v2805_v44, 0.0  ;;  %v3091_v20 = vsel %vm1580_vm7, %v3090_v10, %v3004_v36 }
 0x387   :  { %v3020_v9 = vmax.f32 %v3018_v30, %v3019_v37  ;;  %v3027_v27 = vmax.f32 %v3025_v22, %v3026_v57  ;;  %v3034_v53 = vmax.f32 %v3032_v5, %v3033_v49  ;;  %v2836_v29 = vmax.f32 %v2804_v6, 0.0  ;;  %v15922_v25 = vpop.f32.mrb[26].mxu1 }
 0x388   :  { %v2933_v43 = vmul.f32 %v20033_v59, %v2837_v23  ;;  %v2807_v48 = vadd.f32 %v15922_v25, %v19935_v52  ;;  %v2705_v2 = vpop.f32.mrb[27].mxu1  ;;  %v3013_v26 = vmax.f32 %v3011_v45, %v3012_v42  ;;  %v21666_v32 = vand.u32 15, %v18907_v18 }
 0x389   :  { %v3021_v19 = vrot.slane %v3020_v9, 1  ;;  %v3028_v47 = vrot.slane %v3027_v27, 2  ;;  %v3035_v8 = vrot.slane %v3034_v53, 4  ;;  %v3041_v4 = vsel %vm1425_vm4, %v2836_v29, -inf }
 0x38a   :  { %vm20076_vm11 = vcmp.lt.s32.totalorder %v21666_v32, 9  ;;  %v3042_v3 = vsel %vm1425_vm4, %v2933_v43, -inf  ;;  %v2839_v40 = vmax.f32 %v2807_v48, 0.0  ;;  %v2806_v59 = vadd.f32 %v19935_v52, %v2705_v2 }
 0x38b   :  { %v3092_v39 = vsel %vm1582_vm8, %v3091_v20, %v3013_v26  ;;  %v3029_v17 = vmax.f32 %v3027_v27, %v3028_v47  ;;  %v3036_v0 = vmax.f32 %v3034_v53, %v3035_v8  ;;  %v3043_v51 = vmax.f32 %v3041_v4, %v3042_v3  ;;  %v15925_v18 = vpop.f32.mrb[28].mxu1 }
 0x38c   :  { %15934 = vmatprep.mubr.msk.f32.mxu1 %vm1425_vm4, %v3092_v39  ;;  %v2905_v61 = vsel %vm20064_vm10, 1.0, %v17620_v62  ;;  %v2935_v60 = vmul.f32 %v2903_v35, %v2839_v40  ;;  %v2838_v34 = vmax.f32 %v2806_v59, 0.0  ;;  %v2809_v15 = vadd.f32 %v15925_v18, %v19935_v52  ;;  %v2715_v63 = vpop.f32.mrb[29].mxu1 }
 0x38d   :  { %v2907_v21 = vsel %vm20076_vm11, 1.0, %v17620_v62  ;;  %v3030_v41 = vrot.slane %v3029_v17, 1  ;;  %v3037_v16 = vrot.slane %v3036_v0, 2  ;;  %v3044_v55 = vrot.slane %v3043_v51, 4 }
 0x38e   :  { %v2808_v13 = vadd.f32 %v19935_v52, %v2715_v63  ;;  %v3022_v56 = vmax.f32 %v3020_v9, %v3021_v19  ;;  %v3050_v12 = vsel %vm1425_vm4, %v2838_v34, -inf  ;;  %v3051_v24 = vsel %vm1425_vm4, %v2935_v60, -inf }
 0x38f   :  { %v2841_v10 = vmax.f32 %v2809_v15, 0.0  ;;  %v3031_v35 = vmax.f32 %v3029_v17, %v3030_v41  ;;  %v3038_v36 = vmax.f32 %v3036_v0, %v3037_v16  ;;  %v3045_v45 = vmax.f32 %v3043_v51, %v3044_v55  ;;  %v15928_v22 = vpop.f32.mrb[30].mxu1 }
 0x390   :  { %v3052_v30 = vmax.f32 %v3050_v12, %v3051_v24  ;;  %v2840_v38 = vmax.f32 %v2808_v13, 0.0  ;;  %v2811_v50 = vadd.f32 %v15928_v22, %v19935_v52  ;;  %v2725_v44 = vpop.f32.mrb[31].mxu1  ;;  %v21669_v11 = vand.u32 15, %v18989_v1 }
 0x391   :  { %v2937_v28 = vmul.f32 %v2905_v61, %v2841_v10  ;;  %v3093_v54 = vsel %vm1570_vm14, %v3022_v56, %v3031_v35  ;;  %v3039_v37 = vrot.slane %v3038_v36, 1  ;;  %v3046_v57 = vrot.slane %v3045_v45, 2 }
 0x392   :  { %vm20098_vm12 = vcmp.lt.s32.totalorder %v21669_v11, 9  ;;  %v3053_v6 = vrot.slane %v3052_v30, 4  ;;  %v3059_v42 = vsel %vm1425_vm4, %v2840_v38, -inf  ;;  %v2843_v49 = vmax.f32 %v2811_v50, 0.0 }
 0x393   :  { %v3060_v5 = vsel %vm1425_vm4, %v2937_v28, -inf  ;;  %v2810_v23 = vadd.f32 %v19935_v52, %v2725_v44  ;;  %v3040_v20 = vmax.f32 %v3038_v36, %v3039_v37  ;;  %v3047_v9 = vmax.f32 %v3045_v45, %v3046_v57  ;;  %v15931_v53 = vpop.f32.mrb[32].mxu1  ;;  %v4972_v57 = vld [vmem:[%s21672_s2 + $0x10] sm:$0xff] }
 0x394   :  { %v3054_v27 = vmax.f32 %v3052_v30, %v3053_v6  ;;  %v3061_v1 = vmax.f32 %v3059_v42, %v3060_v5  ;;  %v2939_v29 = vmul.f32 %v2907_v21, %v2843_v49  ;;  %v2813_v43 = vadd.f32 %v15931_v53, %v19935_v52  ;;  %v2735_v2 = vpop.f32.mrb[33].mxu1  ;;  %v14310_v6 = vld [vmem:[%s21673_s4] ss:$0 sm:$0xff]  ;;  %v4959_v42 = vpop.permute.xlu0 %4958 }
 0x395   :  { %v2842_v25 = vmax.f32 %v2810_v23, 0.0  ;;  %v2909_v48 = vsel %vm20098_vm12, 1.0, %v17620_v62  ;;  %v3094_v26 = vsel %vm1572_vm1, %v3093_v54, %v3040_v20  ;;  %v3048_v32 = vrot.slane %v3047_v9, 1  ;;  %v4971_v54 = vld [vmem:[%s21672_s2 + $0x8] sm:$0xff] }
 0x396   :  { %v3055_v58 = vrot.slane %v3054_v27, 2  ;;  %v3062_v19 = vrot.slane %v3061_v1, 4  ;;  %v3069_v8 = vsel %vm1425_vm4, %v2939_v29, -inf  ;;  %v2845_v4 = vmax.f32 %v2813_v43, 0.0  ;;  %v4976_v43 = vld [vmem:[%s21672_s2 + $0x30] sm:$0xff] }
 0x397   :  { %v3068_v47 = vsel %vm1425_vm4, %v2842_v25, -inf  ;;  %v2812_v3 = vadd.f32 %v19935_v52, %v2735_v2  ;;  %v3049_v40 = vmax.f32 %v3047_v9, %v3048_v32  ;;  %v16826_v37 = vpack.c.bf16 %v4971_v54, %v4970_v7  ;;  %v4975_v25 = vld [vmem:[%s21672_s2 + $0x28] sm:$0xff]  ;;  %v20176_v32 = vld [vmem:[%s21463_s12] sm:$0xff] }
 0x398   :  { %v3056_v59 = vmax.f32 %v3054_v27, %v3055_v58  ;;  %v3063_v39 = vmax.f32 %v3061_v1, %v3062_v19  ;;  %v3070_v17 = vmax.f32 %v3068_v47, %v3069_v8  ;;  %v2941_v0 = vmul.f32 %v2909_v48, %v2845_v4  ;;  %v4964_v53 = vpop.permute.xlu0 %4963  ;;  %v4977_v48 = vld [vmem:[%s21672_s2 + $0x38] sm:$0xff]  ;;  %v20188_v58 = vld [vmem:[%s21463_s12 + $0x8] sm:$0xff]  ;;  %v20198_v19 = vld [vmem:[%s21463_s12 + $0x10] sm:$0xff] }
 0x399   :  { %v2844_v51 = vmax.f32 %v2812_v3, 0.0  ;;  %v3095_v18 = vsel %vm1574_vm2, %v3094_v26, %v3049_v40  ;;  %v16834_v2 = vpack.c.bf16 %v4977_v48, %v4976_v43  ;;  %v4978_v26 = vld [vmem:[%s21672_s2 + $0x40] sm:$0xff] }
 0x39a   :  { %v3057_v61 = vrot.slane %v3056_v59, 1  ;;  %v3064_v60 = vrot.slane %v3063_v39, 2  ;;  %v3071_v34 = vrot.slane %v3070_v17, 4  ;;  %v3078_v63 = vsel %vm1425_vm4, %v2941_v0, -inf  ;;  %v14704_v47 = vld [vmem:[%s21464_s13] ss:$0 sm:$0xff] }
 0x39b   :  { %v3077_v15 = vsel %vm1425_vm4, %v2844_v51, -inf  ;;  %v14707_v40 = vld [vmem:[%s21464_s13 + $0x1] ss:$0 sm:$0xff]  ;;  %v14710_v0 = vld [vmem:[%s21464_s13 + $0x2] ss:$0 sm:$0xff] }
 0x39c   :  { %v3058_v21 = vmax.f32 %v3056_v59, %v3057_v61  ;;  %v3065_v41 = vmax.f32 %v3063_v39, %v3064_v60  ;;  %v3072_v16 = vmax.f32 %v3070_v17, %v3071_v34  ;;  %v3079_v55 = vmax.f32 %v3077_v15, %v3078_v63  ;;  %v20228_v60 = vld [vmem:[%s21465_s14] ss:$0 sm:$0xff] }
 0x39e   :  { %v3096_v52 = vsel %vm1576_vm3, %v3095_v18, %v3058_v21  ;;  %v3066_v13 = vrot.slane %v3065_v41, 1  ;;  %v3073_v56 = vrot.slane %v3072_v16, 2  ;;  %v3080_v12 = vrot.slane %v3079_v55, 4 }
 0x3a0   :  { %v3067_v24 = vmax.f32 %v3065_v41, %v3066_v13  ;;  %v3074_v10 = vmax.f32 %v3072_v16, %v3073_v56  ;;  %v3081_v35 = vmax.f32 %v3079_v55, %v3080_v12  ;;  %v20236_v41 = vld [vmem:[%s21465_s14 + $0x1] ss:$0 sm:$0xff] }
 0x3a2   :  { %v3075_v36 = vrot.slane %v3074_v10, 1  ;;  %v3082_v45 = vrot.slane %v3081_v35, 2  ;;  %v3097_v30 = vsel %vm1578_vm6, %v3096_v52, %v3067_v24 }
 0x3a4   :  { %v3076_v22 = vmax.f32 %v3074_v10, %v3075_v36  ;;  %v3083_v28 = vmax.f32 %v3081_v35, %v3082_v45 }
 0x3a6   :  { %v3084_v38 = vrot.slane %v3083_v28, 1  ;;  %v3098_v50 = vsel %vm1580_vm7, %v3097_v30, %v3076_v22 }
 0x3a8   :  { %v3085_v44 = vmax.f32 %v3083_v28, %v3084_v38  ;;  %v20246_v28 = vld [vmem:[%s21465_s14 + $0x2] ss:$0 sm:$0xff] }
 0x3aa   :  { %v3099_v11 = vsel %vm1582_vm8, %v3098_v50, %v3085_v44 }
 0x3ab   :  { %15935 = vmatmul.mubr.msk.f32.vlgmr.msra.gmra.mrb[0].mxu1 %vm1425_vm4, %v3099_v11 }
 0x3ac   :  { %16198 = vmatpush3.msra.mxu1 %v19923_v14  ;;  %16199 = vmatprep.mubr.msk.f32.mxu1 %vm1425_vm4, %v19909_v33  ;;  %v4973_v33 = vld [vmem:[%s21672_s2 + $0x18] sm:$0xff] }
 0x3ad   :  { %16827 = vmatprep.subr.bf16.mxu1 %v16826_v37 }
 0x3b3   :  { %16200 = vmatmul.mubr.msk.f32.vlgmr.msra.gmra.mrb[0].mxu1 %vm1425_vm4, %v19918_v46  ;;  %v4974_v46 = vld [vmem:[%s21672_s2 + $0x20] sm:$0xff] }
 0x3b4   :  { %16829 = vmatpush3.bf16.msra.mxu1 %v16826_v37  ;;  %v16830_v14 = vpack.c.bf16 %v4974_v46, %v4973_v33 }
 0x3b5   :  { %16206 = vmatprep.subr.mxu1 %v4972_v57 }
 0x3b8   :  { %16207 = vmatpush3.msra.mxu1 %v4972_v57  ;;  %v20255_v57 = vld [vmem:[%s21674_s8] sm:$0xff] }
 0x3b9   :  { %16831 = vmatprep.subr.bf16.mxu1 %v16830_v14  ;;  %v20258_v46 = vsub.f32 1.0, %v20255_v57 }
 0x486   :  { %v16201_v5 = vpop.f32.mrb[0].mxu1 }
 0x487   :  { %v16874_v49 = vadd.f32 %v16201_v5, %v14310_v6  ;;  %v4941_v23 = vpop.f32.mrb[1].mxu1 }
 0x488   :  { %v16875_v20 = vadd.f32 %v14310_v6, %v4941_v23 }
 0x489   :  { %v4953_v9 = vmax.f32 %v16874_v49, 0.0  ;;  %v20261_v49 = vmul.f32 0.0, %v20258_v46 }
 0x48a   :  { %v4952_v27 = vmax.f32 %v16875_v20, 0.0 }
 0x48b   :  { %v20149_v29 = vmul.f32 %v4964_v53, %v4953_v9 }
 0x48c   :  { %v20147_v1 = vmul.f32 %v4959_v42, %v4952_v27 }
 0x48e   :  { %16208 = vmatprep.mubr.msk.f32.mxu1 %vm4994_vm15, %v20147_v1 }
 0x48f   :  { %16209 = vmatmul.mubr.msk.f32.vlgmr.msra.gmra.mrb[34].mxu1 %vm4994_vm15, %v20149_v29 }
 0x490   :  { %16833 = vmatpush3.bf16.msra.mxu1 %v16830_v14  ;;  %16217 = vmatprep.mubr.msk.f32.mxu1 %vm4994_vm15, %v20147_v1 }
 0x491   :  { %16215 = vmatprep.subr.mxu1 %v4975_v25 }
 0x494   :  { %16216 = vmatpush3.msra.mxu1 %v4975_v25 }
 0x495   :  { %16218 = vmatmul.mubr.msk.f32.vlgmr.msra.gmra.mrb[36].mxu1 %vm4994_vm15, %v20149_v29  ;;  %16835 = vmatprep.subr.bf16.mxu1 %v16834_v2 }
 0x496   :  { %16837 = vmatpush3.bf16.msra.mxu1 %v16834_v2  ;;  %16226 = vmatprep.mubr.msk.f32.mxu1 %vm4994_vm15, %v20147_v1 }
 0x497   :  { %16224 = vmatprep.subr.mxu1 %v4978_v26 }
 0x49a   :  { %16225 = vmatpush3.msra.mxu1 %v4978_v26 }
 0x49b   :  { %16227 = vmatmul.mubr.msk.f32.vlgmr.msra.gmra.mrb[38].mxu1 %vm4994_vm15, %v20149_v29  ;;  %16229 = vmatprep.subr.mxu1 %v17620_v62 }
 0x49c   :  { %16230 = vmatpush3.msra.mxu1 %v20176_v32  ;;  %16231 = vmatprep.mubr.msk.f32.mxu1 %vm17622_vm13, %v17620_v62 }
 0x49d   :  { %16234 = vmatprep.subr.mxu1 %v17620_v62 }
 0x49f   :  { %16232 = vmatmul.mubr.f32.vlgmr.msra.gmra.mrb[40].mxu1 %v17620_v62 }
 0x4a0   :  { %16235 = vmatpush3.msra.mxu1 %v20188_v58  ;;  %16236 = vmatprep.mubr.msk.f32.mxu1 %vm17622_vm13, %v17620_v62 }
 0x4a1   :  { %16239 = vmatprep.subr.mxu1 %v17620_v62 }
 0x4a3   :  { %16237 = vmatmul.mubr.f32.vlgmr.msra.gmra.mrb[42].mxu1 %v17620_v62 }
 0x4a4   :  { %16240 = vmatpush3.msra.mxu1 %v20198_v19  ;;  %16241 = vmatprep.mubr.msk.f32.mxu1 %vm17622_vm13, %v17620_v62 }
 0x4a5   :  { %16244 = vmatprep.subr.mxu1 %v17620_v62 }
 0x4a7   :  { %16242 = vmatmul.mubr.f32.vlgmr.msra.gmra.mrb[44].mxu1 %v17620_v62 }
 0x4a8   :  { %16245 = vmatpush3.msra.mxu1 %v20176_v32  ;;  %16246 = vmatprep.mubr.msk.f32.mxu1 %vm17622_vm13, %v17620_v62 }
 0x4a9   :  { %16249 = vmatprep.subr.mxu1 %v17620_v62 }
 0x562   :  { %v16210_v8 = vpop.f32.mrb[34].mxu1 }
 0x563   :  { %v20213_v4 = vadd.f32 %v16210_v8, %v14704_v47  ;;  %v5067_v3 = vpop.f32.mrb[35].mxu1 }
 0x564   :  { %v20230_v15 = vadd.f32 %v14704_v47, %v5067_v3 }
 0x568   :  { %v16219_v59 = vpop.f32.mrb[36].mxu1 }
 0x569   :  { %v20218_v39 = vadd.f32 %v16219_v59, %v14707_v40  ;;  %v5148_v17 = vpop.f32.mrb[37].mxu1 }
 0x56a   :  { %v20239_v52 = vadd.f32 %v14707_v40, %v5148_v17 }
 0x56e   :  { %v16228_v51 = vpop.f32.mrb[38].mxu1 }
 0x56f   :  { %v20223_v18 = vadd.f32 %v16228_v51, %v14710_v0  ;;  %v5229_v61 = vpop.f32.mrb[39].mxu1 }
 0x570   :  { %v20249_v11 = vadd.f32 %v14710_v0, %v5229_v61 }
 0x572   :  { %v5313_v34 = vpop.f32.mrb[40].mxu1 }
 0x573   :  { %v5314_v63 = vadd.f32 %v20228_v60, %v5313_v34  ;;  %v16233_v21 = vpop.f32.mrb[41].mxu1 }
 0x575   :  { %v5469_v16 = vadd.f32 %v5314_v63, %v20230_v15 }
 0x576   :  { %v5389_v55 = vpop.f32.mrb[42].mxu1 }
 0x577   :  { %v14716_v13 = vmul.f32 -1.442695, %v5469_v16  ;;  %v5390_v56 = vadd.f32 %v20236_v41, %v5389_v55  ;;  %v16238_v12 = vpop.f32.mrb[43].mxu1 }
 0x579   :  { %17176 = vpow2.f32 %v14716_v13  ;;  %v5476_v24 = vadd.f32 %v5390_v56, %v20239_v52 }
 0x57a   :  { %v5465_v10 = vpop.f32.mrb[44].mxu1 }
 0x57b   :  { %v16243_v35 = vpop.f32.mrb[45].mxu1  ;;  %v14717_v36 = vmul.f32 -1.442695, %v5476_v24  ;;  %v5466_v50 = vadd.f32 %v20246_v28, %v5465_v10 }
 0x57d   :  { %17178 = vpow2.f32 %v14717_v36 }
 0x583   :  { %v17177_v45 = vpop.eup %17176 }
 0x584   :  { %v5473_v30 = vadd.f32 1.0, %v17177_v45 }
 0x586   :  { %17180 = vrcp.f32 %v5473_v30 }
 0x587   :  { %v17179_v22 = vpop.eup %17178 }
 0x588   :  { %v5480_v38 = vadd.f32 1.0, %v17179_v22 }
 0x58a   :  { %17182 = vrcp.f32 %v5480_v38 }
 0x590   :  { %v17181_v44 = vpop.eup %17180 }
 0x591   :  { %v5483_v7 = vmul.f32 %v17181_v44, %v5466_v50 }
 0x593   :  { %v5484_v54 = vadd.f32 %v5483_v7, %v20249_v11 }
 0x594   :  { %v17183_v37 = vpop.eup %17182 }
 0x595   :  { %17184 = vtanh.f32 %v5484_v54  ;;  %v5486_v33 = vsub.f32 1.0, %v17183_v37  ;;  %v5488_v6 = vmul.f32 0.0, %v17183_v37 }
 0x59f   :  { %v17185_v14 = vpop.eup %17184 }
 0x5a0   :  { %v5487_v42 = vmul.f32 %v17185_v14, %v5486_v33 }
 0x5a2   :  { %v5489_v5 = vadd.f32 %v5488_v6, %v5487_v42 }
 0x5a4   :  { %v20264_v23 = vmul.f32 %v5489_v5, %v20255_v57 }
 0x5a6   :  { %v5493_v20 = vadd.f32 %v20261_v49, %v20264_v23 }
 0x5a8   :  { %16247 = vmatmul.mubr.msk.f32.vlgmr.msra.gmra.mrb[46].mxu1 %vm1425_vm4, %v5493_v20  ;;  %v5735_v56 = vrot.slane %v5493_v20, 6 }
 0x5a9   :  { %16250 = vmatpush3.msra.mxu1 %v20188_v58  ;;  %16251 = vmatprep.mubr.msk.f32.mxu1 %vm17622_vm13, %v17620_v62 }
 0x5aa   :  { %16254 = vmatprep.subr.mxu1 %v17620_v62  ;;  %v5740_v22 = vmul.f32 %v5735_v56, %v20258_v46 }
 0x5ac   :  { %16252 = vmatmul.mubr.msk.f32.vlgmr.msra.gmra.mrb[48].mxu1 %vm1425_vm4, %v5493_v20 }
 0x5ad   :  { %16255 = vmatpush3.msra.mxu1 %v20198_v19  ;;  %16256 = vmatprep.mubr.msk.f32.mxu1 %vm17622_vm13, %v17620_v62 }
 0x5ae   :  { %16259 = vmatprep.subr.mxu1 %v17620_v62 }
 0x5b0   :  { %16257 = vmatmul.mubr.msk.f32.vlgmr.msra.gmra.mrb[50].mxu1 %vm1425_vm4, %v5493_v20 }
 0x5b1   :  { %16260 = vmatpush3.msra.mxu1 %v20176_v32  ;;  %16261 = vmatprep.mubr.msk.f32.mxu1 %vm17622_vm13, %v17620_v62 }
 0x5b2   :  { %16264 = vmatprep.subr.mxu1 %v17620_v62 }
 0x67b   :  { %v5563_v9 = vpop.f32.mrb[46].mxu1 }
 0x67c   :  { %v5564_v27 = vadd.f32 %v20228_v60, %v5563_v9  ;;  %v16248_v53 = vpop.f32.mrb[47].mxu1 }
 0x67e   :  { %v5708_v25 = vrot.slane %v5564_v27, 6 }
 0x67f   :  { %v5633_v43 = vpop.f32.mrb[48].mxu1 }
 0x680   :  { %v5710_v48 = vadd.f32 %v5708_v25, %v20230_v15  ;;  %v5634_v2 = vadd.f32 %v20236_v41, %v5633_v43  ;;  %v16253_v26 = vpop.f32.mrb[49].mxu1 }
 0x682   :  { %v14721_v47 = vmul.f32 -1.442695, %v5710_v48  ;;  %v5718_v8 = vrot.slane %v5634_v2, 6 }
 0x683   :  { %v5703_v3 = vpop.f32.mrb[50].mxu1 }
 0x684   :  { %17186 = vpow2.f32 %v14721_v47  ;;  %v5720_v40 = vadd.f32 %v5718_v8, %v20239_v52  ;;  %v16258_v59 = vpop.f32.mrb[51].mxu1  ;;  %v5704_v63 = vadd.f32 %v20246_v28, %v5703_v3 }
 0x686   :  { %v14722_v17 = vmul.f32 -1.442695, %v5720_v40  ;;  %v5728_v21 = vrot.slane %v5704_v63, 6 }
 0x688   :  { %17188 = vpow2.f32 %v14722_v17 }
 0x68e   :  { %v17187_v0 = vpop.eup %17186 }
 0x68f   :  { %v5714_v51 = vadd.f32 1.0, %v17187_v0 }
 0x691   :  { %17190 = vrcp.f32 %v5714_v51 }
 0x692   :  { %v17189_v61 = vpop.eup %17188 }
 0x693   :  { %v5724_v34 = vadd.f32 1.0, %v17189_v61 }
 0x695   :  { %17192 = vrcp.f32 %v5724_v34 }
 0x69b   :  { %v17191_v16 = vpop.eup %17190 }
 0x69c   :  { %v5730_v55 = vmul.f32 %v17191_v16, %v5728_v21 }
 0x69e   :  { %v5731_v13 = vadd.f32 %v5730_v55, %v20249_v11 }
 0x69f   :  { %v17193_v12 = vpop.eup %17192 }
 0x6a0   :  { %17194 = vtanh.f32 %v5731_v13  ;;  %v5737_v24 = vmul.f32 %v17193_v12, %v5735_v56  ;;  %v5733_v10 = vsub.f32 1.0, %v17193_v12 }
 0x6aa   :  { %v17195_v35 = vpop.eup %17194 }
 0x6ab   :  { %v5734_v36 = vmul.f32 %v17195_v35, %v5733_v10 }
 0x6ad   :  { %v5738_v45 = vadd.f32 %v5737_v24, %v5734_v36 }
 0x6af   :  { %v5739_v30 = vmul.f32 %v5738_v45, %v20255_v57 }
 0x6b1   :  { %v5741_v38 = vadd.f32 %v5740_v22, %v5739_v30  ;;  %v9466_v13 = vsel %vm1572_vm1, %v20264_v23, %v5739_v30 }
 0x6b3   :  { %v5743_v50 = vrot.slane %v5741_v38, 2  ;;  %v5984_v59 = vrot.slane %v5741_v38, 6 }
 0x6b5   :  { %16262 = vmatmul.mubr.msk.f32.vlgmr.msra.gmra.mrb[52].mxu1 %vm1425_vm4, %v5743_v50  ;;  %v5989_v55 = vmul.f32 %v5984_v59, %v20258_v46 }
 0x6b6   :  { %16265 = vmatpush3.msra.mxu1 %v20188_v58  ;;  %16266 = vmatprep.mubr.msk.f32.mxu1 %vm17622_vm13, %v17620_v62 }
 0x6b7   :  { %16269 = vmatprep.subr.mxu1 %v17620_v62 }
 0x6b9   :  { %16267 = vmatmul.mubr.msk.f32.vlgmr.msra.gmra.mrb[54].mxu1 %vm1425_vm4, %v5743_v50 }
 0x6ba   :  { %16270 = vmatpush3.msra.mxu1 %v20198_v19  ;;  %16271 = vmatprep.mubr.msk.f32.mxu1 %vm17622_vm13, %v17620_v62 }
 0x6bb   :  { %16274 = vmatprep.subr.mxu1 %v17620_v62 }
 0x6bd   :  { %16272 = vmatmul.mubr.msk.f32.vlgmr.msra.gmra.mrb[56].mxu1 %vm1425_vm4, %v5743_v50 }
 0x6be   :  { %16275 = vmatpush3.msra.mxu1 %v20176_v32  ;;  %16276 = vmatprep.mubr.msk.f32.mxu1 %vm17622_vm13, %v17620_v62 }
 0x6bf   :  { %16279 = vmatprep.subr.mxu1 %v17620_v62 }
 0x788   :  { %v5812_v44 = vpop.f32.mrb[52].mxu1 }
 0x789   :  { %v5813_v7 = vadd.f32 %v20228_v60, %v5812_v44  ;;  %v16263_v54 = vpop.f32.mrb[53].mxu1 }
 0x78b   :  { %v5957_v37 = vrot.slane %v5813_v7, 4 }
 0x78c   :  { %v5882_v33 = vpop.f32.mrb[54].mxu1 }
 0x78d   :  { %v5959_v14 = vadd.f32 %v5957_v37, %v20230_v15  ;;  %v5883_v6 = vadd.f32 %v20236_v41, %v5882_v33  ;;  %v16268_v42 = vpop.f32.mrb[55].mxu1 }
 0x78f   :  { %v14726_v5 = vmul.f32 -1.442695, %v5959_v14  ;;  %v5967_v20 = vrot.slane %v5883_v6, 4 }
 0x790   :  { %v5952_v9 = vpop.f32.mrb[56].mxu1 }
 0x791   :  { %17196 = vpow2.f32 %v14726_v5  ;;  %v5969_v27 = vadd.f32 %v5967_v20, %v20239_v52  ;;  %v16273_v53 = vpop.f32.mrb[57].mxu1  ;;  %v5953_v47 = vadd.f32 %v20246_v28, %v5952_v9 }
 0x793   :  { %v14727_v25 = vmul.f32 -1.442695, %v5969_v27  ;;  %v5977_v8 = vrot.slane %v5953_v47, 4 }
 0x795   :  { %17198 = vpow2.f32 %v14727_v25 }
 0x79b   :  { %v17197_v43 = vpop.eup %17196 }
 0x79c   :  { %v5963_v48 = vadd.f32 1.0, %v17197_v43 }
 0x79e   :  { %17200 = vrcp.f32 %v5963_v48 }
 0x79f   :  { %v17199_v2 = vpop.eup %17198 }
 0x7a0   :  { %v5973_v26 = vadd.f32 1.0, %v17199_v2 }
 0x7a2   :  { %17202 = vrcp.f32 %v5973_v26 }
 0x7a8   :  { %v17201_v3 = vpop.eup %17200 }
 0x7a9   :  { %v5979_v40 = vmul.f32 %v17201_v3, %v5977_v8 }
 0x7ab   :  { %v5980_v17 = vadd.f32 %v5979_v40, %v20249_v11 }
 0x7ac   :  { %v17203_v0 = vpop.eup %17202 }
 0x7ad   :  { %v5986_v51 = vmul.f32 %v17203_v0, %v5984_v59  ;;  %17204 = vtanh.f32 %v5980_v17  ;;  %v5982_v61 = vsub.f32 1.0, %v17203_v0 }
 0x7b7   :  { %v17205_v34 = vpop.eup %17204 }
 0x7b8   :  { %v5983_v63 = vmul.f32 %v17205_v34, %v5982_v61 }
 0x7ba   :  { %v5987_v21 = vadd.f32 %v5986_v51, %v5983_v63 }
 0x7bc   :  { %v5988_v16 = vmul.f32 %v5987_v21, %v20255_v57 }
 0x7be   :  { %v5990_v56 = vadd.f32 %v5989_v55, %v5988_v16  ;;  %v9467_v12 = vsel %vm1576_vm3, %v9466_v13, %v5988_v16 }
 0x7c0   :  { %v5992_v24 = vrot.slane %v5990_v56, 4  ;;  %v6233_v53 = vrot.slane %v5990_v56, 6 }
 0x7c2   :  { %16277 = vmatmul.mubr.msk.f32.vlgmr.msra.gmra.mrb[58].mxu1 %vm1425_vm4, %v5992_v24  ;;  %v6238_v3 = vmul.f32 %v6233_v53, %v20258_v46 }
 0x7c3   :  { %16280 = vmatpush3.msra.mxu1 %v20188_v58  ;;  %16281 = vmatprep.mubr.msk.f32.mxu1 %vm17622_vm13, %v17620_v62 }
 0x7c4   :  { %16284 = vmatprep.subr.mxu1 %v17620_v62 }
 0x7c6   :  { %16282 = vmatmul.mubr.msk.f32.vlgmr.msra.gmra.mrb[60].mxu1 %vm1425_vm4, %v5992_v24 }
 0x7c7   :  { %16285 = vmatpush3.msra.mxu1 %v20198_v19  ;;  %16286 = vmatprep.mubr.msk.f32.mxu1 %vm17622_vm13, %v17620_v62 }
 0x7c8   :  { %16289 = vmatprep.subr.mxu1 %v17620_v62 }
 0x7ca   :  { %16287 = vmatmul.mubr.msk.f32.vlgmr.msra.gmra.mrb[62].mxu1 %vm1425_vm4, %v5992_v24 }
 0x7cb   :  { %16290 = vmatpush3.msra.mxu1 %v20176_v32  ;;  %16291 = vmatprep.mubr.msk.f32.mxu1 %vm17622_vm13, %v17620_v62 }
 0x7cc   :  { %16294 = vmatprep.subr.mxu1 %v17620_v62 }
 0x895   :  { %v6061_v23 = vpop.f32.mrb[58].mxu1 }
 0x896   :  { %v6062_v10 = vadd.f32 %v20228_v60, %v6061_v23  ;;  %v16278_v35 = vpop.f32.mrb[59].mxu1 }
 0x898   :  { %v6206_v36 = vrot.slane %v6062_v10, 2 }
 0x899   :  { %v6131_v45 = vpop.f32.mrb[60].mxu1 }
 0x89a   :  { %v6208_v30 = vadd.f32 %v6206_v36, %v20230_v15  ;;  %v6132_v22 = vadd.f32 %v20236_v41, %v6131_v45  ;;  %v16283_v38 = vpop.f32.mrb[61].mxu1 }
 0x89b   :  { %v20367_v38 = vld [vmem:[%s21674_s8 + $0x8] sm:$0xff] }
 0x89c   :  { %v14731_v50 = vmul.f32 -1.442695, %v6208_v30  ;;  %v6216_v44 = vrot.slane %v6132_v22, 2 }
 0x89d   :  { %v6201_v7 = vpop.f32.mrb[62].mxu1 }
 0x89e   :  { %17206 = vpow2.f32 %v14731_v50  ;;  %v6218_v54 = vadd.f32 %v6216_v44, %v20239_v52  ;;  %v16288_v37 = vpop.f32.mrb[63].mxu1  ;;  %v6202_v15 = vadd.f32 %v20246_v28, %v6201_v7 }
 0x89f   :  { %v20370_v37 = vsub.f32 1.0, %v20367_v38 }
 0x8a0   :  { %v14732_v33 = vmul.f32 -1.442695, %v6218_v54  ;;  %v6226_v20 = vrot.slane %v6202_v15, 2 }
 0x8a2   :  { %17208 = vpow2.f32 %v14732_v33 }
 0x8a8   :  { %v17207_v14 = vpop.eup %17206 }
 0x8a9   :  { %v6212_v6 = vadd.f32 1.0, %v17207_v14 }
 0x8ab   :  { %17210 = vrcp.f32 %v6212_v6 }
 0x8ac   :  { %v17209_v42 = vpop.eup %17208 }
 0x8ad   :  { %v6222_v5 = vadd.f32 1.0, %v17209_v42 }
 0x8af   :  { %17212 = vrcp.f32 %v6222_v5 }
 0x8b5   :  { %v17211_v9 = vpop.eup %17210 }
 0x8b6   :  { %v6228_v27 = vmul.f32 %v17211_v9, %v6226_v20 }
 0x8b8   :  { %v6229_v25 = vadd.f32 %v6228_v27, %v20249_v11 }
 0x8b9   :  { %v17213_v43 = vpop.eup %17212 }
 0x8ba   :  { %v6235_v48 = vmul.f32 %v17213_v43, %v6233_v53  ;;  %17214 = vtanh.f32 %v6229_v25  ;;  %v6231_v52 = vsub.f32 1.0, %v17213_v43 }
 0x8c4   :  { %v17215_v2 = vpop.eup %17214 }
 0x8c5   :  { %v6232_v26 = vmul.f32 %v17215_v2, %v6231_v52 }
 0x8c7   :  { %v6236_v47 = vadd.f32 %v6235_v48, %v6232_v26 }
 0x8c9   :  { %v6237_v8 = vmul.f32 %v6236_v47, %v20255_v57 }
 0x8cb   :  { %v6239_v40 = vadd.f32 %v6238_v3, %v6237_v8  ;;  %v20341_v59 = vsel %vm1580_vm7, %v9467_v12, %v6237_v8 }
 0x8cd   :  { %v6241_v17 = vrot.slane %v6239_v40, 6 }
 0x8cf   :  { %16292 = vmatmul.mubr.msk.f32.vlgmr.msra.gmra.mrb[64].mxu1 %vm1425_vm4, %v6241_v17  ;;  %v6478_v6 = vmul.f32 %v20370_v37, %v6241_v17 }
 0x8d0   :  { %16295 = vmatpush3.msra.mxu1 %v20188_v58  ;;  %16296 = vmatprep.mubr.msk.f32.mxu1 %vm17622_vm13, %v17620_v62 }
 0x8d1   :  { %16299 = vmatprep.subr.mxu1 %v17620_v62 }
 0x8d3   :  { %16297 = vmatmul.mubr.msk.f32.vlgmr.msra.gmra.mrb[66].mxu1 %vm1425_vm4, %v6241_v17 }
 0x8d4   :  { %16300 = vmatpush3.msra.mxu1 %v20198_v19  ;;  %16301 = vmatprep.mubr.msk.f32.mxu1 %vm17622_vm13, %v17620_v62 }
 0x8d5   :  { %16304 = vmatprep.subr.mxu1 %v17620_v62 }
 0x8d7   :  { %16302 = vmatmul.mubr.msk.f32.vlgmr.msra.gmra.mrb[68].mxu1 %vm1425_vm4, %v6241_v17 }
 0x8d8   :  { %16305 = vmatpush3.msra.mxu1 %v20176_v32  ;;  %16306 = vmatprep.mubr.msk.f32.mxu1 %vm17622_vm13, %v17620_v62 }
 0x8d9   :  { %16309 = vmatprep.subr.mxu1 %v17620_v62 }
 0x9a2   :  { %v6310_v11 = vpop.f32.mrb[64].mxu1 }
 0x9a3   :  { %v6311_v57 = vadd.f32 %v20228_v60, %v6310_v11  ;;  %v16293_v0 = vpop.f32.mrb[65].mxu1 }
 0x9a5   :  { %v6454_v51 = vadd.f32 %v6311_v57, %v20213_v4 }
 0x9a6   :  { %v6380_v61 = vpop.f32.mrb[66].mxu1 }
 0x9a7   :  { %v14736_v34 = vmul.f32 -1.442695, %v6454_v51  ;;  %v6381_v63 = vadd.f32 %v20236_v41, %v6380_v61  ;;  %v16298_v21 = vpop.f32.mrb[67].mxu1 }
 0x9a9   :  { %17216 = vpow2.f32 %v14736_v34  ;;  %v6461_v16 = vadd.f32 %v6381_v63, %v20218_v39 }
 0x9aa   :  { %v6450_v55 = vpop.f32.mrb[68].mxu1 }
 0x9ab   :  { %v16303_v13 = vpop.f32.mrb[69].mxu1  ;;  %v14737_v56 = vmul.f32 -1.442695, %v6461_v16  ;;  %v6451_v35 = vadd.f32 %v20246_v28, %v6450_v55 }
 0x9ad   :  { %17218 = vpow2.f32 %v14737_v56 }
 0x9b3   :  { %v17217_v12 = vpop.eup %17216 }
 0x9b4   :  { %v6458_v24 = vadd.f32 1.0, %v17217_v12 }
 0x9b6   :  { %17220 = vrcp.f32 %v6458_v24 }
 0x9b7   :  { %v17219_v23 = vpop.eup %17218 }
 0x9b8   :  { %v6465_v10 = vadd.f32 1.0, %v17219_v23 }
 0x9ba   :  { %17222 = vrcp.f32 %v6465_v10 }
 0x9c0   :  { %v17221_v36 = vpop.eup %17220 }
 0x9c1   :  { %v6468_v45 = vmul.f32 %v17221_v36, %v6451_v35 }
 0x9c3   :  { %v6469_v30 = vadd.f32 %v6468_v45, %v20223_v18 }
 0x9c4   :  { %v17223_v22 = vpop.eup %17222 }
 0x9c5   :  { %17224 = vtanh.f32 %v6469_v30  ;;  %v6471_v50 = vsub.f32 1.0, %v17223_v22  ;;  %v6474_v7 = vmul.f32 %v17223_v22, %v6241_v17 }
 0x9cf   :  { %v17225_v44 = vpop.eup %17224 }
 0x9d0   :  { %v6472_v54 = vmul.f32 %v17225_v44, %v6471_v50 }
 0x9d2   :  { %v6475_v33 = vadd.f32 %v6474_v7, %v6472_v54 }
 0x9d4   :  { %v20373_v14 = vmul.f32 %v6475_v33, %v20367_v38 }
 0x9d6   :  { %v6479_v42 = vadd.f32 %v6478_v6, %v20373_v14 }
 0x9d8   :  { %16307 = vmatmul.mubr.msk.f32.vlgmr.msra.gmra.mrb[70].mxu1 %vm1425_vm4, %v6479_v42  ;;  %v6721_v63 = vrot.slane %v6479_v42, 6 }
 0x9d9   :  { %16310 = vmatpush3.msra.mxu1 %v20188_v58  ;;  %16311 = vmatprep.mubr.msk.f32.mxu1 %vm17622_vm13, %v17620_v62 }
 0x9da   :  { %16314 = vmatprep.subr.mxu1 %v17620_v62  ;;  %v6726_v23 = vmul.f32 %v6721_v63, %v20370_v37 }
 0x9dc   :  { %16312 = vmatmul.mubr.msk.f32.vlgmr.msra.gmra.mrb[72].mxu1 %vm1425_vm4, %v6479_v42 }
 0x9dd   :  { %16315 = vmatpush3.msra.mxu1 %v20198_v19  ;;  %16316 = vmatprep.mubr.msk.f32.mxu1 %vm17622_vm13, %v17620_v62 }
 0x9de   :  { %16319 = vmatprep.subr.mxu1 %v17620_v62 }
 0x9e0   :  { %16317 = vmatmul.mubr.msk.f32.vlgmr.msra.gmra.mrb[74].mxu1 %vm1425_vm4, %v6479_v42 }
 0x9e1   :  { %16320 = vmatpush3.msra.mxu1 %v20176_v32  ;;  %16321 = vmatprep.mubr.msk.f32.mxu1 %vm17622_vm13, %v17620_v62 }
 0x9e2   :  { %16324 = vmatprep.subr.mxu1 %v17620_v62 }
 0xaab   :  { %v6549_v5 = vpop.f32.mrb[70].mxu1 }
 0xaac   :  { %v6550_v15 = vadd.f32 %v20228_v60, %v6549_v5  ;;  %v16308_v20 = vpop.f32.mrb[71].mxu1 }
 0xaae   :  { %v6694_v9 = vrot.slane %v6550_v15, 6 }
 0xaaf   :  { %v6619_v27 = vpop.f32.mrb[72].mxu1 }
 0xab0   :  { %v6696_v53 = vadd.f32 %v6694_v9, %v20213_v4  ;;  %v6620_v25 = vadd.f32 %v20236_v41, %v6619_v27  ;;  %v16313_v43 = vpop.f32.mrb[73].mxu1 }
 0xab2   :  { %v14741_v48 = vmul.f32 -1.442695, %v6696_v53  ;;  %v6704_v52 = vrot.slane %v6620_v25, 6 }
 0xab3   :  { %v6689_v2 = vpop.f32.mrb[74].mxu1 }
 0xab4   :  { %17226 = vpow2.f32 %v14741_v48  ;;  %v6706_v26 = vadd.f32 %v6704_v52, %v20218_v39  ;;  %v16318_v47 = vpop.f32.mrb[75].mxu1  ;;  %v6690_v57 = vadd.f32 %v20246_v28, %v6689_v2 }
 0xab6   :  { %v14742_v8 = vmul.f32 -1.442695, %v6706_v26  ;;  %v6714_v0 = vrot.slane %v6690_v57, 6 }
 0xab8   :  { %17228 = vpow2.f32 %v14742_v8 }
 0xabe   :  { %v17227_v3 = vpop.eup %17226 }
 0xabf   :  { %v6700_v40 = vadd.f32 1.0, %v17227_v3 }
 0xac1   :  { %17230 = vrcp.f32 %v6700_v40 }
 0xac2   :  { %v17229_v17 = vpop.eup %17228 }
 0xac3   :  { %v6710_v11 = vadd.f32 1.0, %v17229_v17 }
 0xac5   :  { %17232 = vrcp.f32 %v6710_v11 }
 0xacb   :  { %v17231_v51 = vpop.eup %17230 }
 0xacc   :  { %v6716_v61 = vmul.f32 %v17231_v51, %v6714_v0 }
 0xace   :  { %v6717_v34 = vadd.f32 %v6716_v61, %v20223_v18 }
 0xacf   :  { %v17233_v21 = vpop.eup %17232 }
 0xad0   :  { %17234 = vtanh.f32 %v6717_v34  ;;  %v6723_v16 = vmul.f32 %v17233_v21, %v6721_v63  ;;  %v6719_v55 = vsub.f32 1.0, %v17233_v21  ;;  %v7224_v21 = vld [vmem:[%s21466_s15] sm:$0xff] }
 0xada   :  { %v17235_v13 = vpop.eup %17234 }
 0xadb   :  { %v6720_v56 = vmul.f32 %v17235_v13, %v6719_v55  ;;  %v7226_v55 = vld [vmem:[%s21466_s15 + $0x10] sm:$0xff]  ;;  %v7228_v13 = vld [vmem:[%s21466_s15 + $0x20] sm:$0xff] }
 0xadd   :  { %v6724_v12 = vadd.f32 %v6723_v16, %v6720_v56  ;;  %v7225_v16 = vld [vmem:[%s21466_s15 + $0x8] sm:$0xff] }
 0xade   :  { %v7229_v56 = vld [vmem:[%s21466_s15 + $0x28] sm:$0xff] }
 0xadf   :  { %v6725_v24 = vmul.f32 %v6724_v12, %v20367_v38  ;;  %v7230_v12 = vld [vmem:[%s21466_s15 + $0x30] sm:$0xff] }
 0xae1   :  { %v6727_v10 = vadd.f32 %v6726_v23, %v6725_v24  ;;  %v9469_v51 = vsel %vm1572_vm1, %v20373_v14, %v6725_v24  ;;  %v16838_v14 = vpack.c.bf16 %v7225_v16, %v7224_v21  ;;  %v7231_v24 = vld [vmem:[%s21466_s15 + $0x38] sm:$0xff] }
 0xae2   :  { %v16846_v23 = vpack.c.bf16 %v7231_v24, %v7230_v12 }
 0xae3   :  { %v6729_v35 = vrot.slane %v6727_v10, 2  ;;  %v6970_v2 = vrot.slane %v6727_v10, 6  ;;  %v7232_v10 = vld [vmem:[%s21466_s15 + $0x40] sm:$0xff] }
 0xae5   :  { %16322 = vmatmul.mubr.msk.f32.vlgmr.msra.gmra.mrb[76].mxu1 %vm1425_vm4, %v6729_v35  ;;  %v6975_v0 = vmul.f32 %v6970_v2, %v20370_v37 }
 0xae6   :  { %16325 = vmatpush3.msra.mxu1 %v20188_v58  ;;  %16326 = vmatprep.mubr.msk.f32.mxu1 %vm17622_vm13, %v17620_v62 }
 0xae7   :  { %16329 = vmatprep.subr.mxu1 %v17620_v62 }
 0xae9   :  { %16327 = vmatmul.mubr.msk.f32.vlgmr.msra.gmra.mrb[78].mxu1 %vm1425_vm4, %v6729_v35 }
 0xaea   :  { %16330 = vmatpush3.msra.mxu1 %v20198_v19  ;;  %16331 = vmatprep.mubr.msk.f32.mxu1 %vm17622_vm13, %v17620_v62 }
 0xaeb   :  { %16334 = vmatprep.subr.mxu1 %v17620_v62 }
 0xaed   :  { %16332 = vmatmul.mubr.msk.f32.vlgmr.msra.gmra.mrb[80].mxu1 %vm1425_vm4, %v6729_v35  ;;  %v20481_v35 = vld [vmem:[%s21467_s16] sm:$0xff] }
 0xaee   :  { %16335 = vmatpush3.msra.mxu1 %v20176_v32  ;;  %16336 = vmatprep.mubr.msk.f32.mxu1 %vm17622_vm13, %v17620_v62 }
 0xaef   :  { %16339 = vmatprep.subr.mxu1 %v17620_v62 }
 0xbb8   :  { %v6798_v36 = vpop.f32.mrb[76].mxu1 }
 0xbb9   :  { %v6799_v45 = vadd.f32 %v20228_v60, %v6798_v36  ;;  %v16323_v30 = vpop.f32.mrb[77].mxu1 }
 0xbbb   :  { %v6943_v22 = vrot.slane %v6799_v45, 4 }
 0xbbc   :  { %v6868_v50 = vpop.f32.mrb[78].mxu1 }
 0xbbd   :  { %v6945_v44 = vadd.f32 %v6943_v22, %v20213_v4  ;;  %v6869_v7 = vadd.f32 %v20236_v41, %v6868_v50  ;;  %v16328_v54 = vpop.f32.mrb[79].mxu1 }
 0xbbf   :  { %v14746_v33 = vmul.f32 -1.442695, %v6945_v44  ;;  %v6953_v6 = vrot.slane %v6869_v7, 4 }
 0xbc0   :  { %v6938_v42 = vpop.f32.mrb[80].mxu1 }
 0xbc1   :  { %17236 = vpow2.f32 %v14746_v33  ;;  %v6955_v32 = vadd.f32 %v6953_v6, %v20218_v39  ;;  %v16333_v5 = vpop.f32.mrb[81].mxu1  ;;  %v6939_v25 = vadd.f32 %v20246_v28, %v6938_v42 }
 0xbc3   :  { %v14747_v15 = vmul.f32 -1.442695, %v6955_v32  ;;  %v6963_v43 = vrot.slane %v6939_v25, 4 }
 0xbc5   :  { %17238 = vpow2.f32 %v14747_v15 }
 0xbcb   :  { %v17237_v20 = vpop.eup %17236 }
 0xbcc   :  { %v6949_v9 = vadd.f32 1.0, %v17237_v20 }
 0xbce   :  { %17240 = vrcp.f32 %v6949_v9 }
 0xbcf   :  { %v17239_v27 = vpop.eup %17238 }
 0xbd0   :  { %v6959_v53 = vadd.f32 1.0, %v17239_v27 }
 0xbd2   :  { %17242 = vrcp.f32 %v6959_v53 }
 0xbd8   :  { %v17241_v48 = vpop.eup %17240 }
 0xbd9   :  { %v6965_v52 = vmul.f32 %v17241_v48, %v6963_v43 }
 0xbdb   :  { %v6966_v26 = vadd.f32 %v6965_v52, %v20223_v18 }
 0xbdc   :  { %v17243_v47 = vpop.eup %17242 }
 0xbdd   :  { %v6972_v8 = vmul.f32 %v17243_v47, %v6970_v2  ;;  %17244 = vtanh.f32 %v6966_v26  ;;  %v6968_v3 = vsub.f32 1.0, %v17243_v47  ;;  %v14759_v2 = vld [vmem:[%s21468_s17 + $0x2] ss:$0 sm:$0xff] }
 0xbe7   :  { %v17245_v40 = vpop.eup %17244 }
 0xbe8   :  { %v6969_v17 = vmul.f32 %v17245_v40, %v6968_v3  ;;  %v20538_v40 = vld [vmem:[%s21469_s18] ss:$0 sm:$0xff] }
 0xbea   :  { %v6973_v11 = vadd.f32 %v6972_v8, %v6969_v17 }
 0xbec   :  { %v6974_v57 = vmul.f32 %v6973_v11, %v20367_v38 }
 0xbee   :  { %v20425_v61 = vadd.f32 %v6975_v0, %v6974_v57  ;;  %v20428_v34 = vsel %vm1576_vm3, %v9469_v51, %v6974_v57 }
 0xbf0   :  { %v6978_v63 = vrot.slane %v20425_v61, 4  ;;  %v7219_v12 = vrot.slane %v20425_v61, 6  ;;  %v20558_v61 = vld [vmem:[%s21469_s18 + $0x2] ss:$0 sm:$0xff] }
 0xbf2   :  { %16337 = vmatmul.mubr.msk.f32.vlgmr.msra.gmra.mrb[82].mxu1 %vm1425_vm4, %v6978_v63 }
 0xbf3   :  { %16340 = vmatpush3.msra.mxu1 %v20188_v58  ;;  %16341 = vmatprep.mubr.msk.f32.mxu1 %vm17622_vm13, %v17620_v62  ;;  %v7227_v58 = vld [vmem:[%s21466_s15 + $0x18] sm:$0xff] }
 0xbf4   :  { %16344 = vmatprep.subr.mxu1 %v17620_v62 }
 0xbf6   :  { %16342 = vmatmul.mubr.msk.f32.vlgmr.msra.gmra.mrb[84].mxu1 %vm1425_vm4, %v6978_v63 }
 0xbf7   :  { %16345 = vmatpush3.msra.mxu1 %v20198_v19  ;;  %16346 = vmatprep.mubr.msk.f32.mxu1 %vm17622_vm13, %v17620_v62  ;;  %v16842_v19 = vpack.c.bf16 %v7228_v13, %v7227_v58 }
 0xbf8   :  { %16839 = vmatprep.subr.bf16.mxu1 %v16838_v14 }
 0xbfa   :  { %16347 = vmatmul.mubr.msk.f32.vlgmr.msra.gmra.mrb[86].mxu1 %vm1425_vm4, %v6978_v63  ;;  %v20544_v63 = vld [vmem:[%s21469_s18 + $0x1] ss:$0 sm:$0xff] }
 0xbfb   :  { %16841 = vmatpush3.bf16.msra.mxu1 %v16838_v14  ;;  %16355 = vmatprep.mubr.msk.f32.mxu1 %vm4994_vm15, %v20147_v1 }
 0xbfc   :  { %16353 = vmatprep.subr.mxu1 %v7226_v55 }
 0xbff   :  { %16354 = vmatpush3.msra.mxu1 %v7226_v55 }
 0xc00   :  { %16356 = vmatmul.mubr.msk.f32.vlgmr.msra.gmra.mrb[88].mxu1 %vm4994_vm15, %v20149_v29  ;;  %16843 = vmatprep.subr.bf16.mxu1 %v16842_v19 }
 0xc01   :  { %16845 = vmatpush3.bf16.msra.mxu1 %v16842_v19  ;;  %16364 = vmatprep.mubr.msk.f32.mxu1 %vm4994_vm15, %v20147_v1 }
 0xc02   :  { %16362 = vmatprep.subr.mxu1 %v7229_v56 }
 0xc05   :  { %16363 = vmatpush3.msra.mxu1 %v7229_v56 }
 0xc06   :  { %16365 = vmatmul.mubr.msk.f32.vlgmr.msra.gmra.mrb[90].mxu1 %vm4994_vm15, %v20149_v29  ;;  %16847 = vmatprep.subr.bf16.mxu1 %v16846_v23 }
 0xc07   :  { %16849 = vmatpush3.bf16.msra.mxu1 %v16846_v23  ;;  %16373 = vmatprep.mubr.msk.f32.mxu1 %vm4994_vm15, %v20147_v1  ;;  %v20493_v1 = vld [vmem:[%s21467_s16 + $0x8] sm:$0xff] }
 0xc08   :  { %16371 = vmatprep.subr.mxu1 %v7232_v10 }
 0xc0b   :  { %16372 = vmatpush3.msra.mxu1 %v7232_v10 }
 0xc0c   :  { %16374 = vmatmul.mubr.msk.f32.vlgmr.msra.gmra.mrb[92].mxu1 %vm4994_vm15, %v20149_v29  ;;  %16376 = vmatprep.subr.mxu1 %v17620_v62  ;;  %v20503_v29 = vld [vmem:[%s21467_s16 + $0x10] sm:$0xff] }
 0xc0d   :  { %16377 = vmatpush3.msra.mxu1 %v20481_v35  ;;  %16378 = vmatprep.mubr.msk.f32.mxu1 %vm17622_vm13, %v17620_v62 }
 0xc0e   :  { %16381 = vmatprep.subr.mxu1 %v17620_v62 }
 0xc10   :  { %16379 = vmatmul.mubr.f32.vlgmr.msra.gmra.mrb[94].mxu1 %v17620_v62 }
 0xc11   :  { %16382 = vmatpush3.msra.mxu1 %v20493_v1  ;;  %16383 = vmatprep.mubr.msk.f32.mxu1 %vm17622_vm13, %v17620_v62 }
 0xc12   :  { %16386 = vmatprep.subr.mxu1 %v17620_v62 }
 0xc14   :  { %16384 = vmatmul.mubr.f32.vlgmr.msra.gmra.mrb[96].mxu1 %v17620_v62 }
 0xc15   :  { %16387 = vmatpush3.msra.mxu1 %v20503_v29  ;;  %16388 = vmatprep.mubr.msk.f32.mxu1 %vm17622_vm13, %v17620_v62 }
 0xc16   :  { %16391 = vmatprep.subr.mxu1 %v17620_v62 }
 0xc18   :  { %16389 = vmatmul.mubr.f32.vlgmr.msra.gmra.mrb[98].mxu1 %v17620_v62 }
 0xc19   :  { %16392 = vmatpush3.msra.mxu1 %v20481_v35  ;;  %16393 = vmatprep.mubr.msk.f32.mxu1 %vm17622_vm13, %v17620_v62 }
 0xc1a   :  { %16396 = vmatprep.subr.mxu1 %v17620_v62 }
 0xcc5   :  { %v7047_v36 = vpop.f32.mrb[82].mxu1 }
 0xcc6   :  { %v7048_v45 = vadd.f32 %v20228_v60, %v7047_v36  ;;  %v16338_v30 = vpop.f32.mrb[83].mxu1  ;;  %v14753_v60 = vld [vmem:[%s21468_s17] ss:$0 sm:$0xff] }
 0xcc8   :  { %v7192_v22 = vrot.slane %v7048_v45, 2 }
 0xcc9   :  { %v7117_v50 = vpop.f32.mrb[84].mxu1 }
 0xcca   :  { %v7194_v44 = vadd.f32 %v7192_v22, %v20213_v4  ;;  %v7118_v7 = vadd.f32 %v20236_v41, %v7117_v50  ;;  %v16343_v54 = vpop.f32.mrb[85].mxu1  ;;  %v14756_v41 = vld [vmem:[%s21468_s17 + $0x1] ss:$0 sm:$0xff] }
 0xccc   :  { %v14751_v33 = vmul.f32 -1.442695, %v7194_v44  ;;  %v7202_v6 = vrot.slane %v7118_v7, 2 }
 0xccd   :  { %v7187_v42 = vpop.f32.mrb[86].mxu1 }
 0xcce   :  { %17246 = vpow2.f32 %v14751_v33  ;;  %v7204_v32 = vadd.f32 %v7202_v6, %v20218_v39  ;;  %v16348_v5 = vpop.f32.mrb[87].mxu1  ;;  %v7188_v47 = vadd.f32 %v20246_v28, %v7187_v42 }
 0xcd0   :  { %v14752_v15 = vmul.f32 -1.442695, %v7204_v32  ;;  %v7212_v11 = vrot.slane %v7188_v47, 2 }
 0xcd2   :  { %17248 = vpow2.f32 %v14752_v15 }
 0xcd3   :  { %v16357_v20 = vpop.f32.mrb[88].mxu1 }
 0xcd4   :  { %v7314_v9 = vpop.f32.mrb[89].mxu1  ;;  %v20546_v21 = vadd.f32 %v16357_v20, %v14753_v60 }
 0xcd5   :  { %v20522_v27 = vadd.f32 %v14753_v60, %v7314_v9 }
 0xcd8   :  { %v17247_v4 = vpop.eup %17246 }
 0xcd9   :  { %v7198_v53 = vadd.f32 1.0, %v17247_v4  ;;  %v16366_v25 = vpop.f32.mrb[90].mxu1 }
 0xcda   :  { %v7395_v43 = vpop.f32.mrb[91].mxu1  ;;  %v20552_v24 = vadd.f32 %v16366_v25, %v14756_v41 }
 0xcdb   :  { %17250 = vrcp.f32 %v7198_v53  ;;  %v20527_v39 = vadd.f32 %v14756_v41, %v7395_v43 }
 0xcdc   :  { %v17249_v48 = vpop.eup %17248 }
 0xcdd   :  { %v7208_v52 = vadd.f32 1.0, %v17249_v48 }
 0xcdf   :  { %17252 = vrcp.f32 %v7208_v52  ;;  %v16375_v26 = vpop.f32.mrb[92].mxu1 }
 0xce0   :  { %v7476_v8 = vpop.f32.mrb[93].mxu1  ;;  %v20566_v4 = vadd.f32 %v16375_v26, %v14759_v2 }
 0xce1   :  { %v20533_v3 = vadd.f32 %v14759_v2, %v7476_v8  ;;  %v20570_v8 = vmul.f32 0.0, %v20370_v37 }
 0xce3   :  { %v7557_v17 = vpop.f32.mrb[94].mxu1 }
 0xce4   :  { %v7558_v57 = vadd.f32 %v20538_v40, %v7557_v17  ;;  %v16380_v0 = vpop.f32.mrb[95].mxu1 }
 0xce5   :  { %v17251_v51 = vpop.eup %17250 }
 0xce6   :  { %v7214_v28 = vmul.f32 %v17251_v51, %v7212_v11  ;;  %v7714_v16 = vrot.slane %v7558_v57, 2 }
 0xce7   :  { %v7633_v14 = vpop.f32.mrb[96].mxu1 }
 0xce8   :  { %v7215_v55 = vadd.f32 %v7214_v28, %v20223_v18  ;;  %v7716_v58 = vadd.f32 %v7714_v16, %v20546_v21  ;;  %v7634_v13 = vadd.f32 %v20544_v63, %v7633_v14  ;;  %v16385_v19 = vpop.f32.mrb[97].mxu1 }
 0xce9   :  { %v17253_v56 = vpop.eup %17252 }
 0xcea   :  { %17254 = vtanh.f32 %v7215_v55  ;;  %v14765_v23 = vmul.f32 -1.442695, %v7716_v58  ;;  %v7724_v10 = vrot.slane %v7634_v13, 2  ;;  %v7221_v45 = vmul.f32 %v17253_v56, %v7219_v12 }
 0xceb   :  { %v7709_v36 = vpop.f32.mrb[98].mxu1  ;;  %v7217_v50 = vsub.f32 1.0, %v17253_v56 }
 0xcec   :  { %17256 = vpow2.f32 %v14765_v23  ;;  %v7726_v30 = vadd.f32 %v7724_v10, %v20552_v24  ;;  %v16390_v22 = vpop.f32.mrb[99].mxu1  ;;  %v7710_v5 = vadd.f32 %v20558_v61, %v7709_v36 }
 0xcee   :  { %v14766_v18 = vmul.f32 -1.442695, %v7726_v30  ;;  %v7734_v20 = vrot.slane %v7710_v5, 2 }
 0xcf0   :  { %17258 = vpow2.f32 %v14766_v18 }
 0xcf4   :  { %v17255_v44 = vpop.eup %17254 }
 0xcf5   :  { %v7218_v7 = vmul.f32 %v17255_v44, %v7217_v50 }
 0xcf6   :  { %v17257_v54 = vpop.eup %17256 }
 0xcf7   :  { %v7720_v33 = vadd.f32 1.0, %v17257_v54  ;;  %v7222_v6 = vadd.f32 %v7221_v45, %v7218_v7 }
 0xcf9   :  { %17260 = vrcp.f32 %v7720_v33  ;;  %v7223_v42 = vmul.f32 %v7222_v6, %v20367_v38 }
 0xcfa   :  { %v17259_v15 = vpop.eup %17258 }
 0xcfb   :  { %v20563_v32 = vsel %vm1580_vm7, %v20428_v34, %v7223_v42  ;;  %v7730_v60 = vadd.f32 1.0, %v17259_v15 }
 0xcfd   :  { %17262 = vrcp.f32 %v7730_v60 }
 0xd03   :  { %v17261_v9 = vpop.eup %17260 }
 0xd04   :  { %v7736_v41 = vmul.f32 %v17261_v9, %v7734_v20 }
 0xd06   :  { %v7737_v53 = vadd.f32 %v7736_v41, %v20566_v4 }
 0xd07   :  { %v17263_v25 = vpop.eup %17262 }
 0xd08   :  { %17264 = vtanh.f32 %v7737_v53  ;;  %v7739_v43 = vsub.f32 1.0, %v17263_v25  ;;  %v7741_v52 = vmul.f32 0.0, %v17263_v25 }
 0xd12   :  { %v17265_v48 = vpop.eup %17264 }
 0xd13   :  { %v7740_v47 = vmul.f32 %v17265_v48, %v7739_v43 }
 0xd15   :  { %v7742_v34 = vadd.f32 %v7741_v52, %v7740_v47 }
 0xd17   :  { %v20573_v17 = vmul.f32 %v7742_v34, %v20367_v38 }
 0xd19   :  { %v7745_v2 = vadd.f32 %v20570_v8, %v20573_v17 }
 0xd1b   :  { %v7747_v26 = vrot.slane %v7745_v2, 6  ;;  %v7988_v7 = vrot.slane %v7745_v2, 2 }
 0xd1d   :  { %16394 = vmatmul.mubr.msk.f32.vlgmr.msra.gmra.mrb[100].mxu1 %vm1425_vm4, %v7747_v26  ;;  %v7993_v9 = vmul.f32 %v7988_v7, %v20370_v37 }
 0xd1e   :  { %16397 = vmatpush3.msra.mxu1 %v20493_v1  ;;  %16398 = vmatprep.mubr.msk.f32.mxu1 %vm17622_vm13, %v17620_v62 }
 0xd1f   :  { %16401 = vmatprep.subr.mxu1 %v17620_v62 }
 0xd21   :  { %16399 = vmatmul.mubr.msk.f32.vlgmr.msra.gmra.mrb[102].mxu1 %vm1425_vm4, %v7747_v26 }
 0xd22   :  { %16402 = vmatpush3.msra.mxu1 %v20503_v29  ;;  %16403 = vmatprep.mubr.msk.f32.mxu1 %vm17622_vm13, %v17620_v62 }
 0xd23   :  { %16406 = vmatprep.subr.mxu1 %v17620_v62 }
 0xd25   :  { %16404 = vmatmul.mubr.msk.f32.vlgmr.msra.gmra.mrb[104].mxu1 %vm1425_vm4, %v7747_v26 }
 0xd26   :  { %16407 = vmatpush3.msra.mxu1 %v20481_v35  ;;  %16408 = vmatprep.mubr.msk.f32.mxu1 %vm17622_vm13, %v17620_v62 }
 0xd27   :  { %16411 = vmatprep.subr.mxu1 %v17620_v62 }
 0xdf0   :  { %v7816_v11 = vpop.f32.mrb[100].mxu1 }
 0xdf1   :  { %v7817_v57 = vadd.f32 %v20538_v40, %v7816_v11  ;;  %v16395_v0 = vpop.f32.mrb[101].mxu1 }
 0xdf3   :  { %v7961_v51 = vrot.slane %v7817_v57, 4 }
 0xdf4   :  { %v7886_v28 = vpop.f32.mrb[102].mxu1 }
 0xdf5   :  { %v7963_v16 = vadd.f32 %v7961_v51, %v20546_v21  ;;  %v7887_v14 = vadd.f32 %v20544_v63, %v7886_v28  ;;  %v16400_v55 = vpop.f32.mrb[103].mxu1 }
 0xdf7   :  { %v14770_v58 = vmul.f32 -1.442695, %v7963_v16  ;;  %v7971_v13 = vrot.slane %v7887_v14, 4 }
 0xdf8   :  { %v7956_v19 = vpop.f32.mrb[104].mxu1 }
 0xdf9   :  { %17266 = vpow2.f32 %v14770_v58  ;;  %v7973_v56 = vadd.f32 %v7971_v13, %v20552_v24  ;;  %v16405_v12 = vpop.f32.mrb[105].mxu1  ;;  %v7957_v22 = vadd.f32 %v20558_v61, %v7956_v19 }
 0xdfb   :  { %v14771_v23 = vmul.f32 -1.442695, %v7973_v56  ;;  %v7981_v18 = vrot.slane %v7957_v22, 4 }
 0xdfd   :  { %17268 = vpow2.f32 %v14771_v23 }
 0xe03   :  { %v17267_v10 = vpop.eup %17266 }
 0xe04   :  { %v7967_v36 = vadd.f32 1.0, %v17267_v10 }
 0xe06   :  { %17270 = vrcp.f32 %v7967_v36 }
 0xe07   :  { %v17269_v45 = vpop.eup %17268 }
 0xe08   :  { %v7977_v30 = vadd.f32 1.0, %v17269_v45 }
 0xe0a   :  { %17272 = vrcp.f32 %v7977_v30 }
 0xe10   :  { %v17271_v50 = vpop.eup %17270 }
 0xe11   :  { %v7983_v44 = vmul.f32 %v17271_v50, %v7981_v18 }
 0xe13   :  { %v7984_v54 = vadd.f32 %v7983_v44, %v20566_v4 }
 0xe14   :  { %v17273_v33 = vpop.eup %17272 }
 0xe15   :  { %v7990_v6 = vmul.f32 %v17273_v33, %v7988_v7  ;;  %17274 = vtanh.f32 %v7984_v54  ;;  %v7986_v42 = vsub.f32 1.0, %v17273_v33 }
 0xe1f   :  { %v17275_v5 = vpop.eup %17274 }
 0xe20   :  { %v7987_v15 = vmul.f32 %v17275_v5, %v7986_v42 }
 0xe22   :  { %v7991_v60 = vadd.f32 %v7990_v6, %v7987_v15 }
 0xe24   :  { %v20599_v20 = vmul.f32 %v7991_v60, %v20367_v38 }
 0xe26   :  { %v7994_v41 = vadd.f32 %v7993_v9, %v20599_v20 }
 0xe28   :  { %v7996_v53 = vrot.slane %v7994_v41, 4  ;;  %v8237_v10 = vrot.slane %v7994_v41, 2 }
 0xe2a   :  { %16409 = vmatmul.mubr.msk.f32.vlgmr.msra.gmra.mrb[106].mxu1 %vm1425_vm4, %v7996_v53  ;;  %v8242_v54 = vmul.f32 %v8237_v10, %v20370_v37 }
 0xe2b   :  { %16412 = vmatpush3.msra.mxu1 %v20493_v1  ;;  %16413 = vmatprep.mubr.msk.f32.mxu1 %vm17622_vm13, %v17620_v62 }
 0xe2c   :  { %16416 = vmatprep.subr.mxu1 %v17620_v62 }
 0xe2e   :  { %16414 = vmatmul.mubr.msk.f32.vlgmr.msra.gmra.mrb[108].mxu1 %vm1425_vm4, %v7996_v53 }
 0xe2f   :  { %16417 = vmatpush3.msra.mxu1 %v20503_v29  ;;  %16418 = vmatprep.mubr.msk.f32.mxu1 %vm17622_vm13, %v17620_v62 }
 0xe30   :  { %16421 = vmatprep.subr.mxu1 %v17620_v62 }
 0xe32   :  { %16419 = vmatmul.mubr.msk.f32.vlgmr.msra.gmra.mrb[110].mxu1 %vm1425_vm4, %v7996_v53 }
 0xe33   :  { %16422 = vmatpush3.msra.mxu1 %v20481_v35  ;;  %16423 = vmatprep.mubr.msk.f32.mxu1 %vm17622_vm13, %v17620_v62 }
 0xe34   :  { %16426 = vmatprep.subr.mxu1 %v17620_v62 }
 0xefd   :  { %v8065_v25 = vpop.f32.mrb[106].mxu1 }
 0xefe   :  { %v8066_v43 = vadd.f32 %v20538_v40, %v8065_v25  ;;  %v16410_v48 = vpop.f32.mrb[107].mxu1 }
 0xf00   :  { %v8210_v52 = vrot.slane %v8066_v43, 6 }
 0xf01   :  { %v8135_v47 = vpop.f32.mrb[108].mxu1 }
 0xf02   :  { %v8212_v34 = vadd.f32 %v8210_v52, %v20546_v21  ;;  %v8136_v2 = vadd.f32 %v20544_v63, %v8135_v47  ;;  %v16415_v26 = vpop.f32.mrb[109].mxu1 }
 0xf04   :  { %v14775_v11 = vmul.f32 -1.442695, %v8212_v34  ;;  %v8220_v57 = vrot.slane %v8136_v2, 6 }
 0xf05   :  { %v8205_v0 = vpop.f32.mrb[110].mxu1 }
 0xf06   :  { %17276 = vpow2.f32 %v14775_v11  ;;  %v8222_v51 = vadd.f32 %v8220_v57, %v20552_v24  ;;  %v16420_v28 = vpop.f32.mrb[111].mxu1  ;;  %v8206_v19 = vadd.f32 %v20558_v61, %v8205_v0 }
 0xf08   :  { %v14776_v16 = vmul.f32 -1.442695, %v8222_v51  ;;  %v8230_v56 = vrot.slane %v8206_v19, 6 }
 0xf0a   :  { %17278 = vpow2.f32 %v14776_v16 }
 0xf10   :  { %v17277_v14 = vpop.eup %17276 }
 0xf11   :  { %v8216_v55 = vadd.f32 1.0, %v17277_v14 }
 0xf13   :  { %17280 = vrcp.f32 %v8216_v55 }
 0xf14   :  { %v17279_v58 = vpop.eup %17278 }
 0xf15   :  { %v8226_v13 = vadd.f32 1.0, %v17279_v58 }
 0xf17   :  { %17282 = vrcp.f32 %v8226_v13 }
 0xf1d   :  { %v17281_v12 = vpop.eup %17280 }
 0xf1e   :  { %v8232_v23 = vmul.f32 %v17281_v12, %v8230_v56 }
 0xf20   :  { %v8233_v36 = vadd.f32 %v8232_v23, %v20566_v4 }
 0xf21   :  { %v17283_v45 = vpop.eup %17282 }
 0xf22   :  { %v8239_v30 = vmul.f32 %v17283_v45, %v8237_v10  ;;  %17284 = vtanh.f32 %v8233_v36  ;;  %v8235_v22 = vsub.f32 1.0, %v17283_v45 }
 0xf2c   :  { %v17285_v18 = vpop.eup %17284 }
 0xf2d   :  { %v8236_v50 = vmul.f32 %v17285_v18, %v8235_v22 }
 0xf2f   :  { %v8240_v44 = vadd.f32 %v8239_v30, %v8236_v50 }
 0xf31   :  { %v20625_v7 = vmul.f32 %v8240_v44, %v20367_v38 }
 0xf33   :  { %v8243_v33 = vadd.f32 %v8242_v54, %v20625_v7 }
 0xf35   :  { %v8245_v6 = vrot.slane %v8243_v33, 2 }
 0xf37   :  { %16424 = vmatmul.mubr.msk.f32.vlgmr.msra.gmra.mrb[112].mxu1 %vm1425_vm4, %v8245_v6  ;;  %v8481_v19 = vmul.f32 %v8245_v6, %v20370_v37 }
 0xf38   :  { %16427 = vmatpush3.msra.mxu1 %v20493_v1  ;;  %16428 = vmatprep.mubr.msk.f32.mxu1 %vm17622_vm13, %v17620_v62 }
 0xf39   :  { %16431 = vmatprep.subr.mxu1 %v17620_v62 }
 0xf3b   :  { %16429 = vmatmul.mubr.msk.f32.vlgmr.msra.gmra.mrb[114].mxu1 %vm1425_vm4, %v8245_v6 }
 0xf3c   :  { %16432 = vmatpush3.msra.mxu1 %v20503_v29  ;;  %16433 = vmatprep.mubr.msk.f32.mxu1 %vm17622_vm13, %v17620_v62 }
 0xf3d   :  { %16436 = vmatprep.subr.mxu1 %v17620_v62 }
 0xf3f   :  { %16434 = vmatmul.mubr.msk.f32.vlgmr.msra.gmra.mrb[116].mxu1 %vm1425_vm4, %v8245_v6 }
 0xf40   :  { %16437 = vmatpush3.msra.mxu1 %v20481_v35  ;;  %16438 = vmatprep.mubr.msk.f32.mxu1 %vm17622_vm13, %v17620_v62 }
 0xf41   :  { %16441 = vmatprep.subr.mxu1 %v17620_v62 }
0x100a   :  { %v8314_v42 = vpop.f32.mrb[112].mxu1 }
0x100b   :  { %v8315_v5 = vadd.f32 %v20538_v40, %v8314_v42  ;;  %v16425_v15 = vpop.f32.mrb[113].mxu1 }
0x100d   :  { %v8458_v60 = vadd.f32 %v8315_v5, %v20546_v21 }
0x100e   :  { %v8384_v9 = vpop.f32.mrb[114].mxu1 }
0x100f   :  { %v14780_v41 = vmul.f32 -1.442695, %v8458_v60  ;;  %v8385_v53 = vadd.f32 %v20544_v63, %v8384_v9  ;;  %v16430_v25 = vpop.f32.mrb[115].mxu1 }
0x1011   :  { %17286 = vpow2.f32 %v14780_v41  ;;  %v8465_v43 = vadd.f32 %v8385_v53, %v20552_v24 }
0x1012   :  { %v8454_v48 = vpop.f32.mrb[116].mxu1 }
0x1013   :  { %v16435_v52 = vpop.f32.mrb[117].mxu1  ;;  %v14781_v47 = vmul.f32 -1.442695, %v8465_v43  ;;  %v8455_v57 = vadd.f32 %v20558_v61, %v8454_v48 }
0x1015   :  { %17288 = vpow2.f32 %v14781_v47 }
0x101b   :  { %v17287_v34 = vpop.eup %17286 }
0x101c   :  { %v8462_v2 = vadd.f32 1.0, %v17287_v34 }
0x101e   :  { %17290 = vrcp.f32 %v8462_v2 }
0x101f   :  { %v17289_v26 = vpop.eup %17288 }
0x1020   :  { %v8469_v11 = vadd.f32 1.0, %v17289_v26 }
0x1022   :  { %17292 = vrcp.f32 %v8469_v11  ;;  %v20679_v11 = vld [vmem:[%s21674_s8] sm:$0xff] }
0x1028   :  { %v17291_v21 = vpop.eup %17290 }
0x1029   :  { %v8472_v0 = vmul.f32 %v17291_v21, %v8455_v57 }
0x102b   :  { %v8473_v51 = vadd.f32 %v8472_v0, %v20566_v4 }
0x102c   :  { %v17293_v28 = vpop.eup %17292 }
0x102d   :  { %17294 = vtanh.f32 %v8473_v51  ;;  %v8475_v16 = vsub.f32 1.0, %v17293_v28  ;;  %v8478_v14 = vmul.f32 %v17293_v28, %v8245_v6 }
0x1037   :  { %v17295_v24 = vpop.eup %17294 }
0x1038   :  { %v8476_v55 = vmul.f32 %v17295_v24, %v8475_v16 }
0x103a   :  { %v8479_v58 = vadd.f32 %v8478_v14, %v8476_v55 }
0x103c   :  { %v20651_v13 = vmul.f32 %v8479_v58, %v20367_v38 }
0x103e   :  { %v8482_v56 = vadd.f32 %v8481_v19, %v20651_v13 }
0x1040   :  { %16439 = vmatmul.mubr.msk.f32.vlgmr.msra.gmra.mrb[118].mxu1 %vm1425_vm4, %v8482_v56  ;;  %v8724_v43 = vrot.slane %v8482_v56, 2 }
0x1041   :  { %16442 = vmatpush3.msra.mxu1 %v20493_v1  ;;  %16443 = vmatprep.mubr.msk.f32.mxu1 %vm17622_vm13, %v17620_v62 }
0x1042   :  { %16446 = vmatprep.subr.mxu1 %v17620_v62  ;;  %v8729_v21 = vmul.f32 %v8724_v43, %v20258_v46 }
0x1044   :  { %16444 = vmatmul.mubr.msk.f32.vlgmr.msra.gmra.mrb[120].mxu1 %vm1425_vm4, %v8482_v56 }
0x1045   :  { %16447 = vmatpush3.msra.mxu1 %v20503_v29  ;;  %16448 = vmatprep.mubr.msk.f32.mxu1 %vm17622_vm13, %v17620_v62 }
0x1046   :  { %16451 = vmatprep.subr.mxu1 %v17620_v62 }
0x1048   :  { %16449 = vmatmul.mubr.msk.f32.vlgmr.msra.gmra.mrb[122].mxu1 %vm1425_vm4, %v8482_v56 }
0x1049   :  { %16452 = vmatpush3.msra.mxu1 %v20481_v35  ;;  %16453 = vmatprep.mubr.msk.f32.mxu1 %vm17622_vm13, %v17620_v62 }
0x104a   :  { %16456 = vmatprep.subr.mxu1 %v17620_v62 }
0x1113   :  { %v8552_v38 = vpop.f32.mrb[118].mxu1 }
0x1114   :  { %v8553_v4 = vadd.f32 %v20538_v40, %v8552_v38  ;;  %v16440_v12 = vpop.f32.mrb[119].mxu1 }
0x1116   :  { %v8697_v23 = vrot.slane %v8553_v4, 2 }
0x1117   :  { %v8622_v10 = vpop.f32.mrb[120].mxu1 }
0x1118   :  { %v8699_v36 = vadd.f32 %v8697_v23, %v20522_v27  ;;  %v8623_v45 = vadd.f32 %v20544_v63, %v8622_v10  ;;  %v16445_v30 = vpop.f32.mrb[121].mxu1 }
0x111a   :  { %v14785_v22 = vmul.f32 -1.442695, %v8699_v36  ;;  %v8707_v18 = vrot.slane %v8623_v45, 2 }
0x111b   :  { %v8692_v50 = vpop.f32.mrb[122].mxu1 }
0x111c   :  { %17296 = vpow2.f32 %v14785_v22  ;;  %v8709_v44 = vadd.f32 %v8707_v18, %v20527_v39  ;;  %v16450_v54 = vpop.f32.mrb[123].mxu1  ;;  %v8693_v60 = vadd.f32 %v20558_v61, %v8692_v50 }
0x111e   :  { %v14786_v33 = vmul.f32 -1.442695, %v8709_v44  ;;  %v8717_v9 = vrot.slane %v8693_v60, 2 }
0x1120   :  { %17298 = vpow2.f32 %v14786_v33 }
0x1126   :  { %v17297_v6 = vpop.eup %17296 }
0x1127   :  { %v8703_v42 = vadd.f32 1.0, %v17297_v6 }
0x1129   :  { %17300 = vrcp.f32 %v8703_v42 }
0x112a   :  { %v17299_v5 = vpop.eup %17298 }
0x112b   :  { %v8713_v15 = vadd.f32 1.0, %v17299_v5 }
0x112d   :  { %17302 = vrcp.f32 %v8713_v15 }
0x1133   :  { %v17301_v41 = vpop.eup %17300 }
0x1134   :  { %v8719_v53 = vmul.f32 %v17301_v41, %v8717_v9 }
0x1136   :  { %v8720_v25 = vadd.f32 %v8719_v53, %v20533_v3 }
0x1137   :  { %v17303_v48 = vpop.eup %17302 }
0x1138   :  { %17304 = vtanh.f32 %v8720_v25  ;;  %v8726_v52 = vmul.f32 %v17303_v48, %v8724_v43  ;;  %v8722_v47 = vsub.f32 1.0, %v17303_v48 }
0x1142   :  { %v17305_v34 = vpop.eup %17304 }
0x1143   :  { %v8723_v2 = vmul.f32 %v17305_v34, %v8722_v47 }
0x1145   :  { %v8727_v26 = vadd.f32 %v8726_v52, %v8723_v2 }
0x1147   :  { %v20682_v57 = vmul.f32 %v20679_v11, %v8727_v26 }
0x1149   :  { %v8730_v0 = vadd.f32 %v8729_v21, %v20682_v57 }
0x114b   :  { %v8732_v51 = vrot.slane %v8730_v0, 6  ;;  %v8973_v6 = vrot.slane %v8730_v0, 2 }
0x114d   :  { %16454 = vmatmul.mubr.msk.f32.vlgmr.msra.gmra.mrb[124].mxu1 %vm1425_vm4, %v8732_v51  ;;  %v8978_v43 = vmul.f32 %v8973_v6, %v20258_v46 }
0x114e   :  { %16457 = vmatpush3.msra.mxu1 %v20493_v1  ;;  %16458 = vmatprep.mubr.msk.f32.mxu1 %vm17622_vm13, %v17620_v62 }
0x114f   :  { %16461 = vmatprep.subr.mxu1 %v17620_v62 }
0x1151   :  { %16459 = vmatmul.mubr.msk.f32.vlgmr.msra.gmra.mrb[126].mxu1 %vm1425_vm4, %v8732_v51 }
0x1152   :  { %16462 = vmatpush3.msra.mxu1 %v20503_v29  ;;  %16463 = vmatprep.mubr.msk.f32.mxu1 %vm17622_vm13, %v17620_v62 }
0x1153   :  { %16466 = vmatprep.subr.mxu1 %v17620_v62 }
0x1155   :  { %16464 = vmatmul.mubr.msk.f32.vlgmr.msra.gmra.mrb[128].mxu1 %vm1425_vm4, %v8732_v51 }
0x1156   :  { %16467 = vmatpush3.msra.mxu1 %v20481_v35  ;;  %16468 = vmatprep.mubr.msk.f32.mxu1 %vm17622_vm13, %v17620_v62 }
0x1157   :  { %16471 = vmatprep.subr.mxu1 %v17620_v62 }
0x1220   :  { %v8801_v28 = vpop.f32.mrb[124].mxu1 }
0x1221   :  { %v8802_v16 = vadd.f32 %v20538_v40, %v8801_v28  ;;  %v16455_v24 = vpop.f32.mrb[125].mxu1 }
0x1223   :  { %v8946_v14 = vrot.slane %v8802_v16, 4 }
0x1224   :  { %v8871_v55 = vpop.f32.mrb[126].mxu1 }
0x1225   :  { %v8948_v58 = vadd.f32 %v8946_v14, %v20522_v27  ;;  %v8872_v19 = vadd.f32 %v20544_v63, %v8871_v55  ;;  %v16460_v56 = vpop.f32.mrb[127].mxu1 }
0x1227   :  { %v14790_v38 = vmul.f32 -1.442695, %v8948_v58  ;;  %v8956_v4 = vrot.slane %v8872_v19, 4 }
0x1228   :  { %v8941_v12 = vpop.f32.mrb[128].mxu1 }
0x1229   :  { %17306 = vpow2.f32 %v14790_v38  ;;  %v8958_v23 = vadd.f32 %v8956_v4, %v20527_v39  ;;  %v16465_v10 = vpop.f32.mrb[129].mxu1  ;;  %v8942_v50 = vadd.f32 %v20558_v61, %v8941_v12 }
0x122b   :  { %v14791_v36 = vmul.f32 -1.442695, %v8958_v23  ;;  %v8966_v44 = vrot.slane %v8942_v50, 4 }
0x122d   :  { %17308 = vpow2.f32 %v14791_v36 }
0x1233   :  { %v17307_v45 = vpop.eup %17306 }
0x1234   :  { %v8952_v30 = vadd.f32 1.0, %v17307_v45 }
0x1236   :  { %17310 = vrcp.f32 %v8952_v30 }
0x1237   :  { %v17309_v22 = vpop.eup %17308 }
0x1238   :  { %v8962_v18 = vadd.f32 1.0, %v17309_v22 }
0x123a   :  { %17312 = vrcp.f32 %v8962_v18 }
0x1240   :  { %v17311_v54 = vpop.eup %17310 }
0x1241   :  { %v8968_v33 = vmul.f32 %v17311_v54, %v8966_v44 }
0x1243   :  { %v8969_v42 = vadd.f32 %v8968_v33, %v20533_v3 }
0x1244   :  { %v17313_v5 = vpop.eup %17312 }
0x1245   :  { %v8975_v15 = vmul.f32 %v17313_v5, %v8973_v6  ;;  %17314 = vtanh.f32 %v8969_v42  ;;  %v8971_v60 = vsub.f32 1.0, %v17313_v5 }
0x124f   :  { %v17315_v9 = vpop.eup %17314 }
0x1250   :  { %v8972_v41 = vmul.f32 %v17315_v9, %v8971_v60  ;;  %v20748_v60 = vld [vmem:[%s21471_s20 + $0x10] sm:$0xff] }
0x1251   :  { %16528 = vmatpush3.msra.mxu0 %v20748_v60 }
0x1252   :  { %v8976_v53 = vadd.f32 %v8975_v15, %v8972_v41  ;;  %16530 = vmatmul.mubr.f32.vlgmr.msra.gmra.mrb[64].mxu0 %v17620_v62  ;;  %16537 = vmatprep.subr.mxu0 %v17620_v62 }
0x1253   :  { %16539 = vmatprep.mubr.msk.f32.mxu0 %vm17622_vm13, %v17620_v62 }
0x1254   :  { %v20708_v25 = vmul.f32 %v20679_v11, %v8976_v53 }
0x1256   :  { %v8979_v48 = vadd.f32 %v8978_v43, %v20708_v25 }
0x1258   :  { %v8981_v52 = vrot.slane %v8979_v48, 4  ;;  %v9222_v45 = vrot.slane %v8979_v48, 2 }
0x125a   :  { %16469 = vmatmul.mubr.msk.f32.vlgmr.msra.gmra.mrb[130].mxu1 %vm1425_vm4, %v8981_v52  ;;  %v9227_v42 = vmul.f32 %v9222_v45, %v20258_v46 }
0x125b   :  { %16472 = vmatpush3.msra.mxu1 %v20493_v1  ;;  %16473 = vmatprep.mubr.msk.f32.mxu1 %vm17622_vm13, %v17620_v62 }
0x125c   :  { %16476 = vmatprep.subr.mxu1 %v17620_v62 }
0x125e   :  { %16474 = vmatmul.mubr.msk.f32.vlgmr.msra.gmra.mrb[132].mxu1 %vm1425_vm4, %v8981_v52 }
0x125f   :  { %16477 = vmatpush3.msra.mxu1 %v20503_v29  ;;  %16478 = vmatprep.mubr.msk.f32.mxu1 %vm17622_vm13, %v17620_v62 }
0x1260   :  { %16481 = vmatprep.subr.mxu1 %v17620_v62 }
0x1262   :  { %16479 = vmatmul.mubr.msk.f32.vlgmr.msra.gmra.mrb[134].mxu1 %vm1425_vm4, %v8981_v52 }
0x1263   :  { %16482 = vmatpush3.msra.mxu1 %v20481_v35  ;;  %16483 = vmatprep.mubr.msk.f32.mxu1 %vm17622_vm13, %v17620_v62 }
0x1264   :  { %16486 = vmatprep.subr.mxu1 %v17620_v62 }
0x132d   :  { %v9050_v47 = vpop.f32.mrb[130].mxu1 }
0x132e   :  { %v9051_v34 = vadd.f32 %v20538_v40, %v9050_v47  ;;  %v16470_v2 = vpop.f32.mrb[131].mxu1 }
0x1330   :  { %v9195_v26 = vrot.slane %v9051_v34, 6 }
0x1331   :  { %v9120_v21 = vpop.f32.mrb[132].mxu1 }
0x1332   :  { %v9197_v0 = vadd.f32 %v9195_v26, %v20522_v27  ;;  %v9121_v51 = vadd.f32 %v20544_v63, %v9120_v21  ;;  %v16475_v28 = vpop.f32.mrb[133].mxu1 }
0x1334   :  { %v14795_v16 = vmul.f32 -1.442695, %v9197_v0  ;;  %v9205_v24 = vrot.slane %v9121_v51, 6 }
0x1335   :  { %v9190_v14 = vpop.f32.mrb[134].mxu1 }
0x1336   :  { %17316 = vpow2.f32 %v14795_v16  ;;  %v9207_v35 = vadd.f32 %v9205_v24, %v20527_v39  ;;  %v16480_v55 = vpop.f32.mrb[135].mxu1  ;;  %v9191_v12 = vadd.f32 %v20558_v61, %v9190_v14  ;;  %v9489_v14 = vld [vmem:[%s21470_s19 + $0x8] sm:$0xff] }
0x1338   :  { %v14796_v58 = vmul.f32 -1.442695, %v9207_v35  ;;  %v9215_v23 = vrot.slane %v9191_v12, 6 }
0x133a   :  { %17318 = vpow2.f32 %v14796_v58 }
0x1340   :  { %v17317_v19 = vpop.eup %17316 }
0x1341   :  { %v9201_v56 = vadd.f32 1.0, %v17317_v19 }
0x1343   :  { %17320 = vrcp.f32 %v9201_v56  ;;  %v9491_v56 = vld [vmem:[%s21470_s19 + $0x18] sm:$0xff] }
0x1344   :  { %v17319_v38 = vpop.eup %17318 }
0x1345   :  { %v9211_v4 = vadd.f32 1.0, %v17319_v38 }
0x1347   :  { %17322 = vrcp.f32 %v9211_v4 }
0x134d   :  { %v17321_v10 = vpop.eup %17320 }
0x134e   :  { %v9217_v36 = vmul.f32 %v17321_v10, %v9215_v23  ;;  %v9475_v10 = vsel %vm1572_vm1, %v20651_v13, %v20625_v7  ;;  %v20791_v7 = vld [vmem:[%s21471_s20 + $0x8] sm:$0xff] }
0x134f   :  { %16538 = vmatpush3.msra.mxu0 %v20791_v7 }
0x1350   :  { %v9218_v30 = vadd.f32 %v9217_v36, %v20533_v3  ;;  %16547 = vmatprep.subr.mxu0 %v17620_v62 }
0x1351   :  { %v17323_v22 = vpop.eup %17322 }
0x1352   :  { %v9224_v18 = vmul.f32 %v17323_v22, %v9222_v45  ;;  %17324 = vtanh.f32 %v9218_v30  ;;  %v9220_v50 = vsub.f32 1.0, %v17323_v22  ;;  %v9476_v30 = vsel %vm1576_vm3, %v9475_v10, %v20599_v20  ;;  %v9493_v20 = vld [vmem:[%s21470_s19 + $0x28] sm:$0xff] }
0x1353   :  { %v9477_v22 = vsel %vm1580_vm7, %v9476_v30, %v20573_v17  ;;  %v9492_v17 = vld [vmem:[%s21470_s19 + $0x20] sm:$0xff] }
0x135c   :  { %v17325_v44 = vpop.eup %17324 }
0x135d   :  { %v9221_v54 = vmul.f32 %v17325_v44, %v9220_v50 }
0x135f   :  { %v9225_v33 = vadd.f32 %v9224_v18, %v9221_v54  ;;  %v16858_v18 = vpack.c.bf16 %v9493_v20, %v9492_v17  ;;  %v14802_v54 = vld [vmem:[%s21472_s21] ss:$0 sm:$0xff] }
0x1361   :  { %v9226_v6 = vmul.f32 %v20679_v11, %v9225_v33 }
0x1363   :  { %v9228_v5 = vadd.f32 %v9227_v42, %v9226_v6 }
0x1365   :  { %v9230_v15 = vrot.slane %v9228_v5, 2  ;;  %v14805_v5 = vld [vmem:[%s21472_s21 + $0x1] ss:$0 sm:$0xff] }
0x1367   :  { %16484 = vmatmul.mubr.msk.f32.vlgmr.msra.gmra.mrb[136].mxu1 %vm1425_vm4, %v9230_v15 }
0x1368   :  { %16487 = vmatpush3.msra.mxu1 %v20493_v1  ;;  %16488 = vmatprep.mubr.msk.f32.mxu1 %vm17622_vm13, %v17620_v62 }
0x1369   :  { %16491 = vmatprep.subr.mxu1 %v17620_v62 }
0x136b   :  { %16489 = vmatmul.mubr.msk.f32.vlgmr.msra.gmra.mrb[138].mxu1 %vm1425_vm4, %v9230_v15 }
0x136c   :  { %16492 = vmatpush3.msra.mxu1 %v20503_v29  ;;  %16493 = vmatprep.mubr.msk.f32.mxu1 %vm17622_vm13, %v17620_v62 }
0x136f   :  { %16494 = vmatmul.mubr.msk.f32.vlgmr.msra.gmra.mrb[140].mxu1 %vm1425_vm4, %v9230_v15 }
0x143a   :  { %v9299_v1 = vpop.f32.mrb[136].mxu1 }
0x143b   :  { %v9300_v29 = vadd.f32 %v20538_v40, %v9299_v1  ;;  %v16485_v9 = vpop.f32.mrb[137].mxu1 }
0x143c   :  { %v14808_v9 = vld [vmem:[%s21472_s21 + $0x2] ss:$0 sm:$0xff] }
0x143d   :  { %v9443_v41 = vadd.f32 %v9300_v29, %v20522_v27 }
0x143e   :  { %v9369_v53 = vpop.f32.mrb[138].mxu1 }
0x143f   :  { %v14800_v43 = vmul.f32 -1.442695, %v9443_v41  ;;  %v9370_v48 = vadd.f32 %v20544_v63, %v9369_v53  ;;  %v16490_v52 = vpop.f32.mrb[139].mxu1 }
0x1441   :  { %17326 = vpow2.f32 %v14800_v43  ;;  %v9450_v47 = vadd.f32 %v9370_v48, %v20527_v39  ;;  %v9488_v39 = vld [vmem:[%s21470_s19] sm:$0xff] }
0x1442   :  { %v9439_v34 = vpop.f32.mrb[140].mxu1  ;;  %v16850_v35 = vpack.c.bf16 %v9489_v14, %v9488_v39  ;;  %v20859_v48 = vld [vmem:[%s21473_s22] ss:$0 sm:$0xff] }
0x1443   :  { %v16495_v2 = vpop.f32.mrb[141].mxu1  ;;  %v14801_v26 = vmul.f32 -1.442695, %v9450_v47  ;;  %v9440_v28 = vadd.f32 %v20558_v61, %v9439_v34 }
0x1444   :  { %16851 = vmatprep.subr.bf16.mxu1 %v16850_v35 }
0x1445   :  { %17328 = vpow2.f32 %v14801_v26  ;;  %16853 = vmatpush3.bf16.msra.mxu1 %v16850_v35  ;;  %v20867_v26 = vld [vmem:[%s21473_s22 + $0x1] ss:$0 sm:$0xff]  ;;  %v20877_v35 = vld [vmem:[%s21473_s22 + $0x2] ss:$0 sm:$0xff] }
0x144b   :  { %v17327_v21 = vpop.eup %17326 }
0x144c   :  { %v9447_v0 = vadd.f32 1.0, %v17327_v21 }
0x144e   :  { %17330 = vrcp.f32 %v9447_v0 }
0x144f   :  { %v17329_v51 = vpop.eup %17328 }
0x1450   :  { %v9454_v40 = vadd.f32 1.0, %v17329_v51 }
0x1452   :  { %17332 = vrcp.f32 %v9454_v40 }
0x1458   :  { %v17331_v27 = vpop.eup %17330 }
0x1459   :  { %v9457_v16 = vmul.f32 %v17331_v27, %v9440_v28 }
0x145b   :  { %v9458_v63 = vadd.f32 %v9457_v16, %v20533_v3  ;;  %v9490_v3 = vld [vmem:[%s21470_s19 + $0x10] sm:$0xff] }
0x145c   :  { %v17333_v24 = vpop.eup %17332  ;;  %v16854_v4 = vpack.c.bf16 %v9491_v56, %v9490_v3 }
0x145d   :  { %17334 = vtanh.f32 %v9458_v63  ;;  %v9460_v55 = vsub.f32 1.0, %v17333_v24  ;;  %v9463_v19 = vmul.f32 %v17333_v24, %v9230_v15 }
0x145e   :  { %16855 = vmatprep.subr.bf16.mxu1 %v16854_v4 }
0x1467   :  { %v17335_v58 = vpop.eup %17334 }
0x1468   :  { %v9461_v61 = vmul.f32 %v17335_v58, %v9460_v55 }
0x146a   :  { %v9464_v38 = vadd.f32 %v9463_v19, %v9461_v61 }
0x146c   :  { %v9465_v12 = vmul.f32 %v20679_v11, %v9464_v38 }
0x146e   :  { %v9472_v23 = vsel %vm1572_vm1, %v9465_v12, %v9226_v6 }
0x146f   :  { %v9473_v36 = vsel %vm1576_vm3, %v9472_v23, %v20708_v25 }
0x1470   :  { %v9474_v45 = vsel %vm1580_vm7, %v9473_v36, %v20682_v57 }
0x1471   :  { %9480 = vrot.lane.b32.xlu1 %v9474_v45, %s17623_s6 }
0x1475   :  { %9482 = vrot.lane.b32.xlu1 %v9477_v22, %s17623_s6 }
0x14e3   :  { %v9481_v13 = vpop.permute.xlu1 %9480 }
0x14e4   :  { %v20797_v57 = vsel %vm1425_vm4, %v20341_v59, %v9481_v13  ;;  %v20823_v59 = vld [vmem:[%s21471_s20] sm:$0xff] }
0x14e5   :  { %16500 = vmatprep.mubr.msk.f32.mxu1 %vm231_vm0, %v20797_v57 }
0x14e7   :  { %v9483_v25 = vpop.permute.xlu1 %9482 }
0x14e8   :  { %v20809_v50 = vsel %vm1425_vm4, %v20563_v32, %v9483_v25  ;;  %v9976_v32 = vpop.f32.mrb[64].mxu0 }
0x14e9   :  { %16501 = vmatmul.mubr.msk.f32.vlgmr.msra.gmra.mrb[142].mxu1 %vm231_vm0, %v20809_v50  ;;  %v16531_v44 = vpop.f32.mrb[65].mxu0  ;;  %v9977_v58 = vadd.f32 %v20877_v35, %v9976_v32 }
0x14ea   :  { %16857 = vmatpush3.bf16.msra.mxu1 %v16854_v4  ;;  %16507 = vmatprep.mubr.msk.f32.mxu1 %vm231_vm0, %v20797_v57 }
0x14eb   :  { %16859 = vmatprep.subr.bf16.mxu1 %v16858_v18 }
0x14ed   :  { %16508 = vmatmul.mubr.msk.f32.vlgmr.msra.gmra.mrb[144].mxu1 %vm231_vm0, %v20809_v50 }
0x14ee   :  { %16861 = vmatpush3.bf16.msra.mxu1 %v16858_v18  ;;  %16514 = vmatprep.mubr.msk.f32.mxu1 %vm231_vm0, %v20797_v57 }
0x14ef   :  { %16517 = vmatprep.subr.mxu1 %v17620_v62 }
0x14f1   :  { %16515 = vmatmul.mubr.msk.f32.vlgmr.msra.gmra.mrb[146].mxu1 %vm231_vm0, %v20809_v50 }
0x14f2   :  { %16518 = vmatpush3.msra.mxu1 %v20823_v59  ;;  %16519 = vmatprep.mubr.msk.f32.mxu1 %vm17622_vm13, %v17620_v62 }
0x14f3   :  { %16522 = vmatprep.subr.mxu1 %v17620_v62 }
0x14f5   :  { %16520 = vmatmul.mubr.f32.vlgmr.msra.gmra.mrb[148].mxu1 %v17620_v62 }
0x14f6   :  { %16523 = vmatpush3.msra.mxu1 %v20791_v7  ;;  %16524 = vmatprep.mubr.msk.f32.mxu1 %vm17622_vm13, %v17620_v62 }
0x14f7   :  { %16532 = vmatprep.subr.mxu1 %v17620_v62 }
0x14f9   :  { %16525 = vmatmul.mubr.f32.vlgmr.msra.gmra.mrb[150].mxu1 %v17620_v62 }
0x14fa   :  { %16533 = vmatpush3.msra.mxu1 %v20823_v59  ;;  %16534 = vmatprep.mubr.msk.f32.mxu1 %vm17622_vm13, %v17620_v62 }
0x14fb   :  { %16542 = vmatprep.subr.mxu1 %v17620_v62 }
0x15bc   :  { %v16502_v33 = vpop.f32.mrb[142].mxu1 }
0x15bd   :  { %v20844_v6 = vadd.f32 %v16502_v33, %v14802_v54  ;;  %v9581_v42 = vpop.f32.mrb[143].mxu1 }
0x15be   :  { %v20861_v47 = vadd.f32 %v14802_v54, %v9581_v42 }
0x15c0   :  { %v16509_v15 = vpop.f32.mrb[144].mxu1 }
0x15c1   :  { %v20849_v1 = vadd.f32 %v16509_v15, %v14805_v5  ;;  %v9662_v29 = vpop.f32.mrb[145].mxu1 }
0x15c2   :  { %v20870_v51 = vadd.f32 %v14805_v5, %v9662_v29 }
0x15c4   :  { %v16516_v41 = vpop.f32.mrb[146].mxu1 }
0x15c5   :  { %v20854_v53 = vadd.f32 %v16516_v41, %v14808_v9  ;;  %v9743_v43 = vpop.f32.mrb[147].mxu1 }
0x15c6   :  { %v20880_v19 = vadd.f32 %v14808_v9, %v9743_v43 }
0x15c8   :  { %v9824_v52 = vpop.f32.mrb[148].mxu1 }
0x15c9   :  { %v9825_v34 = vadd.f32 %v20859_v48, %v9824_v52  ;;  %v16521_v2 = vpop.f32.mrb[149].mxu1 }
0x15cb   :  { %v9980_v21 = vadd.f32 %v9825_v34, %v20861_v47 }
0x15cc   :  { %v9900_v0 = vpop.f32.mrb[150].mxu1 }
0x15cd   :  { %v14814_v40 = vmul.f32 -1.442695, %v9980_v21  ;;  %v9901_v28 = vadd.f32 %v20867_v26, %v9900_v0  ;;  %v16526_v27 = vpop.f32.mrb[151].mxu1 }
0x15cf   :  { %17336 = vpow2.f32 %v14814_v40  ;;  %v9987_v16 = vadd.f32 %v9901_v28, %v20870_v51 }
0x15d1   :  { %v14815_v63 = vmul.f32 -1.442695, %v9987_v16 }
0x15d3   :  { %17338 = vpow2.f32 %v14815_v63 }
0x15d9   :  { %v17337_v24 = vpop.eup %17336 }
0x15da   :  { %v9984_v39 = vadd.f32 1.0, %v17337_v24 }
0x15dc   :  { %17340 = vrcp.f32 %v9984_v39 }
0x15dd   :  { %v17339_v14 = vpop.eup %17338 }
0x15de   :  { %v9991_v55 = vadd.f32 1.0, %v17339_v14 }
0x15e0   :  { %17342 = vrcp.f32 %v9991_v55 }
0x15e6   :  { %v17341_v61 = vpop.eup %17340 }
0x15e7   :  { %v9994_v3 = vmul.f32 %v17341_v61, %v9977_v58 }
0x15e9   :  { %v9995_v56 = vadd.f32 %v9994_v3, %v20880_v19 }
0x15ea   :  { %v17343_v38 = vpop.eup %17342 }
0x15eb   :  { %17344 = vtanh.f32 %v9995_v56  ;;  %v9997_v4 = vsub.f32 1.0, %v17343_v38  ;;  %v9999_v23 = vmul.f32 0.0, %v17343_v38 }
0x15f5   :  { %v17345_v12 = vpop.eup %17344 }
0x15f6   :  { %v9998_v10 = vmul.f32 %v17345_v12, %v9997_v4 }
0x15f8   :  { %v10000_v36 = vadd.f32 %v9999_v23, %v9998_v10 }
0x15fa   :  { %v20884_v45 = vmul.f32 %v20679_v11, %v10000_v36 }
0x15fc   :  { %v10002_v30 = vadd.f32 %v20884_v45, %v20261_v49 }
0x15fe   :  { %16535 = vmatmul.mubr.msk.f32.vlgmr.msra.gmra.mrb[152].mxu1 %vm1425_vm4, %v10002_v30  ;;  %16540 = vmatmul.mubr.msk.f32.vlgmr.msra.gmra.mrb[66].mxu0 %vm1425_vm4, %v10002_v30  ;;  %v10244_v21 = vrot.slane %v10002_v30, 6 }
0x15ff   :  { %16543 = vmatpush3.msra.mxu1 %v20748_v60  ;;  %16544 = vmatprep.mubr.msk.f32.mxu1 %vm17622_vm13, %v17620_v62 }
0x1600   :  { %16548 = vmatpush3.msra.mxu0 %v20823_v59  ;;  %16552 = vmatprep.subr.mxu1 %v17620_v62  ;;  %v10249_v55 = vmul.f32 %v10244_v21, %v20258_v46 }
0x1601   :  { %16549 = vmatprep.mubr.msk.f32.mxu0 %vm17622_vm13, %v17620_v62  ;;  %16557 = vmatprep.subr.mxu0 %v17620_v62 }
0x1602   :  { %16545 = vmatmul.mubr.msk.f32.vlgmr.msra.gmra.mrb[154].mxu1 %vm1425_vm4, %v10002_v30 }
0x1603   :  { %16553 = vmatpush3.msra.mxu1 %v20791_v7  ;;  %16554 = vmatprep.mubr.msk.f32.mxu1 %vm17622_vm13, %v17620_v62 }
0x1604   :  { %16562 = vmatprep.subr.mxu1 %v17620_v62 }
0x16d1   :  { %v10072_v49 = vpop.f32.mrb[152].mxu1  ;;  %v10142_v22 = vpop.f32.mrb[66].mxu0 }
0x16d2   :  { %v10073_v13 = vadd.f32 %v20859_v48, %v10072_v49  ;;  %v10143_v17 = vadd.f32 %v20867_v26, %v10142_v22  ;;  %v16536_v20 = vpop.f32.mrb[153].mxu1  ;;  %v16541_v25 = vpop.f32.mrb[67].mxu0 }
0x16d4   :  { %v10217_v18 = vrot.slane %v10073_v13, 6  ;;  %v10227_v32 = vrot.slane %v10143_v17, 6 }
0x16d5   :  { %v10212_v44 = vpop.f32.mrb[154].mxu1 }
0x16d6   :  { %v10219_v54 = vadd.f32 %v10217_v18, %v20861_v47  ;;  %v10229_v33 = vadd.f32 %v10227_v32, %v20870_v51  ;;  %v16546_v42 = vpop.f32.mrb[155].mxu1  ;;  %v10213_v52 = vadd.f32 %v20877_v35, %v10212_v44 }
0x16d8   :  { %v14819_v5 = vmul.f32 -1.442695, %v10219_v54  ;;  %v14820_v15 = vmul.f32 -1.442695, %v10229_v33  ;;  %v10237_v34 = vrot.slane %v10213_v52, 6 }
0x16da   :  { %17346 = vpow2.f32 %v14819_v5 }
0x16db   :  { %17348 = vpow2.f32 %v14820_v15 }
0x16e4   :  { %v17347_v29 = vpop.eup %17346 }
0x16e5   :  { %v17349_v9 = vpop.eup %17348  ;;  %v10223_v41 = vadd.f32 1.0, %v17347_v29 }
0x16e6   :  { %v10233_v43 = vadd.f32 1.0, %v17349_v9 }
0x16e7   :  { %17350 = vrcp.f32 %v10223_v41 }
0x16e8   :  { %17352 = vrcp.f32 %v10233_v43 }
0x16f1   :  { %v17351_v2 = vpop.eup %17350 }
0x16f2   :  { %v17353_v0 = vpop.eup %17352  ;;  %v10239_v40 = vmul.f32 %v17351_v2, %v10237_v34 }
0x16f3   :  { %v10246_v28 = vmul.f32 %v17353_v0, %v10244_v21  ;;  %v10242_v16 = vsub.f32 1.0, %v17353_v0 }
0x16f4   :  { %v10240_v27 = vadd.f32 %v10239_v40, %v20880_v19 }
0x16f6   :  { %17354 = vtanh.f32 %v10240_v27 }
0x1700   :  { %v17355_v63 = vpop.eup %17354 }
0x1701   :  { %v10243_v24 = vmul.f32 %v17355_v63, %v10242_v16 }
0x1703   :  { %v10247_v39 = vadd.f32 %v10246_v28, %v10243_v24 }
0x1705   :  { %v20910_v14 = vmul.f32 %v20679_v11, %v10247_v39 }
0x1707   :  { %v10250_v58 = vadd.f32 %v10249_v55, %v20910_v14 }
0x1709   :  { %v10252_v61 = vrot.slane %v10250_v58, 2  ;;  %v10493_v5 = vrot.slane %v10250_v58, 6 }
0x170b   :  { %16550 = vmatmul.mubr.msk.f32.vlgmr.msra.gmra.mrb[68].mxu0 %vm1425_vm4, %v10252_v61  ;;  %16555 = vmatmul.mubr.msk.f32.vlgmr.msra.gmra.mrb[156].mxu1 %vm1425_vm4, %v10252_v61  ;;  %v10498_v0 = vmul.f32 %v10493_v5, %v20258_v46 }
0x170c   :  { %16558 = vmatpush3.msra.mxu0 %v20748_v60  ;;  %16559 = vmatprep.mubr.msk.f32.mxu0 %vm17622_vm13, %v17620_v62 }
0x170d   :  { %16563 = vmatpush3.msra.mxu1 %v20823_v59  ;;  %16567 = vmatprep.subr.mxu0 %v17620_v62 }
0x170e   :  { %16564 = vmatprep.mubr.msk.f32.mxu1 %vm17622_vm13, %v17620_v62  ;;  %16572 = vmatprep.subr.mxu1 %v17620_v62 }
0x170f   :  { %16560 = vmatmul.mubr.msk.f32.vlgmr.msra.gmra.mrb[70].mxu0 %vm1425_vm4, %v10252_v61 }
0x1710   :  { %16568 = vmatpush3.msra.mxu0 %v20791_v7  ;;  %16569 = vmatprep.mubr.msk.f32.mxu0 %vm17622_vm13, %v17620_v62 }
0x1711   :  { %16577 = vmatprep.subr.mxu0 %v17620_v62 }
0x17de   :  { %v10321_v3 = vpop.f32.mrb[68].mxu0  ;;  %v10391_v56 = vpop.f32.mrb[156].mxu1 }
0x17df   :  { %v10322_v38 = vadd.f32 %v20859_v48, %v10321_v3  ;;  %v10392_v4 = vadd.f32 %v20867_v26, %v10391_v56  ;;  %v16551_v12 = vpop.f32.mrb[69].mxu0  ;;  %v16556_v23 = vpop.f32.mrb[157].mxu1 }
0x17e1   :  { %v10466_v10 = vrot.slane %v10322_v38, 4  ;;  %v10476_v36 = vrot.slane %v10392_v4, 4 }
0x17e2   :  { %v10461_v30 = vpop.f32.mrb[70].mxu0 }
0x17e3   :  { %v10468_v49 = vadd.f32 %v10466_v10, %v20861_v47  ;;  %v10478_v22 = vadd.f32 %v10476_v36, %v20870_v51  ;;  %v16561_v13 = vpop.f32.mrb[71].mxu0  ;;  %v10462_v54 = vadd.f32 %v20877_v35, %v10461_v30 }
0x17e5   :  { %v14824_v17 = vmul.f32 -1.442695, %v10468_v49  ;;  %v14825_v20 = vmul.f32 -1.442695, %v10478_v22  ;;  %v10486_v33 = vrot.slane %v10462_v54, 4 }
0x17e7   :  { %17356 = vpow2.f32 %v14824_v17 }
0x17e8   :  { %17358 = vpow2.f32 %v14825_v20 }
0x17f1   :  { %v17357_v25 = vpop.eup %17356 }
0x17f2   :  { %v17359_v18 = vpop.eup %17358  ;;  %v10472_v32 = vadd.f32 1.0, %v17357_v25 }
0x17f3   :  { %v10482_v44 = vadd.f32 1.0, %v17359_v18 }
0x17f4   :  { %17360 = vrcp.f32 %v10472_v32 }
0x17f5   :  { %17362 = vrcp.f32 %v10482_v44 }
0x17fe   :  { %v17361_v42 = vpop.eup %17360 }
0x17ff   :  { %v17363_v15 = vpop.eup %17362  ;;  %v10488_v29 = vmul.f32 %v17361_v42, %v10486_v33 }
0x1800   :  { %v10495_v9 = vmul.f32 %v17363_v15, %v10493_v5  ;;  %v10491_v43 = vsub.f32 1.0, %v17363_v15 }
0x1801   :  { %v10489_v41 = vadd.f32 %v10488_v29, %v20880_v19 }
0x1803   :  { %17364 = vtanh.f32 %v10489_v41 }
0x180d   :  { %v17365_v52 = vpop.eup %17364 }
0x180e   :  { %v10492_v34 = vmul.f32 %v17365_v52, %v10491_v43 }
0x1810   :  { %v10496_v2 = vadd.f32 %v10495_v9, %v10492_v34 }
0x1812   :  { %v20936_v21 = vmul.f32 %v20679_v11, %v10496_v2 }
0x1814   :  { %v10499_v40 = vadd.f32 %v10498_v0, %v20936_v21 }
0x1816   :  { %v10501_v28 = vrot.slane %v10499_v40, 4  ;;  %v10742_v20 = vrot.slane %v10499_v40, 6 }
0x1818   :  { %16565 = vmatmul.mubr.msk.f32.vlgmr.msra.gmra.mrb[158].mxu1 %vm1425_vm4, %v10501_v28  ;;  %16570 = vmatmul.mubr.msk.f32.vlgmr.msra.gmra.mrb[72].mxu0 %vm1425_vm4, %v10501_v28  ;;  %v10747_v5 = vmul.f32 %v10742_v20, %v20258_v46 }
0x1819   :  { %16573 = vmatpush3.msra.mxu1 %v20748_v60  ;;  %16574 = vmatprep.mubr.msk.f32.mxu1 %vm17622_vm13, %v17620_v62 }
0x181a   :  { %16578 = vmatpush3.msra.mxu0 %v20823_v59  ;;  %16582 = vmatprep.subr.mxu1 %v17620_v62 }
0x181b   :  { %16579 = vmatprep.mubr.msk.f32.mxu0 %vm17622_vm13, %v17620_v62  ;;  %16587 = vmatprep.subr.mxu0 %v17620_v62 }
0x181c   :  { %16575 = vmatmul.mubr.msk.f32.vlgmr.msra.gmra.mrb[160].mxu1 %vm1425_vm4, %v10501_v28 }
0x181d   :  { %16583 = vmatpush3.msra.mxu1 %v20791_v7  ;;  %16584 = vmatprep.mubr.msk.f32.mxu1 %vm17622_vm13, %v17620_v62 }
0x181e   :  { %16592 = vmatprep.subr.mxu1 %v17620_v62 }
0x18eb   :  { %v10570_v27 = vpop.f32.mrb[158].mxu1  ;;  %v10640_v16 = vpop.f32.mrb[72].mxu0 }
0x18ec   :  { %v10571_v63 = vadd.f32 %v20859_v48, %v10570_v27  ;;  %v10641_v24 = vadd.f32 %v20867_v26, %v10640_v16  ;;  %v16566_v39 = vpop.f32.mrb[159].mxu1  ;;  %v16571_v55 = vpop.f32.mrb[73].mxu0 }
0x18ee   :  { %v10715_v58 = vrot.slane %v10571_v63, 2  ;;  %v10725_v61 = vrot.slane %v10641_v24, 2 }
0x18ef   :  { %v10710_v3 = vpop.f32.mrb[160].mxu1 }
0x18f0   :  { %v10717_v56 = vadd.f32 %v10715_v58, %v20861_v47  ;;  %v10727_v38 = vadd.f32 %v10725_v61, %v20870_v51  ;;  %v16576_v4 = vpop.f32.mrb[161].mxu1  ;;  %v10711_v22 = vadd.f32 %v20877_v35, %v10710_v3 }
0x18f2   :  { %v14829_v12 = vmul.f32 -1.442695, %v10717_v56  ;;  %v14830_v23 = vmul.f32 -1.442695, %v10727_v38  ;;  %v10735_v13 = vrot.slane %v10711_v22, 2 }
0x18f4   :  { %17366 = vpow2.f32 %v14829_v12 }
0x18f5   :  { %17368 = vpow2.f32 %v14830_v23 }
0x18fe   :  { %v17367_v10 = vpop.eup %17366 }
0x18ff   :  { %v17369_v36 = vpop.eup %17368  ;;  %v10721_v30 = vadd.f32 1.0, %v17367_v10 }
0x1900   :  { %v10731_v49 = vadd.f32 1.0, %v17369_v36  ;;  %v20990_v36 = vld [vmem:[%s21674_s8 + $0x8] sm:$0xff] }
0x1901   :  { %17370 = vrcp.f32 %v10721_v30 }
0x1902   :  { %17372 = vrcp.f32 %v10731_v49 }
0x190b   :  { %v17371_v17 = vpop.eup %17370 }
0x190c   :  { %v17373_v25 = vpop.eup %17372  ;;  %v10737_v47 = vmul.f32 %v17371_v17, %v10735_v13 }
0x190d   :  { %v10744_v18 = vmul.f32 %v17373_v25, %v10742_v20  ;;  %v10740_v32 = vsub.f32 1.0, %v17373_v25 }
0x190e   :  { %v10738_v51 = vadd.f32 %v10737_v47, %v20880_v19 }
0x1910   :  { %17374 = vtanh.f32 %v10738_v51 }
0x191a   :  { %v17375_v44 = vpop.eup %17374 }
0x191b   :  { %v10741_v54 = vmul.f32 %v17375_v44, %v10740_v32 }
0x191d   :  { %v10745_v33 = vadd.f32 %v10744_v18, %v10741_v54 }
0x191f   :  { %v20962_v42 = vmul.f32 %v20679_v11, %v10745_v33 }
0x1921   :  { %v10748_v15 = vadd.f32 %v10747_v5, %v20962_v42 }
0x1923   :  { %v10750_v29 = vrot.slane %v10748_v15, 6 }
0x1925   :  { %16580 = vmatmul.mubr.msk.f32.vlgmr.msra.gmra.mrb[74].mxu0 %vm1425_vm4, %v10750_v29  ;;  %16585 = vmatmul.mubr.msk.f32.vlgmr.msra.gmra.mrb[162].mxu1 %vm1425_vm4, %v10750_v29  ;;  %v10986_v49 = vmul.f32 %v10750_v29, %v20370_v37 }
0x1926   :  { %16588 = vmatpush3.msra.mxu0 %v20748_v60  ;;  %16589 = vmatprep.mubr.msk.f32.mxu0 %vm17622_vm13, %v17620_v62 }
0x1927   :  { %16593 = vmatpush3.msra.mxu1 %v20823_v59  ;;  %16597 = vmatprep.subr.mxu0 %v17620_v62 }
0x1928   :  { %16594 = vmatprep.mubr.msk.f32.mxu1 %vm17622_vm13, %v17620_v62  ;;  %16602 = vmatprep.subr.mxu1 %v17620_v62 }
0x1929   :  { %16590 = vmatmul.mubr.msk.f32.vlgmr.msra.gmra.mrb[76].mxu0 %vm1425_vm4, %v10750_v29 }
0x192a   :  { %16598 = vmatpush3.msra.mxu0 %v20791_v7  ;;  %16599 = vmatprep.mubr.msk.f32.mxu0 %vm17622_vm13, %v17620_v62 }
0x192b   :  { %16607 = vmatprep.subr.mxu0 %v17620_v62 }
0x19f8   :  { %v10819_v11 = vpop.f32.mrb[74].mxu0  ;;  %v10889_v19 = vpop.f32.mrb[162].mxu1 }
0x19f9   :  { %v10820_v9 = vadd.f32 %v20859_v48, %v10819_v11  ;;  %v16581_v41 = vpop.f32.mrb[75].mxu0  ;;  %v16586_v43 = vpop.f32.mrb[163].mxu1  ;;  %v10890_v52 = vadd.f32 %v20867_v26, %v10889_v19 }
0x19fb   :  { %v10963_v34 = vadd.f32 %v10820_v9, %v20844_v6  ;;  %v10970_v28 = vadd.f32 %v10890_v52, %v20849_v1 }
0x19fc   :  { %v10959_v2 = vpop.f32.mrb[76].mxu0 }
0x19fd   :  { %v14834_v0 = vmul.f32 -1.442695, %v10963_v34  ;;  %v16591_v40 = vpop.f32.mrb[77].mxu0  ;;  %v14835_v27 = vmul.f32 -1.442695, %v10970_v28  ;;  %v10960_v55 = vadd.f32 %v20877_v35, %v10959_v2 }
0x19ff   :  { %17376 = vpow2.f32 %v14834_v0 }
0x1a00   :  { %17378 = vpow2.f32 %v14835_v27 }
0x1a09   :  { %v17377_v16 = vpop.eup %17376 }
0x1a0a   :  { %v10967_v63 = vadd.f32 1.0, %v17377_v16  ;;  %v17379_v24 = vpop.eup %17378 }
0x1a0b   :  { %v10974_v39 = vadd.f32 1.0, %v17379_v24 }
0x1a0c   :  { %17380 = vrcp.f32 %v10967_v63 }
0x1a0d   :  { %17382 = vrcp.f32 %v10974_v39 }
0x1a16   :  { %v17381_v58 = vpop.eup %17380 }
0x1a17   :  { %v10977_v61 = vmul.f32 %v17381_v58, %v10960_v55  ;;  %v17383_v56 = vpop.eup %17382 }
0x1a18   :  { %v10980_v38 = vsub.f32 1.0, %v17383_v56  ;;  %v10983_v12 = vmul.f32 %v17383_v56, %v10750_v29  ;;  %v11732_v56 = vld [vmem:[%s21474_s23] sm:$0xff] }
0x1a19   :  { %v10978_v3 = vadd.f32 %v10977_v61, %v20854_v53 }
0x1a1b   :  { %17384 = vtanh.f32 %v10978_v3 }
0x1a25   :  { %v17385_v4 = vpop.eup %17384 }
0x1a26   :  { %v10981_v23 = vmul.f32 %v17385_v4, %v10980_v38 }
0x1a28   :  { %v10984_v10 = vadd.f32 %v10983_v12, %v10981_v23 }
0x1a2a   :  { %v20993_v30 = vmul.f32 %v20990_v36, %v10984_v10 }
0x1a2c   :  { %v10987_v22 = vadd.f32 %v10986_v49, %v20993_v30 }
0x1a2e   :  { %16595 = vmatmul.mubr.msk.f32.vlgmr.msra.gmra.mrb[164].mxu1 %vm1425_vm4, %v10987_v22  ;;  %16600 = vmatmul.mubr.msk.f32.vlgmr.msra.gmra.mrb[78].mxu0 %vm1425_vm4, %v10987_v22  ;;  %v11229_v2 = vrot.slane %v10987_v22, 6 }
0x1a2f   :  { %16603 = vmatpush3.msra.mxu1 %v20748_v60  ;;  %16604 = vmatprep.mubr.msk.f32.mxu1 %vm17622_vm13, %v17620_v62 }
0x1a30   :  { %16608 = vmatpush3.msra.mxu0 %v20823_v59  ;;  %16612 = vmatprep.subr.mxu1 %v17620_v62  ;;  %v11234_v58 = vmul.f32 %v11229_v2, %v20370_v37 }
0x1a31   :  { %16609 = vmatprep.mubr.msk.f32.mxu0 %vm17622_vm13, %v17620_v62  ;;  %16617 = vmatprep.subr.mxu0 %v17620_v62 }
0x1a32   :  { %16605 = vmatmul.mubr.msk.f32.vlgmr.msra.gmra.mrb[166].mxu1 %vm1425_vm4, %v10987_v22 }
0x1a33   :  { %16613 = vmatpush3.msra.mxu1 %v20791_v7  ;;  %16614 = vmatprep.mubr.msk.f32.mxu1 %vm17622_vm13, %v17620_v62 }
0x1a34   :  { %16622 = vmatprep.subr.mxu1 %v17620_v62 }
0x1b01   :  { %v11057_v13 = vpop.f32.mrb[164].mxu1  ;;  %v11127_v17 = vpop.f32.mrb[78].mxu0 }
0x1b02   :  { %v11058_v20 = vadd.f32 %v20859_v48, %v11057_v13  ;;  %v11128_v25 = vadd.f32 %v20867_v26, %v11127_v17  ;;  %v16596_v47 = vpop.f32.mrb[165].mxu1  ;;  %v16601_v18 = vpop.f32.mrb[79].mxu0 }
0x1b04   :  { %v11202_v51 = vrot.slane %v11058_v20, 6  ;;  %v11212_v32 = vrot.slane %v11128_v25, 6 }
0x1b05   :  { %v11197_v44 = vpop.f32.mrb[166].mxu1 }
0x1b06   :  { %v11204_v54 = vadd.f32 %v11202_v51, %v20844_v6  ;;  %v11214_v33 = vadd.f32 %v11212_v32, %v20849_v1  ;;  %v16606_v5 = vpop.f32.mrb[167].mxu1  ;;  %v11198_v43 = vadd.f32 %v20877_v35, %v11197_v44 }
0x1b08   :  { %v14839_v15 = vmul.f32 -1.442695, %v11204_v54  ;;  %v14840_v29 = vmul.f32 -1.442695, %v11214_v33  ;;  %v11222_v52 = vrot.slane %v11198_v43, 6 }
0x1b0a   :  { %17386 = vpow2.f32 %v14839_v15 }
0x1b0b   :  { %17388 = vpow2.f32 %v14840_v29 }
0x1b14   :  { %v17387_v11 = vpop.eup %17386 }
0x1b15   :  { %v17389_v19 = vpop.eup %17388  ;;  %v11208_v9 = vadd.f32 1.0, %v17387_v11 }
0x1b16   :  { %v11218_v41 = vadd.f32 1.0, %v17389_v19 }
0x1b17   :  { %17390 = vrcp.f32 %v11208_v9 }
0x1b18   :  { %17392 = vrcp.f32 %v11218_v41 }
0x1b21   :  { %v17391_v34 = vpop.eup %17390 }
0x1b22   :  { %v17393_v0 = vpop.eup %17392  ;;  %v11224_v40 = vmul.f32 %v17391_v34, %v11222_v52 }
0x1b23   :  { %v11231_v28 = vmul.f32 %v17393_v0, %v11229_v2  ;;  %v11227_v16 = vsub.f32 1.0, %v17393_v0 }
0x1b24   :  { %v11225_v27 = vadd.f32 %v11224_v40, %v20854_v53 }
0x1b26   :  { %17394 = vtanh.f32 %v11225_v27  ;;  %v11734_v27 = vld [vmem:[%s21474_s23 + $0x10] sm:$0xff] }
0x1b30   :  { %v17395_v63 = vpop.eup %17394 }
0x1b31   :  { %v11228_v24 = vmul.f32 %v17395_v63, %v11227_v16  ;;  %v11735_v63 = vld [vmem:[%s21474_s23 + $0x18] sm:$0xff] }
0x1b33   :  { %v11232_v39 = vadd.f32 %v11231_v28, %v11228_v24  ;;  %v11736_v24 = vld [vmem:[%s21474_s23 + $0x20] sm:$0xff] }
0x1b35   :  { %v21019_v55 = vmul.f32 %v20990_v36, %v11232_v39  ;;  %v11737_v39 = vld [vmem:[%s21474_s23 + $0x28] sm:$0xff] }
0x1b37   :  { %v11235_v61 = vadd.f32 %v11234_v58, %v21019_v55 }
0x1b39   :  { %v11237_v3 = vrot.slane %v11235_v61, 2  ;;  %v11478_v11 = vrot.slane %v11235_v61, 6  ;;  %v16866_v61 = vpack.c.bf16 %v11735_v63, %v11734_v27 }
0x1b3b   :  { %16610 = vmatmul.mubr.msk.f32.vlgmr.msra.gmra.mrb[80].mxu0 %vm1425_vm4, %v11237_v3  ;;  %16615 = vmatmul.mubr.msk.f32.vlgmr.msra.gmra.mrb[168].mxu1 %vm1425_vm4, %v11237_v3  ;;  %v11483_v28 = vmul.f32 %v11478_v11, %v20370_v37 }
0x1b3c   :  { %16618 = vmatpush3.msra.mxu0 %v20748_v60  ;;  %16619 = vmatprep.mubr.msk.f32.mxu0 %vm17622_vm13, %v17620_v62 }
0x1b3d   :  { %16623 = vmatpush3.msra.mxu1 %v20823_v59  ;;  %16627 = vmatprep.subr.mxu0 %v17620_v62  ;;  %v11733_v59 = vld [vmem:[%s21474_s23 + $0x8] sm:$0xff] }
0x1b3e   :  { %16624 = vmatprep.mubr.msk.f32.mxu1 %vm17622_vm13, %v17620_v62  ;;  %16632 = vmatprep.subr.mxu1 %v17620_v62  ;;  %v16862_v38 = vpack.c.bf16 %v11733_v59, %v11732_v56  ;;  %v21093_v56 = vld [vmem:[%s21475_s24 + $0x8] sm:$0xff] }
0x1b3f   :  { %16620 = vmatmul.mubr.msk.f32.vlgmr.msra.gmra.mrb[82].mxu0 %vm1425_vm4, %v11237_v3  ;;  %v16870_v3 = vpack.c.bf16 %v11737_v39, %v11736_v24 }
0x1b40   :  { %16628 = vmatpush3.msra.mxu0 %v20791_v7  ;;  %16629 = vmatprep.mubr.msk.f32.mxu0 %vm17622_vm13, %v17620_v62 }
0x1b41   :  { %16863 = vmatprep.subr.bf16.mxu0 %v16862_v38 }
0x1c0e   :  { %v11306_v4 = vpop.f32.mrb[80].mxu0  ;;  %v11376_v12 = vpop.f32.mrb[168].mxu1 }
0x1c0f   :  { %v11307_v23 = vadd.f32 %v20859_v48, %v11306_v4  ;;  %v11377_v10 = vadd.f32 %v20867_v26, %v11376_v12  ;;  %v16611_v7 = vpop.f32.mrb[81].mxu0  ;;  %v16616_v49 = vpop.f32.mrb[169].mxu1 }
0x1c10   :  { %v14851_v49 = vld [vmem:[%s21476_s25] ss:$0 sm:$0xff] }
0x1c11   :  { %v11451_v22 = vrot.slane %v11307_v23, 4  ;;  %v11461_v13 = vrot.slane %v11377_v10, 4 }
0x1c12   :  { %v11446_v17 = vpop.f32.mrb[82].mxu0 }
0x1c13   :  { %v11453_v20 = vadd.f32 %v11451_v22, %v20844_v6  ;;  %v11463_v25 = vadd.f32 %v11461_v13, %v20849_v1  ;;  %v16621_v47 = vpop.f32.mrb[83].mxu0  ;;  %v11447_v5 = vadd.f32 %v20877_v35, %v11446_v17 }
0x1c15   :  { %v14844_v18 = vmul.f32 -1.442695, %v11453_v20  ;;  %v14845_v51 = vmul.f32 -1.442695, %v11463_v25  ;;  %v11471_v15 = vrot.slane %v11447_v5, 4 }
0x1c16   :  { %v21147_v5 = vld [vmem:[%s21477_s26] ss:$0 sm:$0xff] }
0x1c17   :  { %17396 = vpow2.f32 %v14844_v18 }
0x1c18   :  { %17398 = vpow2.f32 %v14845_v51  ;;  %v14854_v51 = vld [vmem:[%s21476_s25 + $0x1] ss:$0 sm:$0xff] }
0x1c21   :  { %v17397_v32 = vpop.eup %17396 }
0x1c22   :  { %v17399_v44 = vpop.eup %17398  ;;  %v11457_v54 = vadd.f32 1.0, %v17397_v32 }
0x1c23   :  { %v11467_v33 = vadd.f32 1.0, %v17399_v44  ;;  %v14857_v44 = vld [vmem:[%s21476_s25 + $0x2] ss:$0 sm:$0xff] }
0x1c24   :  { %17400 = vrcp.f32 %v11457_v54 }
0x1c25   :  { %17402 = vrcp.f32 %v11467_v33 }
0x1c2e   :  { %v17401_v29 = vpop.eup %17400 }
0x1c2f   :  { %v17403_v19 = vpop.eup %17402  ;;  %v11473_v9 = vmul.f32 %v17401_v29, %v11471_v15  ;;  %v21154_v29 = vld [vmem:[%s21477_s26 + $0x1] ss:$0 sm:$0xff] }
0x1c30   :  { %v11480_v41 = vmul.f32 %v17403_v19, %v11478_v11  ;;  %v11476_v52 = vsub.f32 1.0, %v17403_v19 }
0x1c31   :  { %v11474_v43 = vadd.f32 %v11473_v9, %v20854_v53 }
0x1c33   :  { %17404 = vtanh.f32 %v11474_v43 }
0x1c3d   :  { %v17405_v34 = vpop.eup %17404 }
0x1c3e   :  { %v11477_v2 = vmul.f32 %v17405_v34, %v11476_v52 }
0x1c40   :  { %v11481_v0 = vadd.f32 %v11480_v41, %v11477_v2 }
0x1c42   :  { %v21050_v40 = vmul.f32 %v20990_v36, %v11481_v0 }
0x1c44   :  { %v21057_v16 = vadd.f32 %v11483_v28, %v21050_v40 }
0x1c46   :  { %v11486_v58 = vrot.slane %v21057_v16, 4 }
0x1c48   :  { %16625 = vmatmul.mubr.msk.f32.vlgmr.msra.gmra.mrb[170].mxu1 %vm1425_vm4, %v11486_v58  ;;  %16630 = vmatmul.mubr.msk.f32.vlgmr.msra.gmra.mrb[84].mxu0 %vm1425_vm4, %v11486_v58 }
0x1c49   :  { %16633 = vmatpush3.msra.mxu1 %v20748_v60  ;;  %16865 = vmatpush3.bf16.msra.mxu0 %v16862_v38  ;;  %v21086_v60 = vld [vmem:[%s21475_s24] sm:$0xff] }
0x1c4a   :  { %16641 = vmatprep.mubr.msk.f32.mxu0 %vm231_vm0, %v20797_v57  ;;  %16634 = vmatprep.mubr.msk.f32.mxu1 %vm17622_vm13, %v17620_v62 }
0x1c4b   :  { %16867 = vmatprep.subr.bf16.mxu1 %v16866_v61  ;;  %16871 = vmatprep.subr.bf16.mxu0 %v16870_v3 }
0x1c4c   :  { %16635 = vmatmul.mubr.msk.f32.vlgmr.msra.gmra.mrb[172].mxu1 %vm1425_vm4, %v11486_v58  ;;  %16642 = vmatmul.mubr.msk.f32.vlgmr.msra.gmra.mrb[86].mxu0 %vm231_vm0, %v20809_v50 }
0x1c4d   :  { %16869 = vmatpush3.bf16.msra.mxu1 %v16866_v61  ;;  %16648 = vmatprep.mubr.msk.f32.mxu1 %vm231_vm0, %v20797_v57 }
0x1c4e   :  { %16873 = vmatpush3.bf16.msra.mxu0 %v16870_v3  ;;  %16655 = vmatprep.mubr.msk.f32.mxu0 %vm231_vm0, %v20797_v57  ;;  %v21106_v57 = vld [vmem:[%s21475_s24 + $0x10] sm:$0xff] }
0x1c4f   :  { %16658 = vmatprep.subr.mxu1 %v17620_v62  ;;  %16663 = vmatprep.subr.mxu0 %v17620_v62 }
0x1c50   :  { %16649 = vmatmul.mubr.msk.f32.vlgmr.msra.gmra.mrb[174].mxu1 %vm231_vm0, %v20809_v50 }
0x1c51   :  { %16656 = vmatmul.mubr.msk.f32.vlgmr.msra.gmra.mrb[88].mxu0 %vm231_vm0, %v20809_v50  ;;  %16659 = vmatpush3.msra.mxu1 %v21086_v60 }
0x1c52   :  { %16660 = vmatprep.mubr.msk.f32.mxu1 %vm17622_vm13, %v17620_v62  ;;  %16664 = vmatpush3.msra.mxu0 %v21093_v56 }
0x1c53   :  { %16665 = vmatprep.mubr.msk.f32.mxu0 %vm17622_vm13, %v17620_v62  ;;  %16668 = vmatprep.subr.mxu1 %v17620_v62 }
0x1c54   :  { %16661 = vmatmul.mubr.f32.vlgmr.msra.gmra.mrb[176].mxu1 %v17620_v62  ;;  %16673 = vmatprep.subr.mxu0 %v17620_v62 }
0x1c55   :  { %16666 = vmatmul.mubr.f32.vlgmr.msra.gmra.mrb[90].mxu0 %v17620_v62  ;;  %16669 = vmatpush3.msra.mxu1 %v21106_v57 }
0x1c56   :  { %16670 = vmatprep.mubr.msk.f32.mxu1 %vm17622_vm13, %v17620_v62  ;;  %16674 = vmatpush3.msra.mxu0 %v21086_v60 }
0x1c57   :  { %16678 = vmatprep.subr.mxu1 %v17620_v62  ;;  %16675 = vmatprep.mubr.msk.f32.mxu0 %vm17622_vm13, %v17620_v62 }
0x1c58   :  { %16671 = vmatmul.mubr.f32.vlgmr.msra.gmra.mrb[178].mxu1 %v17620_v62  ;;  %16683 = vmatprep.subr.mxu0 %v17620_v62 }
0x1c59   :  { %16679 = vmatpush3.msra.mxu1 %v21093_v56  ;;  %16680 = vmatprep.mubr.msk.f32.mxu1 %vm17622_vm13, %v17620_v62 }
0x1c5a   :  { %16688 = vmatprep.subr.mxu1 %v17620_v62 }
0x1d1b   :  { %v11555_v50 = vpop.f32.mrb[170].mxu1  ;;  %v11625_v59 = vpop.f32.mrb[84].mxu0 }
0x1d1c   :  { %v11556_v38 = vadd.f32 %v20859_v48, %v11555_v50  ;;  %v11626_v4 = vadd.f32 %v20867_v26, %v11625_v59  ;;  %v16626_v12 = vpop.f32.mrb[171].mxu1  ;;  %v16631_v23 = vpop.f32.mrb[85].mxu0 }
0x1d1e   :  { %v11700_v10 = vrot.slane %v11556_v38, 2  ;;  %v11710_v7 = vrot.slane %v11626_v4, 2 }
0x1d1f   :  { %v11695_v22 = vpop.f32.mrb[172].mxu1  ;;  %v16643_v13 = vpop.f32.mrb[86].mxu0 }
0x1d20   :  { %v11702_v17 = vadd.f32 %v11700_v10, %v20844_v6  ;;  %v11712_v20 = vadd.f32 %v11710_v7, %v20849_v1  ;;  %v16636_v25 = vpop.f32.mrb[173].mxu1  ;;  %v11819_v47 = vpop.f32.mrb[87].mxu0  ;;  %v21158_v34 = vadd.f32 %v16643_v13, %v14851_v49  ;;  %v11696_v4 = vadd.f32 %v20877_v35, %v11695_v22 }
0x1d21   :  { %v21134_v18 = vadd.f32 %v14851_v49, %v11819_v47  ;;  %v11727_v49 = vrot.slane %v21057_v16, 6 }
0x1d22   :  { %v14849_v48 = vmul.f32 -1.442695, %v11702_v17  ;;  %v14850_v26 = vmul.f32 -1.442695, %v11712_v20  ;;  %v11720_v23 = vrot.slane %v11696_v4, 2 }
0x1d23   :  { %v16650_v32 = vpop.f32.mrb[174].mxu1  ;;  %v21169_v20 = vld [vmem:[%s21477_s26 + $0x2] ss:$0 sm:$0xff] }
0x1d24   :  { %17406 = vpow2.f32 %v14849_v48  ;;  %v16657_v54 = vpop.f32.mrb[88].mxu0  ;;  %v11900_v6 = vpop.f32.mrb[175].mxu1  ;;  %v21161_v24 = vadd.f32 %v16650_v32, %v14854_v51 }
0x1d25   :  { %17408 = vpow2.f32 %v14850_v26  ;;  %v21142_v1 = vadd.f32 %v14854_v51, %v11900_v6  ;;  %v11981_v33 = vpop.f32.mrb[89].mxu0  ;;  %v21173_v32 = vadd.f32 %v16657_v54, %v14857_v44 }
0x1d26   :  { %v21149_v15 = vadd.f32 %v14857_v44, %v11981_v33 }
0x1d27   :  { %v12062_v11 = vpop.f32.mrb[176].mxu1 }
0x1d28   :  { %v12063_v19 = vadd.f32 %v21147_v5, %v12062_v11  ;;  %v12138_v9 = vpop.f32.mrb[90].mxu0  ;;  %v16662_v41 = vpop.f32.mrb[177].mxu1 }
0x1d29   :  { %v12139_v43 = vadd.f32 %v21154_v29, %v12138_v9  ;;  %v16667_v52 = vpop.f32.mrb[91].mxu0 }
0x1d2a   :  { %v12219_v2 = vrot.slane %v12063_v19, 2 }
0x1d2b   :  { %v12229_v0 = vrot.slane %v12139_v43, 2  ;;  %v12214_v28 = vpop.f32.mrb[178].mxu1 }
0x1d2c   :  { %v12221_v27 = vadd.f32 %v12219_v2, %v21158_v34  ;;  %v16672_v63 = vpop.f32.mrb[179].mxu1  ;;  %v12215_v35 = vadd.f32 %v21169_v20, %v12214_v28 }
0x1d2d   :  { %v12231_v50 = vadd.f32 %v12229_v0, %v21161_v24 }
0x1d2e   :  { %v17407_v39 = vpop.eup %17406  ;;  %v14863_v58 = vmul.f32 -1.442695, %v12221_v27  ;;  %v12239_v26 = vrot.slane %v12215_v35, 2 }
0x1d2f   :  { %v17409_v61 = vpop.eup %17408  ;;  %v11706_v3 = vadd.f32 1.0, %v17407_v39  ;;  %v14864_v38 = vmul.f32 -1.442695, %v12231_v50 }
0x1d30   :  { %v11716_v59 = vadd.f32 1.0, %v17409_v61  ;;  %17410 = vpow2.f32 %v14863_v58 }
0x1d31   :  { %17412 = vrcp.f32 %v11706_v3 }
0x1d32   :  { %17414 = vrcp.f32 %v11716_v59 }
0x1d33   :  { %17416 = vpow2.f32 %v14864_v38 }
0x1d3a   :  { %v17411_v12 = vpop.eup %17410 }
0x1d3b   :  { %v17413_v10 = vpop.eup %17412  ;;  %v12225_v7 = vadd.f32 1.0, %v17411_v12 }
0x1d3c   :  { %v17415_v13 = vpop.eup %17414  ;;  %v11722_v17 = vmul.f32 %v17413_v10, %v11720_v23 }
0x1d3d   :  { %17418 = vrcp.f32 %v12225_v7  ;;  %v11729_v25 = vmul.f32 %v17415_v13, %v11727_v49  ;;  %v17417_v22 = vpop.eup %17416  ;;  %v11725_v6 = vsub.f32 1.0, %v17415_v13 }
0x1d3e   :  { %v11723_v47 = vadd.f32 %v11722_v17, %v20854_v53  ;;  %v12235_v48 = vadd.f32 1.0, %v17417_v22 }
0x1d40   :  { %17420 = vtanh.f32 %v11723_v47 }
0x1d41   :  { %17422 = vrcp.f32 %v12235_v48 }
0x1d47   :  { %v17419_v51 = vpop.eup %17418 }
0x1d48   :  { %v12241_v16 = vmul.f32 %v17419_v51, %v12239_v26 }
0x1d4a   :  { %v17421_v33 = vpop.eup %17420  ;;  %v12242_v11 = vadd.f32 %v12241_v16, %v21173_v32 }
0x1d4b   :  { %v11726_v19 = vmul.f32 %v17421_v33, %v11725_v6  ;;  %v17423_v53 = vpop.eup %17422 }
0x1d4c   :  { %17424 = vtanh.f32 %v12242_v11  ;;  %v12244_v41 = vsub.f32 1.0, %v17423_v53  ;;  %v12246_v52 = vmul.f32 0.0, %v17423_v53 }
0x1d4d   :  { %v21176_v9 = vadd.f32 %v11729_v25, %v11726_v19 }
0x1d56   :  { %v17425_v43 = vpop.eup %17424 }
0x1d57   :  { %v12245_v2 = vmul.f32 %v17425_v43, %v12244_v41 }
0x1d59   :  { %v12247_v0 = vadd.f32 %v12246_v52, %v12245_v2 }
0x1d5b   :  { %v21179_v28 = vmul.f32 %v20990_v36, %v12247_v0 }
0x1d5d   :  { %v12249_v44 = vadd.f32 %v21179_v28, %v20570_v8 }
0x1d5f   :  { %v12251_v54 = vrot.slane %v12249_v44, 6  ;;  %v12492_v22 = vrot.slane %v12249_v44, 2 }
0x1d61   :  { %16676 = vmatmul.mubr.msk.f32.vlgmr.msra.gmra.mrb[92].mxu0 %vm1425_vm4, %v12251_v54  ;;  %16681 = vmatmul.mubr.msk.f32.vlgmr.msra.gmra.mrb[180].mxu1 %vm1425_vm4, %v12251_v54  ;;  %v12497_v41 = vmul.f32 %v12492_v22, %v20370_v37 }
0x1d62   :  { %16684 = vmatpush3.msra.mxu0 %v21106_v57  ;;  %16685 = vmatprep.mubr.msk.f32.mxu0 %vm17622_vm13, %v17620_v62 }
0x1d63   :  { %16689 = vmatpush3.msra.mxu1 %v21086_v60  ;;  %16693 = vmatprep.subr.mxu0 %v17620_v62 }
0x1d64   :  { %16690 = vmatprep.mubr.msk.f32.mxu1 %vm17622_vm13, %v17620_v62  ;;  %16698 = vmatprep.subr.mxu1 %v17620_v62 }
0x1d65   :  { %16686 = vmatmul.mubr.msk.f32.vlgmr.msra.gmra.mrb[94].mxu0 %vm1425_vm4, %v12251_v54 }
0x1d66   :  { %16694 = vmatpush3.msra.mxu0 %v21093_v56  ;;  %16695 = vmatprep.mubr.msk.f32.mxu0 %vm17622_vm13, %v17620_v62 }
0x1d67   :  { %16703 = vmatprep.subr.mxu0 %v17620_v62 }
0x1e34   :  { %v12320_v8 = vpop.f32.mrb[92].mxu0  ;;  %v12390_v27 = vpop.f32.mrb[180].mxu1 }
0x1e35   :  { %v12321_v63 = vadd.f32 %v21147_v5, %v12320_v8  ;;  %v12391_v39 = vadd.f32 %v21154_v29, %v12390_v27  ;;  %v16677_v58 = vpop.f32.mrb[93].mxu0  ;;  %v16682_v61 = vpop.f32.mrb[181].mxu1 }
0x1e37   :  { %v12465_v3 = vrot.slane %v12321_v63, 4  ;;  %v12475_v50 = vrot.slane %v12391_v39, 4 }
0x1e38   :  { %v12460_v59 = vpop.f32.mrb[94].mxu0 }
0x1e39   :  { %v12467_v38 = vadd.f32 %v12465_v3, %v21158_v34  ;;  %v12477_v4 = vadd.f32 %v12475_v50, %v21161_v24  ;;  %v16687_v12 = vpop.f32.mrb[95].mxu0  ;;  %v12461_v25 = vadd.f32 %v21169_v20, %v12460_v59 }
0x1e3b   :  { %v14868_v23 = vmul.f32 -1.442695, %v12467_v38  ;;  %v14869_v10 = vmul.f32 -1.442695, %v12477_v4  ;;  %v12485_v47 = vrot.slane %v12461_v25, 4 }
0x1e3d   :  { %17426 = vpow2.f32 %v14868_v23 }
0x1e3e   :  { %17428 = vpow2.f32 %v14869_v10 }
0x1e47   :  { %v17427_v7 = vpop.eup %17426 }
0x1e48   :  { %v17429_v49 = vpop.eup %17428  ;;  %v12471_v13 = vadd.f32 1.0, %v17427_v7 }
0x1e49   :  { %v12481_v17 = vadd.f32 1.0, %v17429_v49 }
0x1e4a   :  { %17430 = vrcp.f32 %v12471_v13 }
0x1e4b   :  { %17432 = vrcp.f32 %v12481_v17 }
0x1e54   :  { %v17431_v35 = vpop.eup %17430 }
0x1e55   :  { %v17433_v48 = vpop.eup %17432  ;;  %v12487_v26 = vmul.f32 %v17431_v35, %v12485_v47 }
0x1e56   :  { %v12494_v51 = vmul.f32 %v17433_v48, %v12492_v22  ;;  %v12490_v6 = vsub.f32 1.0, %v17433_v48 }
0x1e57   :  { %v12488_v16 = vadd.f32 %v12487_v26, %v21173_v32 }
0x1e59   :  { %17434 = vtanh.f32 %v12488_v16 }
0x1e63   :  { %v17435_v33 = vpop.eup %17434 }
0x1e64   :  { %v12491_v11 = vmul.f32 %v17435_v33, %v12490_v6 }
0x1e66   :  { %v12495_v19 = vadd.f32 %v12494_v51, %v12491_v11 }
0x1e68   :  { %v21205_v53 = vmul.f32 %v20990_v36, %v12495_v19 }
0x1e6a   :  { %v12498_v43 = vadd.f32 %v12497_v41, %v21205_v53 }
0x1e6c   :  { %v12500_v52 = vrot.slane %v12498_v43, 4  ;;  %v12741_v17 = vrot.slane %v12498_v43, 2 }
0x1e6e   :  { %16691 = vmatmul.mubr.msk.f32.vlgmr.msra.gmra.mrb[182].mxu1 %vm1425_vm4, %v12500_v52  ;;  %16696 = vmatmul.mubr.msk.f32.vlgmr.msra.gmra.mrb[96].mxu0 %vm1425_vm4, %v12500_v52  ;;  %v12746_v33 = vmul.f32 %v12741_v17, %v20370_v37 }
0x1e6f   :  { %16699 = vmatpush3.msra.mxu1 %v21106_v57  ;;  %16700 = vmatprep.mubr.msk.f32.mxu1 %vm17622_vm13, %v17620_v62 }
0x1e70   :  { %16704 = vmatpush3.msra.mxu0 %v21086_v60  ;;  %16708 = vmatprep.subr.mxu1 %v17620_v62 }
0x1e71   :  { %16705 = vmatprep.mubr.msk.f32.mxu0 %vm17622_vm13, %v17620_v62  ;;  %16713 = vmatprep.subr.mxu0 %v17620_v62 }
0x1e72   :  { %16701 = vmatmul.mubr.msk.f32.vlgmr.msra.gmra.mrb[184].mxu1 %vm1425_vm4, %v12500_v52 }
0x1e73   :  { %16709 = vmatpush3.msra.mxu1 %v21093_v56  ;;  %16710 = vmatprep.mubr.msk.f32.mxu1 %vm17622_vm13, %v17620_v62 }
0x1e74   :  { %16718 = vmatprep.subr.mxu1 %v17620_v62 }
0x1f41   :  { %v12569_v2 = vpop.f32.mrb[182].mxu1  ;;  %v12639_v0 = vpop.f32.mrb[96].mxu0 }
0x1f42   :  { %v12570_v44 = vadd.f32 %v21147_v5, %v12569_v2  ;;  %v12640_v54 = vadd.f32 %v21154_v29, %v12639_v0  ;;  %v16692_v8 = vpop.f32.mrb[183].mxu1  ;;  %v16697_v27 = vpop.f32.mrb[97].mxu0 }
0x1f44   :  { %v12714_v63 = vrot.slane %v12570_v44, 6  ;;  %v12724_v39 = vrot.slane %v12640_v54, 6 }
0x1f45   :  { %v12709_v58 = vpop.f32.mrb[184].mxu1 }
0x1f46   :  { %v12716_v61 = vadd.f32 %v12714_v63, %v21158_v34  ;;  %v12726_v3 = vadd.f32 %v12724_v39, %v21161_v24  ;;  %v16702_v50 = vpop.f32.mrb[185].mxu1  ;;  %v12710_v7 = vadd.f32 %v21169_v20, %v12709_v58 }
0x1f48   :  { %v14873_v59 = vmul.f32 -1.442695, %v12716_v61  ;;  %v14874_v38 = vmul.f32 -1.442695, %v12726_v3  ;;  %v12734_v49 = vrot.slane %v12710_v7, 6 }
0x1f4a   :  { %17436 = vpow2.f32 %v14873_v59 }
0x1f4b   :  { %17438 = vpow2.f32 %v14874_v38 }
0x1f54   :  { %v17437_v4 = vpop.eup %17436 }
0x1f55   :  { %v17439_v12 = vpop.eup %17438  ;;  %v12720_v23 = vadd.f32 1.0, %v17437_v4 }
0x1f56   :  { %v12730_v10 = vadd.f32 1.0, %v17439_v12 }
0x1f57   :  { %17440 = vrcp.f32 %v12720_v23 }
0x1f58   :  { %17442 = vrcp.f32 %v12730_v10 }
0x1f61   :  { %v17441_v13 = vpop.eup %17440 }
0x1f62   :  { %v17443_v25 = vpop.eup %17442  ;;  %v12736_v47 = vmul.f32 %v17441_v13, %v12734_v49 }
0x1f63   :  { %v12743_v35 = vmul.f32 %v17443_v25, %v12741_v17  ;;  %v12739_v48 = vsub.f32 1.0, %v17443_v25 }
0x1f64   :  { %v12737_v22 = vadd.f32 %v12736_v47, %v21173_v32 }
0x1f66   :  { %17444 = vtanh.f32 %v12737_v22 }
0x1f70   :  { %v17445_v26 = vpop.eup %17444 }
0x1f71   :  { %v12740_v51 = vmul.f32 %v17445_v26, %v12739_v48 }
0x1f73   :  { %v12744_v16 = vadd.f32 %v12743_v35, %v12740_v51 }
0x1f75   :  { %v21231_v6 = vmul.f32 %v20990_v36, %v12744_v16 }
0x1f77   :  { %v12747_v11 = vadd.f32 %v12746_v33, %v21231_v6 }
0x1f79   :  { %v12749_v19 = vrot.slane %v12747_v11, 2 }
0x1f7b   :  { %16706 = vmatmul.mubr.msk.f32.vlgmr.msra.gmra.mrb[98].mxu0 %vm1425_vm4, %v12749_v19  ;;  %16711 = vmatmul.mubr.msk.f32.vlgmr.msra.gmra.mrb[186].mxu1 %vm1425_vm4, %v12749_v19  ;;  %v12985_v25 = vmul.f32 %v12749_v19, %v20370_v37 }
0x1f7c   :  { %16714 = vmatpush3.msra.mxu0 %v21106_v57  ;;  %16715 = vmatprep.mubr.msk.f32.mxu0 %vm17622_vm13, %v17620_v62 }
0x1f7d   :  { %16719 = vmatpush3.msra.mxu1 %v21086_v60  ;;  %16723 = vmatprep.subr.mxu0 %v17620_v62 }
0x1f7e   :  { %16720 = vmatprep.mubr.msk.f32.mxu1 %vm17622_vm13, %v17620_v62  ;;  %16728 = vmatprep.subr.mxu1 %v17620_v62 }
0x1f7f   :  { %16716 = vmatmul.mubr.msk.f32.vlgmr.msra.gmra.mrb[100].mxu0 %vm1425_vm4, %v12749_v19 }
0x1f80   :  { %16724 = vmatpush3.msra.mxu0 %v21093_v56  ;;  %16725 = vmatprep.mubr.msk.f32.mxu0 %vm17622_vm13, %v17620_v62 }
0x1f81   :  { %16733 = vmatprep.subr.mxu0 %v17620_v62 }
0x204e   :  { %v12818_v41 = vpop.f32.mrb[98].mxu0  ;;  %v12888_v43 = vpop.f32.mrb[186].mxu1 }
0x204f   :  { %v12819_v52 = vadd.f32 %v21147_v5, %v12818_v41  ;;  %v16707_v2 = vpop.f32.mrb[99].mxu0  ;;  %v16712_v0 = vpop.f32.mrb[187].mxu1  ;;  %v12889_v44 = vadd.f32 %v21154_v29, %v12888_v43 }
0x2051   :  { %v12962_v54 = vadd.f32 %v12819_v52, %v21158_v34  ;;  %v12969_v39 = vadd.f32 %v12889_v44, %v21161_v24 }
0x2052   :  { %v12958_v8 = vpop.f32.mrb[100].mxu0 }
0x2053   :  { %v14878_v27 = vmul.f32 -1.442695, %v12962_v54  ;;  %v16717_v63 = vpop.f32.mrb[101].mxu0  ;;  %v14879_v58 = vmul.f32 -1.442695, %v12969_v39  ;;  %v12959_v38 = vadd.f32 %v21169_v20, %v12958_v8 }
0x2055   :  { %17446 = vpow2.f32 %v14878_v27 }
0x2056   :  { %17448 = vpow2.f32 %v14879_v58 }
0x205f   :  { %v17447_v61 = vpop.eup %17446 }
0x2060   :  { %v12966_v3 = vadd.f32 1.0, %v17447_v61  ;;  %v17449_v50 = vpop.eup %17448 }
0x2061   :  { %v12973_v59 = vadd.f32 1.0, %v17449_v50 }
0x2062   :  { %17450 = vrcp.f32 %v12966_v3 }
0x2063   :  { %17452 = vrcp.f32 %v12973_v59 }
0x206c   :  { %v17451_v4 = vpop.eup %17450 }
0x206d   :  { %v12976_v12 = vmul.f32 %v17451_v4, %v12959_v38  ;;  %v17453_v23 = vpop.eup %17452 }
0x206e   :  { %v12979_v10 = vsub.f32 1.0, %v17453_v23  ;;  %v12982_v24 = vmul.f32 %v17453_v23, %v12749_v19 }
0x206f   :  { %v12977_v34 = vadd.f32 %v12976_v12, %v21173_v32  ;;  %v21285_v12 = vld [vmem:[%s21674_s8] sm:$0xff] }
0x2071   :  { %17454 = vtanh.f32 %v12977_v34 }
0x207b   :  { %v17455_v7 = vpop.eup %17454 }
0x207c   :  { %v12980_v49 = vmul.f32 %v17455_v7, %v12979_v10 }
0x207e   :  { %v12983_v13 = vadd.f32 %v12982_v24, %v12980_v49 }
0x2080   :  { %v21257_v17 = vmul.f32 %v20990_v36, %v12983_v13 }
0x2082   :  { %v12986_v47 = vadd.f32 %v12985_v25, %v21257_v17 }
0x2084   :  { %16721 = vmatmul.mubr.msk.f32.vlgmr.msra.gmra.mrb[188].mxu1 %vm1425_vm4, %v12986_v47  ;;  %16726 = vmatmul.mubr.msk.f32.vlgmr.msra.gmra.mrb[102].mxu0 %vm1425_vm4, %v12986_v47  ;;  %v13228_v63 = vrot.slane %v12986_v47, 2 }
0x2085   :  { %16729 = vmatpush3.msra.mxu1 %v21106_v57  ;;  %16730 = vmatprep.mubr.msk.f32.mxu1 %vm17622_vm13, %v17620_v62 }
0x2086   :  { %16734 = vmatpush3.msra.mxu0 %v21086_v60  ;;  %16738 = vmatprep.subr.mxu1 %v17620_v62  ;;  %v13233_v23 = vmul.f32 %v13228_v63, %v20258_v46 }
0x2087   :  { %16735 = vmatprep.mubr.msk.f32.mxu0 %vm17622_vm13, %v17620_v62  ;;  %16743 = vmatprep.subr.mxu0 %v17620_v62 }
0x2088   :  { %16731 = vmatmul.mubr.msk.f32.vlgmr.msra.gmra.mrb[190].mxu1 %vm1425_vm4, %v12986_v47 }
0x2089   :  { %16739 = vmatpush3.msra.mxu1 %v21093_v56  ;;  %16740 = vmatprep.mubr.msk.f32.mxu1 %vm17622_vm13, %v17620_v62 }
0x208a   :  { %16748 = vmatprep.subr.mxu1 %v17620_v62 }
0x2157   :  { %v13056_v37 = vpop.f32.mrb[188].mxu1  ;;  %v13126_v36 = vpop.f32.mrb[102].mxu0 }
0x2158   :  { %v13057_v32 = vadd.f32 %v21147_v5, %v13056_v37  ;;  %v13127_v35 = vadd.f32 %v21154_v29, %v13126_v36  ;;  %v16722_v22 = vpop.f32.mrb[189].mxu1  ;;  %v16727_v48 = vpop.f32.mrb[103].mxu0 }
0x215a   :  { %v13201_v26 = vrot.slane %v13057_v32, 2  ;;  %v13211_v51 = vrot.slane %v13127_v35, 2 }
0x215b   :  { %v13196_v16 = vpop.f32.mrb[190].mxu1 }
0x215c   :  { %v13203_v33 = vadd.f32 %v13201_v26, %v21134_v18  ;;  %v13213_v11 = vadd.f32 %v13211_v51, %v21142_v1  ;;  %v16732_v19 = vpop.f32.mrb[191].mxu1  ;;  %v13197_v54 = vadd.f32 %v21169_v20, %v13196_v16 }
0x215e   :  { %v14883_v41 = vmul.f32 -1.442695, %v13203_v33  ;;  %v14884_v43 = vmul.f32 -1.442695, %v13213_v11  ;;  %v13221_v8 = vrot.slane %v13197_v54, 2 }
0x2160   :  { %17456 = vpow2.f32 %v14883_v41 }
0x2161   :  { %17458 = vpow2.f32 %v14884_v43 }
0x216a   :  { %v17457_v52 = vpop.eup %17456 }
0x216b   :  { %v17459_v2 = vpop.eup %17458  ;;  %v13207_v0 = vadd.f32 1.0, %v17457_v52 }
0x216c   :  { %v13217_v44 = vadd.f32 1.0, %v17459_v2 }
0x216d   :  { %17460 = vrcp.f32 %v13207_v0 }
0x216e   :  { %17462 = vrcp.f32 %v13217_v44 }
0x2177   :  { %v17461_v27 = vpop.eup %17460 }
0x2178   :  { %v17463_v39 = vpop.eup %17462  ;;  %v13223_v58 = vmul.f32 %v17461_v27, %v13221_v8 }
0x2179   :  { %v13230_v61 = vmul.f32 %v17463_v39, %v13228_v63  ;;  %v13226_v50 = vsub.f32 1.0, %v17463_v39 }
0x217a   :  { %v13224_v3 = vadd.f32 %v13223_v58, %v21149_v15 }
0x217c   :  { %17464 = vtanh.f32 %v13224_v3 }
0x2186   :  { %v17465_v59 = vpop.eup %17464 }
0x2187   :  { %v13227_v38 = vmul.f32 %v17465_v59, %v13226_v50 }
0x2189   :  { %v13231_v4 = vadd.f32 %v13230_v61, %v13227_v38 }
0x218b   :  { %v13232_v34 = vmul.f32 %v21285_v12, %v13231_v4 }
0x218d   :  { %13986 = vrot.lane.b32.xlu1 %v13232_v34, %s17623_s6  ;;  %v13234_v10 = vadd.f32 %v13233_v23, %v13232_v34 }
0x218f   :  { %v13236_v7 = vrot.slane %v13234_v10, 6  ;;  %v13477_v2 = vrot.slane %v13234_v10, 2 }
0x2191   :  { %14006 = vrot.lane.b32.xlu1 %v21179_v28, %s17623_s6  ;;  %16736 = vmatmul.mubr.msk.f32.vlgmr.msra.gmra.mrb[104].mxu0 %vm1425_vm4, %v13236_v7  ;;  %v13482_v3 = vmul.f32 %v13477_v2, %v20258_v46 }
0x2192   :  { %16741 = vmatmul.mubr.msk.f32.vlgmr.msra.gmra.mrb[192].mxu1 %vm1425_vm4, %v13236_v7  ;;  %16744 = vmatpush3.msra.mxu0 %v21106_v57 }
0x2193   :  { %16745 = vmatprep.mubr.msk.f32.mxu0 %vm17622_vm13, %v17620_v62  ;;  %16749 = vmatpush3.msra.mxu1 %v21086_v60 }
0x2194   :  { %16753 = vmatprep.subr.mxu0 %v17620_v62  ;;  %16750 = vmatprep.mubr.msk.f32.mxu1 %vm17622_vm13, %v17620_v62 }
0x2195   :  { %16746 = vmatmul.mubr.msk.f32.vlgmr.msra.gmra.mrb[106].mxu0 %vm1425_vm4, %v13236_v7  ;;  %16758 = vmatprep.subr.mxu1 %v17620_v62 }
0x2196   :  { %16754 = vmatpush3.msra.mxu0 %v21093_v56  ;;  %16755 = vmatprep.mubr.msk.f32.mxu0 %vm17622_vm13, %v17620_v62 }
0x2197   :  { %16763 = vmatprep.subr.mxu0 %v17620_v62 }
0x2264   :  { %v13305_v28 = vpop.f32.mrb[104].mxu0 }
0x2265   :  { %v13306_v24 = vadd.f32 %v21147_v5, %v13305_v28  ;;  %v13375_v49 = vpop.f32.mrb[192].mxu1  ;;  %v16737_v13 = vpop.f32.mrb[105].mxu0 }
0x2266   :  { %v13376_v25 = vadd.f32 %v21154_v29, %v13375_v49  ;;  %v16742_v47 = vpop.f32.mrb[193].mxu1 }
0x2267   :  { %v13450_v37 = vrot.slane %v13306_v24, 4 }
0x2268   :  { %v13460_v36 = vrot.slane %v13376_v25, 4  ;;  %v13445_v32 = vpop.f32.mrb[106].mxu0 }
0x2269   :  { %v13452_v35 = vadd.f32 %v13450_v37, %v21134_v18  ;;  %v16747_v22 = vpop.f32.mrb[107].mxu0  ;;  %v13446_v41 = vadd.f32 %v21169_v20, %v13445_v32 }
0x226a   :  { %v13462_v48 = vadd.f32 %v13460_v36, %v21142_v1 }
0x226b   :  { %v14888_v26 = vmul.f32 -1.442695, %v13452_v35  ;;  %v13470_v43 = vrot.slane %v13446_v41, 4 }
0x226c   :  { %v14889_v51 = vmul.f32 -1.442695, %v13462_v48 }
0x226d   :  { %17466 = vpow2.f32 %v14888_v26 }
0x226e   :  { %17468 = vpow2.f32 %v14889_v51 }
0x2277   :  { %v17467_v16 = vpop.eup %17466 }
0x2278   :  { %v17469_v33 = vpop.eup %17468  ;;  %v13456_v11 = vadd.f32 1.0, %v17467_v16 }
0x2279   :  { %v13466_v19 = vadd.f32 1.0, %v17469_v33 }
0x227a   :  { %17470 = vrcp.f32 %v13456_v11 }
0x227b   :  { %17472 = vrcp.f32 %v13466_v19 }
0x2284   :  { %v17471_v52 = vpop.eup %17470 }
0x2285   :  { %v17473_v0 = vpop.eup %17472  ;;  %v13472_v44 = vmul.f32 %v17471_v52, %v13470_v43 }
0x2286   :  { %v13479_v54 = vmul.f32 %v17473_v0, %v13477_v2  ;;  %v13475_v27 = vsub.f32 1.0, %v17473_v0 }
0x2287   :  { %v13473_v8 = vadd.f32 %v13472_v44, %v21149_v15 }
0x2289   :  { %17474 = vtanh.f32 %v13473_v8 }
0x2293   :  { %v17475_v63 = vpop.eup %17474 }
0x2294   :  { %v13476_v39 = vmul.f32 %v17475_v63, %v13475_v27 }
0x2296   :  { %v13480_v58 = vadd.f32 %v13479_v54, %v13476_v39 }
0x2298   :  { %v13481_v61 = vmul.f32 %v21285_v12, %v13480_v58 }
0x229a   :  { %13981 = vrot.lane.b32.xlu0 %v13481_v61, %s17623_s6  ;;  %v13483_v50 = vadd.f32 %v13482_v3, %v13481_v61 }
0x229c   :  { %v13485_v59 = vrot.slane %v13483_v50, 4  ;;  %v13726_v51 = vrot.slane %v13483_v50, 2 }
0x229e   :  { %16751 = vmatmul.mubr.msk.f32.vlgmr.msra.gmra.mrb[194].mxu1 %vm1425_vm4, %v13485_v59  ;;  %16756 = vmatmul.mubr.msk.f32.vlgmr.msra.gmra.mrb[108].mxu0 %vm1425_vm4, %v13485_v59  ;;  %v13731_v44 = vmul.f32 %v13726_v51, %v20258_v46 }
0x229f   :  { %16759 = vmatpush3.msra.mxu1 %v21106_v57  ;;  %16760 = vmatprep.mubr.msk.f32.mxu1 %vm17622_vm13, %v17620_v62 }
0x22a0   :  { %16764 = vmatpush3.msra.mxu0 %v21086_v60  ;;  %16768 = vmatprep.subr.mxu1 %v17620_v62 }
0x22a1   :  { %16765 = vmatprep.mubr.msk.f32.mxu0 %vm17622_vm13, %v17620_v62  ;;  %16773 = vmatprep.subr.mxu0 %v17620_v62 }
0x22a2   :  { %16761 = vmatmul.mubr.msk.f32.vlgmr.msra.gmra.mrb[196].mxu1 %vm1425_vm4, %v13485_v59 }
0x22a3   :  { %16769 = vmatpush3.msra.mxu1 %v21093_v56  ;;  %16770 = vmatprep.mubr.msk.f32.mxu1 %vm17622_vm13, %v17620_v62 }
0x2371   :  { %v13554_v38 = vpop.f32.mrb[194].mxu1  ;;  %v13624_v4 = vpop.f32.mrb[108].mxu0 }
0x2372   :  { %v13555_v34 = vadd.f32 %v21147_v5, %v13554_v38  ;;  %v13625_v60 = vadd.f32 %v21154_v29, %v13624_v4  ;;  %v16752_v23 = vpop.f32.mrb[195].mxu1  ;;  %v16757_v10 = vpop.f32.mrb[109].mxu0 }
0x2374   :  { %v13699_v7 = vrot.slane %v13555_v34, 6  ;;  %v13709_v28 = vrot.slane %v13625_v60, 6 }
0x2375   :  { %v13694_v24 = vpop.f32.mrb[196].mxu1 }
0x2376   :  { %v13701_v49 = vadd.f32 %v13699_v7, %v21134_v18  ;;  %v13711_v13 = vadd.f32 %v13709_v28, %v21142_v1  ;;  %v16762_v25 = vpop.f32.mrb[197].mxu1  ;;  %v13695_v22 = vadd.f32 %v21169_v20, %v13694_v24 }
0x2377   :  { %v13982_v25 = vpop.permute.xlu0 %13981 }
0x2378   :  { %v14893_v56 = vmul.f32 -1.442695, %v13701_v49  ;;  %v14894_v47 = vmul.f32 -1.442695, %v13711_v13  ;;  %v13719_v48 = vrot.slane %v13695_v22, 6 }
0x237a   :  { %17476 = vpow2.f32 %v14893_v56  ;;  %v13987_v56 = vpop.permute.xlu1 %13986 }
0x237b   :  { %17478 = vpow2.f32 %v14894_v47 }
0x2384   :  { %v17477_v37 = vpop.eup %17476 }
0x2385   :  { %v17479_v36 = vpop.eup %17478  ;;  %v13705_v32 = vadd.f32 1.0, %v17477_v37  ;;  %v13989_v37 = vsel %vm1425_vm4, %v20962_v42, %v13987_v56 }
0x2386   :  { %v13715_v35 = vadd.f32 1.0, %v17479_v36 }
0x2387   :  { %17480 = vrcp.f32 %v13705_v32  ;;  %v14085_v32 = vcombine.high %v13989_v37, %v13989_v37 }
0x2388   :  { %17482 = vrcp.f32 %v13715_v35 }
0x2391   :  { %v17481_v26 = vpop.eup %17480 }
0x2392   :  { %v17483_v16 = vpop.eup %17482  ;;  %v13721_v33 = vmul.f32 %v17481_v26, %v13719_v48  ;;  %v13984_v48 = vsel %vm1425_vm4, %v20936_v21, %v13982_v25  ;;  %v17595_v26 = vld [vmem:[%s21674_s8 + $0x8] sm:$0xff]  ;;  %s17625_s8 = smov [#allocation2]  }
0x2393   :  { %v13728_v11 = vmul.f32 %v17483_v16, %v13726_v51  ;;  %v13724_v41 = vsub.f32 1.0, %v17483_v16  ;;  %v11731_v42 = vmul.f32 %v17595_v26, %v21176_v9  ;;  %s14299_s9 = sshll.u32 %s17625_s8, 4  ;;  %s14300_s9 = int_to_ptr.vmem [resolvable:$true] %s14299_s9 }
0x2394   :  { %v13722_v19 = vadd.f32 %v13721_v33, %v21149_v15  ;;  %s17596_s17 = scalar_lea.vmem %s14300_s9, 256  ;;  %p17601_p1 = scmp.lt.s32.totalorder %s14300_s9, %s14300_s9 }
0x2395   :  { %p17597_p0 = scmp.ne.s32.totalorder %s14300_s9, %s17596_s17  ;;  %p17602_p2 = scmp.lt.s32.totalorder %s17596_s17, %s17596_s17 }
0x2396   :  { %17484 = vtanh.f32 %v13722_v19 }
0x2397   :  { %p17603_p3 = por %p17602_p2, %p17601_p1 }
0x2399   :  { %p17604_p4 = pnand %p17603_p3, %p17597_p0 }
0x23a0   :  { %v17485_v43 = vpop.eup %17484 }
0x23a1   :  { %v13725_v52 = vmul.f32 %v17485_v43, %v13724_v41 }
0x23a3   :  { %v13729_v2 = vadd.f32 %v13728_v11, %v13725_v52  ;;  %v14061_v11 = vcombine.high %v13984_v48, %v13984_v48 }
0x23a5   :  { %v13730_v0 = vmul.f32 %v21285_v12, %v13729_v2 }
0x23a7   :  { %13976 = vrot.lane.b32.xlu0 %v13730_v0, %s17623_s6  ;;  %v13732_v54 = vadd.f32 %v13731_v44, %v13730_v0 }
0x23a9   :  { %v13734_v8 = vrot.slane %v13732_v54, 2 }
0x23ab   :  { %13996 = vrot.lane.b32.xlu0 %v21231_v6, %s17623_s6  ;;  %16766 = vmatmul.mubr.msk.f32.vlgmr.msra.gmra.mrb[110].mxu0 %vm1425_vm4, %v13734_v8 }
0x23ac   :  { %16771 = vmatmul.mubr.msk.f32.vlgmr.msra.gmra.mrb[198].mxu1 %vm1425_vm4, %v13734_v8  ;;  %16774 = vmatpush3.msra.mxu0 %v21106_v57 }
0x23ad   :  { %16775 = vmatprep.mubr.msk.f32.mxu0 %vm17622_vm13, %v17620_v62 }
0x23af   :  { %13991 = vrot.lane.b32.xlu0 %v21257_v17, %s17623_s6  ;;  %16776 = vmatmul.mubr.msk.f32.vlgmr.msra.gmra.mrb[112].mxu0 %vm1425_vm4, %v13734_v8 }
0x247e   :  { %v13803_v46 = vpop.f32.mrb[110].mxu0 }
0x247f   :  { %v13804_v27 = vadd.f32 %v21147_v5, %v13803_v46  ;;  %v13873_v63 = vpop.f32.mrb[198].mxu1  ;;  %v16767_v39 = vpop.f32.mrb[111].mxu0 }
0x2480   :  { %v13874_v6 = vadd.f32 %v21154_v29, %v13873_v63  ;;  %v16772_v58 = vpop.f32.mrb[199].mxu1 }
0x2481   :  { %v13947_v61 = vadd.f32 %v13804_v27, %v21134_v18 }
0x2482   :  { %v13943_v3 = vpop.f32.mrb[112].mxu0  ;;  %v13954_v62 = vadd.f32 %v13874_v6, %v21142_v1 }
0x2483   :  { %v14898_v57 = vmul.f32 -1.442695, %v13947_v61  ;;  %v16777_v50 = vpop.f32.mrb[113].mxu0  ;;  %v13944_v34 = vadd.f32 %v21169_v20, %v13943_v3  ;;  %v17624_v20 = vmov 1966171168  }
0x2484   :  { %v14899_v59 = vmul.f32 -1.442695, %v13954_v62  ;;  %v14012_v13 = vunpack.c.l.s4 %v17624_v20 }
0x2485   :  { %17486 = vpow2.f32 %v14898_v57 }
0x2486   :  { %17488 = vpow2.f32 %v14899_v59  ;;  %v14013_v47 = vunpack.c.0.s8 %v14012_v13 }
0x2488   :  { %v21362_v36 = vsub.s32 %v14013_v47, %v18652_v31 }
0x248a   :  { %v14068_v9 = vrot.slane %v14061_v11, %v21362_v36 }
0x248c   :  { %v14076_v58 = vrot.slane %v14068_v9, %v21362_v36 }
0x248f   :  { %v17487_v17 = vpop.eup %17486 }
0x2490   :  { %v13951_v38 = vadd.f32 1.0, %v17487_v17  ;;  %v17489_v4 = vpop.eup %17488 }
0x2491   :  { %v13958_v5 = vadd.f32 1.0, %v17489_v4 }
0x2492   :  { %17490 = vrcp.f32 %v13951_v38 }
0x2493   :  { %17492 = vrcp.f32 %v13958_v5 }
0x249c   :  { %v17491_v60 = vpop.eup %17490 }
0x249d   :  { %v13961_v29 = vmul.f32 %v17491_v60, %v13944_v34  ;;  %v17493_v23 = vpop.eup %17492 }
0x249e   :  { %v13964_v10 = vsub.f32 1.0, %v17493_v23  ;;  %v13967_v28 = vmul.f32 %v17493_v23, %v13734_v8  ;;  %v21386_v8 = vsub.s32 0, %v18652_v31 }
0x249f   :  { %v13962_v18 = vadd.f32 %v13961_v29, %v21149_v15  ;;  %v13977_v15 = vpop.permute.xlu0 %13976 }
0x24a0   :  { %v13979_v22 = vsel %vm1425_vm4, %v20910_v14, %v13977_v15  ;;  %v14221_v23 = vrot.slane %v14076_v58, %v21386_v8 }
0x24a1   :  { %17494 = vtanh.f32 %v13962_v18  ;;  %v14042_v51 = vrot.slane %v13979_v22, %v21362_v36 }
0x24a3   :  { %v13997_v35 = vpop.permute.xlu0 %13996  ;;  %v14043_v43 = vcombine.high %v14042_v51, %v14042_v51  ;;  %v14050_v0 = vrot.slane %v14042_v51, %v21362_v36 }
0x24a4   :  { %v13999_v21 = vsel %vm1425_vm4, %v21019_v55, %v13997_v35 }
0x24a5   :  { %v14140_v44 = vrot.slane %v13999_v21, %v21362_v36  ;;  %v14057_v55 = vrot.slane %v14043_v43, %v21362_v36  ;;  %v14058_v39 = vcombine.high %v14050_v0, %v14050_v0 }
0x24a7   :  { %v13992_v19 = vpop.permute.xlu0 %13991  ;;  %v14141_v61 = vcombine.high %v14140_v44, %v14140_v44  ;;  %v14059_v62 = vcombine.high %v14057_v55, %v14057_v55  ;;  %v14148_v5 = vrot.slane %v14140_v44, %v21362_v36  ;;  %v14211_v34 = vrot.slane %v14058_v39, %v21386_v8 }
0x24a8   :  { %v13994_v52 = vsel %vm1425_vm4, %v20993_v30, %v13992_v19  ;;  %v14069_v30 = vcombine.high %v14068_v9, %v14068_v9 }
0x24a9   :  { %v14117_v54 = vrot.slane %v13994_v52, %v21362_v36  ;;  %v14156_v56 = vcombine.high %v14148_v5, %v14148_v5 }
0x24aa   :  { %v14083_v4 = vrot.slane %v14069_v30, %v21362_v36 }
0x24ab   :  { %v17495_v7 = vpop.eup %17494  ;;  %v14118_v3 = vcombine.high %v14117_v54, %v14117_v54  ;;  %v14125_v60 = vrot.slane %v14117_v54, %v21362_v36 }
0x24ac   :  { %v13965_v1 = vmul.f32 %v17495_v7, %v13964_v10  ;;  %v14155_v10 = vrot.slane %v14141_v61, %v21362_v36  ;;  %v14225_v25 = vrot.slane %v14083_v4, %v21386_v8 }
0x24ad   :  { %v14132_v7 = vrot.slane %v14118_v3, %v21362_v36  ;;  %v14241_v15 = vrot.slane %v14125_v60, %v21386_v8 }
0x24ae   :  { %v13968_v24 = vadd.f32 %v13967_v28, %v13965_v1  ;;  %v14215_v28 = vrot.slane %v14059_v62, %v21386_v8 }
0x24af   :  { %v14245_v22 = vrot.slane %v14132_v7, %v21386_v8 }
0x24b0   :  { %v13969_v49 = vmul.f32 %v21285_v12, %v13968_v24  ;;  %v14092_v12 = vrot.slane %v14085_v32, %v21362_v36 }
0x24b2   :  { %13971 = vrot.lane.b32.xlu1 %v13969_v49, %s17623_s6  ;;  %v14093_v16 = vcombine.high %v14092_v12, %v14092_v12  ;;  %v14100_v41 = vrot.slane %v14092_v12, %v21362_v36  ;;  %v14157_v12 = vcombine.high %v14155_v10, %v14155_v10 }
0x24b4   :  { %v14107_v2 = vrot.slane %v14093_v16, %v21362_v36  ;;  %v14108_v46 = vcombine.high %v14100_v41, %v14100_v41  ;;  %v14255_v43 = vrot.slane %v14157_v12, %v21386_v8 }
0x24b6   :  { %14001 = vrot.lane.b32.xlu1 %v21205_v53, %s17623_s6  ;;  %v14007_v53 = vpop.permute.xlu1 %14006  ;;  %v14109_v63 = vcombine.high %v14107_v2, %v14107_v2  ;;  %v14231_v50 = vrot.slane %v14108_v46, %v21386_v8 }
0x24b7   :  { %v14009_v33 = vsel %vm1425_vm4, %v11731_v42, %v14007_v53 }
0x24b8   :  { %v14183_v14 = vcombine.high %v14009_v33, %v14009_v33  ;;  %v14235_v17 = vrot.slane %v14109_v63, %v21386_v8  ;;  %v14251_v33 = vrot.slane %v14156_v56, %v21386_v8 }
0x24ba   :  { %v14190_v27 = vrot.slane %v14183_v14, %v21362_v36 }
0x24bc   :  { %v14191_v31 = vcombine.high %v14190_v27, %v14190_v27  ;;  %v14198_v38 = vrot.slane %v14190_v27, %v21362_v36 }
0x24be   :  { %v14205_v13 = vrot.slane %v14191_v31, %v21362_v36  ;;  %v14206_v35 = vcombine.high %v14198_v38, %v14198_v38 }
0x24c0   :  { %v14207_v16 = vcombine.high %v14205_v13, %v14205_v13  ;;  %v14271_v14 = vrot.slane %v14206_v35, %v21386_v8 }
0x24c2   :  { %v14275_v9 = vrot.slane %v14207_v16, %v21386_v8 }
0x2524   :  { %v13972_v6 = vpop.permute.xlu1 %13971 }
0x2525   :  { %v13974_v57 = vsel %vm1425_vm4, %v20884_v45, %v13972_v6 }
0x2526   :  { %v14017_v59 = vrot.slane %v13974_v57, %v21362_v36 }
0x2528   :  { %v14018_v29 = vcombine.high %v14017_v59, %v14017_v59  ;;  %v14025_v45 = vrot.slane %v14017_v59, %v21362_v36  ;;  %v14002_v18 = vpop.permute.xlu1 %14001 }
0x2529   :  { %v14004_v1 = vsel %vm1425_vm4, %v21050_v40, %v14002_v18 }
0x252a   :  { %v14032_v24 = vrot.slane %v14018_v29, %v21362_v36  ;;  %v14278_v49 = vsel %vm1570_vm14, %v14025_v45, %v14211_v34  ;;  %v14159_v20 = vcombine.high %v14004_v1, %v14004_v1 }
0x252b   :  { %v14280_v47 = vsel %vm1572_vm1, %v14278_v49, %v14221_v23 }
0x252c   :  { %v14279_v37 = vsel %vm1570_vm14, %v14032_v24, %v14215_v28  ;;  %v14282_v40 = vsel %vm1574_vm2, %v14280_v47, %v14231_v50  ;;  %v14166_v32 = vrot.slane %v14159_v20, %v21362_v36 }
0x252d   :  { %v14281_v53 = vsel %vm1572_vm1, %v14279_v37, %v14225_v25  ;;  %v14284_v26 = vsel %vm1576_vm3, %v14282_v40, %v14241_v15 }
0x252e   :  { %v14283_v48 = vsel %vm1574_vm2, %v14281_v53, %v14235_v17  ;;  %v14167_v42 = vcombine.high %v14166_v32, %v14166_v32  ;;  %v14174_v51 = vrot.slane %v14166_v32, %v21362_v36  ;;  %v14286_v21 = vsel %vm1578_vm6, %v14284_v26, %v14251_v33 }
0x252f   :  { %v14285_v41 = vsel %vm1576_vm3, %v14283_v48, %v14245_v22 }
0x2530   :  { %v14181_v11 = vrot.slane %v14167_v42, %v21362_v36  ;;  %v14261_v19 = vrot.slane %v14174_v51, %v21386_v8  ;;  %v14287_v36 = vsel %vm1578_vm6, %v14285_v41, %v14255_v43 }
0x2532   :  { %v14265_v52 = vrot.slane %v14181_v11, %v21386_v8  ;;  %v14288_v2 = vsel %vm1580_vm7, %v14286_v21, %v14261_v19 }
0x2533   :  { %v14290_v0 = vsel %vm1582_vm8, %v14288_v2, %v14271_v14 }
0x2534   :  { %v14289_v44 = vsel %vm1580_vm7, %v14287_v36, %v14265_v52  ;;  %14292 = vst.msk [vmem:[#allocation2] sm:$0xff] %vm231_vm0, %v14290_v0 }
0x2535   :  { %v14291_v54 = vsel %vm1582_vm8, %v14289_v44, %v14275_v9 }
0x2536   :  { %14293 = vst.msk [vmem:[#allocation2 + $0x8] sm:$0xff] %vm231_vm0, %v14291_v54 }
0x2537   :  { %17607 = shalt.err (!%p17604_p4)
}
0x2538   :  { %s17608_s20 = scalar_lea.hbm %s21478_s27, 256 }
0x2539   :  { %p17609_p5 = scmp.ne.s32.totalorder %s21478_s27, %s17608_s20  ;;  %p17612_p6 = scmp.lt.u32.totalorder %s17608_s20, %s21478_s27 }
0x253b   :  { %p17614_p7 = pnand %p17612_p6, %p17609_p5 }
0x253d   :  { %17617 = shalt.err (!%p17614_p7)
}
0x253e   :  { %s17626_s28 = smov 128  }
0x253f   :  { %14305 = dma.vmem_to_hbm [thread:$0]  %s14300_s9, 256, %s21478_s27, [#allocation3], %s17626_s28, %s17626_s28, %s17623_s6  }
0x2540   :  { %17618 = dma.done.wait [#allocation3], 256  }
0x2541   :  { %17619 = vsyncadd [#allocation3], 4294967040 }
0x2542   :  { %14309 = vsyncpa [#allocation3], 1 }

</bundles_post_ra>
